<compile_context>
chip_gen: v6e
topology: v6e:2x2x1
jax: 0.10.0
libtpu: 0.0.40
codegen_flags: <defaults>
</compile_context>

<pallas_src>
import math

import jax
import jax.numpy as jnp
from jax import lax
from jax.experimental import pallas as pl
from jax.experimental.pallas import tpu as pltpu

# ---------------- model hyperparameters (small, consistent with the module) --------
D_MODEL = 32
N_HEADS = 4
D_K = D_MODEL // N_HEADS
D_FF = 64
N_LAYERS = 2
SRC_VOCAB = 64
TGT_VOCAB = 64
SEQ_LEN = 8
BATCH = 2
EPS = 1e-6
PROJ_PAD = 128            # lane-dense output width (TGT_VOCAB padded to 128 lanes)

# canonical ordering of the weight arrays passed to the kernel
WEIGHT_NAMES = (
    "src_emb", "tgt_emb", "pe",
    # encoder: per-head attention stacks (L*H leading dim), ffn + LN stacks (L)
    "e_wq", "e_bq", "e_wk", "e_bk", "e_wv", "e_bv", "e_wo", "e_bo",
    "e_w1", "e_b1", "e_w2", "e_b2", "e_ln_a", "e_ln_b",
    # decoder self-attention
    "ds_wq", "ds_bq", "ds_wk", "ds_bk", "ds_wv", "ds_bv", "ds_wo", "ds_bo",
    # decoder cross-attention
    "dc_wq", "dc_bq", "dc_wk", "dc_bk", "dc_wv", "dc_bv", "dc_wo", "dc_bo",
    # decoder ffn + LN
    "d_w1", "d_b1", "d_w2", "d_b2", "d_ln_a", "d_ln_b",
    # final norms + (lane-padded) projection
    "enc_norm_a", "enc_norm_b", "dec_norm_a", "dec_norm_b",
    "proj_w", "proj_b",
)


# ---------------------------- in-kernel helpers (pure jnp on values) ----------------
def _layer_norm(x, a, b):
    """torch-style custom LayerNormalization: unbiased std, divide by (std + eps)."""
    mean = jnp.mean(x, axis=-1, keepdims=True)
    var = jnp.sum((x - mean) ** 2, axis=-1, keepdims=True) * (1.0 / (D_MODEL - 1))
    inv = pl.reciprocal(jnp.sqrt(var) + EPS, approx=True)     # EUP, VALU-free
    return a * (x - mean) * inv + b


def _ffn(x, w1, b1, w2, b2):
    h = jnp.maximum(jnp.dot(x, w1, preferred_element_type=jnp.float32) + b1, 0.0)
    return jnp.dot(h, w2, preferred_element_type=jnp.float32) + b2


def _embed(ids, emb, pe, vocab):
    """Embedding gather as a one-hot matmul on the idle MXU, plus PE add.

    ids : (B*S, 1) int32 token ids
    emb : (vocab, D) embedding table with sqrt(d_model) pre-folded
    pe  : (B*S, D) positional encoding pre-tiled over the batch
    """
    iota = lax.broadcasted_iota(jnp.int32, (BATCH * SEQ_LEN, vocab), 1)
    onehot = jnp.where(ids == iota, 1.0, 0.0)
    return jnp.dot(onehot, emb, preferred_element_type=jnp.float32) + pe


def _mha(xq, xkv, bias, wq, bq, wk, bk, wv, bv, wo, bo, base):
    """Block-diagonal-batch multi-head attention.

    xq, xkv : (B*S, D) query / key-value activations (whole batch folded in)
    bias    : (B*S, B*S) additive mask: 0 where allowed, -1e9 for masked keys and
              cross-batch pairs (replaces masked_fill(mask==0, -1e9))
    wq..wo  : per-head weight-stack refs, leading dim L*H; `base = layer * N_HEADS`
    1/sqrt(d_k) is folded into wq/bq at init; each head's W_o slice is applied per
    head, so no head concatenation / transpose is ever materialized.
    """
    acc = None
    for h in range(N_HEADS):                         # unrolled: H = 4
        i = base + h
        q = jnp.dot(xq, wq[i], preferred_element_type=jnp.float32) + bq[i]
        k = jnp.dot(xkv, wk[i], preferred_element_type=jnp.float32) + bk[i]
        v = jnp.dot(xkv, wv[i], preferred_element_type=jnp.float32) + bv[i]
        # scores = q @ k^T (contract on last dims, no transpose op) + additive mask
        s = lax.dot_general(q, k, (((1,), (1,)), ((), ())),
                            preferred_element_type=jnp.float32) + bias
        s = s - jnp.max(s, axis=-1, keepdims=True)   # stabilized softmax (as torch)
        p = jnp.exp(s)
        p = p * pl.reciprocal(jnp.sum(p, axis=-1, keepdims=True), approx=True)
        ctx = jnp.dot(p, v, preferred_element_type=jnp.float32)          # (B*S, dk)
        head_out = jnp.dot(ctx, wo[i], preferred_element_type=jnp.float32)
        acc = head_out if acc is None else acc + head_out
    return acc + bo                                   # (B*S, D)


# ---------------------------- the single fused kernel -------------------------------
def transformer_kernel(*refs):
    (src_ids_ref, tgt_ids_ref, src_bias_ref, tgt_bias_ref,
     src_emb_ref, tgt_emb_ref, pe_ref,
     e_wq, e_bq, e_wk, e_bk, e_wv, e_bv, e_wo, e_bo,
     e_w1, e_b1, e_w2, e_b2, e_ln_a, e_ln_b,
     ds_wq, ds_bq, ds_wk, ds_bk, ds_wv, ds_bv, ds_wo, ds_bo,
     dc_wq, dc_bq, dc_wk, dc_bk, dc_wv, dc_bv, dc_wo, dc_bo,
     d_w1, d_b1, d_w2, d_b2, d_ln_a, d_ln_b,
     enc_na, enc_nb, dec_na, dec_nb, proj_w, proj_b,
     o_ref) = refs

    src_bias = src_bias_ref[...]      # (B*S, B*S) additive block-diagonal mask
    tgt_bias = tgt_bias_ref[...]
    pe = pe_ref[...]

    # ---------------- embeddings (fused: one-hot gather + PE add) ----------------
    x = _embed(src_ids_ref[...], src_emb_ref[...], pe, SRC_VOCAB)   # (B*S, D)
    y = _embed(tgt_ids_ref[...], tgt_emb_ref[...], pe, TGT_VOCAB)   # (B*S, D)

    # ---------------- encoder ----------------
    for l in range(N_LAYERS):         # unrolled (L = 2): static ref indexing is free
        h = _layer_norm(x, e_ln_a[2 * l], e_ln_b[2 * l])
        x = x + _mha(h, h, src_bias, e_wq, e_bq, e_wk, e_bk, e_wv, e_bv,
                     e_wo, e_bo[l], l * N_HEADS)
        h = _layer_norm(x, e_ln_a[2 * l + 1], e_ln_b[2 * l + 1])
        x = x + _ffn(h, e_w1[l], e_b1[l], e_w2[l], e_b2[l])
    enc = _layer_norm(x, enc_na[...], enc_nb[...])    # encoder final norm

    # ---------------- decoder ----------------
    for l in range(N_LAYERS):
        h = _layer_norm(y, d_ln_a[3 * l], d_ln_b[3 * l])
        y = y + _mha(h, h, tgt_bias, ds_wq, ds_bq, ds_wk, ds_bk, ds_wv, ds_bv,
                     ds_wo, ds_bo[l], l * N_HEADS)
        h = _layer_norm(y, d_ln_a[3 * l + 1], d_ln_b[3 * l + 1])
        y = y + _mha(h, enc, src_bias, dc_wq, dc_bq, dc_wk, dc_bk, dc_wv, dc_bv,
                     dc_wo, dc_bo[l], l * N_HEADS)
        h = _layer_norm(y, d_ln_a[3 * l + 2], d_ln_b[3 * l + 2])
        y = y + _ffn(h, d_w1[l], d_b1[l], d_w2[l], d_b2[l])
    dec = _layer_norm(y, dec_na[...], dec_nb[...])    # decoder final norm

    # ---------------- lane-dense projection (TGT_VOCAB padded to 128 lanes) --------
    o_ref[...] = (jnp.dot(dec, proj_w[...], preferred_element_type=jnp.float32)
                  + proj_b[...])


# ---------------------------- wrapper (one pallas_call per forward) -----------------
def _block_diag_bias(mask_bss):
    """(B, S, S) 0/1 mask -> (B*S, B*S) additive bias.

    0 where attention is allowed, -1e9 on masked keys AND on cross-batch blocks, so
    one block-diagonal softmax over B*S keys reproduces per-batch masked softmax.
    """
    b, sq, sk = mask_bss.shape
    eye = jnp.eye(b, dtype=jnp.float32)
    allowed = jnp.einsum("bc,bij->bicj", eye, mask_bss).reshape(b * sq, b * sk)
    return (allowed - 1.0) * 1e9


def transformer_forward(params, src, tgt, src_mask, tgt_mask):
    b, s_src = src.shape
    _, s_tgt = tgt.shape

    # Token ids go straight into the kernel (embedding gather is fused in-kernel).
    src_ids = src.reshape(b * s_src, 1).astype(jnp.int32)
    tgt_ids = tgt.reshape(b * s_tgt, 1).astype(jnp.int32)

    # 0/1 masks -> block-diagonal additive biases (one tiny XLA fusion).
    # s_src == s_tgt here, so the src bias serves both encoder self-attention and
    # decoder cross-attention (the reference reuses src_mask for both).
    src_m = jnp.broadcast_to(src_mask.astype(jnp.float32),
                             (b, 1, s_src, s_src)).reshape(b, s_src, s_src)
    tgt_m = jnp.broadcast_to(tgt_mask.astype(jnp.float32),
                             (b, 1, s_tgt, s_tgt)).reshape(b, s_tgt, s_tgt)
    src_bias = _block_diag_bias(src_m)
    tgt_bias = _block_diag_bias(tgt_m)

    weights = tuple(params[name] for name in WEIGHT_NAMES)
    inputs = (src_ids, tgt_ids, src_bias, tgt_bias) + weights

    # Single launch, no grid: every input is a whole-array VMEM resident (explicit),
    # no pipelining / double-buffering, no per-(B,H) grid steps.
    out = pl.pallas_call(
        transformer_kernel,
        out_shape=jax.ShapeDtypeStruct((b * s_tgt, PROJ_PAD), jnp.float32),
        in_specs=[pl.BlockSpec(memory_space=pltpu.MemorySpace.VMEM)] * len(inputs),
        out_specs=pl.BlockSpec(memory_space=pltpu.MemorySpace.VMEM),
    )(*inputs)

    return out[:, :TGT_VOCAB].reshape(b, s_tgt, TGT_VOCAB)


# ---------------------------- parameter init ----------------------------------------
def init_params(key):
    def nrm(k, shape, scale=0.02):
        return (scale * jax.random.normal(k, shape)).astype(jnp.float32)

    keys = iter(jax.random.split(key, 64))
    L, H, D, DK, F = N_LAYERS, N_HEADS, D_MODEL, D_K, D_FF
    q_scale = 1.0 / math.sqrt(DK)            # folded into every Q projection at init

    p = {}

    # --- embeddings (sqrt(d_model) folded) + sinusoidal PE pre-tiled to (B*S, D) ---
    p["src_emb"] = nrm(next(keys), (SRC_VOCAB, D), scale=1.0) * math.sqrt(D)
    p["tgt_emb"] = nrm(next(keys), (TGT_VOCAB, D), scale=1.0) * math.sqrt(D)
    position = jnp.arange(SEQ_LEN, dtype=jnp.float32)[:, None]
    div_term = jnp.exp(jnp.arange(0, D, 2, dtype=jnp.float32)
                       * (-math.log(10000.0) / D))
    pe = jnp.zeros((SEQ_LEN, D), jnp.float32)
    pe = pe.at[:, 0::2].set(jnp.sin(position * div_term))
    pe = pe.at[:, 1::2].set(jnp.cos(position * div_term))
    p["pe"] = jnp.tile(pe, (BATCH, 1))        # (B*S, D)

    def attn(prefix):
        # per-head pre-split weights: no in-kernel lane slicing needed
        p[prefix + "_wq"] = nrm(next(keys), (L * H, D, DK)) * q_scale
        p[prefix + "_bq"] = jnp.zeros((L * H, 1, DK), jnp.float32)   # *q_scale no-op
        p[prefix + "_wk"] = nrm(next(keys), (L * H, D, DK))
        p[prefix + "_bk"] = jnp.zeros((L * H, 1, DK), jnp.float32)
        p[prefix + "_wv"] = nrm(next(keys), (L * H, D, DK))
        p[prefix + "_bv"] = jnp.zeros((L * H, 1, DK), jnp.float32)
        p[prefix + "_wo"] = nrm(next(keys), (L * H, DK, D))
        p[prefix + "_bo"] = jnp.zeros((L, 1, D), jnp.float32)

    def ffn(prefix):
        p[prefix + "_w1"] = nrm(next(keys), (L, D, F))
        p[prefix + "_b1"] = jnp.zeros((L, 1, F), jnp.float32)
        p[prefix + "_w2"] = nrm(next(keys), (L, F, D))
        p[prefix + "_b2"] = jnp.zeros((L, 1, D), jnp.float32)

    # encoder
    attn("e"); ffn("e")
    p["e_ln_a"] = jnp.ones((2 * L, 1, D), jnp.float32)   # [layer * (ln1, ln2)]
    p["e_ln_b"] = jnp.zeros((2 * L, 1, D), jnp.float32)

    # decoder
    attn("ds"); attn("dc"); ffn("d")
    p["d_ln_a"] = jnp.ones((3 * L, 1, D), jnp.float32)   # [layer * (ln1, ln2, ln3)]
    p["d_ln_b"] = jnp.zeros((3 * L, 1, D), jnp.float32)

    # final norms
    p["enc_norm_a"] = jnp.ones((1, D), jnp.float32)
    p["enc_norm_b"] = jnp.zeros((1, D), jnp.float32)
    p["dec_norm_a"] = jnp.ones((1, D), jnp.float32)
    p["dec_norm_b"] = jnp.zeros((1, D), jnp.float32)

    # lane-dense projection: pad TGT_VOCAB (64) out to 128 lanes with zeros
    proj_w = jnp.zeros((D, PROJ_PAD), jnp.float32)
    proj_w = proj_w.at[:, :TGT_VOCAB].set(nrm(next(keys), (D, TGT_VOCAB)))
    p["proj_w"] = proj_w
    p["proj_b"] = jnp.zeros((1, PROJ_PAD), jnp.float32)
    return p


# ------------------------------------ main -------------------------------------------
if __name__ == "__main__":
    key = jax.random.PRNGKey(0)
    k_param, k_src, k_tgt = jax.random.split(key, 3)
    params = init_params(k_param)

    src = jax.random.randint(k_src, (BATCH, SEQ_LEN), 0, SRC_VOCAB, dtype=jnp.int32)
    tgt = jax.random.randint(k_tgt, (BATCH, SEQ_LEN), 0, TGT_VOCAB, dtype=jnp.int32)

    # src padding mask (mask out last 2 keys of batch element 1) and causal tgt mask
    src_mask = jnp.ones((BATCH, 1, 1, SEQ_LEN), jnp.float32)
    src_mask = src_mask.at[1, 0, 0, -2:].set(0.0)
    causal = jnp.tril(jnp.ones((SEQ_LEN, SEQ_LEN), jnp.float32))
    tgt_mask = jnp.broadcast_to(causal[None, None], (BATCH, 1, SEQ_LEN, SEQ_LEN))

    fwd = jax.jit(transformer_forward)
    logits = fwd(params, src, tgt, src_mask, tgt_mask)
    jax.block_until_ready(logits)

    assert logits.shape == (BATCH, SEQ_LEN, TGT_VOCAB)
    assert bool(jnp.all(jnp.isfinite(logits)))
    print("KERNEL_OK")
</pallas_src>

<mosaic_0001>
module attributes {stable_mosaic.version = 11 : i64} {
  func.func @transformer_kernel(%arg0: memref<16x1xi32, #tpu.memory_space<vmem>>, %arg1: memref<16x1xi32, #tpu.memory_space<vmem>>, %arg2: memref<16x16xf32, #tpu.memory_space<vmem>>, %arg3: memref<16x16xf32, #tpu.memory_space<vmem>>, %arg4: memref<64x32xf32, #tpu.memory_space<vmem>>, %arg5: memref<64x32xf32, #tpu.memory_space<vmem>>, %arg6: memref<16x32xf32, #tpu.memory_space<vmem>>, %arg7: memref<8x32x8xf32, #tpu.memory_space<vmem>>, %arg8: memref<8x1x8xf32, #tpu.memory_space<vmem>>, %arg9: memref<8x32x8xf32, #tpu.memory_space<vmem>>, %arg10: memref<8x1x8xf32, #tpu.memory_space<vmem>>, %arg11: memref<8x32x8xf32, #tpu.memory_space<vmem>>, %arg12: memref<8x1x8xf32, #tpu.memory_space<vmem>>, %arg13: memref<8x8x32xf32, #tpu.memory_space<vmem>>, %arg14: memref<2x1x32xf32, #tpu.memory_space<vmem>>, %arg15: memref<2x32x64xf32, #tpu.memory_space<vmem>>, %arg16: memref<2x1x64xf32, #tpu.memory_space<vmem>>, %arg17: memref<2x64x32xf32, #tpu.memory_space<vmem>>, %arg18: memref<2x1x32xf32, #tpu.memory_space<vmem>>, %arg19: memref<4x1x32xf32, #tpu.memory_space<vmem>>, %arg20: memref<4x1x32xf32, #tpu.memory_space<vmem>>, %arg21: memref<8x32x8xf32, #tpu.memory_space<vmem>>, %arg22: memref<8x1x8xf32, #tpu.memory_space<vmem>>, %arg23: memref<8x32x8xf32, #tpu.memory_space<vmem>>, %arg24: memref<8x1x8xf32, #tpu.memory_space<vmem>>, %arg25: memref<8x32x8xf32, #tpu.memory_space<vmem>>, %arg26: memref<8x1x8xf32, #tpu.memory_space<vmem>>, %arg27: memref<8x8x32xf32, #tpu.memory_space<vmem>>, %arg28: memref<2x1x32xf32, #tpu.memory_space<vmem>>, %arg29: memref<8x32x8xf32, #tpu.memory_space<vmem>>, %arg30: memref<8x1x8xf32, #tpu.memory_space<vmem>>, %arg31: memref<8x32x8xf32, #tpu.memory_space<vmem>>, %arg32: memref<8x1x8xf32, #tpu.memory_space<vmem>>, %arg33: memref<8x32x8xf32, #tpu.memory_space<vmem>>, %arg34: memref<8x1x8xf32, #tpu.memory_space<vmem>>, %arg35: memref<8x8x32xf32, #tpu.memory_space<vmem>>, %arg36: memref<2x1x32xf32, #tpu.memory_space<vmem>>, %arg37: memref<2x32x64xf32, #tpu.memory_space<vmem>>, %arg38: memref<2x1x64xf32, #tpu.memory_space<vmem>>, %arg39: memref<2x64x32xf32, #tpu.memory_space<vmem>>, %arg40: memref<2x1x32xf32, #tpu.memory_space<vmem>>, %arg41: memref<6x1x32xf32, #tpu.memory_space<vmem>>, %arg42: memref<6x1x32xf32, #tpu.memory_space<vmem>>, %arg43: memref<1x32xf32, #tpu.memory_space<vmem>>, %arg44: memref<1x32xf32, #tpu.memory_space<vmem>>, %arg45: memref<1x32xf32, #tpu.memory_space<vmem>>, %arg46: memref<1x32xf32, #tpu.memory_space<vmem>>, %arg47: memref<32x128xf32, #tpu.memory_space<vmem>>, %arg48: memref<1x128xf32, #tpu.memory_space<vmem>>, %arg49: memref<16x128xf32, #tpu.memory_space<vmem>>) attributes {dimension_semantics = [], scalar_prefetch = 0 : i64, scratch_operands = 0 : i64, tpu.core_type = #tpu.core_type<tc>} {
    %c0 = arith.constant 0 : index
    %c0_0 = arith.constant 0 : index
    %0 = vector.load %arg2[%c0, %c0_0] : memref<16x16xf32, #tpu.memory_space<vmem>>, vector<16x16xf32>
    %c0_1 = arith.constant 0 : index
    %c0_2 = arith.constant 0 : index
    %1 = vector.load %arg3[%c0_1, %c0_2] : memref<16x16xf32, #tpu.memory_space<vmem>>, vector<16x16xf32>
    %c0_3 = arith.constant 0 : index
    %c0_4 = arith.constant 0 : index
    %2 = vector.load %arg6[%c0_3, %c0_4] : memref<16x32xf32, #tpu.memory_space<vmem>>, vector<16x32xf32>
    %c0_5 = arith.constant 0 : index
    %c0_6 = arith.constant 0 : index
    %3 = vector.load %arg0[%c0_5, %c0_6] : memref<16x1xi32, #tpu.memory_space<vmem>>, vector<16x1xi32>
    %c0_7 = arith.constant 0 : index
    %c0_8 = arith.constant 0 : index
    %4 = vector.load %arg4[%c0_7, %c0_8] : memref<64x32xf32, #tpu.memory_space<vmem>>, vector<64x32xf32>
    %5 = tpu.iota {dimensions = array<i32: 1>} : vector<16x64xi32>
    %6 = vector.broadcast %3 : vector<16x1xi32> to vector<16x64xi32>
    %7 = arith.cmpi eq, %6, %5 : vector<16x64xi32>
    %cst = arith.constant 1.000000e+00 : f32
    %cst_9 = arith.constant 0.000000e+00 : f32
    %8 = vector.broadcast %cst : f32 to vector<16x64xf32>
    %9 = vector.broadcast %cst_9 : f32 to vector<16x64xf32>
    %10 = arith.select %7, %8, %9 : vector<16x64xi1>, vector<16x64xf32>
    %cst_10 = arith.constant dense<0.000000e+00> : vector<16x32xf32>
    %11 = tpu.matmul %10, %4, %cst_10 {dimension_numbers = #tpu.dot_dimension_numbers<[1], [0], [0], [1], [0, 0, 1, 1], [], []>} : vector<16x64xf32>, vector<64x32xf32>, vector<16x32xf32> -> vector<16x32xf32>
    %12 = arith.addf %11, %2 : vector<16x32xf32>
    %c0_11 = arith.constant 0 : index
    %c0_12 = arith.constant 0 : index
    %13 = vector.load %arg1[%c0_11, %c0_12] : memref<16x1xi32, #tpu.memory_space<vmem>>, vector<16x1xi32>
    %c0_13 = arith.constant 0 : index
    %c0_14 = arith.constant 0 : index
    %14 = vector.load %arg5[%c0_13, %c0_14] : memref<64x32xf32, #tpu.memory_space<vmem>>, vector<64x32xf32>
    %15 = tpu.iota {dimensions = array<i32: 1>} : vector<16x64xi32>
    %16 = vector.broadcast %13 : vector<16x1xi32> to vector<16x64xi32>
    %17 = arith.cmpi eq, %16, %15 : vector<16x64xi32>
    %cst_15 = arith.constant 1.000000e+00 : f32
    %cst_16 = arith.constant 0.000000e+00 : f32
    %18 = vector.broadcast %cst_15 : f32 to vector<16x64xf32>
    %19 = vector.broadcast %cst_16 : f32 to vector<16x64xf32>
    %20 = arith.select %17, %18, %19 : vector<16x64xi1>, vector<16x64xf32>
    %cst_17 = arith.constant dense<0.000000e+00> : vector<16x32xf32>
    %21 = tpu.matmul %20, %14, %cst_17 {dimension_numbers = #tpu.dot_dimension_numbers<[1], [0], [0], [1], [0, 0, 1, 1], [], []>} : vector<16x64xf32>, vector<64x32xf32>, vector<16x32xf32> -> vector<16x32xf32>
    %22 = arith.addf %21, %2 : vector<16x32xf32>
    %c0_18 = arith.constant 0 : index
    %c0_19 = arith.constant 0 : index
    %c0_20 = arith.constant 0 : index
    %23 = vector.load %arg19[%c0_18, %c0_19, %c0_20] : memref<4x1x32xf32, #tpu.memory_space<vmem>>, vector<1x1x32xf32>
    %24 = vector.shape_cast %23 : vector<1x1x32xf32> to vector<1x32xf32>
    %c0_21 = arith.constant 0 : index
    %c0_22 = arith.constant 0 : index
    %c0_23 = arith.constant 0 : index
    %25 = vector.load %arg20[%c0_21, %c0_22, %c0_23] : memref<4x1x32xf32, #tpu.memory_space<vmem>>, vector<1x1x32xf32>
    %26 = vector.shape_cast %25 : vector<1x1x32xf32> to vector<1x32xf32>
    %cst_24 = arith.constant dense<0.000000e+00> : vector<16xf32>
    %27 = vector.multi_reduction <add>, %12, %cst_24 [1] : vector<16x32xf32> to vector<16xf32>
    %28 = vector.shape_cast %27 : vector<16xf32> to vector<16x1xf32>
    %cst_25 = arith.constant 3.200000e+01 : f32
    %29 = vector.broadcast %cst_25 : f32 to vector<16x1xf32>
    %30 = arith.divf %28, %29 : vector<16x1xf32>
    %31 = vector.broadcast %30 : vector<16x1xf32> to vector<16x32xf32>
    %32 = arith.subf %12, %31 : vector<16x32xf32>
    %33 = arith.mulf %32, %32 : vector<16x32xf32>
    %cst_26 = arith.constant dense<0.000000e+00> : vector<16xf32>
    %34 = vector.multi_reduction <add>, %33, %cst_26 [1] : vector<16x32xf32> to vector<16xf32>
    %35 = vector.shape_cast %34 : vector<16xf32> to vector<16x1xf32>
    %cst_27 = arith.constant 0.0322580636 : f32
    %36 = vector.broadcast %cst_27 : f32 to vector<16x1xf32>
    %37 = arith.mulf %35, %36 : vector<16x1xf32>
    %38 = math.sqrt %37 : vector<16x1xf32>
    %cst_28 = arith.constant 9.99999997E-7 : f32
    %39 = vector.broadcast %cst_28 : f32 to vector<16x1xf32>
    %40 = arith.addf %38, %39 : vector<16x1xf32>
    %41 = tpu.reciprocal %40 {approx = true} : vector<16x1xf32> -> vector<16x1xf32>
    %42 = vector.broadcast %30 : vector<16x1xf32> to vector<16x32xf32>
    %43 = arith.subf %12, %42 : vector<16x32xf32>
    %44 = vector.broadcast %24 : vector<1x32xf32> to vector<16x32xf32>
    %45 = arith.mulf %44, %43 : vector<16x32xf32>
    %46 = vector.broadcast %41 : vector<16x1xf32> to vector<16x32xf32>
    %47 = arith.mulf %45, %46 : vector<16x32xf32>
    %48 = vector.broadcast %26 : vector<1x32xf32> to vector<16x32xf32>
    %49 = arith.addf %47, %48 : vector<16x32xf32>
    %c0_29 = arith.constant 0 : index
    %c0_30 = arith.constant 0 : index
    %c0_31 = arith.constant 0 : index
    %50 = vector.load %arg14[%c0_29, %c0_30, %c0_31] : memref<2x1x32xf32, #tpu.memory_space<vmem>>, vector<1x1x32xf32>
    %51 = vector.shape_cast %50 : vector<1x1x32xf32> to vector<1x32xf32>
    %c0_32 = arith.constant 0 : index
    %c0_33 = arith.constant 0 : index
    %c0_34 = arith.constant 0 : index
    %52 = vector.load %arg7[%c0_32, %c0_33, %c0_34] : memref<8x32x8xf32, #tpu.memory_space<vmem>>, vector<1x32x8xf32>
    %53 = vector.shape_cast %52 : vector<1x32x8xf32> to vector<32x8xf32>
    %cst_35 = arith.constant dense<0.000000e+00> : vector<16x8xf32>
    %54 = tpu.matmul %49, %53, %cst_35 {dimension_numbers = #tpu.dot_dimension_numbers<[1], [0], [0], [1], [0, 0, 1, 1], [], []>} : vector<16x32xf32>, vector<32x8xf32>, vector<16x8xf32> -> vector<16x8xf32>
    %c0_36 = arith.constant 0 : index
    %c0_37 = arith.constant 0 : index
    %c0_38 = arith.constant 0 : index
    %55 = vector.load %arg8[%c0_36, %c0_37, %c0_38] : memref<8x1x8xf32, #tpu.memory_space<vmem>>, vector<1x1x8xf32>
    %56 = vector.shape_cast %55 : vector<1x1x8xf32> to vector<1x8xf32>
    %57 = vector.broadcast %56 : vector<1x8xf32> to vector<16x8xf32>
    %58 = arith.addf %54, %57 : vector<16x8xf32>
    %c0_39 = arith.constant 0 : index
    %c0_40 = arith.constant 0 : index
    %c0_41 = arith.constant 0 : index
    %59 = vector.load %arg9[%c0_39, %c0_40, %c0_41] : memref<8x32x8xf32, #tpu.memory_space<vmem>>, vector<1x32x8xf32>
    %60 = vector.shape_cast %59 : vector<1x32x8xf32> to vector<32x8xf32>
    %cst_42 = arith.constant dense<0.000000e+00> : vector<16x8xf32>
    %61 = tpu.matmul %49, %60, %cst_42 {dimension_numbers = #tpu.dot_dimension_numbers<[1], [0], [0], [1], [0, 0, 1, 1], [], []>} : vector<16x32xf32>, vector<32x8xf32>, vector<16x8xf32> -> vector<16x8xf32>
    %c0_43 = arith.constant 0 : index
    %c0_44 = arith.constant 0 : index
    %c0_45 = arith.constant 0 : index
    %62 = vector.load %arg10[%c0_43, %c0_44, %c0_45] : memref<8x1x8xf32, #tpu.memory_space<vmem>>, vector<1x1x8xf32>
    %63 = vector.shape_cast %62 : vector<1x1x8xf32> to vector<1x8xf32>
    %64 = vector.broadcast %63 : vector<1x8xf32> to vector<16x8xf32>
    %65 = arith.addf %61, %64 : vector<16x8xf32>
    %c0_46 = arith.constant 0 : index
    %c0_47 = arith.constant 0 : index
    %c0_48 = arith.constant 0 : index
    %66 = vector.load %arg11[%c0_46, %c0_47, %c0_48] : memref<8x32x8xf32, #tpu.memory_space<vmem>>, vector<1x32x8xf32>
    %67 = vector.shape_cast %66 : vector<1x32x8xf32> to vector<32x8xf32>
    %cst_49 = arith.constant dense<0.000000e+00> : vector<16x8xf32>
    %68 = tpu.matmul %49, %67, %cst_49 {dimension_numbers = #tpu.dot_dimension_numbers<[1], [0], [0], [1], [0, 0, 1, 1], [], []>} : vector<16x32xf32>, vector<32x8xf32>, vector<16x8xf32> -> vector<16x8xf32>
    %c0_50 = arith.constant 0 : index
    %c0_51 = arith.constant 0 : index
    %c0_52 = arith.constant 0 : index
    %69 = vector.load %arg12[%c0_50, %c0_51, %c0_52] : memref<8x1x8xf32, #tpu.memory_space<vmem>>, vector<1x1x8xf32>
    %70 = vector.shape_cast %69 : vector<1x1x8xf32> to vector<1x8xf32>
    %71 = vector.broadcast %70 : vector<1x8xf32> to vector<16x8xf32>
    %72 = arith.addf %68, %71 : vector<16x8xf32>
    %cst_53 = arith.constant dense<0.000000e+00> : vector<16x16xf32>
    %73 = tpu.matmul %58, %65, %cst_53 {dimension_numbers = #tpu.dot_dimension_numbers<[1], [1], [0], [0], [0, 0, 1, 0], [], []>} : vector<16x8xf32>, vector<16x8xf32>, vector<16x16xf32> -> vector<16x16xf32>
    %74 = arith.addf %73, %0 : vector<16x16xf32>
    %cst_54 = arith.constant dense<0xFF800000> : vector<16xf32>
    %75 = vector.multi_reduction <maximumf>, %74, %cst_54 [1] : vector<16x16xf32> to vector<16xf32>
    %76 = vector.shape_cast %75 : vector<16xf32> to vector<16x1xf32>
    %77 = vector.broadcast %76 : vector<16x1xf32> to vector<16x16xf32>
    %78 = arith.subf %74, %77 : vector<16x16xf32>
    %79 = math.exp %78 : vector<16x16xf32>
    %cst_55 = arith.constant dense<0.000000e+00> : vector<16xf32>
    %80 = vector.multi_reduction <add>, %79, %cst_55 [1] : vector<16x16xf32> to vector<16xf32>
    %81 = vector.shape_cast %80 : vector<16xf32> to vector<16x1xf32>
    %82 = tpu.reciprocal %81 {approx = true} : vector<16x1xf32> -> vector<16x1xf32>
    %83 = vector.broadcast %82 : vector<16x1xf32> to vector<16x16xf32>
    %84 = arith.mulf %79, %83 : vector<16x16xf32>
    %cst_56 = arith.constant dense<0.000000e+00> : vector<16x8xf32>
    %85 = tpu.matmul %84, %72, %cst_56 {dimension_numbers = #tpu.dot_dimension_numbers<[1], [0], [0], [1], [0, 0, 1, 1], [], []>} : vector<16x16xf32>, vector<16x8xf32>, vector<16x8xf32> -> vector<16x8xf32>
    %c0_57 = arith.constant 0 : index
    %c0_58 = arith.constant 0 : index
    %c0_59 = arith.constant 0 : index
    %86 = vector.load %arg13[%c0_57, %c0_58, %c0_59] : memref<8x8x32xf32, #tpu.memory_space<vmem>>, vector<1x8x32xf32>
    %87 = vector.shape_cast %86 : vector<1x8x32xf32> to vector<8x32xf32>
    %cst_60 = arith.constant dense<0.000000e+00> : vector<16x32xf32>
    %88 = tpu.matmul %85, %87, %cst_60 {dimension_numbers = #tpu.dot_dimension_numbers<[1], [0], [0], [1], [0, 0, 1, 1], [], []>} : vector<16x8xf32>, vector<8x32xf32>, vector<16x32xf32> -> vector<16x32xf32>
    %c1 = arith.constant 1 : index
    %c0_61 = arith.constant 0 : index
    %c0_62 = arith.constant 0 : index
    %89 = vector.load %arg7[%c1, %c0_61, %c0_62] : memref<8x32x8xf32, #tpu.memory_space<vmem>>, vector<1x32x8xf32>
    %90 = vector.shape_cast %89 : vector<1x32x8xf32> to vector<32x8xf32>
    %cst_63 = arith.constant dense<0.000000e+00> : vector<16x8xf32>
    %91 = tpu.matmul %49, %90, %cst_63 {dimension_numbers = #tpu.dot_dimension_numbers<[1], [0], [0], [1], [0, 0, 1, 1], [], []>} : vector<16x32xf32>, vector<32x8xf32>, vector<16x8xf32> -> vector<16x8xf32>
    %c1_64 = arith.constant 1 : index
    %c0_65 = arith.constant 0 : index
    %c0_66 = arith.constant 0 : index
    %92 = vector.load %arg8[%c1_64, %c0_65, %c0_66] : memref<8x1x8xf32, #tpu.memory_space<vmem>>, vector<1x1x8xf32>
    %93 = vector.shape_cast %92 : vector<1x1x8xf32> to vector<1x8xf32>
    %94 = vector.broadcast %93 : vector<1x8xf32> to vector<16x8xf32>
    %95 = arith.addf %91, %94 : vector<16x8xf32>
    %c1_67 = arith.constant 1 : index
    %c0_68 = arith.constant 0 : index
    %c0_69 = arith.constant 0 : index
    %96 = vector.load %arg9[%c1_67, %c0_68, %c0_69] : memref<8x32x8xf32, #tpu.memory_space<vmem>>, vector<1x32x8xf32>
    %97 = vector.shape_cast %96 : vector<1x32x8xf32> to vector<32x8xf32>
    %cst_70 = arith.constant dense<0.000000e+00> : vector<16x8xf32>
    %98 = tpu.matmul %49, %97, %cst_70 {dimension_numbers = #tpu.dot_dimension_numbers<[1], [0], [0], [1], [0, 0, 1, 1], [], []>} : vector<16x32xf32>, vector<32x8xf32>, vector<16x8xf32> -> vector<16x8xf32>
    %c1_71 = arith.constant 1 : index
    %c0_72 = arith.constant 0 : index
    %c0_73 = arith.constant 0 : index
    %99 = vector.load %arg10[%c1_71, %c0_72, %c0_73] : memref<8x1x8xf32, #tpu.memory_space<vmem>>, vector<1x1x8xf32>
    %100 = vector.shape_cast %99 : vector<1x1x8xf32> to vector<1x8xf32>
    %101 = vector.broadcast %100 : vector<1x8xf32> to vector<16x8xf32>
    %102 = arith.addf %98, %101 : vector<16x8xf32>
    %c1_74 = arith.constant 1 : index
    %c0_75 = arith.constant 0 : index
    %c0_76 = arith.constant 0 : index
    %103 = vector.load %arg11[%c1_74, %c0_75, %c0_76] : memref<8x32x8xf32, #tpu.memory_space<vmem>>, vector<1x32x8xf32>
    %104 = vector.shape_cast %103 : vector<1x32x8xf32> to vector<32x8xf32>
    %cst_77 = arith.constant dense<0.000000e+00> : vector<16x8xf32>
    %105 = tpu.matmul %49, %104, %cst_77 {dimension_numbers = #tpu.dot_dimension_numbers<[1], [0], [0], [1], [0, 0, 1, 1], [], []>} : vector<16x32xf32>, vector<32x8xf32>, vector<16x8xf32> -> vector<16x8xf32>
    %c1_78 = arith.constant 1 : index
    %c0_79 = arith.constant 0 : index
    %c0_80 = arith.constant 0 : index
    %106 = vector.load %arg12[%c1_78, %c0_79, %c0_80] : memref<8x1x8xf32, #tpu.memory_space<vmem>>, vector<1x1x8xf32>
    %107 = vector.shape_cast %106 : vector<1x1x8xf32> to vector<1x8xf32>
    %108 = vector.broadcast %107 : vector<1x8xf32> to vector<16x8xf32>
    %109 = arith.addf %105, %108 : vector<16x8xf32>
    %cst_81 = arith.constant dense<0.000000e+00> : vector<16x16xf32>
    %110 = tpu.matmul %95, %102, %cst_81 {dimension_numbers = #tpu.dot_dimension_numbers<[1], [1], [0], [0], [0, 0, 1, 0], [], []>} : vector<16x8xf32>, vector<16x8xf32>, vector<16x16xf32> -> vector<16x16xf32>
    %111 = arith.addf %110, %0 : vector<16x16xf32>
    %cst_82 = arith.constant dense<0xFF800000> : vector<16xf32>
    %112 = vector.multi_reduction <maximumf>, %111, %cst_82 [1] : vector<16x16xf32> to vector<16xf32>
    %113 = vector.shape_cast %112 : vector<16xf32> to vector<16x1xf32>
    %114 = vector.broadcast %113 : vector<16x1xf32> to vector<16x16xf32>
    %115 = arith.subf %111, %114 : vector<16x16xf32>
    %116 = math.exp %115 : vector<16x16xf32>
    %cst_83 = arith.constant dense<0.000000e+00> : vector<16xf32>
    %117 = vector.multi_reduction <add>, %116, %cst_83 [1] : vector<16x16xf32> to vector<16xf32>
    %118 = vector.shape_cast %117 : vector<16xf32> to vector<16x1xf32>
    %119 = tpu.reciprocal %118 {approx = true} : vector<16x1xf32> -> vector<16x1xf32>
    %120 = vector.broadcast %119 : vector<16x1xf32> to vector<16x16xf32>
    %121 = arith.mulf %116, %120 : vector<16x16xf32>
    %cst_84 = arith.constant dense<0.000000e+00> : vector<16x8xf32>
    %122 = tpu.matmul %121, %109, %cst_84 {dimension_numbers = #tpu.dot_dimension_numbers<[1], [0], [0], [1], [0, 0, 1, 1], [], []>} : vector<16x16xf32>, vector<16x8xf32>, vector<16x8xf32> -> vector<16x8xf32>
    %c1_85 = arith.constant 1 : index
    %c0_86 = arith.constant 0 : index
    %c0_87 = arith.constant 0 : index
    %123 = vector.load %arg13[%c1_85, %c0_86, %c0_87] : memref<8x8x32xf32, #tpu.memory_space<vmem>>, vector<1x8x32xf32>
    %124 = vector.shape_cast %123 : vector<1x8x32xf32> to vector<8x32xf32>
    %cst_88 = arith.constant dense<0.000000e+00> : vector<16x32xf32>
    %125 = tpu.matmul %122, %124, %cst_88 {dimension_numbers = #tpu.dot_dimension_numbers<[1], [0], [0], [1], [0, 0, 1, 1], [], []>} : vector<16x8xf32>, vector<8x32xf32>, vector<16x32xf32> -> vector<16x32xf32>
    %126 = arith.addf %88, %125 : vector<16x32xf32>
    %c2 = arith.constant 2 : index
    %c0_89 = arith.constant 0 : index
    %c0_90 = arith.constant 0 : index
    %127 = vector.load %arg7[%c2, %c0_89, %c0_90] : memref<8x32x8xf32, #tpu.memory_space<vmem>>, vector<1x32x8xf32>
    %128 = vector.shape_cast %127 : vector<1x32x8xf32> to vector<32x8xf32>
    %cst_91 = arith.constant dense<0.000000e+00> : vector<16x8xf32>
    %129 = tpu.matmul %49, %128, %cst_91 {dimension_numbers = #tpu.dot_dimension_numbers<[1], [0], [0], [1], [0, 0, 1, 1], [], []>} : vector<16x32xf32>, vector<32x8xf32>, vector<16x8xf32> -> vector<16x8xf32>
    %c2_92 = arith.constant 2 : index
    %c0_93 = arith.constant 0 : index
    %c0_94 = arith.constant 0 : index
    %130 = vector.load %arg8[%c2_92, %c0_93, %c0_94] : memref<8x1x8xf32, #tpu.memory_space<vmem>>, vector<1x1x8xf32>
    %131 = vector.shape_cast %130 : vector<1x1x8xf32> to vector<1x8xf32>
    %132 = vector.broadcast %131 : vector<1x8xf32> to vector<16x8xf32>
    %133 = arith.addf %129, %132 : vector<16x8xf32>
    %c2_95 = arith.constant 2 : index
    %c0_96 = arith.constant 0 : index
    %c0_97 = arith.constant 0 : index
    %134 = vector.load %arg9[%c2_95, %c0_96, %c0_97] : memref<8x32x8xf32, #tpu.memory_space<vmem>>, vector<1x32x8xf32>
    %135 = vector.shape_cast %134 : vector<1x32x8xf32> to vector<32x8xf32>
    %cst_98 = arith.constant dense<0.000000e+00> : vector<16x8xf32>
    %136 = tpu.matmul %49, %135, %cst_98 {dimension_numbers = #tpu.dot_dimension_numbers<[1], [0], [0], [1], [0, 0, 1, 1], [], []>} : vector<16x32xf32>, vector<32x8xf32>, vector<16x8xf32> -> vector<16x8xf32>
    %c2_99 = arith.constant 2 : index
    %c0_100 = arith.constant 0 : index
    %c0_101 = arith.constant 0 : index
    %137 = vector.load %arg10[%c2_99, %c0_100, %c0_101] : memref<8x1x8xf32, #tpu.memory_space<vmem>>, vector<1x1x8xf32>
    %138 = vector.shape_cast %137 : vector<1x1x8xf32> to vector<1x8xf32>
    %139 = vector.broadcast %138 : vector<1x8xf32> to vector<16x8xf32>
    %140 = arith.addf %136, %139 : vector<16x8xf32>
    %c2_102 = arith.constant 2 : index
    %c0_103 = arith.constant 0 : index
    %c0_104 = arith.constant 0 : index
    %141 = vector.load %arg11[%c2_102, %c0_103, %c0_104] : memref<8x32x8xf32, #tpu.memory_space<vmem>>, vector<1x32x8xf32>
    %142 = vector.shape_cast %141 : vector<1x32x8xf32> to vector<32x8xf32>
    %cst_105 = arith.constant dense<0.000000e+00> : vector<16x8xf32>
    %143 = tpu.matmul %49, %142, %cst_105 {dimension_numbers = #tpu.dot_dimension_numbers<[1], [0], [0], [1], [0, 0, 1, 1], [], []>} : vector<16x32xf32>, vector<32x8xf32>, vector<16x8xf32> -> vector<16x8xf32>
    %c2_106 = arith.constant 2 : index
    %c0_107 = arith.constant 0 : index
    %c0_108 = arith.constant 0 : index
    %144 = vector.load %arg12[%c2_106, %c0_107, %c0_108] : memref<8x1x8xf32, #tpu.memory_space<vmem>>, vector<1x1x8xf32>
    %145 = vector.shape_cast %144 : vector<1x1x8xf32> to vector<1x8xf32>
    %146 = vector.broadcast %145 : vector<1x8xf32> to vector<16x8xf32>
    %147 = arith.addf %143, %146 : vector<16x8xf32>
    %cst_109 = arith.constant dense<0.000000e+00> : vector<16x16xf32>
    %148 = tpu.matmul %133, %140, %cst_109 {dimension_numbers = #tpu.dot_dimension_numbers<[1], [1], [0], [0], [0, 0, 1, 0], [], []>} : vector<16x8xf32>, vector<16x8xf32>, vector<16x16xf32> -> vector<16x16xf32>
    %149 = arith.addf %148, %0 : vector<16x16xf32>
    %cst_110 = arith.constant dense<0xFF800000> : vector<16xf32>
    %150 = vector.multi_reduction <maximumf>, %149, %cst_110 [1] : vector<16x16xf32> to vector<16xf32>
    %151 = vector.shape_cast %150 : vector<16xf32> to vector<16x1xf32>
    %152 = vector.broadcast %151 : vector<16x1xf32> to vector<16x16xf32>
    %153 = arith.subf %149, %152 : vector<16x16xf32>
    %154 = math.exp %153 : vector<16x16xf32>
    %cst_111 = arith.constant dense<0.000000e+00> : vector<16xf32>
    %155 = vector.multi_reduction <add>, %154, %cst_111 [1] : vector<16x16xf32> to vector<16xf32>
    %156 = vector.shape_cast %155 : vector<16xf32> to vector<16x1xf32>
    %157 = tpu.reciprocal %156 {approx = true} : vector<16x1xf32> -> vector<16x1xf32>
    %158 = vector.broadcast %157 : vector<16x1xf32> to vector<16x16xf32>
    %159 = arith.mulf %154, %158 : vector<16x16xf32>
    %cst_112 = arith.constant dense<0.000000e+00> : vector<16x8xf32>
    %160 = tpu.matmul %159, %147, %cst_112 {dimension_numbers = #tpu.dot_dimension_numbers<[1], [0], [0], [1], [0, 0, 1, 1], [], []>} : vector<16x16xf32>, vector<16x8xf32>, vector<16x8xf32> -> vector<16x8xf32>
    %c2_113 = arith.constant 2 : index
    %c0_114 = arith.constant 0 : index
    %c0_115 = arith.constant 0 : index
    %161 = vector.load %arg13[%c2_113, %c0_114, %c0_115] : memref<8x8x32xf32, #tpu.memory_space<vmem>>, vector<1x8x32xf32>
    %162 = vector.shape_cast %161 : vector<1x8x32xf32> to vector<8x32xf32>
    %cst_116 = arith.constant dense<0.000000e+00> : vector<16x32xf32>
    %163 = tpu.matmul %160, %162, %cst_116 {dimension_numbers = #tpu.dot_dimension_numbers<[1], [0], [0], [1], [0, 0, 1, 1], [], []>} : vector<16x8xf32>, vector<8x32xf32>, vector<16x32xf32> -> vector<16x32xf32>
    %164 = arith.addf %126, %163 : vector<16x32xf32>
    %c3 = arith.constant 3 : index
    %c0_117 = arith.constant 0 : index
    %c0_118 = arith.constant 0 : index
    %165 = vector.load %arg7[%c3, %c0_117, %c0_118] : memref<8x32x8xf32, #tpu.memory_space<vmem>>, vector<1x32x8xf32>
    %166 = vector.shape_cast %165 : vector<1x32x8xf32> to vector<32x8xf32>
    %cst_119 = arith.constant dense<0.000000e+00> : vector<16x8xf32>
    %167 = tpu.matmul %49, %166, %cst_119 {dimension_numbers = #tpu.dot_dimension_numbers<[1], [0], [0], [1], [0, 0, 1, 1], [], []>} : vector<16x32xf32>, vector<32x8xf32>, vector<16x8xf32> -> vector<16x8xf32>
    %c3_120 = arith.constant 3 : index
    %c0_121 = arith.constant 0 : index
    %c0_122 = arith.constant 0 : index
    %168 = vector.load %arg8[%c3_120, %c0_121, %c0_122] : memref<8x1x8xf32, #tpu.memory_space<vmem>>, vector<1x1x8xf32>
    %169 = vector.shape_cast %168 : vector<1x1x8xf32> to vector<1x8xf32>
    %170 = vector.broadcast %169 : vector<1x8xf32> to vector<16x8xf32>
    %171 = arith.addf %167, %170 : vector<16x8xf32>
    %c3_123 = arith.constant 3 : index
    %c0_124 = arith.constant 0 : index
    %c0_125 = arith.constant 0 : index
    %172 = vector.load %arg9[%c3_123, %c0_124, %c0_125] : memref<8x32x8xf32, #tpu.memory_space<vmem>>, vector<1x32x8xf32>
    %173 = vector.shape_cast %172 : vector<1x32x8xf32> to vector<32x8xf32>
    %cst_126 = arith.constant dense<0.000000e+00> : vector<16x8xf32>
    %174 = tpu.matmul %49, %173, %cst_126 {dimension_numbers = #tpu.dot_dimension_numbers<[1], [0], [0], [1], [0, 0, 1, 1], [], []>} : vector<16x32xf32>, vector<32x8xf32>, vector<16x8xf32> -> vector<16x8xf32>
    %c3_127 = arith.constant 3 : index
    %c0_128 = arith.constant 0 : index
    %c0_129 = arith.constant 0 : index
    %175 = vector.load %arg10[%c3_127, %c0_128, %c0_129] : memref<8x1x8xf32, #tpu.memory_space<vmem>>, vector<1x1x8xf32>
    %176 = vector.shape_cast %175 : vector<1x1x8xf32> to vector<1x8xf32>
    %177 = vector.broadcast %176 : vector<1x8xf32> to vector<16x8xf32>
    %178 = arith.addf %174, %177 : vector<16x8xf32>
    %c3_130 = arith.constant 3 : index
    %c0_131 = arith.constant 0 : index
    %c0_132 = arith.constant 0 : index
    %179 = vector.load %arg11[%c3_130, %c0_131, %c0_132] : memref<8x32x8xf32, #tpu.memory_space<vmem>>, vector<1x32x8xf32>
    %180 = vector.shape_cast %179 : vector<1x32x8xf32> to vector<32x8xf32>
    %cst_133 = arith.constant dense<0.000000e+00> : vector<16x8xf32>
    %181 = tpu.matmul %49, %180, %cst_133 {dimension_numbers = #tpu.dot_dimension_numbers<[1], [0], [0], [1], [0, 0, 1, 1], [], []>} : vector<16x32xf32>, vector<32x8xf32>, vector<16x8xf32> -> vector<16x8xf32>
    %c3_134 = arith.constant 3 : index
    %c0_135 = arith.constant 0 : index
    %c0_136 = arith.constant 0 : index
    %182 = vector.load %arg12[%c3_134, %c0_135, %c0_136] : memref<8x1x8xf32, #tpu.memory_space<vmem>>, vector<1x1x8xf32>
    %183 = vector.shape_cast %182 : vector<1x1x8xf32> to vector<1x8xf32>
    %184 = vector.broadcast %183 : vector<1x8xf32> to vector<16x8xf32>
    %185 = arith.addf %181, %184 : vector<16x8xf32>
    %cst_137 = arith.constant dense<0.000000e+00> : vector<16x16xf32>
    %186 = tpu.matmul %171, %178, %cst_137 {dimension_numbers = #tpu.dot_dimension_numbers<[1], [1], [0], [0], [0, 0, 1, 0], [], []>} : vector<16x8xf32>, vector<16x8xf32>, vector<16x16xf32> -> vector<16x16xf32>
    %187 = arith.addf %186, %0 : vector<16x16xf32>
    %cst_138 = arith.constant dense<0xFF800000> : vector<16xf32>
    %188 = vector.multi_reduction <maximumf>, %187, %cst_138 [1] : vector<16x16xf32> to vector<16xf32>
    %189 = vector.shape_cast %188 : vector<16xf32> to vector<16x1xf32>
    %190 = vector.broadcast %189 : vector<16x1xf32> to vector<16x16xf32>
    %191 = arith.subf %187, %190 : vector<16x16xf32>
    %192 = math.exp %191 : vector<16x16xf32>
    %cst_139 = arith.constant dense<0.000000e+00> : vector<16xf32>
    %193 = vector.multi_reduction <add>, %192, %cst_139 [1] : vector<16x16xf32> to vector<16xf32>
    %194 = vector.shape_cast %193 : vector<16xf32> to vector<16x1xf32>
    %195 = tpu.reciprocal %194 {approx = true} : vector<16x1xf32> -> vector<16x1xf32>
    %196 = vector.broadcast %195 : vector<16x1xf32> to vector<16x16xf32>
    %197 = arith.mulf %192, %196 : vector<16x16xf32>
    %cst_140 = arith.constant dense<0.000000e+00> : vector<16x8xf32>
    %198 = tpu.matmul %197, %185, %cst_140 {dimension_numbers = #tpu.dot_dimension_numbers<[1], [0], [0], [1], [0, 0, 1, 1], [], []>} : vector<16x16xf32>, vector<16x8xf32>, vector<16x8xf32> -> vector<16x8xf32>
    %c3_141 = arith.constant 3 : index
    %c0_142 = arith.constant 0 : index
    %c0_143 = arith.constant 0 : index
    %199 = vector.load %arg13[%c3_141, %c0_142, %c0_143] : memref<8x8x32xf32, #tpu.memory_space<vmem>>, vector<1x8x32xf32>
    %200 = vector.shape_cast %199 : vector<1x8x32xf32> to vector<8x32xf32>
    %cst_144 = arith.constant dense<0.000000e+00> : vector<16x32xf32>
    %201 = tpu.matmul %198, %200, %cst_144 {dimension_numbers = #tpu.dot_dimension_numbers<[1], [0], [0], [1], [0, 0, 1, 1], [], []>} : vector<16x8xf32>, vector<8x32xf32>, vector<16x32xf32> -> vector<16x32xf32>
    %202 = arith.addf %164, %201 : vector<16x32xf32>
    %203 = vector.broadcast %51 : vector<1x32xf32> to vector<16x32xf32>
    %204 = arith.addf %202, %203 : vector<16x32xf32>
    %205 = arith.addf %12, %204 : vector<16x32xf32>
    %c1_145 = arith.constant 1 : index
    %c0_146 = arith.constant 0 : index
    %c0_147 = arith.constant 0 : index
    %206 = vector.load %arg19[%c1_145, %c0_146, %c0_147] : memref<4x1x32xf32, #tpu.memory_space<vmem>>, vector<1x1x32xf32>
    %207 = vector.shape_cast %206 : vector<1x1x32xf32> to vector<1x32xf32>
    %c1_148 = arith.constant 1 : index
    %c0_149 = arith.constant 0 : index
    %c0_150 = arith.constant 0 : index
    %208 = vector.load %arg20[%c1_148, %c0_149, %c0_150] : memref<4x1x32xf32, #tpu.memory_space<vmem>>, vector<1x1x32xf32>
    %209 = vector.shape_cast %208 : vector<1x1x32xf32> to vector<1x32xf32>
    %cst_151 = arith.constant dense<0.000000e+00> : vector<16xf32>
    %210 = vector.multi_reduction <add>, %205, %cst_151 [1] : vector<16x32xf32> to vector<16xf32>
    %211 = vector.shape_cast %210 : vector<16xf32> to vector<16x1xf32>
    %cst_152 = arith.constant 3.200000e+01 : f32
    %212 = vector.broadcast %cst_152 : f32 to vector<16x1xf32>
    %213 = arith.divf %211, %212 : vector<16x1xf32>
    %214 = vector.broadcast %213 : vector<16x1xf32> to vector<16x32xf32>
    %215 = arith.subf %205, %214 : vector<16x32xf32>
    %216 = arith.mulf %215, %215 : vector<16x32xf32>
    %cst_153 = arith.constant dense<0.000000e+00> : vector<16xf32>
    %217 = vector.multi_reduction <add>, %216, %cst_153 [1] : vector<16x32xf32> to vector<16xf32>
    %218 = vector.shape_cast %217 : vector<16xf32> to vector<16x1xf32>
    %cst_154 = arith.constant 0.0322580636 : f32
    %219 = vector.broadcast %cst_154 : f32 to vector<16x1xf32>
    %220 = arith.mulf %218, %219 : vector<16x1xf32>
    %221 = math.sqrt %220 : vector<16x1xf32>
    %cst_155 = arith.constant 9.99999997E-7 : f32
    %222 = vector.broadcast %cst_155 : f32 to vector<16x1xf32>
    %223 = arith.addf %221, %222 : vector<16x1xf32>
    %224 = tpu.reciprocal %223 {approx = true} : vector<16x1xf32> -> vector<16x1xf32>
    %225 = vector.broadcast %213 : vector<16x1xf32> to vector<16x32xf32>
    %226 = arith.subf %205, %225 : vector<16x32xf32>
    %227 = vector.broadcast %207 : vector<1x32xf32> to vector<16x32xf32>
    %228 = arith.mulf %227, %226 : vector<16x32xf32>
    %229 = vector.broadcast %224 : vector<16x1xf32> to vector<16x32xf32>
    %230 = arith.mulf %228, %229 : vector<16x32xf32>
    %231 = vector.broadcast %209 : vector<1x32xf32> to vector<16x32xf32>
    %232 = arith.addf %230, %231 : vector<16x32xf32>
    %c0_156 = arith.constant 0 : index
    %c0_157 = arith.constant 0 : index
    %c0_158 = arith.constant 0 : index
    %233 = vector.load %arg15[%c0_156, %c0_157, %c0_158] : memref<2x32x64xf32, #tpu.memory_space<vmem>>, vector<1x32x64xf32>
    %234 = vector.shape_cast %233 : vector<1x32x64xf32> to vector<32x64xf32>
    %c0_159 = arith.constant 0 : index
    %c0_160 = arith.constant 0 : index
    %c0_161 = arith.constant 0 : index
    %235 = vector.load %arg16[%c0_159, %c0_160, %c0_161] : memref<2x1x64xf32, #tpu.memory_space<vmem>>, vector<1x1x64xf32>
    %236 = vector.shape_cast %235 : vector<1x1x64xf32> to vector<1x64xf32>
    %c0_162 = arith.constant 0 : index
    %c0_163 = arith.constant 0 : index
    %c0_164 = arith.constant 0 : index
    %237 = vector.load %arg17[%c0_162, %c0_163, %c0_164] : memref<2x64x32xf32, #tpu.memory_space<vmem>>, vector<1x64x32xf32>
    %238 = vector.shape_cast %237 : vector<1x64x32xf32> to vector<64x32xf32>
    %c0_165 = arith.constant 0 : index
    %c0_166 = arith.constant 0 : index
    %c0_167 = arith.constant 0 : index
    %239 = vector.load %arg18[%c0_165, %c0_166, %c0_167] : memref<2x1x32xf32, #tpu.memory_space<vmem>>, vector<1x1x32xf32>
    %240 = vector.shape_cast %239 : vector<1x1x32xf32> to vector<1x32xf32>
    %cst_168 = arith.constant dense<0.000000e+00> : vector<16x64xf32>
    %241 = tpu.matmul %232, %234, %cst_168 {dimension_numbers = #tpu.dot_dimension_numbers<[1], [0], [0], [1], [0, 0, 1, 1], [], []>} : vector<16x32xf32>, vector<32x64xf32>, vector<16x64xf32> -> vector<16x64xf32>
    %242 = vector.broadcast %236 : vector<1x64xf32> to vector<16x64xf32>
    %243 = arith.addf %241, %242 : vector<16x64xf32>
    %cst_169 = arith.constant 0.000000e+00 : f32
    %244 = vector.broadcast %cst_169 : f32 to vector<16x64xf32>
    %245 = arith.maximumf %243, %244 : vector<16x64xf32>
    %cst_170 = arith.constant dense<0.000000e+00> : vector<16x32xf32>
    %246 = tpu.matmul %245, %238, %cst_170 {dimension_numbers = #tpu.dot_dimension_numbers<[1], [0], [0], [1], [0, 0, 1, 1], [], []>} : vector<16x64xf32>, vector<64x32xf32>, vector<16x32xf32> -> vector<16x32xf32>
    %247 = vector.broadcast %240 : vector<1x32xf32> to vector<16x32xf32>
    %248 = arith.addf %246, %247 : vector<16x32xf32>
    %249 = arith.addf %205, %248 : vector<16x32xf32>
    %c2_171 = arith.constant 2 : index
    %c0_172 = arith.constant 0 : index
    %c0_173 = arith.constant 0 : index
    %250 = vector.load %arg19[%c2_171, %c0_172, %c0_173] : memref<4x1x32xf32, #tpu.memory_space<vmem>>, vector<1x1x32xf32>
    %251 = vector.shape_cast %250 : vector<1x1x32xf32> to vector<1x32xf32>
    %c2_174 = arith.constant 2 : index
    %c0_175 = arith.constant 0 : index
    %c0_176 = arith.constant 0 : index
    %252 = vector.load %arg20[%c2_174, %c0_175, %c0_176] : memref<4x1x32xf32, #tpu.memory_space<vmem>>, vector<1x1x32xf32>
    %253 = vector.shape_cast %252 : vector<1x1x32xf32> to vector<1x32xf32>
    %cst_177 = arith.constant dense<0.000000e+00> : vector<16xf32>
    %254 = vector.multi_reduction <add>, %249, %cst_177 [1] : vector<16x32xf32> to vector<16xf32>
    %255 = vector.shape_cast %254 : vector<16xf32> to vector<16x1xf32>
    %cst_178 = arith.constant 3.200000e+01 : f32
    %256 = vector.broadcast %cst_178 : f32 to vector<16x1xf32>
    %257 = arith.divf %255, %256 : vector<16x1xf32>
    %258 = vector.broadcast %257 : vector<16x1xf32> to vector<16x32xf32>
    %259 = arith.subf %249, %258 : vector<16x32xf32>
    %260 = arith.mulf %259, %259 : vector<16x32xf32>
    %cst_179 = arith.constant dense<0.000000e+00> : vector<16xf32>
    %261 = vector.multi_reduction <add>, %260, %cst_179 [1] : vector<16x32xf32> to vector<16xf32>
    %262 = vector.shape_cast %261 : vector<16xf32> to vector<16x1xf32>
    %cst_180 = arith.constant 0.0322580636 : f32
    %263 = vector.broadcast %cst_180 : f32 to vector<16x1xf32>
    %264 = arith.mulf %262, %263 : vector<16x1xf32>
    %265 = math.sqrt %264 : vector<16x1xf32>
    %cst_181 = arith.constant 9.99999997E-7 : f32
    %266 = vector.broadcast %cst_181 : f32 to vector<16x1xf32>
    %267 = arith.addf %265, %266 : vector<16x1xf32>
    %268 = tpu.reciprocal %267 {approx = true} : vector<16x1xf32> -> vector<16x1xf32>
    %269 = vector.broadcast %257 : vector<16x1xf32> to vector<16x32xf32>
    %270 = arith.subf %249, %269 : vector<16x32xf32>
    %271 = vector.broadcast %251 : vector<1x32xf32> to vector<16x32xf32>
    %272 = arith.mulf %271, %270 : vector<16x32xf32>
    %273 = vector.broadcast %268 : vector<16x1xf32> to vector<16x32xf32>
    %274 = arith.mulf %272, %273 : vector<16x32xf32>
    %275 = vector.broadcast %253 : vector<1x32xf32> to vector<16x32xf32>
    %276 = arith.addf %274, %275 : vector<16x32xf32>
    %c1_182 = arith.constant 1 : index
    %c0_183 = arith.constant 0 : index
    %c0_184 = arith.constant 0 : index
    %277 = vector.load %arg14[%c1_182, %c0_183, %c0_184] : memref<2x1x32xf32, #tpu.memory_space<vmem>>, vector<1x1x32xf32>
    %278 = vector.shape_cast %277 : vector<1x1x32xf32> to vector<1x32xf32>
    %c4 = arith.constant 4 : index
    %c0_185 = arith.constant 0 : index
    %c0_186 = arith.constant 0 : index
    %279 = vector.load %arg7[%c4, %c0_185, %c0_186] : memref<8x32x8xf32, #tpu.memory_space<vmem>>, vector<1x32x8xf32>
    %280 = vector.shape_cast %279 : vector<1x32x8xf32> to vector<32x8xf32>
    %cst_187 = arith.constant dense<0.000000e+00> : vector<16x8xf32>
    %281 = tpu.matmul %276, %280, %cst_187 {dimension_numbers = #tpu.dot_dimension_numbers<[1], [0], [0], [1], [0, 0, 1, 1], [], []>} : vector<16x32xf32>, vector<32x8xf32>, vector<16x8xf32> -> vector<16x8xf32>
    %c4_188 = arith.constant 4 : index
    %c0_189 = arith.constant 0 : index
    %c0_190 = arith.constant 0 : index
    %282 = vector.load %arg8[%c4_188, %c0_189, %c0_190] : memref<8x1x8xf32, #tpu.memory_space<vmem>>, vector<1x1x8xf32>
    %283 = vector.shape_cast %282 : vector<1x1x8xf32> to vector<1x8xf32>
    %284 = vector.broadcast %283 : vector<1x8xf32> to vector<16x8xf32>
    %285 = arith.addf %281, %284 : vector<16x8xf32>
    %c4_191 = arith.constant 4 : index
    %c0_192 = arith.constant 0 : index
    %c0_193 = arith.constant 0 : index
    %286 = vector.load %arg9[%c4_191, %c0_192, %c0_193] : memref<8x32x8xf32, #tpu.memory_space<vmem>>, vector<1x32x8xf32>
    %287 = vector.shape_cast %286 : vector<1x32x8xf32> to vector<32x8xf32>
    %cst_194 = arith.constant dense<0.000000e+00> : vector<16x8xf32>
    %288 = tpu.matmul %276, %287, %cst_194 {dimension_numbers = #tpu.dot_dimension_numbers<[1], [0], [0], [1], [0, 0, 1, 1], [], []>} : vector<16x32xf32>, vector<32x8xf32>, vector<16x8xf32> -> vector<16x8xf32>
    %c4_195 = arith.constant 4 : index
    %c0_196 = arith.constant 0 : index
    %c0_197 = arith.constant 0 : index
    %289 = vector.load %arg10[%c4_195, %c0_196, %c0_197] : memref<8x1x8xf32, #tpu.memory_space<vmem>>, vector<1x1x8xf32>
    %290 = vector.shape_cast %289 : vector<1x1x8xf32> to vector<1x8xf32>
    %291 = vector.broadcast %290 : vector<1x8xf32> to vector<16x8xf32>
    %292 = arith.addf %288, %291 : vector<16x8xf32>
    %c4_198 = arith.constant 4 : index
    %c0_199 = arith.constant 0 : index
    %c0_200 = arith.constant 0 : index
    %293 = vector.load %arg11[%c4_198, %c0_199, %c0_200] : memref<8x32x8xf32, #tpu.memory_space<vmem>>, vector<1x32x8xf32>
    %294 = vector.shape_cast %293 : vector<1x32x8xf32> to vector<32x8xf32>
    %cst_201 = arith.constant dense<0.000000e+00> : vector<16x8xf32>
    %295 = tpu.matmul %276, %294, %cst_201 {dimension_numbers = #tpu.dot_dimension_numbers<[1], [0], [0], [1], [0, 0, 1, 1], [], []>} : vector<16x32xf32>, vector<32x8xf32>, vector<16x8xf32> -> vector<16x8xf32>
    %c4_202 = arith.constant 4 : index
    %c0_203 = arith.constant 0 : index
    %c0_204 = arith.constant 0 : index
    %296 = vector.load %arg12[%c4_202, %c0_203, %c0_204] : memref<8x1x8xf32, #tpu.memory_space<vmem>>, vector<1x1x8xf32>
    %297 = vector.shape_cast %296 : vector<1x1x8xf32> to vector<1x8xf32>
    %298 = vector.broadcast %297 : vector<1x8xf32> to vector<16x8xf32>
    %299 = arith.addf %295, %298 : vector<16x8xf32>
    %cst_205 = arith.constant dense<0.000000e+00> : vector<16x16xf32>
    %300 = tpu.matmul %285, %292, %cst_205 {dimension_numbers = #tpu.dot_dimension_numbers<[1], [1], [0], [0], [0, 0, 1, 0], [], []>} : vector<16x8xf32>, vector<16x8xf32>, vector<16x16xf32> -> vector<16x16xf32>
    %301 = arith.addf %300, %0 : vector<16x16xf32>
    %cst_206 = arith.constant dense<0xFF800000> : vector<16xf32>
    %302 = vector.multi_reduction <maximumf>, %301, %cst_206 [1] : vector<16x16xf32> to vector<16xf32>
    %303 = vector.shape_cast %302 : vector<16xf32> to vector<16x1xf32>
    %304 = vector.broadcast %303 : vector<16x1xf32> to vector<16x16xf32>
    %305 = arith.subf %301, %304 : vector<16x16xf32>
    %306 = math.exp %305 : vector<16x16xf32>
    %cst_207 = arith.constant dense<0.000000e+00> : vector<16xf32>
    %307 = vector.multi_reduction <add>, %306, %cst_207 [1] : vector<16x16xf32> to vector<16xf32>
    %308 = vector.shape_cast %307 : vector<16xf32> to vector<16x1xf32>
    %309 = tpu.reciprocal %308 {approx = true} : vector<16x1xf32> -> vector<16x1xf32>
    %310 = vector.broadcast %309 : vector<16x1xf32> to vector<16x16xf32>
    %311 = arith.mulf %306, %310 : vector<16x16xf32>
    %cst_208 = arith.constant dense<0.000000e+00> : vector<16x8xf32>
    %312 = tpu.matmul %311, %299, %cst_208 {dimension_numbers = #tpu.dot_dimension_numbers<[1], [0], [0], [1], [0, 0, 1, 1], [], []>} : vector<16x16xf32>, vector<16x8xf32>, vector<16x8xf32> -> vector<16x8xf32>
    %c4_209 = arith.constant 4 : index
    %c0_210 = arith.constant 0 : index
    %c0_211 = arith.constant 0 : index
    %313 = vector.load %arg13[%c4_209, %c0_210, %c0_211] : memref<8x8x32xf32, #tpu.memory_space<vmem>>, vector<1x8x32xf32>
    %314 = vector.shape_cast %313 : vector<1x8x32xf32> to vector<8x32xf32>
    %cst_212 = arith.constant dense<0.000000e+00> : vector<16x32xf32>
    %315 = tpu.matmul %312, %314, %cst_212 {dimension_numbers = #tpu.dot_dimension_numbers<[1], [0], [0], [1], [0, 0, 1, 1], [], []>} : vector<16x8xf32>, vector<8x32xf32>, vector<16x32xf32> -> vector<16x32xf32>
    %c5 = arith.constant 5 : index
    %c0_213 = arith.constant 0 : index
    %c0_214 = arith.constant 0 : index
    %316 = vector.load %arg7[%c5, %c0_213, %c0_214] : memref<8x32x8xf32, #tpu.memory_space<vmem>>, vector<1x32x8xf32>
    %317 = vector.shape_cast %316 : vector<1x32x8xf32> to vector<32x8xf32>
    %cst_215 = arith.constant dense<0.000000e+00> : vector<16x8xf32>
    %318 = tpu.matmul %276, %317, %cst_215 {dimension_numbers = #tpu.dot_dimension_numbers<[1], [0], [0], [1], [0, 0, 1, 1], [], []>} : vector<16x32xf32>, vector<32x8xf32>, vector<16x8xf32> -> vector<16x8xf32>
    %c5_216 = arith.constant 5 : index
    %c0_217 = arith.constant 0 : index
    %c0_218 = arith.constant 0 : index
    %319 = vector.load %arg8[%c5_216, %c0_217, %c0_218] : memref<8x1x8xf32, #tpu.memory_space<vmem>>, vector<1x1x8xf32>
    %320 = vector.shape_cast %319 : vector<1x1x8xf32> to vector<1x8xf32>
    %321 = vector.broadcast %320 : vector<1x8xf32> to vector<16x8xf32>
    %322 = arith.addf %318, %321 : vector<16x8xf32>
    %c5_219 = arith.constant 5 : index
    %c0_220 = arith.constant 0 : index
    %c0_221 = arith.constant 0 : index
    %323 = vector.load %arg9[%c5_219, %c0_220, %c0_221] : memref<8x32x8xf32, #tpu.memory_space<vmem>>, vector<1x32x8xf32>
    %324 = vector.shape_cast %323 : vector<1x32x8xf32> to vector<32x8xf32>
    %cst_222 = arith.constant dense<0.000000e+00> : vector<16x8xf32>
    %325 = tpu.matmul %276, %324, %cst_222 {dimension_numbers = #tpu.dot_dimension_numbers<[1], [0], [0], [1], [0, 0, 1, 1], [], []>} : vector<16x32xf32>, vector<32x8xf32>, vector<16x8xf32> -> vector<16x8xf32>
    %c5_223 = arith.constant 5 : index
    %c0_224 = arith.constant 0 : index
    %c0_225 = arith.constant 0 : index
    %326 = vector.load %arg10[%c5_223, %c0_224, %c0_225] : memref<8x1x8xf32, #tpu.memory_space<vmem>>, vector<1x1x8xf32>
    %327 = vector.shape_cast %326 : vector<1x1x8xf32> to vector<1x8xf32>
    %328 = vector.broadcast %327 : vector<1x8xf32> to vector<16x8xf32>
    %329 = arith.addf %325, %328 : vector<16x8xf32>
    %c5_226 = arith.constant 5 : index
    %c0_227 = arith.constant 0 : index
    %c0_228 = arith.constant 0 : index
    %330 = vector.load %arg11[%c5_226, %c0_227, %c0_228] : memref<8x32x8xf32, #tpu.memory_space<vmem>>, vector<1x32x8xf32>
    %331 = vector.shape_cast %330 : vector<1x32x8xf32> to vector<32x8xf32>
    %cst_229 = arith.constant dense<0.000000e+00> : vector<16x8xf32>
    %332 = tpu.matmul %276, %331, %cst_229 {dimension_numbers = #tpu.dot_dimension_numbers<[1], [0], [0], [1], [0, 0, 1, 1], [], []>} : vector<16x32xf32>, vector<32x8xf32>, vector<16x8xf32> -> vector<16x8xf32>
    %c5_230 = arith.constant 5 : index
    %c0_231 = arith.constant 0 : index
    %c0_232 = arith.constant 0 : index
    %333 = vector.load %arg12[%c5_230, %c0_231, %c0_232] : memref<8x1x8xf32, #tpu.memory_space<vmem>>, vector<1x1x8xf32>
    %334 = vector.shape_cast %333 : vector<1x1x8xf32> to vector<1x8xf32>
    %335 = vector.broadcast %334 : vector<1x8xf32> to vector<16x8xf32>
    %336 = arith.addf %332, %335 : vector<16x8xf32>
    %cst_233 = arith.constant dense<0.000000e+00> : vector<16x16xf32>
    %337 = tpu.matmul %322, %329, %cst_233 {dimension_numbers = #tpu.dot_dimension_numbers<[1], [1], [0], [0], [0, 0, 1, 0], [], []>} : vector<16x8xf32>, vector<16x8xf32>, vector<16x16xf32> -> vector<16x16xf32>
    %338 = arith.addf %337, %0 : vector<16x16xf32>
    %cst_234 = arith.constant dense<0xFF800000> : vector<16xf32>
    %339 = vector.multi_reduction <maximumf>, %338, %cst_234 [1] : vector<16x16xf32> to vector<16xf32>
    %340 = vector.shape_cast %339 : vector<16xf32> to vector<16x1xf32>
    %341 = vector.broadcast %340 : vector<16x1xf32> to vector<16x16xf32>
    %342 = arith.subf %338, %341 : vector<16x16xf32>
    %343 = math.exp %342 : vector<16x16xf32>
    %cst_235 = arith.constant dense<0.000000e+00> : vector<16xf32>
    %344 = vector.multi_reduction <add>, %343, %cst_235 [1] : vector<16x16xf32> to vector<16xf32>
    %345 = vector.shape_cast %344 : vector<16xf32> to vector<16x1xf32>
    %346 = tpu.reciprocal %345 {approx = true} : vector<16x1xf32> -> vector<16x1xf32>
    %347 = vector.broadcast %346 : vector<16x1xf32> to vector<16x16xf32>
    %348 = arith.mulf %343, %347 : vector<16x16xf32>
    %cst_236 = arith.constant dense<0.000000e+00> : vector<16x8xf32>
    %349 = tpu.matmul %348, %336, %cst_236 {dimension_numbers = #tpu.dot_dimension_numbers<[1], [0], [0], [1], [0, 0, 1, 1], [], []>} : vector<16x16xf32>, vector<16x8xf32>, vector<16x8xf32> -> vector<16x8xf32>
    %c5_237 = arith.constant 5 : index
    %c0_238 = arith.constant 0 : index
    %c0_239 = arith.constant 0 : index
    %350 = vector.load %arg13[%c5_237, %c0_238, %c0_239] : memref<8x8x32xf32, #tpu.memory_space<vmem>>, vector<1x8x32xf32>
    %351 = vector.shape_cast %350 : vector<1x8x32xf32> to vector<8x32xf32>
    %cst_240 = arith.constant dense<0.000000e+00> : vector<16x32xf32>
    %352 = tpu.matmul %349, %351, %cst_240 {dimension_numbers = #tpu.dot_dimension_numbers<[1], [0], [0], [1], [0, 0, 1, 1], [], []>} : vector<16x8xf32>, vector<8x32xf32>, vector<16x32xf32> -> vector<16x32xf32>
    %353 = arith.addf %315, %352 : vector<16x32xf32>
    %c6 = arith.constant 6 : index
    %c0_241 = arith.constant 0 : index
    %c0_242 = arith.constant 0 : index
    %354 = vector.load %arg7[%c6, %c0_241, %c0_242] : memref<8x32x8xf32, #tpu.memory_space<vmem>>, vector<1x32x8xf32>
    %355 = vector.shape_cast %354 : vector<1x32x8xf32> to vector<32x8xf32>
    %cst_243 = arith.constant dense<0.000000e+00> : vector<16x8xf32>
    %356 = tpu.matmul %276, %355, %cst_243 {dimension_numbers = #tpu.dot_dimension_numbers<[1], [0], [0], [1], [0, 0, 1, 1], [], []>} : vector<16x32xf32>, vector<32x8xf32>, vector<16x8xf32> -> vector<16x8xf32>
    %c6_244 = arith.constant 6 : index
    %c0_245 = arith.constant 0 : index
    %c0_246 = arith.constant 0 : index
    %357 = vector.load %arg8[%c6_244, %c0_245, %c0_246] : memref<8x1x8xf32, #tpu.memory_space<vmem>>, vector<1x1x8xf32>
    %358 = vector.shape_cast %357 : vector<1x1x8xf32> to vector<1x8xf32>
    %359 = vector.broadcast %358 : vector<1x8xf32> to vector<16x8xf32>
    %360 = arith.addf %356, %359 : vector<16x8xf32>
    %c6_247 = arith.constant 6 : index
    %c0_248 = arith.constant 0 : index
    %c0_249 = arith.constant 0 : index
    %361 = vector.load %arg9[%c6_247, %c0_248, %c0_249] : memref<8x32x8xf32, #tpu.memory_space<vmem>>, vector<1x32x8xf32>
    %362 = vector.shape_cast %361 : vector<1x32x8xf32> to vector<32x8xf32>
    %cst_250 = arith.constant dense<0.000000e+00> : vector<16x8xf32>
    %363 = tpu.matmul %276, %362, %cst_250 {dimension_numbers = #tpu.dot_dimension_numbers<[1], [0], [0], [1], [0, 0, 1, 1], [], []>} : vector<16x32xf32>, vector<32x8xf32>, vector<16x8xf32> -> vector<16x8xf32>
    %c6_251 = arith.constant 6 : index
    %c0_252 = arith.constant 0 : index
    %c0_253 = arith.constant 0 : index
    %364 = vector.load %arg10[%c6_251, %c0_252, %c0_253] : memref<8x1x8xf32, #tpu.memory_space<vmem>>, vector<1x1x8xf32>
    %365 = vector.shape_cast %364 : vector<1x1x8xf32> to vector<1x8xf32>
    %366 = vector.broadcast %365 : vector<1x8xf32> to vector<16x8xf32>
    %367 = arith.addf %363, %366 : vector<16x8xf32>
    %c6_254 = arith.constant 6 : index
    %c0_255 = arith.constant 0 : index
    %c0_256 = arith.constant 0 : index
    %368 = vector.load %arg11[%c6_254, %c0_255, %c0_256] : memref<8x32x8xf32, #tpu.memory_space<vmem>>, vector<1x32x8xf32>
    %369 = vector.shape_cast %368 : vector<1x32x8xf32> to vector<32x8xf32>
    %cst_257 = arith.constant dense<0.000000e+00> : vector<16x8xf32>
    %370 = tpu.matmul %276, %369, %cst_257 {dimension_numbers = #tpu.dot_dimension_numbers<[1], [0], [0], [1], [0, 0, 1, 1], [], []>} : vector<16x32xf32>, vector<32x8xf32>, vector<16x8xf32> -> vector<16x8xf32>
    %c6_258 = arith.constant 6 : index
    %c0_259 = arith.constant 0 : index
    %c0_260 = arith.constant 0 : index
    %371 = vector.load %arg12[%c6_258, %c0_259, %c0_260] : memref<8x1x8xf32, #tpu.memory_space<vmem>>, vector<1x1x8xf32>
    %372 = vector.shape_cast %371 : vector<1x1x8xf32> to vector<1x8xf32>
    %373 = vector.broadcast %372 : vector<1x8xf32> to vector<16x8xf32>
    %374 = arith.addf %370, %373 : vector<16x8xf32>
    %cst_261 = arith.constant dense<0.000000e+00> : vector<16x16xf32>
    %375 = tpu.matmul %360, %367, %cst_261 {dimension_numbers = #tpu.dot_dimension_numbers<[1], [1], [0], [0], [0, 0, 1, 0], [], []>} : vector<16x8xf32>, vector<16x8xf32>, vector<16x16xf32> -> vector<16x16xf32>
    %376 = arith.addf %375, %0 : vector<16x16xf32>
    %cst_262 = arith.constant dense<0xFF800000> : vector<16xf32>
    %377 = vector.multi_reduction <maximumf>, %376, %cst_262 [1] : vector<16x16xf32> to vector<16xf32>
    %378 = vector.shape_cast %377 : vector<16xf32> to vector<16x1xf32>
    %379 = vector.broadcast %378 : vector<16x1xf32> to vector<16x16xf32>
    %380 = arith.subf %376, %379 : vector<16x16xf32>
    %381 = math.exp %380 : vector<16x16xf32>
    %cst_263 = arith.constant dense<0.000000e+00> : vector<16xf32>
    %382 = vector.multi_reduction <add>, %381, %cst_263 [1] : vector<16x16xf32> to vector<16xf32>
    %383 = vector.shape_cast %382 : vector<16xf32> to vector<16x1xf32>
    %384 = tpu.reciprocal %383 {approx = true} : vector<16x1xf32> -> vector<16x1xf32>
    %385 = vector.broadcast %384 : vector<16x1xf32> to vector<16x16xf32>
    %386 = arith.mulf %381, %385 : vector<16x16xf32>
    %cst_264 = arith.constant dense<0.000000e+00> : vector<16x8xf32>
    %387 = tpu.matmul %386, %374, %cst_264 {dimension_numbers = #tpu.dot_dimension_numbers<[1], [0], [0], [1], [0, 0, 1, 1], [], []>} : vector<16x16xf32>, vector<16x8xf32>, vector<16x8xf32> -> vector<16x8xf32>
    %c6_265 = arith.constant 6 : index
    %c0_266 = arith.constant 0 : index
    %c0_267 = arith.constant 0 : index
    %388 = vector.load %arg13[%c6_265, %c0_266, %c0_267] : memref<8x8x32xf32, #tpu.memory_space<vmem>>, vector<1x8x32xf32>
    %389 = vector.shape_cast %388 : vector<1x8x32xf32> to vector<8x32xf32>
    %cst_268 = arith.constant dense<0.000000e+00> : vector<16x32xf32>
    %390 = tpu.matmul %387, %389, %cst_268 {dimension_numbers = #tpu.dot_dimension_numbers<[1], [0], [0], [1], [0, 0, 1, 1], [], []>} : vector<16x8xf32>, vector<8x32xf32>, vector<16x32xf32> -> vector<16x32xf32>
    %391 = arith.addf %353, %390 : vector<16x32xf32>
    %c7 = arith.constant 7 : index
    %c0_269 = arith.constant 0 : index
    %c0_270 = arith.constant 0 : index
    %392 = vector.load %arg7[%c7, %c0_269, %c0_270] : memref<8x32x8xf32, #tpu.memory_space<vmem>>, vector<1x32x8xf32>
    %393 = vector.shape_cast %392 : vector<1x32x8xf32> to vector<32x8xf32>
    %cst_271 = arith.constant dense<0.000000e+00> : vector<16x8xf32>
    %394 = tpu.matmul %276, %393, %cst_271 {dimension_numbers = #tpu.dot_dimension_numbers<[1], [0], [0], [1], [0, 0, 1, 1], [], []>} : vector<16x32xf32>, vector<32x8xf32>, vector<16x8xf32> -> vector<16x8xf32>
    %c7_272 = arith.constant 7 : index
    %c0_273 = arith.constant 0 : index
    %c0_274 = arith.constant 0 : index
    %395 = vector.load %arg8[%c7_272, %c0_273, %c0_274] : memref<8x1x8xf32, #tpu.memory_space<vmem>>, vector<1x1x8xf32>
    %396 = vector.shape_cast %395 : vector<1x1x8xf32> to vector<1x8xf32>
    %397 = vector.broadcast %396 : vector<1x8xf32> to vector<16x8xf32>
    %398 = arith.addf %394, %397 : vector<16x8xf32>
    %c7_275 = arith.constant 7 : index
    %c0_276 = arith.constant 0 : index
    %c0_277 = arith.constant 0 : index
    %399 = vector.load %arg9[%c7_275, %c0_276, %c0_277] : memref<8x32x8xf32, #tpu.memory_space<vmem>>, vector<1x32x8xf32>
    %400 = vector.shape_cast %399 : vector<1x32x8xf32> to vector<32x8xf32>
    %cst_278 = arith.constant dense<0.000000e+00> : vector<16x8xf32>
    %401 = tpu.matmul %276, %400, %cst_278 {dimension_numbers = #tpu.dot_dimension_numbers<[1], [0], [0], [1], [0, 0, 1, 1], [], []>} : vector<16x32xf32>, vector<32x8xf32>, vector<16x8xf32> -> vector<16x8xf32>
    %c7_279 = arith.constant 7 : index
    %c0_280 = arith.constant 0 : index
    %c0_281 = arith.constant 0 : index
    %402 = vector.load %arg10[%c7_279, %c0_280, %c0_281] : memref<8x1x8xf32, #tpu.memory_space<vmem>>, vector<1x1x8xf32>
    %403 = vector.shape_cast %402 : vector<1x1x8xf32> to vector<1x8xf32>
    %404 = vector.broadcast %403 : vector<1x8xf32> to vector<16x8xf32>
    %405 = arith.addf %401, %404 : vector<16x8xf32>
    %c7_282 = arith.constant 7 : index
    %c0_283 = arith.constant 0 : index
    %c0_284 = arith.constant 0 : index
    %406 = vector.load %arg11[%c7_282, %c0_283, %c0_284] : memref<8x32x8xf32, #tpu.memory_space<vmem>>, vector<1x32x8xf32>
    %407 = vector.shape_cast %406 : vector<1x32x8xf32> to vector<32x8xf32>
    %cst_285 = arith.constant dense<0.000000e+00> : vector<16x8xf32>
    %408 = tpu.matmul %276, %407, %cst_285 {dimension_numbers = #tpu.dot_dimension_numbers<[1], [0], [0], [1], [0, 0, 1, 1], [], []>} : vector<16x32xf32>, vector<32x8xf32>, vector<16x8xf32> -> vector<16x8xf32>
    %c7_286 = arith.constant 7 : index
    %c0_287 = arith.constant 0 : index
    %c0_288 = arith.constant 0 : index
    %409 = vector.load %arg12[%c7_286, %c0_287, %c0_288] : memref<8x1x8xf32, #tpu.memory_space<vmem>>, vector<1x1x8xf32>
    %410 = vector.shape_cast %409 : vector<1x1x8xf32> to vector<1x8xf32>
    %411 = vector.broadcast %410 : vector<1x8xf32> to vector<16x8xf32>
    %412 = arith.addf %408, %411 : vector<16x8xf32>
    %cst_289 = arith.constant dense<0.000000e+00> : vector<16x16xf32>
    %413 = tpu.matmul %398, %405, %cst_289 {dimension_numbers = #tpu.dot_dimension_numbers<[1], [1], [0], [0], [0, 0, 1, 0], [], []>} : vector<16x8xf32>, vector<16x8xf32>, vector<16x16xf32> -> vector<16x16xf32>
    %414 = arith.addf %413, %0 : vector<16x16xf32>
    %cst_290 = arith.constant dense<0xFF800000> : vector<16xf32>
    %415 = vector.multi_reduction <maximumf>, %414, %cst_290 [1] : vector<16x16xf32> to vector<16xf32>
    %416 = vector.shape_cast %415 : vector<16xf32> to vector<16x1xf32>
    %417 = vector.broadcast %416 : vector<16x1xf32> to vector<16x16xf32>
    %418 = arith.subf %414, %417 : vector<16x16xf32>
    %419 = math.exp %418 : vector<16x16xf32>
    %cst_291 = arith.constant dense<0.000000e+00> : vector<16xf32>
    %420 = vector.multi_reduction <add>, %419, %cst_291 [1] : vector<16x16xf32> to vector<16xf32>
    %421 = vector.shape_cast %420 : vector<16xf32> to vector<16x1xf32>
    %422 = tpu.reciprocal %421 {approx = true} : vector<16x1xf32> -> vector<16x1xf32>
    %423 = vector.broadcast %422 : vector<16x1xf32> to vector<16x16xf32>
    %424 = arith.mulf %419, %423 : vector<16x16xf32>
    %cst_292 = arith.constant dense<0.000000e+00> : vector<16x8xf32>
    %425 = tpu.matmul %424, %412, %cst_292 {dimension_numbers = #tpu.dot_dimension_numbers<[1], [0], [0], [1], [0, 0, 1, 1], [], []>} : vector<16x16xf32>, vector<16x8xf32>, vector<16x8xf32> -> vector<16x8xf32>
    %c7_293 = arith.constant 7 : index
    %c0_294 = arith.constant 0 : index
    %c0_295 = arith.constant 0 : index
    %426 = vector.load %arg13[%c7_293, %c0_294, %c0_295] : memref<8x8x32xf32, #tpu.memory_space<vmem>>, vector<1x8x32xf32>
    %427 = vector.shape_cast %426 : vector<1x8x32xf32> to vector<8x32xf32>
    %cst_296 = arith.constant dense<0.000000e+00> : vector<16x32xf32>
    %428 = tpu.matmul %425, %427, %cst_296 {dimension_numbers = #tpu.dot_dimension_numbers<[1], [0], [0], [1], [0, 0, 1, 1], [], []>} : vector<16x8xf32>, vector<8x32xf32>, vector<16x32xf32> -> vector<16x32xf32>
    %429 = arith.addf %391, %428 : vector<16x32xf32>
    %430 = vector.broadcast %278 : vector<1x32xf32> to vector<16x32xf32>
    %431 = arith.addf %429, %430 : vector<16x32xf32>
    %432 = arith.addf %249, %431 : vector<16x32xf32>
    %c3_297 = arith.constant 3 : index
    %c0_298 = arith.constant 0 : index
    %c0_299 = arith.constant 0 : index
    %433 = vector.load %arg19[%c3_297, %c0_298, %c0_299] : memref<4x1x32xf32, #tpu.memory_space<vmem>>, vector<1x1x32xf32>
    %434 = vector.shape_cast %433 : vector<1x1x32xf32> to vector<1x32xf32>
    %c3_300 = arith.constant 3 : index
    %c0_301 = arith.constant 0 : index
    %c0_302 = arith.constant 0 : index
    %435 = vector.load %arg20[%c3_300, %c0_301, %c0_302] : memref<4x1x32xf32, #tpu.memory_space<vmem>>, vector<1x1x32xf32>
    %436 = vector.shape_cast %435 : vector<1x1x32xf32> to vector<1x32xf32>
    %cst_303 = arith.constant dense<0.000000e+00> : vector<16xf32>
    %437 = vector.multi_reduction <add>, %432, %cst_303 [1] : vector<16x32xf32> to vector<16xf32>
    %438 = vector.shape_cast %437 : vector<16xf32> to vector<16x1xf32>
    %cst_304 = arith.constant 3.200000e+01 : f32
    %439 = vector.broadcast %cst_304 : f32 to vector<16x1xf32>
    %440 = arith.divf %438, %439 : vector<16x1xf32>
    %441 = vector.broadcast %440 : vector<16x1xf32> to vector<16x32xf32>
    %442 = arith.subf %432, %441 : vector<16x32xf32>
    %443 = arith.mulf %442, %442 : vector<16x32xf32>
    %cst_305 = arith.constant dense<0.000000e+00> : vector<16xf32>
    %444 = vector.multi_reduction <add>, %443, %cst_305 [1] : vector<16x32xf32> to vector<16xf32>
    %445 = vector.shape_cast %444 : vector<16xf32> to vector<16x1xf32>
    %cst_306 = arith.constant 0.0322580636 : f32
    %446 = vector.broadcast %cst_306 : f32 to vector<16x1xf32>
    %447 = arith.mulf %445, %446 : vector<16x1xf32>
    %448 = math.sqrt %447 : vector<16x1xf32>
    %cst_307 = arith.constant 9.99999997E-7 : f32
    %449 = vector.broadcast %cst_307 : f32 to vector<16x1xf32>
    %450 = arith.addf %448, %449 : vector<16x1xf32>
    %451 = tpu.reciprocal %450 {approx = true} : vector<16x1xf32> -> vector<16x1xf32>
    %452 = vector.broadcast %440 : vector<16x1xf32> to vector<16x32xf32>
    %453 = arith.subf %432, %452 : vector<16x32xf32>
    %454 = vector.broadcast %434 : vector<1x32xf32> to vector<16x32xf32>
    %455 = arith.mulf %454, %453 : vector<16x32xf32>
    %456 = vector.broadcast %451 : vector<16x1xf32> to vector<16x32xf32>
    %457 = arith.mulf %455, %456 : vector<16x32xf32>
    %458 = vector.broadcast %436 : vector<1x32xf32> to vector<16x32xf32>
    %459 = arith.addf %457, %458 : vector<16x32xf32>
    %c1_308 = arith.constant 1 : index
    %c0_309 = arith.constant 0 : index
    %c0_310 = arith.constant 0 : index
    %460 = vector.load %arg15[%c1_308, %c0_309, %c0_310] : memref<2x32x64xf32, #tpu.memory_space<vmem>>, vector<1x32x64xf32>
    %461 = vector.shape_cast %460 : vector<1x32x64xf32> to vector<32x64xf32>
    %c1_311 = arith.constant 1 : index
    %c0_312 = arith.constant 0 : index
    %c0_313 = arith.constant 0 : index
    %462 = vector.load %arg16[%c1_311, %c0_312, %c0_313] : memref<2x1x64xf32, #tpu.memory_space<vmem>>, vector<1x1x64xf32>
    %463 = vector.shape_cast %462 : vector<1x1x64xf32> to vector<1x64xf32>
    %c1_314 = arith.constant 1 : index
    %c0_315 = arith.constant 0 : index
    %c0_316 = arith.constant 0 : index
    %464 = vector.load %arg17[%c1_314, %c0_315, %c0_316] : memref<2x64x32xf32, #tpu.memory_space<vmem>>, vector<1x64x32xf32>
    %465 = vector.shape_cast %464 : vector<1x64x32xf32> to vector<64x32xf32>
    %c1_317 = arith.constant 1 : index
    %c0_318 = arith.constant 0 : index
    %c0_319 = arith.constant 0 : index
    %466 = vector.load %arg18[%c1_317, %c0_318, %c0_319] : memref<2x1x32xf32, #tpu.memory_space<vmem>>, vector<1x1x32xf32>
    %467 = vector.shape_cast %466 : vector<1x1x32xf32> to vector<1x32xf32>
    %cst_320 = arith.constant dense<0.000000e+00> : vector<16x64xf32>
    %468 = tpu.matmul %459, %461, %cst_320 {dimension_numbers = #tpu.dot_dimension_numbers<[1], [0], [0], [1], [0, 0, 1, 1], [], []>} : vector<16x32xf32>, vector<32x64xf32>, vector<16x64xf32> -> vector<16x64xf32>
    %469 = vector.broadcast %463 : vector<1x64xf32> to vector<16x64xf32>
    %470 = arith.addf %468, %469 : vector<16x64xf32>
    %cst_321 = arith.constant 0.000000e+00 : f32
    %471 = vector.broadcast %cst_321 : f32 to vector<16x64xf32>
    %472 = arith.maximumf %470, %471 : vector<16x64xf32>
    %cst_322 = arith.constant dense<0.000000e+00> : vector<16x32xf32>
    %473 = tpu.matmul %472, %465, %cst_322 {dimension_numbers = #tpu.dot_dimension_numbers<[1], [0], [0], [1], [0, 0, 1, 1], [], []>} : vector<16x64xf32>, vector<64x32xf32>, vector<16x32xf32> -> vector<16x32xf32>
    %474 = vector.broadcast %467 : vector<1x32xf32> to vector<16x32xf32>
    %475 = arith.addf %473, %474 : vector<16x32xf32>
    %476 = arith.addf %432, %475 : vector<16x32xf32>
    %c0_323 = arith.constant 0 : index
    %c0_324 = arith.constant 0 : index
    %477 = vector.load %arg43[%c0_323, %c0_324] : memref<1x32xf32, #tpu.memory_space<vmem>>, vector<1x32xf32>
    %c0_325 = arith.constant 0 : index
    %c0_326 = arith.constant 0 : index
    %478 = vector.load %arg44[%c0_325, %c0_326] : memref<1x32xf32, #tpu.memory_space<vmem>>, vector<1x32xf32>
    %cst_327 = arith.constant dense<0.000000e+00> : vector<16xf32>
    %479 = vector.multi_reduction <add>, %476, %cst_327 [1] : vector<16x32xf32> to vector<16xf32>
    %480 = vector.shape_cast %479 : vector<16xf32> to vector<16x1xf32>
    %cst_328 = arith.constant 3.200000e+01 : f32
    %481 = vector.broadcast %cst_328 : f32 to vector<16x1xf32>
    %482 = arith.divf %480, %481 : vector<16x1xf32>
    %483 = vector.broadcast %482 : vector<16x1xf32> to vector<16x32xf32>
    %484 = arith.subf %476, %483 : vector<16x32xf32>
    %485 = arith.mulf %484, %484 : vector<16x32xf32>
    %cst_329 = arith.constant dense<0.000000e+00> : vector<16xf32>
    %486 = vector.multi_reduction <add>, %485, %cst_329 [1] : vector<16x32xf32> to vector<16xf32>
    %487 = vector.shape_cast %486 : vector<16xf32> to vector<16x1xf32>
    %cst_330 = arith.constant 0.0322580636 : f32
    %488 = vector.broadcast %cst_330 : f32 to vector<16x1xf32>
    %489 = arith.mulf %487, %488 : vector<16x1xf32>
    %490 = math.sqrt %489 : vector<16x1xf32>
    %cst_331 = arith.constant 9.99999997E-7 : f32
    %491 = vector.broadcast %cst_331 : f32 to vector<16x1xf32>
    %492 = arith.addf %490, %491 : vector<16x1xf32>
    %493 = tpu.reciprocal %492 {approx = true} : vector<16x1xf32> -> vector<16x1xf32>
    %494 = vector.broadcast %482 : vector<16x1xf32> to vector<16x32xf32>
    %495 = arith.subf %476, %494 : vector<16x32xf32>
    %496 = vector.broadcast %477 : vector<1x32xf32> to vector<16x32xf32>
    %497 = arith.mulf %496, %495 : vector<16x32xf32>
    %498 = vector.broadcast %493 : vector<16x1xf32> to vector<16x32xf32>
    %499 = arith.mulf %497, %498 : vector<16x32xf32>
    %500 = vector.broadcast %478 : vector<1x32xf32> to vector<16x32xf32>
    %501 = arith.addf %499, %500 : vector<16x32xf32>
    %c0_332 = arith.constant 0 : index
    %c0_333 = arith.constant 0 : index
    %c0_334 = arith.constant 0 : index
    %502 = vector.load %arg41[%c0_332, %c0_333, %c0_334] : memref<6x1x32xf32, #tpu.memory_space<vmem>>, vector<1x1x32xf32>
    %503 = vector.shape_cast %502 : vector<1x1x32xf32> to vector<1x32xf32>
    %c0_335 = arith.constant 0 : index
    %c0_336 = arith.constant 0 : index
    %c0_337 = arith.constant 0 : index
    %504 = vector.load %arg42[%c0_335, %c0_336, %c0_337] : memref<6x1x32xf32, #tpu.memory_space<vmem>>, vector<1x1x32xf32>
    %505 = vector.shape_cast %504 : vector<1x1x32xf32> to vector<1x32xf32>
    %cst_338 = arith.constant dense<0.000000e+00> : vector<16xf32>
    %506 = vector.multi_reduction <add>, %22, %cst_338 [1] : vector<16x32xf32> to vector<16xf32>
    %507 = vector.shape_cast %506 : vector<16xf32> to vector<16x1xf32>
    %cst_339 = arith.constant 3.200000e+01 : f32
    %508 = vector.broadcast %cst_339 : f32 to vector<16x1xf32>
    %509 = arith.divf %507, %508 : vector<16x1xf32>
    %510 = vector.broadcast %509 : vector<16x1xf32> to vector<16x32xf32>
    %511 = arith.subf %22, %510 : vector<16x32xf32>
    %512 = arith.mulf %511, %511 : vector<16x32xf32>
    %cst_340 = arith.constant dense<0.000000e+00> : vector<16xf32>
    %513 = vector.multi_reduction <add>, %512, %cst_340 [1] : vector<16x32xf32> to vector<16xf32>
    %514 = vector.shape_cast %513 : vector<16xf32> to vector<16x1xf32>
    %cst_341 = arith.constant 0.0322580636 : f32
    %515 = vector.broadcast %cst_341 : f32 to vector<16x1xf32>
    %516 = arith.mulf %514, %515 : vector<16x1xf32>
    %517 = math.sqrt %516 : vector<16x1xf32>
    %cst_342 = arith.constant 9.99999997E-7 : f32
    %518 = vector.broadcast %cst_342 : f32 to vector<16x1xf32>
    %519 = arith.addf %517, %518 : vector<16x1xf32>
    %520 = tpu.reciprocal %519 {approx = true} : vector<16x1xf32> -> vector<16x1xf32>
    %521 = vector.broadcast %509 : vector<16x1xf32> to vector<16x32xf32>
    %522 = arith.subf %22, %521 : vector<16x32xf32>
    %523 = vector.broadcast %503 : vector<1x32xf32> to vector<16x32xf32>
    %524 = arith.mulf %523, %522 : vector<16x32xf32>
    %525 = vector.broadcast %520 : vector<16x1xf32> to vector<16x32xf32>
    %526 = arith.mulf %524, %525 : vector<16x32xf32>
    %527 = vector.broadcast %505 : vector<1x32xf32> to vector<16x32xf32>
    %528 = arith.addf %526, %527 : vector<16x32xf32>
    %c0_343 = arith.constant 0 : index
    %c0_344 = arith.constant 0 : index
    %c0_345 = arith.constant 0 : index
    %529 = vector.load %arg28[%c0_343, %c0_344, %c0_345] : memref<2x1x32xf32, #tpu.memory_space<vmem>>, vector<1x1x32xf32>
    %530 = vector.shape_cast %529 : vector<1x1x32xf32> to vector<1x32xf32>
    %c0_346 = arith.constant 0 : index
    %c0_347 = arith.constant 0 : index
    %c0_348 = arith.constant 0 : index
    %531 = vector.load %arg21[%c0_346, %c0_347, %c0_348] : memref<8x32x8xf32, #tpu.memory_space<vmem>>, vector<1x32x8xf32>
    %532 = vector.shape_cast %531 : vector<1x32x8xf32> to vector<32x8xf32>
    %cst_349 = arith.constant dense<0.000000e+00> : vector<16x8xf32>
    %533 = tpu.matmul %528, %532, %cst_349 {dimension_numbers = #tpu.dot_dimension_numbers<[1], [0], [0], [1], [0, 0, 1, 1], [], []>} : vector<16x32xf32>, vector<32x8xf32>, vector<16x8xf32> -> vector<16x8xf32>
    %c0_350 = arith.constant 0 : index
    %c0_351 = arith.constant 0 : index
    %c0_352 = arith.constant 0 : index
    %534 = vector.load %arg22[%c0_350, %c0_351, %c0_352] : memref<8x1x8xf32, #tpu.memory_space<vmem>>, vector<1x1x8xf32>
    %535 = vector.shape_cast %534 : vector<1x1x8xf32> to vector<1x8xf32>
    %536 = vector.broadcast %535 : vector<1x8xf32> to vector<16x8xf32>
    %537 = arith.addf %533, %536 : vector<16x8xf32>
    %c0_353 = arith.constant 0 : index
    %c0_354 = arith.constant 0 : index
    %c0_355 = arith.constant 0 : index
    %538 = vector.load %arg23[%c0_353, %c0_354, %c0_355] : memref<8x32x8xf32, #tpu.memory_space<vmem>>, vector<1x32x8xf32>
    %539 = vector.shape_cast %538 : vector<1x32x8xf32> to vector<32x8xf32>
    %cst_356 = arith.constant dense<0.000000e+00> : vector<16x8xf32>
    %540 = tpu.matmul %528, %539, %cst_356 {dimension_numbers = #tpu.dot_dimension_numbers<[1], [0], [0], [1], [0, 0, 1, 1], [], []>} : vector<16x32xf32>, vector<32x8xf32>, vector<16x8xf32> -> vector<16x8xf32>
    %c0_357 = arith.constant 0 : index
    %c0_358 = arith.constant 0 : index
    %c0_359 = arith.constant 0 : index
    %541 = vector.load %arg24[%c0_357, %c0_358, %c0_359] : memref<8x1x8xf32, #tpu.memory_space<vmem>>, vector<1x1x8xf32>
    %542 = vector.shape_cast %541 : vector<1x1x8xf32> to vector<1x8xf32>
    %543 = vector.broadcast %542 : vector<1x8xf32> to vector<16x8xf32>
    %544 = arith.addf %540, %543 : vector<16x8xf32>
    %c0_360 = arith.constant 0 : index
    %c0_361 = arith.constant 0 : index
    %c0_362 = arith.constant 0 : index
    %545 = vector.load %arg25[%c0_360, %c0_361, %c0_362] : memref<8x32x8xf32, #tpu.memory_space<vmem>>, vector<1x32x8xf32>
    %546 = vector.shape_cast %545 : vector<1x32x8xf32> to vector<32x8xf32>
    %cst_363 = arith.constant dense<0.000000e+00> : vector<16x8xf32>
    %547 = tpu.matmul %528, %546, %cst_363 {dimension_numbers = #tpu.dot_dimension_numbers<[1], [0], [0], [1], [0, 0, 1, 1], [], []>} : vector<16x32xf32>, vector<32x8xf32>, vector<16x8xf32> -> vector<16x8xf32>
    %c0_364 = arith.constant 0 : index
    %c0_365 = arith.constant 0 : index
    %c0_366 = arith.constant 0 : index
    %548 = vector.load %arg26[%c0_364, %c0_365, %c0_366] : memref<8x1x8xf32, #tpu.memory_space<vmem>>, vector<1x1x8xf32>
    %549 = vector.shape_cast %548 : vector<1x1x8xf32> to vector<1x8xf32>
    %550 = vector.broadcast %549 : vector<1x8xf32> to vector<16x8xf32>
    %551 = arith.addf %547, %550 : vector<16x8xf32>
    %cst_367 = arith.constant dense<0.000000e+00> : vector<16x16xf32>
    %552 = tpu.matmul %537, %544, %cst_367 {dimension_numbers = #tpu.dot_dimension_numbers<[1], [1], [0], [0], [0, 0, 1, 0], [], []>} : vector<16x8xf32>, vector<16x8xf32>, vector<16x16xf32> -> vector<16x16xf32>
    %553 = arith.addf %552, %1 : vector<16x16xf32>
    %cst_368 = arith.constant dense<0xFF800000> : vector<16xf32>
    %554 = vector.multi_reduction <maximumf>, %553, %cst_368 [1] : vector<16x16xf32> to vector<16xf32>
    %555 = vector.shape_cast %554 : vector<16xf32> to vector<16x1xf32>
    %556 = vector.broadcast %555 : vector<16x1xf32> to vector<16x16xf32>
    %557 = arith.subf %553, %556 : vector<16x16xf32>
    %558 = math.exp %557 : vector<16x16xf32>
    %cst_369 = arith.constant dense<0.000000e+00> : vector<16xf32>
    %559 = vector.multi_reduction <add>, %558, %cst_369 [1] : vector<16x16xf32> to vector<16xf32>
    %560 = vector.shape_cast %559 : vector<16xf32> to vector<16x1xf32>
    %561 = tpu.reciprocal %560 {approx = true} : vector<16x1xf32> -> vector<16x1xf32>
    %562 = vector.broadcast %561 : vector<16x1xf32> to vector<16x16xf32>
    %563 = arith.mulf %558, %562 : vector<16x16xf32>
    %cst_370 = arith.constant dense<0.000000e+00> : vector<16x8xf32>
    %564 = tpu.matmul %563, %551, %cst_370 {dimension_numbers = #tpu.dot_dimension_numbers<[1], [0], [0], [1], [0, 0, 1, 1], [], []>} : vector<16x16xf32>, vector<16x8xf32>, vector<16x8xf32> -> vector<16x8xf32>
    %c0_371 = arith.constant 0 : index
    %c0_372 = arith.constant 0 : index
    %c0_373 = arith.constant 0 : index
    %565 = vector.load %arg27[%c0_371, %c0_372, %c0_373] : memref<8x8x32xf32, #tpu.memory_space<vmem>>, vector<1x8x32xf32>
    %566 = vector.shape_cast %565 : vector<1x8x32xf32> to vector<8x32xf32>
    %cst_374 = arith.constant dense<0.000000e+00> : vector<16x32xf32>
    %567 = tpu.matmul %564, %566, %cst_374 {dimension_numbers = #tpu.dot_dimension_numbers<[1], [0], [0], [1], [0, 0, 1, 1], [], []>} : vector<16x8xf32>, vector<8x32xf32>, vector<16x32xf32> -> vector<16x32xf32>
    %c1_375 = arith.constant 1 : index
    %c0_376 = arith.constant 0 : index
    %c0_377 = arith.constant 0 : index
    %568 = vector.load %arg21[%c1_375, %c0_376, %c0_377] : memref<8x32x8xf32, #tpu.memory_space<vmem>>, vector<1x32x8xf32>
    %569 = vector.shape_cast %568 : vector<1x32x8xf32> to vector<32x8xf32>
    %cst_378 = arith.constant dense<0.000000e+00> : vector<16x8xf32>
    %570 = tpu.matmul %528, %569, %cst_378 {dimension_numbers = #tpu.dot_dimension_numbers<[1], [0], [0], [1], [0, 0, 1, 1], [], []>} : vector<16x32xf32>, vector<32x8xf32>, vector<16x8xf32> -> vector<16x8xf32>
    %c1_379 = arith.constant 1 : index
    %c0_380 = arith.constant 0 : index
    %c0_381 = arith.constant 0 : index
    %571 = vector.load %arg22[%c1_379, %c0_380, %c0_381] : memref<8x1x8xf32, #tpu.memory_space<vmem>>, vector<1x1x8xf32>
    %572 = vector.shape_cast %571 : vector<1x1x8xf32> to vector<1x8xf32>
    %573 = vector.broadcast %572 : vector<1x8xf32> to vector<16x8xf32>
    %574 = arith.addf %570, %573 : vector<16x8xf32>
    %c1_382 = arith.constant 1 : index
    %c0_383 = arith.constant 0 : index
    %c0_384 = arith.constant 0 : index
    %575 = vector.load %arg23[%c1_382, %c0_383, %c0_384] : memref<8x32x8xf32, #tpu.memory_space<vmem>>, vector<1x32x8xf32>
    %576 = vector.shape_cast %575 : vector<1x32x8xf32> to vector<32x8xf32>
    %cst_385 = arith.constant dense<0.000000e+00> : vector<16x8xf32>
    %577 = tpu.matmul %528, %576, %cst_385 {dimension_numbers = #tpu.dot_dimension_numbers<[1], [0], [0], [1], [0, 0, 1, 1], [], []>} : vector<16x32xf32>, vector<32x8xf32>, vector<16x8xf32> -> vector<16x8xf32>
    %c1_386 = arith.constant 1 : index
    %c0_387 = arith.constant 0 : index
    %c0_388 = arith.constant 0 : index
    %578 = vector.load %arg24[%c1_386, %c0_387, %c0_388] : memref<8x1x8xf32, #tpu.memory_space<vmem>>, vector<1x1x8xf32>
    %579 = vector.shape_cast %578 : vector<1x1x8xf32> to vector<1x8xf32>
    %580 = vector.broadcast %579 : vector<1x8xf32> to vector<16x8xf32>
    %581 = arith.addf %577, %580 : vector<16x8xf32>
    %c1_389 = arith.constant 1 : index
    %c0_390 = arith.constant 0 : index
    %c0_391 = arith.constant 0 : index
    %582 = vector.load %arg25[%c1_389, %c0_390, %c0_391] : memref<8x32x8xf32, #tpu.memory_space<vmem>>, vector<1x32x8xf32>
    %583 = vector.shape_cast %582 : vector<1x32x8xf32> to vector<32x8xf32>
    %cst_392 = arith.constant dense<0.000000e+00> : vector<16x8xf32>
    %584 = tpu.matmul %528, %583, %cst_392 {dimension_numbers = #tpu.dot_dimension_numbers<[1], [0], [0], [1], [0, 0, 1, 1], [], []>} : vector<16x32xf32>, vector<32x8xf32>, vector<16x8xf32> -> vector<16x8xf32>
    %c1_393 = arith.constant 1 : index
    %c0_394 = arith.constant 0 : index
    %c0_395 = arith.constant 0 : index
    %585 = vector.load %arg26[%c1_393, %c0_394, %c0_395] : memref<8x1x8xf32, #tpu.memory_space<vmem>>, vector<1x1x8xf32>
    %586 = vector.shape_cast %585 : vector<1x1x8xf32> to vector<1x8xf32>
    %587 = vector.broadcast %586 : vector<1x8xf32> to vector<16x8xf32>
    %588 = arith.addf %584, %587 : vector<16x8xf32>
    %cst_396 = arith.constant dense<0.000000e+00> : vector<16x16xf32>
    %589 = tpu.matmul %574, %581, %cst_396 {dimension_numbers = #tpu.dot_dimension_numbers<[1], [1], [0], [0], [0, 0, 1, 0], [], []>} : vector<16x8xf32>, vector<16x8xf32>, vector<16x16xf32> -> vector<16x16xf32>
    %590 = arith.addf %589, %1 : vector<16x16xf32>
    %cst_397 = arith.constant dense<0xFF800000> : vector<16xf32>
    %591 = vector.multi_reduction <maximumf>, %590, %cst_397 [1] : vector<16x16xf32> to vector<16xf32>
    %592 = vector.shape_cast %591 : vector<16xf32> to vector<16x1xf32>
    %593 = vector.broadcast %592 : vector<16x1xf32> to vector<16x16xf32>
    %594 = arith.subf %590, %593 : vector<16x16xf32>
    %595 = math.exp %594 : vector<16x16xf32>
    %cst_398 = arith.constant dense<0.000000e+00> : vector<16xf32>
    %596 = vector.multi_reduction <add>, %595, %cst_398 [1] : vector<16x16xf32> to vector<16xf32>
    %597 = vector.shape_cast %596 : vector<16xf32> to vector<16x1xf32>
    %598 = tpu.reciprocal %597 {approx = true} : vector<16x1xf32> -> vector<16x1xf32>
    %599 = vector.broadcast %598 : vector<16x1xf32> to vector<16x16xf32>
    %600 = arith.mulf %595, %599 : vector<16x16xf32>
    %cst_399 = arith.constant dense<0.000000e+00> : vector<16x8xf32>
    %601 = tpu.matmul %600, %588, %cst_399 {dimension_numbers = #tpu.dot_dimension_numbers<[1], [0], [0], [1], [0, 0, 1, 1], [], []>} : vector<16x16xf32>, vector<16x8xf32>, vector<16x8xf32> -> vector<16x8xf32>
    %c1_400 = arith.constant 1 : index
    %c0_401 = arith.constant 0 : index
    %c0_402 = arith.constant 0 : index
    %602 = vector.load %arg27[%c1_400, %c0_401, %c0_402] : memref<8x8x32xf32, #tpu.memory_space<vmem>>, vector<1x8x32xf32>
    %603 = vector.shape_cast %602 : vector<1x8x32xf32> to vector<8x32xf32>
    %cst_403 = arith.constant dense<0.000000e+00> : vector<16x32xf32>
    %604 = tpu.matmul %601, %603, %cst_403 {dimension_numbers = #tpu.dot_dimension_numbers<[1], [0], [0], [1], [0, 0, 1, 1], [], []>} : vector<16x8xf32>, vector<8x32xf32>, vector<16x32xf32> -> vector<16x32xf32>
    %605 = arith.addf %567, %604 : vector<16x32xf32>
    %c2_404 = arith.constant 2 : index
    %c0_405 = arith.constant 0 : index
    %c0_406 = arith.constant 0 : index
    %606 = vector.load %arg21[%c2_404, %c0_405, %c0_406] : memref<8x32x8xf32, #tpu.memory_space<vmem>>, vector<1x32x8xf32>
    %607 = vector.shape_cast %606 : vector<1x32x8xf32> to vector<32x8xf32>
    %cst_407 = arith.constant dense<0.000000e+00> : vector<16x8xf32>
    %608 = tpu.matmul %528, %607, %cst_407 {dimension_numbers = #tpu.dot_dimension_numbers<[1], [0], [0], [1], [0, 0, 1, 1], [], []>} : vector<16x32xf32>, vector<32x8xf32>, vector<16x8xf32> -> vector<16x8xf32>
    %c2_408 = arith.constant 2 : index
    %c0_409 = arith.constant 0 : index
    %c0_410 = arith.constant 0 : index
    %609 = vector.load %arg22[%c2_408, %c0_409, %c0_410] : memref<8x1x8xf32, #tpu.memory_space<vmem>>, vector<1x1x8xf32>
    %610 = vector.shape_cast %609 : vector<1x1x8xf32> to vector<1x8xf32>
    %611 = vector.broadcast %610 : vector<1x8xf32> to vector<16x8xf32>
    %612 = arith.addf %608, %611 : vector<16x8xf32>
    %c2_411 = arith.constant 2 : index
    %c0_412 = arith.constant 0 : index
    %c0_413 = arith.constant 0 : index
    %613 = vector.load %arg23[%c2_411, %c0_412, %c0_413] : memref<8x32x8xf32, #tpu.memory_space<vmem>>, vector<1x32x8xf32>
    %614 = vector.shape_cast %613 : vector<1x32x8xf32> to vector<32x8xf32>
    %cst_414 = arith.constant dense<0.000000e+00> : vector<16x8xf32>
    %615 = tpu.matmul %528, %614, %cst_414 {dimension_numbers = #tpu.dot_dimension_numbers<[1], [0], [0], [1], [0, 0, 1, 1], [], []>} : vector<16x32xf32>, vector<32x8xf32>, vector<16x8xf32> -> vector<16x8xf32>
    %c2_415 = arith.constant 2 : index
    %c0_416 = arith.constant 0 : index
    %c0_417 = arith.constant 0 : index
    %616 = vector.load %arg24[%c2_415, %c0_416, %c0_417] : memref<8x1x8xf32, #tpu.memory_space<vmem>>, vector<1x1x8xf32>
    %617 = vector.shape_cast %616 : vector<1x1x8xf32> to vector<1x8xf32>
    %618 = vector.broadcast %617 : vector<1x8xf32> to vector<16x8xf32>
    %619 = arith.addf %615, %618 : vector<16x8xf32>
    %c2_418 = arith.constant 2 : index
    %c0_419 = arith.constant 0 : index
    %c0_420 = arith.constant 0 : index
    %620 = vector.load %arg25[%c2_418, %c0_419, %c0_420] : memref<8x32x8xf32, #tpu.memory_space<vmem>>, vector<1x32x8xf32>
    %621 = vector.shape_cast %620 : vector<1x32x8xf32> to vector<32x8xf32>
    %cst_421 = arith.constant dense<0.000000e+00> : vector<16x8xf32>
    %622 = tpu.matmul %528, %621, %cst_421 {dimension_numbers = #tpu.dot_dimension_numbers<[1], [0], [0], [1], [0, 0, 1, 1], [], []>} : vector<16x32xf32>, vector<32x8xf32>, vector<16x8xf32> -> vector<16x8xf32>
    %c2_422 = arith.constant 2 : index
    %c0_423 = arith.constant 0 : index
    %c0_424 = arith.constant 0 : index
    %623 = vector.load %arg26[%c2_422, %c0_423, %c0_424] : memref<8x1x8xf32, #tpu.memory_space<vmem>>, vector<1x1x8xf32>
    %624 = vector.shape_cast %623 : vector<1x1x8xf32> to vector<1x8xf32>
    %625 = vector.broadcast %624 : vector<1x8xf32> to vector<16x8xf32>
    %626 = arith.addf %622, %625 : vector<16x8xf32>
    %cst_425 = arith.constant dense<0.000000e+00> : vector<16x16xf32>
    %627 = tpu.matmul %612, %619, %cst_425 {dimension_numbers = #tpu.dot_dimension_numbers<[1], [1], [0], [0], [0, 0, 1, 0], [], []>} : vector<16x8xf32>, vector<16x8xf32>, vector<16x16xf32> -> vector<16x16xf32>
    %628 = arith.addf %627, %1 : vector<16x16xf32>
    %cst_426 = arith.constant dense<0xFF800000> : vector<16xf32>
    %629 = vector.multi_reduction <maximumf>, %628, %cst_426 [1] : vector<16x16xf32> to vector<16xf32>
    %630 = vector.shape_cast %629 : vector<16xf32> to vector<16x1xf32>
    %631 = vector.broadcast %630 : vector<16x1xf32> to vector<16x16xf32>
    %632 = arith.subf %628, %631 : vector<16x16xf32>
    %633 = math.exp %632 : vector<16x16xf32>
    %cst_427 = arith.constant dense<0.000000e+00> : vector<16xf32>
    %634 = vector.multi_reduction <add>, %633, %cst_427 [1] : vector<16x16xf32> to vector<16xf32>
    %635 = vector.shape_cast %634 : vector<16xf32> to vector<16x1xf32>
    %636 = tpu.reciprocal %635 {approx = true} : vector<16x1xf32> -> vector<16x1xf32>
    %637 = vector.broadcast %636 : vector<16x1xf32> to vector<16x16xf32>
    %638 = arith.mulf %633, %637 : vector<16x16xf32>
    %cst_428 = arith.constant dense<0.000000e+00> : vector<16x8xf32>
    %639 = tpu.matmul %638, %626, %cst_428 {dimension_numbers = #tpu.dot_dimension_numbers<[1], [0], [0], [1], [0, 0, 1, 1], [], []>} : vector<16x16xf32>, vector<16x8xf32>, vector<16x8xf32> -> vector<16x8xf32>
    %c2_429 = arith.constant 2 : index
    %c0_430 = arith.constant 0 : index
    %c0_431 = arith.constant 0 : index
    %640 = vector.load %arg27[%c2_429, %c0_430, %c0_431] : memref<8x8x32xf32, #tpu.memory_space<vmem>>, vector<1x8x32xf32>
    %641 = vector.shape_cast %640 : vector<1x8x32xf32> to vector<8x32xf32>
    %cst_432 = arith.constant dense<0.000000e+00> : vector<16x32xf32>
    %642 = tpu.matmul %639, %641, %cst_432 {dimension_numbers = #tpu.dot_dimension_numbers<[1], [0], [0], [1], [0, 0, 1, 1], [], []>} : vector<16x8xf32>, vector<8x32xf32>, vector<16x32xf32> -> vector<16x32xf32>
    %643 = arith.addf %605, %642 : vector<16x32xf32>
    %c3_433 = arith.constant 3 : index
    %c0_434 = arith.constant 0 : index
    %c0_435 = arith.constant 0 : index
    %644 = vector.load %arg21[%c3_433, %c0_434, %c0_435] : memref<8x32x8xf32, #tpu.memory_space<vmem>>, vector<1x32x8xf32>
    %645 = vector.shape_cast %644 : vector<1x32x8xf32> to vector<32x8xf32>
    %cst_436 = arith.constant dense<0.000000e+00> : vector<16x8xf32>
    %646 = tpu.matmul %528, %645, %cst_436 {dimension_numbers = #tpu.dot_dimension_numbers<[1], [0], [0], [1], [0, 0, 1, 1], [], []>} : vector<16x32xf32>, vector<32x8xf32>, vector<16x8xf32> -> vector<16x8xf32>
    %c3_437 = arith.constant 3 : index
    %c0_438 = arith.constant 0 : index
    %c0_439 = arith.constant 0 : index
    %647 = vector.load %arg22[%c3_437, %c0_438, %c0_439] : memref<8x1x8xf32, #tpu.memory_space<vmem>>, vector<1x1x8xf32>
    %648 = vector.shape_cast %647 : vector<1x1x8xf32> to vector<1x8xf32>
    %649 = vector.broadcast %648 : vector<1x8xf32> to vector<16x8xf32>
    %650 = arith.addf %646, %649 : vector<16x8xf32>
    %c3_440 = arith.constant 3 : index
    %c0_441 = arith.constant 0 : index
    %c0_442 = arith.constant 0 : index
    %651 = vector.load %arg23[%c3_440, %c0_441, %c0_442] : memref<8x32x8xf32, #tpu.memory_space<vmem>>, vector<1x32x8xf32>
    %652 = vector.shape_cast %651 : vector<1x32x8xf32> to vector<32x8xf32>
    %cst_443 = arith.constant dense<0.000000e+00> : vector<16x8xf32>
    %653 = tpu.matmul %528, %652, %cst_443 {dimension_numbers = #tpu.dot_dimension_numbers<[1], [0], [0], [1], [0, 0, 1, 1], [], []>} : vector<16x32xf32>, vector<32x8xf32>, vector<16x8xf32> -> vector<16x8xf32>
    %c3_444 = arith.constant 3 : index
    %c0_445 = arith.constant 0 : index
    %c0_446 = arith.constant 0 : index
    %654 = vector.load %arg24[%c3_444, %c0_445, %c0_446] : memref<8x1x8xf32, #tpu.memory_space<vmem>>, vector<1x1x8xf32>
    %655 = vector.shape_cast %654 : vector<1x1x8xf32> to vector<1x8xf32>
    %656 = vector.broadcast %655 : vector<1x8xf32> to vector<16x8xf32>
    %657 = arith.addf %653, %656 : vector<16x8xf32>
    %c3_447 = arith.constant 3 : index
    %c0_448 = arith.constant 0 : index
    %c0_449 = arith.constant 0 : index
    %658 = vector.load %arg25[%c3_447, %c0_448, %c0_449] : memref<8x32x8xf32, #tpu.memory_space<vmem>>, vector<1x32x8xf32>
    %659 = vector.shape_cast %658 : vector<1x32x8xf32> to vector<32x8xf32>
    %cst_450 = arith.constant dense<0.000000e+00> : vector<16x8xf32>
    %660 = tpu.matmul %528, %659, %cst_450 {dimension_numbers = #tpu.dot_dimension_numbers<[1], [0], [0], [1], [0, 0, 1, 1], [], []>} : vector<16x32xf32>, vector<32x8xf32>, vector<16x8xf32> -> vector<16x8xf32>
    %c3_451 = arith.constant 3 : index
    %c0_452 = arith.constant 0 : index
    %c0_453 = arith.constant 0 : index
    %661 = vector.load %arg26[%c3_451, %c0_452, %c0_453] : memref<8x1x8xf32, #tpu.memory_space<vmem>>, vector<1x1x8xf32>
    %662 = vector.shape_cast %661 : vector<1x1x8xf32> to vector<1x8xf32>
    %663 = vector.broadcast %662 : vector<1x8xf32> to vector<16x8xf32>
    %664 = arith.addf %660, %663 : vector<16x8xf32>
    %cst_454 = arith.constant dense<0.000000e+00> : vector<16x16xf32>
    %665 = tpu.matmul %650, %657, %cst_454 {dimension_numbers = #tpu.dot_dimension_numbers<[1], [1], [0], [0], [0, 0, 1, 0], [], []>} : vector<16x8xf32>, vector<16x8xf32>, vector<16x16xf32> -> vector<16x16xf32>
    %666 = arith.addf %665, %1 : vector<16x16xf32>
    %cst_455 = arith.constant dense<0xFF800000> : vector<16xf32>
    %667 = vector.multi_reduction <maximumf>, %666, %cst_455 [1] : vector<16x16xf32> to vector<16xf32>
    %668 = vector.shape_cast %667 : vector<16xf32> to vector<16x1xf32>
    %669 = vector.broadcast %668 : vector<16x1xf32> to vector<16x16xf32>
    %670 = arith.subf %666, %669 : vector<16x16xf32>
    %671 = math.exp %670 : vector<16x16xf32>
    %cst_456 = arith.constant dense<0.000000e+00> : vector<16xf32>
    %672 = vector.multi_reduction <add>, %671, %cst_456 [1] : vector<16x16xf32> to vector<16xf32>
    %673 = vector.shape_cast %672 : vector<16xf32> to vector<16x1xf32>
    %674 = tpu.reciprocal %673 {approx = true} : vector<16x1xf32> -> vector<16x1xf32>
    %675 = vector.broadcast %674 : vector<16x1xf32> to vector<16x16xf32>
    %676 = arith.mulf %671, %675 : vector<16x16xf32>
    %cst_457 = arith.constant dense<0.000000e+00> : vector<16x8xf32>
    %677 = tpu.matmul %676, %664, %cst_457 {dimension_numbers = #tpu.dot_dimension_numbers<[1], [0], [0], [1], [0, 0, 1, 1], [], []>} : vector<16x16xf32>, vector<16x8xf32>, vector<16x8xf32> -> vector<16x8xf32>
    %c3_458 = arith.constant 3 : index
    %c0_459 = arith.constant 0 : index
    %c0_460 = arith.constant 0 : index
    %678 = vector.load %arg27[%c3_458, %c0_459, %c0_460] : memref<8x8x32xf32, #tpu.memory_space<vmem>>, vector<1x8x32xf32>
    %679 = vector.shape_cast %678 : vector<1x8x32xf32> to vector<8x32xf32>
    %cst_461 = arith.constant dense<0.000000e+00> : vector<16x32xf32>
    %680 = tpu.matmul %677, %679, %cst_461 {dimension_numbers = #tpu.dot_dimension_numbers<[1], [0], [0], [1], [0, 0, 1, 1], [], []>} : vector<16x8xf32>, vector<8x32xf32>, vector<16x32xf32> -> vector<16x32xf32>
    %681 = arith.addf %643, %680 : vector<16x32xf32>
    %682 = vector.broadcast %530 : vector<1x32xf32> to vector<16x32xf32>
    %683 = arith.addf %681, %682 : vector<16x32xf32>
    %684 = arith.addf %22, %683 : vector<16x32xf32>
    %c1_462 = arith.constant 1 : index
    %c0_463 = arith.constant 0 : index
    %c0_464 = arith.constant 0 : index
    %685 = vector.load %arg41[%c1_462, %c0_463, %c0_464] : memref<6x1x32xf32, #tpu.memory_space<vmem>>, vector<1x1x32xf32>
    %686 = vector.shape_cast %685 : vector<1x1x32xf32> to vector<1x32xf32>
    %c1_465 = arith.constant 1 : index
    %c0_466 = arith.constant 0 : index
    %c0_467 = arith.constant 0 : index
    %687 = vector.load %arg42[%c1_465, %c0_466, %c0_467] : memref<6x1x32xf32, #tpu.memory_space<vmem>>, vector<1x1x32xf32>
    %688 = vector.shape_cast %687 : vector<1x1x32xf32> to vector<1x32xf32>
    %cst_468 = arith.constant dense<0.000000e+00> : vector<16xf32>
    %689 = vector.multi_reduction <add>, %684, %cst_468 [1] : vector<16x32xf32> to vector<16xf32>
    %690 = vector.shape_cast %689 : vector<16xf32> to vector<16x1xf32>
    %cst_469 = arith.constant 3.200000e+01 : f32
    %691 = vector.broadcast %cst_469 : f32 to vector<16x1xf32>
    %692 = arith.divf %690, %691 : vector<16x1xf32>
    %693 = vector.broadcast %692 : vector<16x1xf32> to vector<16x32xf32>
    %694 = arith.subf %684, %693 : vector<16x32xf32>
    %695 = arith.mulf %694, %694 : vector<16x32xf32>
    %cst_470 = arith.constant dense<0.000000e+00> : vector<16xf32>
    %696 = vector.multi_reduction <add>, %695, %cst_470 [1] : vector<16x32xf32> to vector<16xf32>
    %697 = vector.shape_cast %696 : vector<16xf32> to vector<16x1xf32>
    %cst_471 = arith.constant 0.0322580636 : f32
    %698 = vector.broadcast %cst_471 : f32 to vector<16x1xf32>
    %699 = arith.mulf %697, %698 : vector<16x1xf32>
    %700 = math.sqrt %699 : vector<16x1xf32>
    %cst_472 = arith.constant 9.99999997E-7 : f32
    %701 = vector.broadcast %cst_472 : f32 to vector<16x1xf32>
    %702 = arith.addf %700, %701 : vector<16x1xf32>
    %703 = tpu.reciprocal %702 {approx = true} : vector<16x1xf32> -> vector<16x1xf32>
    %704 = vector.broadcast %692 : vector<16x1xf32> to vector<16x32xf32>
    %705 = arith.subf %684, %704 : vector<16x32xf32>
    %706 = vector.broadcast %686 : vector<1x32xf32> to vector<16x32xf32>
    %707 = arith.mulf %706, %705 : vector<16x32xf32>
    %708 = vector.broadcast %703 : vector<16x1xf32> to vector<16x32xf32>
    %709 = arith.mulf %707, %708 : vector<16x32xf32>
    %710 = vector.broadcast %688 : vector<1x32xf32> to vector<16x32xf32>
    %711 = arith.addf %709, %710 : vector<16x32xf32>
    %c0_473 = arith.constant 0 : index
    %c0_474 = arith.constant 0 : index
    %c0_475 = arith.constant 0 : index
    %712 = vector.load %arg36[%c0_473, %c0_474, %c0_475] : memref<2x1x32xf32, #tpu.memory_space<vmem>>, vector<1x1x32xf32>
    %713 = vector.shape_cast %712 : vector<1x1x32xf32> to vector<1x32xf32>
    %c0_476 = arith.constant 0 : index
    %c0_477 = arith.constant 0 : index
    %c0_478 = arith.constant 0 : index
    %714 = vector.load %arg29[%c0_476, %c0_477, %c0_478] : memref<8x32x8xf32, #tpu.memory_space<vmem>>, vector<1x32x8xf32>
    %715 = vector.shape_cast %714 : vector<1x32x8xf32> to vector<32x8xf32>
    %cst_479 = arith.constant dense<0.000000e+00> : vector<16x8xf32>
    %716 = tpu.matmul %711, %715, %cst_479 {dimension_numbers = #tpu.dot_dimension_numbers<[1], [0], [0], [1], [0, 0, 1, 1], [], []>} : vector<16x32xf32>, vector<32x8xf32>, vector<16x8xf32> -> vector<16x8xf32>
    %c0_480 = arith.constant 0 : index
    %c0_481 = arith.constant 0 : index
    %c0_482 = arith.constant 0 : index
    %717 = vector.load %arg30[%c0_480, %c0_481, %c0_482] : memref<8x1x8xf32, #tpu.memory_space<vmem>>, vector<1x1x8xf32>
    %718 = vector.shape_cast %717 : vector<1x1x8xf32> to vector<1x8xf32>
    %719 = vector.broadcast %718 : vector<1x8xf32> to vector<16x8xf32>
    %720 = arith.addf %716, %719 : vector<16x8xf32>
    %c0_483 = arith.constant 0 : index
    %c0_484 = arith.constant 0 : index
    %c0_485 = arith.constant 0 : index
    %721 = vector.load %arg31[%c0_483, %c0_484, %c0_485] : memref<8x32x8xf32, #tpu.memory_space<vmem>>, vector<1x32x8xf32>
    %722 = vector.shape_cast %721 : vector<1x32x8xf32> to vector<32x8xf32>
    %cst_486 = arith.constant dense<0.000000e+00> : vector<16x8xf32>
    %723 = tpu.matmul %501, %722, %cst_486 {dimension_numbers = #tpu.dot_dimension_numbers<[1], [0], [0], [1], [0, 0, 1, 1], [], []>} : vector<16x32xf32>, vector<32x8xf32>, vector<16x8xf32> -> vector<16x8xf32>
    %c0_487 = arith.constant 0 : index
    %c0_488 = arith.constant 0 : index
    %c0_489 = arith.constant 0 : index
    %724 = vector.load %arg32[%c0_487, %c0_488, %c0_489] : memref<8x1x8xf32, #tpu.memory_space<vmem>>, vector<1x1x8xf32>
    %725 = vector.shape_cast %724 : vector<1x1x8xf32> to vector<1x8xf32>
    %726 = vector.broadcast %725 : vector<1x8xf32> to vector<16x8xf32>
    %727 = arith.addf %723, %726 : vector<16x8xf32>
    %c0_490 = arith.constant 0 : index
    %c0_491 = arith.constant 0 : index
    %c0_492 = arith.constant 0 : index
    %728 = vector.load %arg33[%c0_490, %c0_491, %c0_492] : memref<8x32x8xf32, #tpu.memory_space<vmem>>, vector<1x32x8xf32>
    %729 = vector.shape_cast %728 : vector<1x32x8xf32> to vector<32x8xf32>
    %cst_493 = arith.constant dense<0.000000e+00> : vector<16x8xf32>
    %730 = tpu.matmul %501, %729, %cst_493 {dimension_numbers = #tpu.dot_dimension_numbers<[1], [0], [0], [1], [0, 0, 1, 1], [], []>} : vector<16x32xf32>, vector<32x8xf32>, vector<16x8xf32> -> vector<16x8xf32>
    %c0_494 = arith.constant 0 : index
    %c0_495 = arith.constant 0 : index
    %c0_496 = arith.constant 0 : index
    %731 = vector.load %arg34[%c0_494, %c0_495, %c0_496] : memref<8x1x8xf32, #tpu.memory_space<vmem>>, vector<1x1x8xf32>
    %732 = vector.shape_cast %731 : vector<1x1x8xf32> to vector<1x8xf32>
    %733 = vector.broadcast %732 : vector<1x8xf32> to vector<16x8xf32>
    %734 = arith.addf %730, %733 : vector<16x8xf32>
    %cst_497 = arith.constant dense<0.000000e+00> : vector<16x16xf32>
    %735 = tpu.matmul %720, %727, %cst_497 {dimension_numbers = #tpu.dot_dimension_numbers<[1], [1], [0], [0], [0, 0, 1, 0], [], []>} : vector<16x8xf32>, vector<16x8xf32>, vector<16x16xf32> -> vector<16x16xf32>
    %736 = arith.addf %735, %0 : vector<16x16xf32>
    %cst_498 = arith.constant dense<0xFF800000> : vector<16xf32>
    %737 = vector.multi_reduction <maximumf>, %736, %cst_498 [1] : vector<16x16xf32> to vector<16xf32>
    %738 = vector.shape_cast %737 : vector<16xf32> to vector<16x1xf32>
    %739 = vector.broadcast %738 : vector<16x1xf32> to vector<16x16xf32>
    %740 = arith.subf %736, %739 : vector<16x16xf32>
    %741 = math.exp %740 : vector<16x16xf32>
    %cst_499 = arith.constant dense<0.000000e+00> : vector<16xf32>
    %742 = vector.multi_reduction <add>, %741, %cst_499 [1] : vector<16x16xf32> to vector<16xf32>
    %743 = vector.shape_cast %742 : vector<16xf32> to vector<16x1xf32>
    %744 = tpu.reciprocal %743 {approx = true} : vector<16x1xf32> -> vector<16x1xf32>
    %745 = vector.broadcast %744 : vector<16x1xf32> to vector<16x16xf32>
    %746 = arith.mulf %741, %745 : vector<16x16xf32>
    %cst_500 = arith.constant dense<0.000000e+00> : vector<16x8xf32>
    %747 = tpu.matmul %746, %734, %cst_500 {dimension_numbers = #tpu.dot_dimension_numbers<[1], [0], [0], [1], [0, 0, 1, 1], [], []>} : vector<16x16xf32>, vector<16x8xf32>, vector<16x8xf32> -> vector<16x8xf32>
    %c0_501 = arith.constant 0 : index
    %c0_502 = arith.constant 0 : index
    %c0_503 = arith.constant 0 : index
    %748 = vector.load %arg35[%c0_501, %c0_502, %c0_503] : memref<8x8x32xf32, #tpu.memory_space<vmem>>, vector<1x8x32xf32>
    %749 = vector.shape_cast %748 : vector<1x8x32xf32> to vector<8x32xf32>
    %cst_504 = arith.constant dense<0.000000e+00> : vector<16x32xf32>
    %750 = tpu.matmul %747, %749, %cst_504 {dimension_numbers = #tpu.dot_dimension_numbers<[1], [0], [0], [1], [0, 0, 1, 1], [], []>} : vector<16x8xf32>, vector<8x32xf32>, vector<16x32xf32> -> vector<16x32xf32>
    %c1_505 = arith.constant 1 : index
    %c0_506 = arith.constant 0 : index
    %c0_507 = arith.constant 0 : index
    %751 = vector.load %arg29[%c1_505, %c0_506, %c0_507] : memref<8x32x8xf32, #tpu.memory_space<vmem>>, vector<1x32x8xf32>
    %752 = vector.shape_cast %751 : vector<1x32x8xf32> to vector<32x8xf32>
    %cst_508 = arith.constant dense<0.000000e+00> : vector<16x8xf32>
    %753 = tpu.matmul %711, %752, %cst_508 {dimension_numbers = #tpu.dot_dimension_numbers<[1], [0], [0], [1], [0, 0, 1, 1], [], []>} : vector<16x32xf32>, vector<32x8xf32>, vector<16x8xf32> -> vector<16x8xf32>
    %c1_509 = arith.constant 1 : index
    %c0_510 = arith.constant 0 : index
    %c0_511 = arith.constant 0 : index
    %754 = vector.load %arg30[%c1_509, %c0_510, %c0_511] : memref<8x1x8xf32, #tpu.memory_space<vmem>>, vector<1x1x8xf32>
    %755 = vector.shape_cast %754 : vector<1x1x8xf32> to vector<1x8xf32>
    %756 = vector.broadcast %755 : vector<1x8xf32> to vector<16x8xf32>
    %757 = arith.addf %753, %756 : vector<16x8xf32>
    %c1_512 = arith.constant 1 : index
    %c0_513 = arith.constant 0 : index
    %c0_514 = arith.constant 0 : index
    %758 = vector.load %arg31[%c1_512, %c0_513, %c0_514] : memref<8x32x8xf32, #tpu.memory_space<vmem>>, vector<1x32x8xf32>
    %759 = vector.shape_cast %758 : vector<1x32x8xf32> to vector<32x8xf32>
    %cst_515 = arith.constant dense<0.000000e+00> : vector<16x8xf32>
    %760 = tpu.matmul %501, %759, %cst_515 {dimension_numbers = #tpu.dot_dimension_numbers<[1], [0], [0], [1], [0, 0, 1, 1], [], []>} : vector<16x32xf32>, vector<32x8xf32>, vector<16x8xf32> -> vector<16x8xf32>
    %c1_516 = arith.constant 1 : index
    %c0_517 = arith.constant 0 : index
    %c0_518 = arith.constant 0 : index
    %761 = vector.load %arg32[%c1_516, %c0_517, %c0_518] : memref<8x1x8xf32, #tpu.memory_space<vmem>>, vector<1x1x8xf32>
    %762 = vector.shape_cast %761 : vector<1x1x8xf32> to vector<1x8xf32>
    %763 = vector.broadcast %762 : vector<1x8xf32> to vector<16x8xf32>
    %764 = arith.addf %760, %763 : vector<16x8xf32>
    %c1_519 = arith.constant 1 : index
    %c0_520 = arith.constant 0 : index
    %c0_521 = arith.constant 0 : index
    %765 = vector.load %arg33[%c1_519, %c0_520, %c0_521] : memref<8x32x8xf32, #tpu.memory_space<vmem>>, vector<1x32x8xf32>
    %766 = vector.shape_cast %765 : vector<1x32x8xf32> to vector<32x8xf32>
    %cst_522 = arith.constant dense<0.000000e+00> : vector<16x8xf32>
    %767 = tpu.matmul %501, %766, %cst_522 {dimension_numbers = #tpu.dot_dimension_numbers<[1], [0], [0], [1], [0, 0, 1, 1], [], []>} : vector<16x32xf32>, vector<32x8xf32>, vector<16x8xf32> -> vector<16x8xf32>
    %c1_523 = arith.constant 1 : index
    %c0_524 = arith.constant 0 : index
    %c0_525 = arith.constant 0 : index
    %768 = vector.load %arg34[%c1_523, %c0_524, %c0_525] : memref<8x1x8xf32, #tpu.memory_space<vmem>>, vector<1x1x8xf32>
    %769 = vector.shape_cast %768 : vector<1x1x8xf32> to vector<1x8xf32>
    %770 = vector.broadcast %769 : vector<1x8xf32> to vector<16x8xf32>
    %771 = arith.addf %767, %770 : vector<16x8xf32>
    %cst_526 = arith.constant dense<0.000000e+00> : vector<16x16xf32>
    %772 = tpu.matmul %757, %764, %cst_526 {dimension_numbers = #tpu.dot_dimension_numbers<[1], [1], [0], [0], [0, 0, 1, 0], [], []>} : vector<16x8xf32>, vector<16x8xf32>, vector<16x16xf32> -> vector<16x16xf32>
    %773 = arith.addf %772, %0 : vector<16x16xf32>
    %cst_527 = arith.constant dense<0xFF800000> : vector<16xf32>
    %774 = vector.multi_reduction <maximumf>, %773, %cst_527 [1] : vector<16x16xf32> to vector<16xf32>
    %775 = vector.shape_cast %774 : vector<16xf32> to vector<16x1xf32>
    %776 = vector.broadcast %775 : vector<16x1xf32> to vector<16x16xf32>
    %777 = arith.subf %773, %776 : vector<16x16xf32>
    %778 = math.exp %777 : vector<16x16xf32>
    %cst_528 = arith.constant dense<0.000000e+00> : vector<16xf32>
    %779 = vector.multi_reduction <add>, %778, %cst_528 [1] : vector<16x16xf32> to vector<16xf32>
    %780 = vector.shape_cast %779 : vector<16xf32> to vector<16x1xf32>
    %781 = tpu.reciprocal %780 {approx = true} : vector<16x1xf32> -> vector<16x1xf32>
    %782 = vector.broadcast %781 : vector<16x1xf32> to vector<16x16xf32>
    %783 = arith.mulf %778, %782 : vector<16x16xf32>
    %cst_529 = arith.constant dense<0.000000e+00> : vector<16x8xf32>
    %784 = tpu.matmul %783, %771, %cst_529 {dimension_numbers = #tpu.dot_dimension_numbers<[1], [0], [0], [1], [0, 0, 1, 1], [], []>} : vector<16x16xf32>, vector<16x8xf32>, vector<16x8xf32> -> vector<16x8xf32>
    %c1_530 = arith.constant 1 : index
    %c0_531 = arith.constant 0 : index
    %c0_532 = arith.constant 0 : index
    %785 = vector.load %arg35[%c1_530, %c0_531, %c0_532] : memref<8x8x32xf32, #tpu.memory_space<vmem>>, vector<1x8x32xf32>
    %786 = vector.shape_cast %785 : vector<1x8x32xf32> to vector<8x32xf32>
    %cst_533 = arith.constant dense<0.000000e+00> : vector<16x32xf32>
    %787 = tpu.matmul %784, %786, %cst_533 {dimension_numbers = #tpu.dot_dimension_numbers<[1], [0], [0], [1], [0, 0, 1, 1], [], []>} : vector<16x8xf32>, vector<8x32xf32>, vector<16x32xf32> -> vector<16x32xf32>
    %788 = arith.addf %750, %787 : vector<16x32xf32>
    %c2_534 = arith.constant 2 : index
    %c0_535 = arith.constant 0 : index
    %c0_536 = arith.constant 0 : index
    %789 = vector.load %arg29[%c2_534, %c0_535, %c0_536] : memref<8x32x8xf32, #tpu.memory_space<vmem>>, vector<1x32x8xf32>
    %790 = vector.shape_cast %789 : vector<1x32x8xf32> to vector<32x8xf32>
    %cst_537 = arith.constant dense<0.000000e+00> : vector<16x8xf32>
    %791 = tpu.matmul %711, %790, %cst_537 {dimension_numbers = #tpu.dot_dimension_numbers<[1], [0], [0], [1], [0, 0, 1, 1], [], []>} : vector<16x32xf32>, vector<32x8xf32>, vector<16x8xf32> -> vector<16x8xf32>
    %c2_538 = arith.constant 2 : index
    %c0_539 = arith.constant 0 : index
    %c0_540 = arith.constant 0 : index
    %792 = vector.load %arg30[%c2_538, %c0_539, %c0_540] : memref<8x1x8xf32, #tpu.memory_space<vmem>>, vector<1x1x8xf32>
    %793 = vector.shape_cast %792 : vector<1x1x8xf32> to vector<1x8xf32>
    %794 = vector.broadcast %793 : vector<1x8xf32> to vector<16x8xf32>
    %795 = arith.addf %791, %794 : vector<16x8xf32>
    %c2_541 = arith.constant 2 : index
    %c0_542 = arith.constant 0 : index
    %c0_543 = arith.constant 0 : index
    %796 = vector.load %arg31[%c2_541, %c0_542, %c0_543] : memref<8x32x8xf32, #tpu.memory_space<vmem>>, vector<1x32x8xf32>
    %797 = vector.shape_cast %796 : vector<1x32x8xf32> to vector<32x8xf32>
    %cst_544 = arith.constant dense<0.000000e+00> : vector<16x8xf32>
    %798 = tpu.matmul %501, %797, %cst_544 {dimension_numbers = #tpu.dot_dimension_numbers<[1], [0], [0], [1], [0, 0, 1, 1], [], []>} : vector<16x32xf32>, vector<32x8xf32>, vector<16x8xf32> -> vector<16x8xf32>
    %c2_545 = arith.constant 2 : index
    %c0_546 = arith.constant 0 : index
    %c0_547 = arith.constant 0 : index
    %799 = vector.load %arg32[%c2_545, %c0_546, %c0_547] : memref<8x1x8xf32, #tpu.memory_space<vmem>>, vector<1x1x8xf32>
    %800 = vector.shape_cast %799 : vector<1x1x8xf32> to vector<1x8xf32>
    %801 = vector.broadcast %800 : vector<1x8xf32> to vector<16x8xf32>
    %802 = arith.addf %798, %801 : vector<16x8xf32>
    %c2_548 = arith.constant 2 : index
    %c0_549 = arith.constant 0 : index
    %c0_550 = arith.constant 0 : index
    %803 = vector.load %arg33[%c2_548, %c0_549, %c0_550] : memref<8x32x8xf32, #tpu.memory_space<vmem>>, vector<1x32x8xf32>
    %804 = vector.shape_cast %803 : vector<1x32x8xf32> to vector<32x8xf32>
    %cst_551 = arith.constant dense<0.000000e+00> : vector<16x8xf32>
    %805 = tpu.matmul %501, %804, %cst_551 {dimension_numbers = #tpu.dot_dimension_numbers<[1], [0], [0], [1], [0, 0, 1, 1], [], []>} : vector<16x32xf32>, vector<32x8xf32>, vector<16x8xf32> -> vector<16x8xf32>
    %c2_552 = arith.constant 2 : index
    %c0_553 = arith.constant 0 : index
    %c0_554 = arith.constant 0 : index
    %806 = vector.load %arg34[%c2_552, %c0_553, %c0_554] : memref<8x1x8xf32, #tpu.memory_space<vmem>>, vector<1x1x8xf32>
    %807 = vector.shape_cast %806 : vector<1x1x8xf32> to vector<1x8xf32>
    %808 = vector.broadcast %807 : vector<1x8xf32> to vector<16x8xf32>
    %809 = arith.addf %805, %808 : vector<16x8xf32>
    %cst_555 = arith.constant dense<0.000000e+00> : vector<16x16xf32>
    %810 = tpu.matmul %795, %802, %cst_555 {dimension_numbers = #tpu.dot_dimension_numbers<[1], [1], [0], [0], [0, 0, 1, 0], [], []>} : vector<16x8xf32>, vector<16x8xf32>, vector<16x16xf32> -> vector<16x16xf32>
    %811 = arith.addf %810, %0 : vector<16x16xf32>
    %cst_556 = arith.constant dense<0xFF800000> : vector<16xf32>
    %812 = vector.multi_reduction <maximumf>, %811, %cst_556 [1] : vector<16x16xf32> to vector<16xf32>
    %813 = vector.shape_cast %812 : vector<16xf32> to vector<16x1xf32>
    %814 = vector.broadcast %813 : vector<16x1xf32> to vector<16x16xf32>
    %815 = arith.subf %811, %814 : vector<16x16xf32>
    %816 = math.exp %815 : vector<16x16xf32>
    %cst_557 = arith.constant dense<0.000000e+00> : vector<16xf32>
    %817 = vector.multi_reduction <add>, %816, %cst_557 [1] : vector<16x16xf32> to vector<16xf32>
    %818 = vector.shape_cast %817 : vector<16xf32> to vector<16x1xf32>
    %819 = tpu.reciprocal %818 {approx = true} : vector<16x1xf32> -> vector<16x1xf32>
    %820 = vector.broadcast %819 : vector<16x1xf32> to vector<16x16xf32>
    %821 = arith.mulf %816, %820 : vector<16x16xf32>
    %cst_558 = arith.constant dense<0.000000e+00> : vector<16x8xf32>
    %822 = tpu.matmul %821, %809, %cst_558 {dimension_numbers = #tpu.dot_dimension_numbers<[1], [0], [0], [1], [0, 0, 1, 1], [], []>} : vector<16x16xf32>, vector<16x8xf32>, vector<16x8xf32> -> vector<16x8xf32>
    %c2_559 = arith.constant 2 : index
    %c0_560 = arith.constant 0 : index
    %c0_561 = arith.constant 0 : index
    %823 = vector.load %arg35[%c2_559, %c0_560, %c0_561] : memref<8x8x32xf32, #tpu.memory_space<vmem>>, vector<1x8x32xf32>
    %824 = vector.shape_cast %823 : vector<1x8x32xf32> to vector<8x32xf32>
    %cst_562 = arith.constant dense<0.000000e+00> : vector<16x32xf32>
    %825 = tpu.matmul %822, %824, %cst_562 {dimension_numbers = #tpu.dot_dimension_numbers<[1], [0], [0], [1], [0, 0, 1, 1], [], []>} : vector<16x8xf32>, vector<8x32xf32>, vector<16x32xf32> -> vector<16x32xf32>
    %826 = arith.addf %788, %825 : vector<16x32xf32>
    %c3_563 = arith.constant 3 : index
    %c0_564 = arith.constant 0 : index
    %c0_565 = arith.constant 0 : index
    %827 = vector.load %arg29[%c3_563, %c0_564, %c0_565] : memref<8x32x8xf32, #tpu.memory_space<vmem>>, vector<1x32x8xf32>
    %828 = vector.shape_cast %827 : vector<1x32x8xf32> to vector<32x8xf32>
    %cst_566 = arith.constant dense<0.000000e+00> : vector<16x8xf32>
    %829 = tpu.matmul %711, %828, %cst_566 {dimension_numbers = #tpu.dot_dimension_numbers<[1], [0], [0], [1], [0, 0, 1, 1], [], []>} : vector<16x32xf32>, vector<32x8xf32>, vector<16x8xf32> -> vector<16x8xf32>
    %c3_567 = arith.constant 3 : index
    %c0_568 = arith.constant 0 : index
    %c0_569 = arith.constant 0 : index
    %830 = vector.load %arg30[%c3_567, %c0_568, %c0_569] : memref<8x1x8xf32, #tpu.memory_space<vmem>>, vector<1x1x8xf32>
    %831 = vector.shape_cast %830 : vector<1x1x8xf32> to vector<1x8xf32>
    %832 = vector.broadcast %831 : vector<1x8xf32> to vector<16x8xf32>
    %833 = arith.addf %829, %832 : vector<16x8xf32>
    %c3_570 = arith.constant 3 : index
    %c0_571 = arith.constant 0 : index
    %c0_572 = arith.constant 0 : index
    %834 = vector.load %arg31[%c3_570, %c0_571, %c0_572] : memref<8x32x8xf32, #tpu.memory_space<vmem>>, vector<1x32x8xf32>
    %835 = vector.shape_cast %834 : vector<1x32x8xf32> to vector<32x8xf32>
    %cst_573 = arith.constant dense<0.000000e+00> : vector<16x8xf32>
    %836 = tpu.matmul %501, %835, %cst_573 {dimension_numbers = #tpu.dot_dimension_numbers<[1], [0], [0], [1], [0, 0, 1, 1], [], []>} : vector<16x32xf32>, vector<32x8xf32>, vector<16x8xf32> -> vector<16x8xf32>
    %c3_574 = arith.constant 3 : index
    %c0_575 = arith.constant 0 : index
    %c0_576 = arith.constant 0 : index
    %837 = vector.load %arg32[%c3_574, %c0_575, %c0_576] : memref<8x1x8xf32, #tpu.memory_space<vmem>>, vector<1x1x8xf32>
    %838 = vector.shape_cast %837 : vector<1x1x8xf32> to vector<1x8xf32>
    %839 = vector.broadcast %838 : vector<1x8xf32> to vector<16x8xf32>
    %840 = arith.addf %836, %839 : vector<16x8xf32>
    %c3_577 = arith.constant 3 : index
    %c0_578 = arith.constant 0 : index
    %c0_579 = arith.constant 0 : index
    %841 = vector.load %arg33[%c3_577, %c0_578, %c0_579] : memref<8x32x8xf32, #tpu.memory_space<vmem>>, vector<1x32x8xf32>
    %842 = vector.shape_cast %841 : vector<1x32x8xf32> to vector<32x8xf32>
    %cst_580 = arith.constant dense<0.000000e+00> : vector<16x8xf32>
    %843 = tpu.matmul %501, %842, %cst_580 {dimension_numbers = #tpu.dot_dimension_numbers<[1], [0], [0], [1], [0, 0, 1, 1], [], []>} : vector<16x32xf32>, vector<32x8xf32>, vector<16x8xf32> -> vector<16x8xf32>
    %c3_581 = arith.constant 3 : index
    %c0_582 = arith.constant 0 : index
    %c0_583 = arith.constant 0 : index
    %844 = vector.load %arg34[%c3_581, %c0_582, %c0_583] : memref<8x1x8xf32, #tpu.memory_space<vmem>>, vector<1x1x8xf32>
    %845 = vector.shape_cast %844 : vector<1x1x8xf32> to vector<1x8xf32>
    %846 = vector.broadcast %845 : vector<1x8xf32> to vector<16x8xf32>
    %847 = arith.addf %843, %846 : vector<16x8xf32>
    %cst_584 = arith.constant dense<0.000000e+00> : vector<16x16xf32>
    %848 = tpu.matmul %833, %840, %cst_584 {dimension_numbers = #tpu.dot_dimension_numbers<[1], [1], [0], [0], [0, 0, 1, 0], [], []>} : vector<16x8xf32>, vector<16x8xf32>, vector<16x16xf32> -> vector<16x16xf32>
    %849 = arith.addf %848, %0 : vector<16x16xf32>
    %cst_585 = arith.constant dense<0xFF800000> : vector<16xf32>
    %850 = vector.multi_reduction <maximumf>, %849, %cst_585 [1] : vector<16x16xf32> to vector<16xf32>
    %851 = vector.shape_cast %850 : vector<16xf32> to vector<16x1xf32>
    %852 = vector.broadcast %851 : vector<16x1xf32> to vector<16x16xf32>
    %853 = arith.subf %849, %852 : vector<16x16xf32>
    %854 = math.exp %853 : vector<16x16xf32>
    %cst_586 = arith.constant dense<0.000000e+00> : vector<16xf32>
    %855 = vector.multi_reduction <add>, %854, %cst_586 [1] : vector<16x16xf32> to vector<16xf32>
    %856 = vector.shape_cast %855 : vector<16xf32> to vector<16x1xf32>
    %857 = tpu.reciprocal %856 {approx = true} : vector<16x1xf32> -> vector<16x1xf32>
    %858 = vector.broadcast %857 : vector<16x1xf32> to vector<16x16xf32>
    %859 = arith.mulf %854, %858 : vector<16x16xf32>
    %cst_587 = arith.constant dense<0.000000e+00> : vector<16x8xf32>
    %860 = tpu.matmul %859, %847, %cst_587 {dimension_numbers = #tpu.dot_dimension_numbers<[1], [0], [0], [1], [0, 0, 1, 1], [], []>} : vector<16x16xf32>, vector<16x8xf32>, vector<16x8xf32> -> vector<16x8xf32>
    %c3_588 = arith.constant 3 : index
    %c0_589 = arith.constant 0 : index
    %c0_590 = arith.constant 0 : index
    %861 = vector.load %arg35[%c3_588, %c0_589, %c0_590] : memref<8x8x32xf32, #tpu.memory_space<vmem>>, vector<1x8x32xf32>
    %862 = vector.shape_cast %861 : vector<1x8x32xf32> to vector<8x32xf32>
    %cst_591 = arith.constant dense<0.000000e+00> : vector<16x32xf32>
    %863 = tpu.matmul %860, %862, %cst_591 {dimension_numbers = #tpu.dot_dimension_numbers<[1], [0], [0], [1], [0, 0, 1, 1], [], []>} : vector<16x8xf32>, vector<8x32xf32>, vector<16x32xf32> -> vector<16x32xf32>
    %864 = arith.addf %826, %863 : vector<16x32xf32>
    %865 = vector.broadcast %713 : vector<1x32xf32> to vector<16x32xf32>
    %866 = arith.addf %864, %865 : vector<16x32xf32>
    %867 = arith.addf %684, %866 : vector<16x32xf32>
    %c2_592 = arith.constant 2 : index
    %c0_593 = arith.constant 0 : index
    %c0_594 = arith.constant 0 : index
    %868 = vector.load %arg41[%c2_592, %c0_593, %c0_594] : memref<6x1x32xf32, #tpu.memory_space<vmem>>, vector<1x1x32xf32>
    %869 = vector.shape_cast %868 : vector<1x1x32xf32> to vector<1x32xf32>
    %c2_595 = arith.constant 2 : index
    %c0_596 = arith.constant 0 : index
    %c0_597 = arith.constant 0 : index
    %870 = vector.load %arg42[%c2_595, %c0_596, %c0_597] : memref<6x1x32xf32, #tpu.memory_space<vmem>>, vector<1x1x32xf32>
    %871 = vector.shape_cast %870 : vector<1x1x32xf32> to vector<1x32xf32>
    %cst_598 = arith.constant dense<0.000000e+00> : vector<16xf32>
    %872 = vector.multi_reduction <add>, %867, %cst_598 [1] : vector<16x32xf32> to vector<16xf32>
    %873 = vector.shape_cast %872 : vector<16xf32> to vector<16x1xf32>
    %cst_599 = arith.constant 3.200000e+01 : f32
    %874 = vector.broadcast %cst_599 : f32 to vector<16x1xf32>
    %875 = arith.divf %873, %874 : vector<16x1xf32>
    %876 = vector.broadcast %875 : vector<16x1xf32> to vector<16x32xf32>
    %877 = arith.subf %867, %876 : vector<16x32xf32>
    %878 = arith.mulf %877, %877 : vector<16x32xf32>
    %cst_600 = arith.constant dense<0.000000e+00> : vector<16xf32>
    %879 = vector.multi_reduction <add>, %878, %cst_600 [1] : vector<16x32xf32> to vector<16xf32>
    %880 = vector.shape_cast %879 : vector<16xf32> to vector<16x1xf32>
    %cst_601 = arith.constant 0.0322580636 : f32
    %881 = vector.broadcast %cst_601 : f32 to vector<16x1xf32>
    %882 = arith.mulf %880, %881 : vector<16x1xf32>
    %883 = math.sqrt %882 : vector<16x1xf32>
    %cst_602 = arith.constant 9.99999997E-7 : f32
    %884 = vector.broadcast %cst_602 : f32 to vector<16x1xf32>
    %885 = arith.addf %883, %884 : vector<16x1xf32>
    %886 = tpu.reciprocal %885 {approx = true} : vector<16x1xf32> -> vector<16x1xf32>
    %887 = vector.broadcast %875 : vector<16x1xf32> to vector<16x32xf32>
    %888 = arith.subf %867, %887 : vector<16x32xf32>
    %889 = vector.broadcast %869 : vector<1x32xf32> to vector<16x32xf32>
    %890 = arith.mulf %889, %888 : vector<16x32xf32>
    %891 = vector.broadcast %886 : vector<16x1xf32> to vector<16x32xf32>
    %892 = arith.mulf %890, %891 : vector<16x32xf32>
    %893 = vector.broadcast %871 : vector<1x32xf32> to vector<16x32xf32>
    %894 = arith.addf %892, %893 : vector<16x32xf32>
    %c0_603 = arith.constant 0 : index
    %c0_604 = arith.constant 0 : index
    %c0_605 = arith.constant 0 : index
    %895 = vector.load %arg37[%c0_603, %c0_604, %c0_605] : memref<2x32x64xf32, #tpu.memory_space<vmem>>, vector<1x32x64xf32>
    %896 = vector.shape_cast %895 : vector<1x32x64xf32> to vector<32x64xf32>
    %c0_606 = arith.constant 0 : index
    %c0_607 = arith.constant 0 : index
    %c0_608 = arith.constant 0 : index
    %897 = vector.load %arg38[%c0_606, %c0_607, %c0_608] : memref<2x1x64xf32, #tpu.memory_space<vmem>>, vector<1x1x64xf32>
    %898 = vector.shape_cast %897 : vector<1x1x64xf32> to vector<1x64xf32>
    %c0_609 = arith.constant 0 : index
    %c0_610 = arith.constant 0 : index
    %c0_611 = arith.constant 0 : index
    %899 = vector.load %arg39[%c0_609, %c0_610, %c0_611] : memref<2x64x32xf32, #tpu.memory_space<vmem>>, vector<1x64x32xf32>
    %900 = vector.shape_cast %899 : vector<1x64x32xf32> to vector<64x32xf32>
    %c0_612 = arith.constant 0 : index
    %c0_613 = arith.constant 0 : index
    %c0_614 = arith.constant 0 : index
    %901 = vector.load %arg40[%c0_612, %c0_613, %c0_614] : memref<2x1x32xf32, #tpu.memory_space<vmem>>, vector<1x1x32xf32>
    %902 = vector.shape_cast %901 : vector<1x1x32xf32> to vector<1x32xf32>
    %cst_615 = arith.constant dense<0.000000e+00> : vector<16x64xf32>
    %903 = tpu.matmul %894, %896, %cst_615 {dimension_numbers = #tpu.dot_dimension_numbers<[1], [0], [0], [1], [0, 0, 1, 1], [], []>} : vector<16x32xf32>, vector<32x64xf32>, vector<16x64xf32> -> vector<16x64xf32>
    %904 = vector.broadcast %898 : vector<1x64xf32> to vector<16x64xf32>
    %905 = arith.addf %903, %904 : vector<16x64xf32>
    %cst_616 = arith.constant 0.000000e+00 : f32
    %906 = vector.broadcast %cst_616 : f32 to vector<16x64xf32>
    %907 = arith.maximumf %905, %906 : vector<16x64xf32>
    %cst_617 = arith.constant dense<0.000000e+00> : vector<16x32xf32>
    %908 = tpu.matmul %907, %900, %cst_617 {dimension_numbers = #tpu.dot_dimension_numbers<[1], [0], [0], [1], [0, 0, 1, 1], [], []>} : vector<16x64xf32>, vector<64x32xf32>, vector<16x32xf32> -> vector<16x32xf32>
    %909 = vector.broadcast %902 : vector<1x32xf32> to vector<16x32xf32>
    %910 = arith.addf %908, %909 : vector<16x32xf32>
    %911 = arith.addf %867, %910 : vector<16x32xf32>
    %c3_618 = arith.constant 3 : index
    %c0_619 = arith.constant 0 : index
    %c0_620 = arith.constant 0 : index
    %912 = vector.load %arg41[%c3_618, %c0_619, %c0_620] : memref<6x1x32xf32, #tpu.memory_space<vmem>>, vector<1x1x32xf32>
    %913 = vector.shape_cast %912 : vector<1x1x32xf32> to vector<1x32xf32>
    %c3_621 = arith.constant 3 : index
    %c0_622 = arith.constant 0 : index
    %c0_623 = arith.constant 0 : index
    %914 = vector.load %arg42[%c3_621, %c0_622, %c0_623] : memref<6x1x32xf32, #tpu.memory_space<vmem>>, vector<1x1x32xf32>
    %915 = vector.shape_cast %914 : vector<1x1x32xf32> to vector<1x32xf32>
    %cst_624 = arith.constant dense<0.000000e+00> : vector<16xf32>
    %916 = vector.multi_reduction <add>, %911, %cst_624 [1] : vector<16x32xf32> to vector<16xf32>
    %917 = vector.shape_cast %916 : vector<16xf32> to vector<16x1xf32>
    %cst_625 = arith.constant 3.200000e+01 : f32
    %918 = vector.broadcast %cst_625 : f32 to vector<16x1xf32>
    %919 = arith.divf %917, %918 : vector<16x1xf32>
    %920 = vector.broadcast %919 : vector<16x1xf32> to vector<16x32xf32>
    %921 = arith.subf %911, %920 : vector<16x32xf32>
    %922 = arith.mulf %921, %921 : vector<16x32xf32>
    %cst_626 = arith.constant dense<0.000000e+00> : vector<16xf32>
    %923 = vector.multi_reduction <add>, %922, %cst_626 [1] : vector<16x32xf32> to vector<16xf32>
    %924 = vector.shape_cast %923 : vector<16xf32> to vector<16x1xf32>
    %cst_627 = arith.constant 0.0322580636 : f32
    %925 = vector.broadcast %cst_627 : f32 to vector<16x1xf32>
    %926 = arith.mulf %924, %925 : vector<16x1xf32>
    %927 = math.sqrt %926 : vector<16x1xf32>
    %cst_628 = arith.constant 9.99999997E-7 : f32
    %928 = vector.broadcast %cst_628 : f32 to vector<16x1xf32>
    %929 = arith.addf %927, %928 : vector<16x1xf32>
    %930 = tpu.reciprocal %929 {approx = true} : vector<16x1xf32> -> vector<16x1xf32>
    %931 = vector.broadcast %919 : vector<16x1xf32> to vector<16x32xf32>
    %932 = arith.subf %911, %931 : vector<16x32xf32>
    %933 = vector.broadcast %913 : vector<1x32xf32> to vector<16x32xf32>
    %934 = arith.mulf %933, %932 : vector<16x32xf32>
    %935 = vector.broadcast %930 : vector<16x1xf32> to vector<16x32xf32>
    %936 = arith.mulf %934, %935 : vector<16x32xf32>
    %937 = vector.broadcast %915 : vector<1x32xf32> to vector<16x32xf32>
    %938 = arith.addf %936, %937 : vector<16x32xf32>
    %c1_629 = arith.constant 1 : index
    %c0_630 = arith.constant 0 : index
    %c0_631 = arith.constant 0 : index
    %939 = vector.load %arg28[%c1_629, %c0_630, %c0_631] : memref<2x1x32xf32, #tpu.memory_space<vmem>>, vector<1x1x32xf32>
    %940 = vector.shape_cast %939 : vector<1x1x32xf32> to vector<1x32xf32>
    %c4_632 = arith.constant 4 : index
    %c0_633 = arith.constant 0 : index
    %c0_634 = arith.constant 0 : index
    %941 = vector.load %arg21[%c4_632, %c0_633, %c0_634] : memref<8x32x8xf32, #tpu.memory_space<vmem>>, vector<1x32x8xf32>
    %942 = vector.shape_cast %941 : vector<1x32x8xf32> to vector<32x8xf32>
    %cst_635 = arith.constant dense<0.000000e+00> : vector<16x8xf32>
    %943 = tpu.matmul %938, %942, %cst_635 {dimension_numbers = #tpu.dot_dimension_numbers<[1], [0], [0], [1], [0, 0, 1, 1], [], []>} : vector<16x32xf32>, vector<32x8xf32>, vector<16x8xf32> -> vector<16x8xf32>
    %c4_636 = arith.constant 4 : index
    %c0_637 = arith.constant 0 : index
    %c0_638 = arith.constant 0 : index
    %944 = vector.load %arg22[%c4_636, %c0_637, %c0_638] : memref<8x1x8xf32, #tpu.memory_space<vmem>>, vector<1x1x8xf32>
    %945 = vector.shape_cast %944 : vector<1x1x8xf32> to vector<1x8xf32>
    %946 = vector.broadcast %945 : vector<1x8xf32> to vector<16x8xf32>
    %947 = arith.addf %943, %946 : vector<16x8xf32>
    %c4_639 = arith.constant 4 : index
    %c0_640 = arith.constant 0 : index
    %c0_641 = arith.constant 0 : index
    %948 = vector.load %arg23[%c4_639, %c0_640, %c0_641] : memref<8x32x8xf32, #tpu.memory_space<vmem>>, vector<1x32x8xf32>
    %949 = vector.shape_cast %948 : vector<1x32x8xf32> to vector<32x8xf32>
    %cst_642 = arith.constant dense<0.000000e+00> : vector<16x8xf32>
    %950 = tpu.matmul %938, %949, %cst_642 {dimension_numbers = #tpu.dot_dimension_numbers<[1], [0], [0], [1], [0, 0, 1, 1], [], []>} : vector<16x32xf32>, vector<32x8xf32>, vector<16x8xf32> -> vector<16x8xf32>
    %c4_643 = arith.constant 4 : index
    %c0_644 = arith.constant 0 : index
    %c0_645 = arith.constant 0 : index
    %951 = vector.load %arg24[%c4_643, %c0_644, %c0_645] : memref<8x1x8xf32, #tpu.memory_space<vmem>>, vector<1x1x8xf32>
    %952 = vector.shape_cast %951 : vector<1x1x8xf32> to vector<1x8xf32>
    %953 = vector.broadcast %952 : vector<1x8xf32> to vector<16x8xf32>
    %954 = arith.addf %950, %953 : vector<16x8xf32>
    %c4_646 = arith.constant 4 : index
    %c0_647 = arith.constant 0 : index
    %c0_648 = arith.constant 0 : index
    %955 = vector.load %arg25[%c4_646, %c0_647, %c0_648] : memref<8x32x8xf32, #tpu.memory_space<vmem>>, vector<1x32x8xf32>
    %956 = vector.shape_cast %955 : vector<1x32x8xf32> to vector<32x8xf32>
    %cst_649 = arith.constant dense<0.000000e+00> : vector<16x8xf32>
    %957 = tpu.matmul %938, %956, %cst_649 {dimension_numbers = #tpu.dot_dimension_numbers<[1], [0], [0], [1], [0, 0, 1, 1], [], []>} : vector<16x32xf32>, vector<32x8xf32>, vector<16x8xf32> -> vector<16x8xf32>
    %c4_650 = arith.constant 4 : index
    %c0_651 = arith.constant 0 : index
    %c0_652 = arith.constant 0 : index
    %958 = vector.load %arg26[%c4_650, %c0_651, %c0_652] : memref<8x1x8xf32, #tpu.memory_space<vmem>>, vector<1x1x8xf32>
    %959 = vector.shape_cast %958 : vector<1x1x8xf32> to vector<1x8xf32>
    %960 = vector.broadcast %959 : vector<1x8xf32> to vector<16x8xf32>
    %961 = arith.addf %957, %960 : vector<16x8xf32>
    %cst_653 = arith.constant dense<0.000000e+00> : vector<16x16xf32>
    %962 = tpu.matmul %947, %954, %cst_653 {dimension_numbers = #tpu.dot_dimension_numbers<[1], [1], [0], [0], [0, 0, 1, 0], [], []>} : vector<16x8xf32>, vector<16x8xf32>, vector<16x16xf32> -> vector<16x16xf32>
    %963 = arith.addf %962, %1 : vector<16x16xf32>
    %cst_654 = arith.constant dense<0xFF800000> : vector<16xf32>
    %964 = vector.multi_reduction <maximumf>, %963, %cst_654 [1] : vector<16x16xf32> to vector<16xf32>
    %965 = vector.shape_cast %964 : vector<16xf32> to vector<16x1xf32>
    %966 = vector.broadcast %965 : vector<16x1xf32> to vector<16x16xf32>
    %967 = arith.subf %963, %966 : vector<16x16xf32>
    %968 = math.exp %967 : vector<16x16xf32>
    %cst_655 = arith.constant dense<0.000000e+00> : vector<16xf32>
    %969 = vector.multi_reduction <add>, %968, %cst_655 [1] : vector<16x16xf32> to vector<16xf32>
    %970 = vector.shape_cast %969 : vector<16xf32> to vector<16x1xf32>
    %971 = tpu.reciprocal %970 {approx = true} : vector<16x1xf32> -> vector<16x1xf32>
    %972 = vector.broadcast %971 : vector<16x1xf32> to vector<16x16xf32>
    %973 = arith.mulf %968, %972 : vector<16x16xf32>
    %cst_656 = arith.constant dense<0.000000e+00> : vector<16x8xf32>
    %974 = tpu.matmul %973, %961, %cst_656 {dimension_numbers = #tpu.dot_dimension_numbers<[1], [0], [0], [1], [0, 0, 1, 1], [], []>} : vector<16x16xf32>, vector<16x8xf32>, vector<16x8xf32> -> vector<16x8xf32>
    %c4_657 = arith.constant 4 : index
    %c0_658 = arith.constant 0 : index
    %c0_659 = arith.constant 0 : index
    %975 = vector.load %arg27[%c4_657, %c0_658, %c0_659] : memref<8x8x32xf32, #tpu.memory_space<vmem>>, vector<1x8x32xf32>
    %976 = vector.shape_cast %975 : vector<1x8x32xf32> to vector<8x32xf32>
    %cst_660 = arith.constant dense<0.000000e+00> : vector<16x32xf32>
    %977 = tpu.matmul %974, %976, %cst_660 {dimension_numbers = #tpu.dot_dimension_numbers<[1], [0], [0], [1], [0, 0, 1, 1], [], []>} : vector<16x8xf32>, vector<8x32xf32>, vector<16x32xf32> -> vector<16x32xf32>
    %c5_661 = arith.constant 5 : index
    %c0_662 = arith.constant 0 : index
    %c0_663 = arith.constant 0 : index
    %978 = vector.load %arg21[%c5_661, %c0_662, %c0_663] : memref<8x32x8xf32, #tpu.memory_space<vmem>>, vector<1x32x8xf32>
    %979 = vector.shape_cast %978 : vector<1x32x8xf32> to vector<32x8xf32>
    %cst_664 = arith.constant dense<0.000000e+00> : vector<16x8xf32>
    %980 = tpu.matmul %938, %979, %cst_664 {dimension_numbers = #tpu.dot_dimension_numbers<[1], [0], [0], [1], [0, 0, 1, 1], [], []>} : vector<16x32xf32>, vector<32x8xf32>, vector<16x8xf32> -> vector<16x8xf32>
    %c5_665 = arith.constant 5 : index
    %c0_666 = arith.constant 0 : index
    %c0_667 = arith.constant 0 : index
    %981 = vector.load %arg22[%c5_665, %c0_666, %c0_667] : memref<8x1x8xf32, #tpu.memory_space<vmem>>, vector<1x1x8xf32>
    %982 = vector.shape_cast %981 : vector<1x1x8xf32> to vector<1x8xf32>
    %983 = vector.broadcast %982 : vector<1x8xf32> to vector<16x8xf32>
    %984 = arith.addf %980, %983 : vector<16x8xf32>
    %c5_668 = arith.constant 5 : index
    %c0_669 = arith.constant 0 : index
    %c0_670 = arith.constant 0 : index
    %985 = vector.load %arg23[%c5_668, %c0_669, %c0_670] : memref<8x32x8xf32, #tpu.memory_space<vmem>>, vector<1x32x8xf32>
    %986 = vector.shape_cast %985 : vector<1x32x8xf32> to vector<32x8xf32>
    %cst_671 = arith.constant dense<0.000000e+00> : vector<16x8xf32>
    %987 = tpu.matmul %938, %986, %cst_671 {dimension_numbers = #tpu.dot_dimension_numbers<[1], [0], [0], [1], [0, 0, 1, 1], [], []>} : vector<16x32xf32>, vector<32x8xf32>, vector<16x8xf32> -> vector<16x8xf32>
    %c5_672 = arith.constant 5 : index
    %c0_673 = arith.constant 0 : index
    %c0_674 = arith.constant 0 : index
    %988 = vector.load %arg24[%c5_672, %c0_673, %c0_674] : memref<8x1x8xf32, #tpu.memory_space<vmem>>, vector<1x1x8xf32>
    %989 = vector.shape_cast %988 : vector<1x1x8xf32> to vector<1x8xf32>
    %990 = vector.broadcast %989 : vector<1x8xf32> to vector<16x8xf32>
    %991 = arith.addf %987, %990 : vector<16x8xf32>
    %c5_675 = arith.constant 5 : index
    %c0_676 = arith.constant 0 : index
    %c0_677 = arith.constant 0 : index
    %992 = vector.load %arg25[%c5_675, %c0_676, %c0_677] : memref<8x32x8xf32, #tpu.memory_space<vmem>>, vector<1x32x8xf32>
    %993 = vector.shape_cast %992 : vector<1x32x8xf32> to vector<32x8xf32>
    %cst_678 = arith.constant dense<0.000000e+00> : vector<16x8xf32>
    %994 = tpu.matmul %938, %993, %cst_678 {dimension_numbers = #tpu.dot_dimension_numbers<[1], [0], [0], [1], [0, 0, 1, 1], [], []>} : vector<16x32xf32>, vector<32x8xf32>, vector<16x8xf32> -> vector<16x8xf32>
    %c5_679 = arith.constant 5 : index
    %c0_680 = arith.constant 0 : index
    %c0_681 = arith.constant 0 : index
    %995 = vector.load %arg26[%c5_679, %c0_680, %c0_681] : memref<8x1x8xf32, #tpu.memory_space<vmem>>, vector<1x1x8xf32>
    %996 = vector.shape_cast %995 : vector<1x1x8xf32> to vector<1x8xf32>
    %997 = vector.broadcast %996 : vector<1x8xf32> to vector<16x8xf32>
    %998 = arith.addf %994, %997 : vector<16x8xf32>
    %cst_682 = arith.constant dense<0.000000e+00> : vector<16x16xf32>
    %999 = tpu.matmul %984, %991, %cst_682 {dimension_numbers = #tpu.dot_dimension_numbers<[1], [1], [0], [0], [0, 0, 1, 0], [], []>} : vector<16x8xf32>, vector<16x8xf32>, vector<16x16xf32> -> vector<16x16xf32>
    %1000 = arith.addf %999, %1 : vector<16x16xf32>
    %cst_683 = arith.constant dense<0xFF800000> : vector<16xf32>
    %1001 = vector.multi_reduction <maximumf>, %1000, %cst_683 [1] : vector<16x16xf32> to vector<16xf32>
    %1002 = vector.shape_cast %1001 : vector<16xf32> to vector<16x1xf32>
    %1003 = vector.broadcast %1002 : vector<16x1xf32> to vector<16x16xf32>
    %1004 = arith.subf %1000, %1003 : vector<16x16xf32>
    %1005 = math.exp %1004 : vector<16x16xf32>
    %cst_684 = arith.constant dense<0.000000e+00> : vector<16xf32>
    %1006 = vector.multi_reduction <add>, %1005, %cst_684 [1] : vector<16x16xf32> to vector<16xf32>
    %1007 = vector.shape_cast %1006 : vector<16xf32> to vector<16x1xf32>
    %1008 = tpu.reciprocal %1007 {approx = true} : vector<16x1xf32> -> vector<16x1xf32>
    %1009 = vector.broadcast %1008 : vector<16x1xf32> to vector<16x16xf32>
    %1010 = arith.mulf %1005, %1009 : vector<16x16xf32>
    %cst_685 = arith.constant dense<0.000000e+00> : vector<16x8xf32>
    %1011 = tpu.matmul %1010, %998, %cst_685 {dimension_numbers = #tpu.dot_dimension_numbers<[1], [0], [0], [1], [0, 0, 1, 1], [], []>} : vector<16x16xf32>, vector<16x8xf32>, vector<16x8xf32> -> vector<16x8xf32>
    %c5_686 = arith.constant 5 : index
    %c0_687 = arith.constant 0 : index
    %c0_688 = arith.constant 0 : index
    %1012 = vector.load %arg27[%c5_686, %c0_687, %c0_688] : memref<8x8x32xf32, #tpu.memory_space<vmem>>, vector<1x8x32xf32>
    %1013 = vector.shape_cast %1012 : vector<1x8x32xf32> to vector<8x32xf32>
    %cst_689 = arith.constant dense<0.000000e+00> : vector<16x32xf32>
    %1014 = tpu.matmul %1011, %1013, %cst_689 {dimension_numbers = #tpu.dot_dimension_numbers<[1], [0], [0], [1], [0, 0, 1, 1], [], []>} : vector<16x8xf32>, vector<8x32xf32>, vector<16x32xf32> -> vector<16x32xf32>
    %1015 = arith.addf %977, %1014 : vector<16x32xf32>
    %c6_690 = arith.constant 6 : index
    %c0_691 = arith.constant 0 : index
    %c0_692 = arith.constant 0 : index
    %1016 = vector.load %arg21[%c6_690, %c0_691, %c0_692] : memref<8x32x8xf32, #tpu.memory_space<vmem>>, vector<1x32x8xf32>
    %1017 = vector.shape_cast %1016 : vector<1x32x8xf32> to vector<32x8xf32>
    %cst_693 = arith.constant dense<0.000000e+00> : vector<16x8xf32>
    %1018 = tpu.matmul %938, %1017, %cst_693 {dimension_numbers = #tpu.dot_dimension_numbers<[1], [0], [0], [1], [0, 0, 1, 1], [], []>} : vector<16x32xf32>, vector<32x8xf32>, vector<16x8xf32> -> vector<16x8xf32>
    %c6_694 = arith.constant 6 : index
    %c0_695 = arith.constant 0 : index
    %c0_696 = arith.constant 0 : index
    %1019 = vector.load %arg22[%c6_694, %c0_695, %c0_696] : memref<8x1x8xf32, #tpu.memory_space<vmem>>, vector<1x1x8xf32>
    %1020 = vector.shape_cast %1019 : vector<1x1x8xf32> to vector<1x8xf32>
    %1021 = vector.broadcast %1020 : vector<1x8xf32> to vector<16x8xf32>
    %1022 = arith.addf %1018, %1021 : vector<16x8xf32>
    %c6_697 = arith.constant 6 : index
    %c0_698 = arith.constant 0 : index
    %c0_699 = arith.constant 0 : index
    %1023 = vector.load %arg23[%c6_697, %c0_698, %c0_699] : memref<8x32x8xf32, #tpu.memory_space<vmem>>, vector<1x32x8xf32>
    %1024 = vector.shape_cast %1023 : vector<1x32x8xf32> to vector<32x8xf32>
    %cst_700 = arith.constant dense<0.000000e+00> : vector<16x8xf32>
    %1025 = tpu.matmul %938, %1024, %cst_700 {dimension_numbers = #tpu.dot_dimension_numbers<[1], [0], [0], [1], [0, 0, 1, 1], [], []>} : vector<16x32xf32>, vector<32x8xf32>, vector<16x8xf32> -> vector<16x8xf32>
    %c6_701 = arith.constant 6 : index
    %c0_702 = arith.constant 0 : index
    %c0_703 = arith.constant 0 : index
    %1026 = vector.load %arg24[%c6_701, %c0_702, %c0_703] : memref<8x1x8xf32, #tpu.memory_space<vmem>>, vector<1x1x8xf32>
    %1027 = vector.shape_cast %1026 : vector<1x1x8xf32> to vector<1x8xf32>
    %1028 = vector.broadcast %1027 : vector<1x8xf32> to vector<16x8xf32>
    %1029 = arith.addf %1025, %1028 : vector<16x8xf32>
    %c6_704 = arith.constant 6 : index
    %c0_705 = arith.constant 0 : index
    %c0_706 = arith.constant 0 : index
    %1030 = vector.load %arg25[%c6_704, %c0_705, %c0_706] : memref<8x32x8xf32, #tpu.memory_space<vmem>>, vector<1x32x8xf32>
    %1031 = vector.shape_cast %1030 : vector<1x32x8xf32> to vector<32x8xf32>
    %cst_707 = arith.constant dense<0.000000e+00> : vector<16x8xf32>
    %1032 = tpu.matmul %938, %1031, %cst_707 {dimension_numbers = #tpu.dot_dimension_numbers<[1], [0], [0], [1], [0, 0, 1, 1], [], []>} : vector<16x32xf32>, vector<32x8xf32>, vector<16x8xf32> -> vector<16x8xf32>
    %c6_708 = arith.constant 6 : index
    %c0_709 = arith.constant 0 : index
    %c0_710 = arith.constant 0 : index
    %1033 = vector.load %arg26[%c6_708, %c0_709, %c0_710] : memref<8x1x8xf32, #tpu.memory_space<vmem>>, vector<1x1x8xf32>
    %1034 = vector.shape_cast %1033 : vector<1x1x8xf32> to vector<1x8xf32>
    %1035 = vector.broadcast %1034 : vector<1x8xf32> to vector<16x8xf32>
    %1036 = arith.addf %1032, %1035 : vector<16x8xf32>
    %cst_711 = arith.constant dense<0.000000e+00> : vector<16x16xf32>
    %1037 = tpu.matmul %1022, %1029, %cst_711 {dimension_numbers = #tpu.dot_dimension_numbers<[1], [1], [0], [0], [0, 0, 1, 0], [], []>} : vector<16x8xf32>, vector<16x8xf32>, vector<16x16xf32> -> vector<16x16xf32>
    %1038 = arith.addf %1037, %1 : vector<16x16xf32>
    %cst_712 = arith.constant dense<0xFF800000> : vector<16xf32>
    %1039 = vector.multi_reduction <maximumf>, %1038, %cst_712 [1] : vector<16x16xf32> to vector<16xf32>
    %1040 = vector.shape_cast %1039 : vector<16xf32> to vector<16x1xf32>
    %1041 = vector.broadcast %1040 : vector<16x1xf32> to vector<16x16xf32>
    %1042 = arith.subf %1038, %1041 : vector<16x16xf32>
    %1043 = math.exp %1042 : vector<16x16xf32>
    %cst_713 = arith.constant dense<0.000000e+00> : vector<16xf32>
    %1044 = vector.multi_reduction <add>, %1043, %cst_713 [1] : vector<16x16xf32> to vector<16xf32>
    %1045 = vector.shape_cast %1044 : vector<16xf32> to vector<16x1xf32>
    %1046 = tpu.reciprocal %1045 {approx = true} : vector<16x1xf32> -> vector<16x1xf32>
    %1047 = vector.broadcast %1046 : vector<16x1xf32> to vector<16x16xf32>
    %1048 = arith.mulf %1043, %1047 : vector<16x16xf32>
    %cst_714 = arith.constant dense<0.000000e+00> : vector<16x8xf32>
    %1049 = tpu.matmul %1048, %1036, %cst_714 {dimension_numbers = #tpu.dot_dimension_numbers<[1], [0], [0], [1], [0, 0, 1, 1], [], []>} : vector<16x16xf32>, vector<16x8xf32>, vector<16x8xf32> -> vector<16x8xf32>
    %c6_715 = arith.constant 6 : index
    %c0_716 = arith.constant 0 : index
    %c0_717 = arith.constant 0 : index
    %1050 = vector.load %arg27[%c6_715, %c0_716, %c0_717] : memref<8x8x32xf32, #tpu.memory_space<vmem>>, vector<1x8x32xf32>
    %1051 = vector.shape_cast %1050 : vector<1x8x32xf32> to vector<8x32xf32>
    %cst_718 = arith.constant dense<0.000000e+00> : vector<16x32xf32>
    %1052 = tpu.matmul %1049, %1051, %cst_718 {dimension_numbers = #tpu.dot_dimension_numbers<[1], [0], [0], [1], [0, 0, 1, 1], [], []>} : vector<16x8xf32>, vector<8x32xf32>, vector<16x32xf32> -> vector<16x32xf32>
    %1053 = arith.addf %1015, %1052 : vector<16x32xf32>
    %c7_719 = arith.constant 7 : index
    %c0_720 = arith.constant 0 : index
    %c0_721 = arith.constant 0 : index
    %1054 = vector.load %arg21[%c7_719, %c0_720, %c0_721] : memref<8x32x8xf32, #tpu.memory_space<vmem>>, vector<1x32x8xf32>
    %1055 = vector.shape_cast %1054 : vector<1x32x8xf32> to vector<32x8xf32>
    %cst_722 = arith.constant dense<0.000000e+00> : vector<16x8xf32>
    %1056 = tpu.matmul %938, %1055, %cst_722 {dimension_numbers = #tpu.dot_dimension_numbers<[1], [0], [0], [1], [0, 0, 1, 1], [], []>} : vector<16x32xf32>, vector<32x8xf32>, vector<16x8xf32> -> vector<16x8xf32>
    %c7_723 = arith.constant 7 : index
    %c0_724 = arith.constant 0 : index
    %c0_725 = arith.constant 0 : index
    %1057 = vector.load %arg22[%c7_723, %c0_724, %c0_725] : memref<8x1x8xf32, #tpu.memory_space<vmem>>, vector<1x1x8xf32>
    %1058 = vector.shape_cast %1057 : vector<1x1x8xf32> to vector<1x8xf32>
    %1059 = vector.broadcast %1058 : vector<1x8xf32> to vector<16x8xf32>
    %1060 = arith.addf %1056, %1059 : vector<16x8xf32>
    %c7_726 = arith.constant 7 : index
    %c0_727 = arith.constant 0 : index
    %c0_728 = arith.constant 0 : index
    %1061 = vector.load %arg23[%c7_726, %c0_727, %c0_728] : memref<8x32x8xf32, #tpu.memory_space<vmem>>, vector<1x32x8xf32>
    %1062 = vector.shape_cast %1061 : vector<1x32x8xf32> to vector<32x8xf32>
    %cst_729 = arith.constant dense<0.000000e+00> : vector<16x8xf32>
    %1063 = tpu.matmul %938, %1062, %cst_729 {dimension_numbers = #tpu.dot_dimension_numbers<[1], [0], [0], [1], [0, 0, 1, 1], [], []>} : vector<16x32xf32>, vector<32x8xf32>, vector<16x8xf32> -> vector<16x8xf32>
    %c7_730 = arith.constant 7 : index
    %c0_731 = arith.constant 0 : index
    %c0_732 = arith.constant 0 : index
    %1064 = vector.load %arg24[%c7_730, %c0_731, %c0_732] : memref<8x1x8xf32, #tpu.memory_space<vmem>>, vector<1x1x8xf32>
    %1065 = vector.shape_cast %1064 : vector<1x1x8xf32> to vector<1x8xf32>
    %1066 = vector.broadcast %1065 : vector<1x8xf32> to vector<16x8xf32>
    %1067 = arith.addf %1063, %1066 : vector<16x8xf32>
    %c7_733 = arith.constant 7 : index
    %c0_734 = arith.constant 0 : index
    %c0_735 = arith.constant 0 : index
    %1068 = vector.load %arg25[%c7_733, %c0_734, %c0_735] : memref<8x32x8xf32, #tpu.memory_space<vmem>>, vector<1x32x8xf32>
    %1069 = vector.shape_cast %1068 : vector<1x32x8xf32> to vector<32x8xf32>
    %cst_736 = arith.constant dense<0.000000e+00> : vector<16x8xf32>
    %1070 = tpu.matmul %938, %1069, %cst_736 {dimension_numbers = #tpu.dot_dimension_numbers<[1], [0], [0], [1], [0, 0, 1, 1], [], []>} : vector<16x32xf32>, vector<32x8xf32>, vector<16x8xf32> -> vector<16x8xf32>
    %c7_737 = arith.constant 7 : index
    %c0_738 = arith.constant 0 : index
    %c0_739 = arith.constant 0 : index
    %1071 = vector.load %arg26[%c7_737, %c0_738, %c0_739] : memref<8x1x8xf32, #tpu.memory_space<vmem>>, vector<1x1x8xf32>
    %1072 = vector.shape_cast %1071 : vector<1x1x8xf32> to vector<1x8xf32>
    %1073 = vector.broadcast %1072 : vector<1x8xf32> to vector<16x8xf32>
    %1074 = arith.addf %1070, %1073 : vector<16x8xf32>
    %cst_740 = arith.constant dense<0.000000e+00> : vector<16x16xf32>
    %1075 = tpu.matmul %1060, %1067, %cst_740 {dimension_numbers = #tpu.dot_dimension_numbers<[1], [1], [0], [0], [0, 0, 1, 0], [], []>} : vector<16x8xf32>, vector<16x8xf32>, vector<16x16xf32> -> vector<16x16xf32>
    %1076 = arith.addf %1075, %1 : vector<16x16xf32>
    %cst_741 = arith.constant dense<0xFF800000> : vector<16xf32>
    %1077 = vector.multi_reduction <maximumf>, %1076, %cst_741 [1] : vector<16x16xf32> to vector<16xf32>
    %1078 = vector.shape_cast %1077 : vector<16xf32> to vector<16x1xf32>
    %1079 = vector.broadcast %1078 : vector<16x1xf32> to vector<16x16xf32>
    %1080 = arith.subf %1076, %1079 : vector<16x16xf32>
    %1081 = math.exp %1080 : vector<16x16xf32>
    %cst_742 = arith.constant dense<0.000000e+00> : vector<16xf32>
    %1082 = vector.multi_reduction <add>, %1081, %cst_742 [1] : vector<16x16xf32> to vector<16xf32>
    %1083 = vector.shape_cast %1082 : vector<16xf32> to vector<16x1xf32>
    %1084 = tpu.reciprocal %1083 {approx = true} : vector<16x1xf32> -> vector<16x1xf32>
    %1085 = vector.broadcast %1084 : vector<16x1xf32> to vector<16x16xf32>
    %1086 = arith.mulf %1081, %1085 : vector<16x16xf32>
    %cst_743 = arith.constant dense<0.000000e+00> : vector<16x8xf32>
    %1087 = tpu.matmul %1086, %1074, %cst_743 {dimension_numbers = #tpu.dot_dimension_numbers<[1], [0], [0], [1], [0, 0, 1, 1], [], []>} : vector<16x16xf32>, vector<16x8xf32>, vector<16x8xf32> -> vector<16x8xf32>
    %c7_744 = arith.constant 7 : index
    %c0_745 = arith.constant 0 : index
    %c0_746 = arith.constant 0 : index
    %1088 = vector.load %arg27[%c7_744, %c0_745, %c0_746] : memref<8x8x32xf32, #tpu.memory_space<vmem>>, vector<1x8x32xf32>
    %1089 = vector.shape_cast %1088 : vector<1x8x32xf32> to vector<8x32xf32>
    %cst_747 = arith.constant dense<0.000000e+00> : vector<16x32xf32>
    %1090 = tpu.matmul %1087, %1089, %cst_747 {dimension_numbers = #tpu.dot_dimension_numbers<[1], [0], [0], [1], [0, 0, 1, 1], [], []>} : vector<16x8xf32>, vector<8x32xf32>, vector<16x32xf32> -> vector<16x32xf32>
    %1091 = arith.addf %1053, %1090 : vector<16x32xf32>
    %1092 = vector.broadcast %940 : vector<1x32xf32> to vector<16x32xf32>
    %1093 = arith.addf %1091, %1092 : vector<16x32xf32>
    %1094 = arith.addf %911, %1093 : vector<16x32xf32>
    %c4_748 = arith.constant 4 : index
    %c0_749 = arith.constant 0 : index
    %c0_750 = arith.constant 0 : index
    %1095 = vector.load %arg41[%c4_748, %c0_749, %c0_750] : memref<6x1x32xf32, #tpu.memory_space<vmem>>, vector<1x1x32xf32>
    %1096 = vector.shape_cast %1095 : vector<1x1x32xf32> to vector<1x32xf32>
    %c4_751 = arith.constant 4 : index
    %c0_752 = arith.constant 0 : index
    %c0_753 = arith.constant 0 : index
    %1097 = vector.load %arg42[%c4_751, %c0_752, %c0_753] : memref<6x1x32xf32, #tpu.memory_space<vmem>>, vector<1x1x32xf32>
    %1098 = vector.shape_cast %1097 : vector<1x1x32xf32> to vector<1x32xf32>
    %cst_754 = arith.constant dense<0.000000e+00> : vector<16xf32>
    %1099 = vector.multi_reduction <add>, %1094, %cst_754 [1] : vector<16x32xf32> to vector<16xf32>
    %1100 = vector.shape_cast %1099 : vector<16xf32> to vector<16x1xf32>
    %cst_755 = arith.constant 3.200000e+01 : f32
    %1101 = vector.broadcast %cst_755 : f32 to vector<16x1xf32>
    %1102 = arith.divf %1100, %1101 : vector<16x1xf32>
    %1103 = vector.broadcast %1102 : vector<16x1xf32> to vector<16x32xf32>
    %1104 = arith.subf %1094, %1103 : vector<16x32xf32>
    %1105 = arith.mulf %1104, %1104 : vector<16x32xf32>
    %cst_756 = arith.constant dense<0.000000e+00> : vector<16xf32>
    %1106 = vector.multi_reduction <add>, %1105, %cst_756 [1] : vector<16x32xf32> to vector<16xf32>
    %1107 = vector.shape_cast %1106 : vector<16xf32> to vector<16x1xf32>
    %cst_757 = arith.constant 0.0322580636 : f32
    %1108 = vector.broadcast %cst_757 : f32 to vector<16x1xf32>
    %1109 = arith.mulf %1107, %1108 : vector<16x1xf32>
    %1110 = math.sqrt %1109 : vector<16x1xf32>
    %cst_758 = arith.constant 9.99999997E-7 : f32
    %1111 = vector.broadcast %cst_758 : f32 to vector<16x1xf32>
    %1112 = arith.addf %1110, %1111 : vector<16x1xf32>
    %1113 = tpu.reciprocal %1112 {approx = true} : vector<16x1xf32> -> vector<16x1xf32>
    %1114 = vector.broadcast %1102 : vector<16x1xf32> to vector<16x32xf32>
    %1115 = arith.subf %1094, %1114 : vector<16x32xf32>
    %1116 = vector.broadcast %1096 : vector<1x32xf32> to vector<16x32xf32>
    %1117 = arith.mulf %1116, %1115 : vector<16x32xf32>
    %1118 = vector.broadcast %1113 : vector<16x1xf32> to vector<16x32xf32>
    %1119 = arith.mulf %1117, %1118 : vector<16x32xf32>
    %1120 = vector.broadcast %1098 : vector<1x32xf32> to vector<16x32xf32>
    %1121 = arith.addf %1119, %1120 : vector<16x32xf32>
    %c1_759 = arith.constant 1 : index
    %c0_760 = arith.constant 0 : index
    %c0_761 = arith.constant 0 : index
    %1122 = vector.load %arg36[%c1_759, %c0_760, %c0_761] : memref<2x1x32xf32, #tpu.memory_space<vmem>>, vector<1x1x32xf32>
    %1123 = vector.shape_cast %1122 : vector<1x1x32xf32> to vector<1x32xf32>
    %c4_762 = arith.constant 4 : index
    %c0_763 = arith.constant 0 : index
    %c0_764 = arith.constant 0 : index
    %1124 = vector.load %arg29[%c4_762, %c0_763, %c0_764] : memref<8x32x8xf32, #tpu.memory_space<vmem>>, vector<1x32x8xf32>
    %1125 = vector.shape_cast %1124 : vector<1x32x8xf32> to vector<32x8xf32>
    %cst_765 = arith.constant dense<0.000000e+00> : vector<16x8xf32>
    %1126 = tpu.matmul %1121, %1125, %cst_765 {dimension_numbers = #tpu.dot_dimension_numbers<[1], [0], [0], [1], [0, 0, 1, 1], [], []>} : vector<16x32xf32>, vector<32x8xf32>, vector<16x8xf32> -> vector<16x8xf32>
    %c4_766 = arith.constant 4 : index
    %c0_767 = arith.constant 0 : index
    %c0_768 = arith.constant 0 : index
    %1127 = vector.load %arg30[%c4_766, %c0_767, %c0_768] : memref<8x1x8xf32, #tpu.memory_space<vmem>>, vector<1x1x8xf32>
    %1128 = vector.shape_cast %1127 : vector<1x1x8xf32> to vector<1x8xf32>
    %1129 = vector.broadcast %1128 : vector<1x8xf32> to vector<16x8xf32>
    %1130 = arith.addf %1126, %1129 : vector<16x8xf32>
    %c4_769 = arith.constant 4 : index
    %c0_770 = arith.constant 0 : index
    %c0_771 = arith.constant 0 : index
    %1131 = vector.load %arg31[%c4_769, %c0_770, %c0_771] : memref<8x32x8xf32, #tpu.memory_space<vmem>>, vector<1x32x8xf32>
    %1132 = vector.shape_cast %1131 : vector<1x32x8xf32> to vector<32x8xf32>
    %cst_772 = arith.constant dense<0.000000e+00> : vector<16x8xf32>
    %1133 = tpu.matmul %501, %1132, %cst_772 {dimension_numbers = #tpu.dot_dimension_numbers<[1], [0], [0], [1], [0, 0, 1, 1], [], []>} : vector<16x32xf32>, vector<32x8xf32>, vector<16x8xf32> -> vector<16x8xf32>
    %c4_773 = arith.constant 4 : index
    %c0_774 = arith.constant 0 : index
    %c0_775 = arith.constant 0 : index
    %1134 = vector.load %arg32[%c4_773, %c0_774, %c0_775] : memref<8x1x8xf32, #tpu.memory_space<vmem>>, vector<1x1x8xf32>
    %1135 = vector.shape_cast %1134 : vector<1x1x8xf32> to vector<1x8xf32>
    %1136 = vector.broadcast %1135 : vector<1x8xf32> to vector<16x8xf32>
    %1137 = arith.addf %1133, %1136 : vector<16x8xf32>
    %c4_776 = arith.constant 4 : index
    %c0_777 = arith.constant 0 : index
    %c0_778 = arith.constant 0 : index
    %1138 = vector.load %arg33[%c4_776, %c0_777, %c0_778] : memref<8x32x8xf32, #tpu.memory_space<vmem>>, vector<1x32x8xf32>
    %1139 = vector.shape_cast %1138 : vector<1x32x8xf32> to vector<32x8xf32>
    %cst_779 = arith.constant dense<0.000000e+00> : vector<16x8xf32>
    %1140 = tpu.matmul %501, %1139, %cst_779 {dimension_numbers = #tpu.dot_dimension_numbers<[1], [0], [0], [1], [0, 0, 1, 1], [], []>} : vector<16x32xf32>, vector<32x8xf32>, vector<16x8xf32> -> vector<16x8xf32>
    %c4_780 = arith.constant 4 : index
    %c0_781 = arith.constant 0 : index
    %c0_782 = arith.constant 0 : index
    %1141 = vector.load %arg34[%c4_780, %c0_781, %c0_782] : memref<8x1x8xf32, #tpu.memory_space<vmem>>, vector<1x1x8xf32>
    %1142 = vector.shape_cast %1141 : vector<1x1x8xf32> to vector<1x8xf32>
    %1143 = vector.broadcast %1142 : vector<1x8xf32> to vector<16x8xf32>
    %1144 = arith.addf %1140, %1143 : vector<16x8xf32>
    %cst_783 = arith.constant dense<0.000000e+00> : vector<16x16xf32>
    %1145 = tpu.matmul %1130, %1137, %cst_783 {dimension_numbers = #tpu.dot_dimension_numbers<[1], [1], [0], [0], [0, 0, 1, 0], [], []>} : vector<16x8xf32>, vector<16x8xf32>, vector<16x16xf32> -> vector<16x16xf32>
    %1146 = arith.addf %1145, %0 : vector<16x16xf32>
    %cst_784 = arith.constant dense<0xFF800000> : vector<16xf32>
    %1147 = vector.multi_reduction <maximumf>, %1146, %cst_784 [1] : vector<16x16xf32> to vector<16xf32>
    %1148 = vector.shape_cast %1147 : vector<16xf32> to vector<16x1xf32>
    %1149 = vector.broadcast %1148 : vector<16x1xf32> to vector<16x16xf32>
    %1150 = arith.subf %1146, %1149 : vector<16x16xf32>
    %1151 = math.exp %1150 : vector<16x16xf32>
    %cst_785 = arith.constant dense<0.000000e+00> : vector<16xf32>
    %1152 = vector.multi_reduction <add>, %1151, %cst_785 [1] : vector<16x16xf32> to vector<16xf32>
    %1153 = vector.shape_cast %1152 : vector<16xf32> to vector<16x1xf32>
    %1154 = tpu.reciprocal %1153 {approx = true} : vector<16x1xf32> -> vector<16x1xf32>
    %1155 = vector.broadcast %1154 : vector<16x1xf32> to vector<16x16xf32>
    %1156 = arith.mulf %1151, %1155 : vector<16x16xf32>
    %cst_786 = arith.constant dense<0.000000e+00> : vector<16x8xf32>
    %1157 = tpu.matmul %1156, %1144, %cst_786 {dimension_numbers = #tpu.dot_dimension_numbers<[1], [0], [0], [1], [0, 0, 1, 1], [], []>} : vector<16x16xf32>, vector<16x8xf32>, vector<16x8xf32> -> vector<16x8xf32>
    %c4_787 = arith.constant 4 : index
    %c0_788 = arith.constant 0 : index
    %c0_789 = arith.constant 0 : index
    %1158 = vector.load %arg35[%c4_787, %c0_788, %c0_789] : memref<8x8x32xf32, #tpu.memory_space<vmem>>, vector<1x8x32xf32>
    %1159 = vector.shape_cast %1158 : vector<1x8x32xf32> to vector<8x32xf32>
    %cst_790 = arith.constant dense<0.000000e+00> : vector<16x32xf32>
    %1160 = tpu.matmul %1157, %1159, %cst_790 {dimension_numbers = #tpu.dot_dimension_numbers<[1], [0], [0], [1], [0, 0, 1, 1], [], []>} : vector<16x8xf32>, vector<8x32xf32>, vector<16x32xf32> -> vector<16x32xf32>
    %c5_791 = arith.constant 5 : index
    %c0_792 = arith.constant 0 : index
    %c0_793 = arith.constant 0 : index
    %1161 = vector.load %arg29[%c5_791, %c0_792, %c0_793] : memref<8x32x8xf32, #tpu.memory_space<vmem>>, vector<1x32x8xf32>
    %1162 = vector.shape_cast %1161 : vector<1x32x8xf32> to vector<32x8xf32>
    %cst_794 = arith.constant dense<0.000000e+00> : vector<16x8xf32>
    %1163 = tpu.matmul %1121, %1162, %cst_794 {dimension_numbers = #tpu.dot_dimension_numbers<[1], [0], [0], [1], [0, 0, 1, 1], [], []>} : vector<16x32xf32>, vector<32x8xf32>, vector<16x8xf32> -> vector<16x8xf32>
    %c5_795 = arith.constant 5 : index
    %c0_796 = arith.constant 0 : index
    %c0_797 = arith.constant 0 : index
    %1164 = vector.load %arg30[%c5_795, %c0_796, %c0_797] : memref<8x1x8xf32, #tpu.memory_space<vmem>>, vector<1x1x8xf32>
    %1165 = vector.shape_cast %1164 : vector<1x1x8xf32> to vector<1x8xf32>
    %1166 = vector.broadcast %1165 : vector<1x8xf32> to vector<16x8xf32>
    %1167 = arith.addf %1163, %1166 : vector<16x8xf32>
    %c5_798 = arith.constant 5 : index
    %c0_799 = arith.constant 0 : index
    %c0_800 = arith.constant 0 : index
    %1168 = vector.load %arg31[%c5_798, %c0_799, %c0_800] : memref<8x32x8xf32, #tpu.memory_space<vmem>>, vector<1x32x8xf32>
    %1169 = vector.shape_cast %1168 : vector<1x32x8xf32> to vector<32x8xf32>
    %cst_801 = arith.constant dense<0.000000e+00> : vector<16x8xf32>
    %1170 = tpu.matmul %501, %1169, %cst_801 {dimension_numbers = #tpu.dot_dimension_numbers<[1], [0], [0], [1], [0, 0, 1, 1], [], []>} : vector<16x32xf32>, vector<32x8xf32>, vector<16x8xf32> -> vector<16x8xf32>
    %c5_802 = arith.constant 5 : index
    %c0_803 = arith.constant 0 : index
    %c0_804 = arith.constant 0 : index
    %1171 = vector.load %arg32[%c5_802, %c0_803, %c0_804] : memref<8x1x8xf32, #tpu.memory_space<vmem>>, vector<1x1x8xf32>
    %1172 = vector.shape_cast %1171 : vector<1x1x8xf32> to vector<1x8xf32>
    %1173 = vector.broadcast %1172 : vector<1x8xf32> to vector<16x8xf32>
    %1174 = arith.addf %1170, %1173 : vector<16x8xf32>
    %c5_805 = arith.constant 5 : index
    %c0_806 = arith.constant 0 : index
    %c0_807 = arith.constant 0 : index
    %1175 = vector.load %arg33[%c5_805, %c0_806, %c0_807] : memref<8x32x8xf32, #tpu.memory_space<vmem>>, vector<1x32x8xf32>
    %1176 = vector.shape_cast %1175 : vector<1x32x8xf32> to vector<32x8xf32>
    %cst_808 = arith.constant dense<0.000000e+00> : vector<16x8xf32>
    %1177 = tpu.matmul %501, %1176, %cst_808 {dimension_numbers = #tpu.dot_dimension_numbers<[1], [0], [0], [1], [0, 0, 1, 1], [], []>} : vector<16x32xf32>, vector<32x8xf32>, vector<16x8xf32> -> vector<16x8xf32>
    %c5_809 = arith.constant 5 : index
    %c0_810 = arith.constant 0 : index
    %c0_811 = arith.constant 0 : index
    %1178 = vector.load %arg34[%c5_809, %c0_810, %c0_811] : memref<8x1x8xf32, #tpu.memory_space<vmem>>, vector<1x1x8xf32>
    %1179 = vector.shape_cast %1178 : vector<1x1x8xf32> to vector<1x8xf32>
    %1180 = vector.broadcast %1179 : vector<1x8xf32> to vector<16x8xf32>
    %1181 = arith.addf %1177, %1180 : vector<16x8xf32>
    %cst_812 = arith.constant dense<0.000000e+00> : vector<16x16xf32>
    %1182 = tpu.matmul %1167, %1174, %cst_812 {dimension_numbers = #tpu.dot_dimension_numbers<[1], [1], [0], [0], [0, 0, 1, 0], [], []>} : vector<16x8xf32>, vector<16x8xf32>, vector<16x16xf32> -> vector<16x16xf32>
    %1183 = arith.addf %1182, %0 : vector<16x16xf32>
    %cst_813 = arith.constant dense<0xFF800000> : vector<16xf32>
    %1184 = vector.multi_reduction <maximumf>, %1183, %cst_813 [1] : vector<16x16xf32> to vector<16xf32>
    %1185 = vector.shape_cast %1184 : vector<16xf32> to vector<16x1xf32>
    %1186 = vector.broadcast %1185 : vector<16x1xf32> to vector<16x16xf32>
    %1187 = arith.subf %1183, %1186 : vector<16x16xf32>
    %1188 = math.exp %1187 : vector<16x16xf32>
    %cst_814 = arith.constant dense<0.000000e+00> : vector<16xf32>
    %1189 = vector.multi_reduction <add>, %1188, %cst_814 [1] : vector<16x16xf32> to vector<16xf32>
    %1190 = vector.shape_cast %1189 : vector<16xf32> to vector<16x1xf32>
    %1191 = tpu.reciprocal %1190 {approx = true} : vector<16x1xf32> -> vector<16x1xf32>
    %1192 = vector.broadcast %1191 : vector<16x1xf32> to vector<16x16xf32>
    %1193 = arith.mulf %1188, %1192 : vector<16x16xf32>
    %cst_815 = arith.constant dense<0.000000e+00> : vector<16x8xf32>
    %1194 = tpu.matmul %1193, %1181, %cst_815 {dimension_numbers = #tpu.dot_dimension_numbers<[1], [0], [0], [1], [0, 0, 1, 1], [], []>} : vector<16x16xf32>, vector<16x8xf32>, vector<16x8xf32> -> vector<16x8xf32>
    %c5_816 = arith.constant 5 : index
    %c0_817 = arith.constant 0 : index
    %c0_818 = arith.constant 0 : index
    %1195 = vector.load %arg35[%c5_816, %c0_817, %c0_818] : memref<8x8x32xf32, #tpu.memory_space<vmem>>, vector<1x8x32xf32>
    %1196 = vector.shape_cast %1195 : vector<1x8x32xf32> to vector<8x32xf32>
    %cst_819 = arith.constant dense<0.000000e+00> : vector<16x32xf32>
    %1197 = tpu.matmul %1194, %1196, %cst_819 {dimension_numbers = #tpu.dot_dimension_numbers<[1], [0], [0], [1], [0, 0, 1, 1], [], []>} : vector<16x8xf32>, vector<8x32xf32>, vector<16x32xf32> -> vector<16x32xf32>
    %1198 = arith.addf %1160, %1197 : vector<16x32xf32>
    %c6_820 = arith.constant 6 : index
    %c0_821 = arith.constant 0 : index
    %c0_822 = arith.constant 0 : index
    %1199 = vector.load %arg29[%c6_820, %c0_821, %c0_822] : memref<8x32x8xf32, #tpu.memory_space<vmem>>, vector<1x32x8xf32>
    %1200 = vector.shape_cast %1199 : vector<1x32x8xf32> to vector<32x8xf32>
    %cst_823 = arith.constant dense<0.000000e+00> : vector<16x8xf32>
    %1201 = tpu.matmul %1121, %1200, %cst_823 {dimension_numbers = #tpu.dot_dimension_numbers<[1], [0], [0], [1], [0, 0, 1, 1], [], []>} : vector<16x32xf32>, vector<32x8xf32>, vector<16x8xf32> -> vector<16x8xf32>
    %c6_824 = arith.constant 6 : index
    %c0_825 = arith.constant 0 : index
    %c0_826 = arith.constant 0 : index
    %1202 = vector.load %arg30[%c6_824, %c0_825, %c0_826] : memref<8x1x8xf32, #tpu.memory_space<vmem>>, vector<1x1x8xf32>
    %1203 = vector.shape_cast %1202 : vector<1x1x8xf32> to vector<1x8xf32>
    %1204 = vector.broadcast %1203 : vector<1x8xf32> to vector<16x8xf32>
    %1205 = arith.addf %1201, %1204 : vector<16x8xf32>
    %c6_827 = arith.constant 6 : index
    %c0_828 = arith.constant 0 : index
    %c0_829 = arith.constant 0 : index
    %1206 = vector.load %arg31[%c6_827, %c0_828, %c0_829] : memref<8x32x8xf32, #tpu.memory_space<vmem>>, vector<1x32x8xf32>
    %1207 = vector.shape_cast %1206 : vector<1x32x8xf32> to vector<32x8xf32>
    %cst_830 = arith.constant dense<0.000000e+00> : vector<16x8xf32>
    %1208 = tpu.matmul %501, %1207, %cst_830 {dimension_numbers = #tpu.dot_dimension_numbers<[1], [0], [0], [1], [0, 0, 1, 1], [], []>} : vector<16x32xf32>, vector<32x8xf32>, vector<16x8xf32> -> vector<16x8xf32>
    %c6_831 = arith.constant 6 : index
    %c0_832 = arith.constant 0 : index
    %c0_833 = arith.constant 0 : index
    %1209 = vector.load %arg32[%c6_831, %c0_832, %c0_833] : memref<8x1x8xf32, #tpu.memory_space<vmem>>, vector<1x1x8xf32>
    %1210 = vector.shape_cast %1209 : vector<1x1x8xf32> to vector<1x8xf32>
    %1211 = vector.broadcast %1210 : vector<1x8xf32> to vector<16x8xf32>
    %1212 = arith.addf %1208, %1211 : vector<16x8xf32>
    %c6_834 = arith.constant 6 : index
    %c0_835 = arith.constant 0 : index
    %c0_836 = arith.constant 0 : index
    %1213 = vector.load %arg33[%c6_834, %c0_835, %c0_836] : memref<8x32x8xf32, #tpu.memory_space<vmem>>, vector<1x32x8xf32>
    %1214 = vector.shape_cast %1213 : vector<1x32x8xf32> to vector<32x8xf32>
    %cst_837 = arith.constant dense<0.000000e+00> : vector<16x8xf32>
    %1215 = tpu.matmul %501, %1214, %cst_837 {dimension_numbers = #tpu.dot_dimension_numbers<[1], [0], [0], [1], [0, 0, 1, 1], [], []>} : vector<16x32xf32>, vector<32x8xf32>, vector<16x8xf32> -> vector<16x8xf32>
    %c6_838 = arith.constant 6 : index
    %c0_839 = arith.constant 0 : index
    %c0_840 = arith.constant 0 : index
    %1216 = vector.load %arg34[%c6_838, %c0_839, %c0_840] : memref<8x1x8xf32, #tpu.memory_space<vmem>>, vector<1x1x8xf32>
    %1217 = vector.shape_cast %1216 : vector<1x1x8xf32> to vector<1x8xf32>
    %1218 = vector.broadcast %1217 : vector<1x8xf32> to vector<16x8xf32>
    %1219 = arith.addf %1215, %1218 : vector<16x8xf32>
    %cst_841 = arith.constant dense<0.000000e+00> : vector<16x16xf32>
    %1220 = tpu.matmul %1205, %1212, %cst_841 {dimension_numbers = #tpu.dot_dimension_numbers<[1], [1], [0], [0], [0, 0, 1, 0], [], []>} : vector<16x8xf32>, vector<16x8xf32>, vector<16x16xf32> -> vector<16x16xf32>
    %1221 = arith.addf %1220, %0 : vector<16x16xf32>
    %cst_842 = arith.constant dense<0xFF800000> : vector<16xf32>
    %1222 = vector.multi_reduction <maximumf>, %1221, %cst_842 [1] : vector<16x16xf32> to vector<16xf32>
    %1223 = vector.shape_cast %1222 : vector<16xf32> to vector<16x1xf32>
    %1224 = vector.broadcast %1223 : vector<16x1xf32> to vector<16x16xf32>
    %1225 = arith.subf %1221, %1224 : vector<16x16xf32>
    %1226 = math.exp %1225 : vector<16x16xf32>
    %cst_843 = arith.constant dense<0.000000e+00> : vector<16xf32>
    %1227 = vector.multi_reduction <add>, %1226, %cst_843 [1] : vector<16x16xf32> to vector<16xf32>
    %1228 = vector.shape_cast %1227 : vector<16xf32> to vector<16x1xf32>
    %1229 = tpu.reciprocal %1228 {approx = true} : vector<16x1xf32> -> vector<16x1xf32>
    %1230 = vector.broadcast %1229 : vector<16x1xf32> to vector<16x16xf32>
    %1231 = arith.mulf %1226, %1230 : vector<16x16xf32>
    %cst_844 = arith.constant dense<0.000000e+00> : vector<16x8xf32>
    %1232 = tpu.matmul %1231, %1219, %cst_844 {dimension_numbers = #tpu.dot_dimension_numbers<[1], [0], [0], [1], [0, 0, 1, 1], [], []>} : vector<16x16xf32>, vector<16x8xf32>, vector<16x8xf32> -> vector<16x8xf32>
    %c6_845 = arith.constant 6 : index
    %c0_846 = arith.constant 0 : index
    %c0_847 = arith.constant 0 : index
    %1233 = vector.load %arg35[%c6_845, %c0_846, %c0_847] : memref<8x8x32xf32, #tpu.memory_space<vmem>>, vector<1x8x32xf32>
    %1234 = vector.shape_cast %1233 : vector<1x8x32xf32> to vector<8x32xf32>
    %cst_848 = arith.constant dense<0.000000e+00> : vector<16x32xf32>
    %1235 = tpu.matmul %1232, %1234, %cst_848 {dimension_numbers = #tpu.dot_dimension_numbers<[1], [0], [0], [1], [0, 0, 1, 1], [], []>} : vector<16x8xf32>, vector<8x32xf32>, vector<16x32xf32> -> vector<16x32xf32>
    %1236 = arith.addf %1198, %1235 : vector<16x32xf32>
    %c7_849 = arith.constant 7 : index
    %c0_850 = arith.constant 0 : index
    %c0_851 = arith.constant 0 : index
    %1237 = vector.load %arg29[%c7_849, %c0_850, %c0_851] : memref<8x32x8xf32, #tpu.memory_space<vmem>>, vector<1x32x8xf32>
    %1238 = vector.shape_cast %1237 : vector<1x32x8xf32> to vector<32x8xf32>
    %cst_852 = arith.constant dense<0.000000e+00> : vector<16x8xf32>
    %1239 = tpu.matmul %1121, %1238, %cst_852 {dimension_numbers = #tpu.dot_dimension_numbers<[1], [0], [0], [1], [0, 0, 1, 1], [], []>} : vector<16x32xf32>, vector<32x8xf32>, vector<16x8xf32> -> vector<16x8xf32>
    %c7_853 = arith.constant 7 : index
    %c0_854 = arith.constant 0 : index
    %c0_855 = arith.constant 0 : index
    %1240 = vector.load %arg30[%c7_853, %c0_854, %c0_855] : memref<8x1x8xf32, #tpu.memory_space<vmem>>, vector<1x1x8xf32>
    %1241 = vector.shape_cast %1240 : vector<1x1x8xf32> to vector<1x8xf32>
    %1242 = vector.broadcast %1241 : vector<1x8xf32> to vector<16x8xf32>
    %1243 = arith.addf %1239, %1242 : vector<16x8xf32>
    %c7_856 = arith.constant 7 : index
    %c0_857 = arith.constant 0 : index
    %c0_858 = arith.constant 0 : index
    %1244 = vector.load %arg31[%c7_856, %c0_857, %c0_858] : memref<8x32x8xf32, #tpu.memory_space<vmem>>, vector<1x32x8xf32>
    %1245 = vector.shape_cast %1244 : vector<1x32x8xf32> to vector<32x8xf32>
    %cst_859 = arith.constant dense<0.000000e+00> : vector<16x8xf32>
    %1246 = tpu.matmul %501, %1245, %cst_859 {dimension_numbers = #tpu.dot_dimension_numbers<[1], [0], [0], [1], [0, 0, 1, 1], [], []>} : vector<16x32xf32>, vector<32x8xf32>, vector<16x8xf32> -> vector<16x8xf32>
    %c7_860 = arith.constant 7 : index
    %c0_861 = arith.constant 0 : index
    %c0_862 = arith.constant 0 : index
    %1247 = vector.load %arg32[%c7_860, %c0_861, %c0_862] : memref<8x1x8xf32, #tpu.memory_space<vmem>>, vector<1x1x8xf32>
    %1248 = vector.shape_cast %1247 : vector<1x1x8xf32> to vector<1x8xf32>
    %1249 = vector.broadcast %1248 : vector<1x8xf32> to vector<16x8xf32>
    %1250 = arith.addf %1246, %1249 : vector<16x8xf32>
    %c7_863 = arith.constant 7 : index
    %c0_864 = arith.constant 0 : index
    %c0_865 = arith.constant 0 : index
    %1251 = vector.load %arg33[%c7_863, %c0_864, %c0_865] : memref<8x32x8xf32, #tpu.memory_space<vmem>>, vector<1x32x8xf32>
    %1252 = vector.shape_cast %1251 : vector<1x32x8xf32> to vector<32x8xf32>
    %cst_866 = arith.constant dense<0.000000e+00> : vector<16x8xf32>
    %1253 = tpu.matmul %501, %1252, %cst_866 {dimension_numbers = #tpu.dot_dimension_numbers<[1], [0], [0], [1], [0, 0, 1, 1], [], []>} : vector<16x32xf32>, vector<32x8xf32>, vector<16x8xf32> -> vector<16x8xf32>
    %c7_867 = arith.constant 7 : index
    %c0_868 = arith.constant 0 : index
    %c0_869 = arith.constant 0 : index
    %1254 = vector.load %arg34[%c7_867, %c0_868, %c0_869] : memref<8x1x8xf32, #tpu.memory_space<vmem>>, vector<1x1x8xf32>
    %1255 = vector.shape_cast %1254 : vector<1x1x8xf32> to vector<1x8xf32>
    %1256 = vector.broadcast %1255 : vector<1x8xf32> to vector<16x8xf32>
    %1257 = arith.addf %1253, %1256 : vector<16x8xf32>
    %cst_870 = arith.constant dense<0.000000e+00> : vector<16x16xf32>
    %1258 = tpu.matmul %1243, %1250, %cst_870 {dimension_numbers = #tpu.dot_dimension_numbers<[1], [1], [0], [0], [0, 0, 1, 0], [], []>} : vector<16x8xf32>, vector<16x8xf32>, vector<16x16xf32> -> vector<16x16xf32>
    %1259 = arith.addf %1258, %0 : vector<16x16xf32>
    %cst_871 = arith.constant dense<0xFF800000> : vector<16xf32>
    %1260 = vector.multi_reduction <maximumf>, %1259, %cst_871 [1] : vector<16x16xf32> to vector<16xf32>
    %1261 = vector.shape_cast %1260 : vector<16xf32> to vector<16x1xf32>
    %1262 = vector.broadcast %1261 : vector<16x1xf32> to vector<16x16xf32>
    %1263 = arith.subf %1259, %1262 : vector<16x16xf32>
    %1264 = math.exp %1263 : vector<16x16xf32>
    %cst_872 = arith.constant dense<0.000000e+00> : vector<16xf32>
    %1265 = vector.multi_reduction <add>, %1264, %cst_872 [1] : vector<16x16xf32> to vector<16xf32>
    %1266 = vector.shape_cast %1265 : vector<16xf32> to vector<16x1xf32>
    %1267 = tpu.reciprocal %1266 {approx = true} : vector<16x1xf32> -> vector<16x1xf32>
    %1268 = vector.broadcast %1267 : vector<16x1xf32> to vector<16x16xf32>
    %1269 = arith.mulf %1264, %1268 : vector<16x16xf32>
    %cst_873 = arith.constant dense<0.000000e+00> : vector<16x8xf32>
    %1270 = tpu.matmul %1269, %1257, %cst_873 {dimension_numbers = #tpu.dot_dimension_numbers<[1], [0], [0], [1], [0, 0, 1, 1], [], []>} : vector<16x16xf32>, vector<16x8xf32>, vector<16x8xf32> -> vector<16x8xf32>
    %c7_874 = arith.constant 7 : index
    %c0_875 = arith.constant 0 : index
    %c0_876 = arith.constant 0 : index
    %1271 = vector.load %arg35[%c7_874, %c0_875, %c0_876] : memref<8x8x32xf32, #tpu.memory_space<vmem>>, vector<1x8x32xf32>
    %1272 = vector.shape_cast %1271 : vector<1x8x32xf32> to vector<8x32xf32>
    %cst_877 = arith.constant dense<0.000000e+00> : vector<16x32xf32>
    %1273 = tpu.matmul %1270, %1272, %cst_877 {dimension_numbers = #tpu.dot_dimension_numbers<[1], [0], [0], [1], [0, 0, 1, 1], [], []>} : vector<16x8xf32>, vector<8x32xf32>, vector<16x32xf32> -> vector<16x32xf32>
    %1274 = arith.addf %1236, %1273 : vector<16x32xf32>
    %1275 = vector.broadcast %1123 : vector<1x32xf32> to vector<16x32xf32>
    %1276 = arith.addf %1274, %1275 : vector<16x32xf32>
    %1277 = arith.addf %1094, %1276 : vector<16x32xf32>
    %c5_878 = arith.constant 5 : index
    %c0_879 = arith.constant 0 : index
    %c0_880 = arith.constant 0 : index
    %1278 = vector.load %arg41[%c5_878, %c0_879, %c0_880] : memref<6x1x32xf32, #tpu.memory_space<vmem>>, vector<1x1x32xf32>
    %1279 = vector.shape_cast %1278 : vector<1x1x32xf32> to vector<1x32xf32>
    %c5_881 = arith.constant 5 : index
    %c0_882 = arith.constant 0 : index
    %c0_883 = arith.constant 0 : index
    %1280 = vector.load %arg42[%c5_881, %c0_882, %c0_883] : memref<6x1x32xf32, #tpu.memory_space<vmem>>, vector<1x1x32xf32>
    %1281 = vector.shape_cast %1280 : vector<1x1x32xf32> to vector<1x32xf32>
    %cst_884 = arith.constant dense<0.000000e+00> : vector<16xf32>
    %1282 = vector.multi_reduction <add>, %1277, %cst_884 [1] : vector<16x32xf32> to vector<16xf32>
    %1283 = vector.shape_cast %1282 : vector<16xf32> to vector<16x1xf32>
    %cst_885 = arith.constant 3.200000e+01 : f32
    %1284 = vector.broadcast %cst_885 : f32 to vector<16x1xf32>
    %1285 = arith.divf %1283, %1284 : vector<16x1xf32>
    %1286 = vector.broadcast %1285 : vector<16x1xf32> to vector<16x32xf32>
    %1287 = arith.subf %1277, %1286 : vector<16x32xf32>
    %1288 = arith.mulf %1287, %1287 : vector<16x32xf32>
    %cst_886 = arith.constant dense<0.000000e+00> : vector<16xf32>
    %1289 = vector.multi_reduction <add>, %1288, %cst_886 [1] : vector<16x32xf32> to vector<16xf32>
    %1290 = vector.shape_cast %1289 : vector<16xf32> to vector<16x1xf32>
    %cst_887 = arith.constant 0.0322580636 : f32
    %1291 = vector.broadcast %cst_887 : f32 to vector<16x1xf32>
    %1292 = arith.mulf %1290, %1291 : vector<16x1xf32>
    %1293 = math.sqrt %1292 : vector<16x1xf32>
    %cst_888 = arith.constant 9.99999997E-7 : f32
    %1294 = vector.broadcast %cst_888 : f32 to vector<16x1xf32>
    %1295 = arith.addf %1293, %1294 : vector<16x1xf32>
    %1296 = tpu.reciprocal %1295 {approx = true} : vector<16x1xf32> -> vector<16x1xf32>
    %1297 = vector.broadcast %1285 : vector<16x1xf32> to vector<16x32xf32>
    %1298 = arith.subf %1277, %1297 : vector<16x32xf32>
    %1299 = vector.broadcast %1279 : vector<1x32xf32> to vector<16x32xf32>
    %1300 = arith.mulf %1299, %1298 : vector<16x32xf32>
    %1301 = vector.broadcast %1296 : vector<16x1xf32> to vector<16x32xf32>
    %1302 = arith.mulf %1300, %1301 : vector<16x32xf32>
    %1303 = vector.broadcast %1281 : vector<1x32xf32> to vector<16x32xf32>
    %1304 = arith.addf %1302, %1303 : vector<16x32xf32>
    %c1_889 = arith.constant 1 : index
    %c0_890 = arith.constant 0 : index
    %c0_891 = arith.constant 0 : index
    %1305 = vector.load %arg37[%c1_889, %c0_890, %c0_891] : memref<2x32x64xf32, #tpu.memory_space<vmem>>, vector<1x32x64xf32>
    %1306 = vector.shape_cast %1305 : vector<1x32x64xf32> to vector<32x64xf32>
    %c1_892 = arith.constant 1 : index
    %c0_893 = arith.constant 0 : index
    %c0_894 = arith.constant 0 : index
    %1307 = vector.load %arg38[%c1_892, %c0_893, %c0_894] : memref<2x1x64xf32, #tpu.memory_space<vmem>>, vector<1x1x64xf32>
    %1308 = vector.shape_cast %1307 : vector<1x1x64xf32> to vector<1x64xf32>
    %c1_895 = arith.constant 1 : index
    %c0_896 = arith.constant 0 : index
    %c0_897 = arith.constant 0 : index
    %1309 = vector.load %arg39[%c1_895, %c0_896, %c0_897] : memref<2x64x32xf32, #tpu.memory_space<vmem>>, vector<1x64x32xf32>
    %1310 = vector.shape_cast %1309 : vector<1x64x32xf32> to vector<64x32xf32>
    %c1_898 = arith.constant 1 : index
    %c0_899 = arith.constant 0 : index
    %c0_900 = arith.constant 0 : index
    %1311 = vector.load %arg40[%c1_898, %c0_899, %c0_900] : memref<2x1x32xf32, #tpu.memory_space<vmem>>, vector<1x1x32xf32>
    %1312 = vector.shape_cast %1311 : vector<1x1x32xf32> to vector<1x32xf32>
    %cst_901 = arith.constant dense<0.000000e+00> : vector<16x64xf32>
    %1313 = tpu.matmul %1304, %1306, %cst_901 {dimension_numbers = #tpu.dot_dimension_numbers<[1], [0], [0], [1], [0, 0, 1, 1], [], []>} : vector<16x32xf32>, vector<32x64xf32>, vector<16x64xf32> -> vector<16x64xf32>
    %1314 = vector.broadcast %1308 : vector<1x64xf32> to vector<16x64xf32>
    %1315 = arith.addf %1313, %1314 : vector<16x64xf32>
    %cst_902 = arith.constant 0.000000e+00 : f32
    %1316 = vector.broadcast %cst_902 : f32 to vector<16x64xf32>
    %1317 = arith.maximumf %1315, %1316 : vector<16x64xf32>
    %cst_903 = arith.constant dense<0.000000e+00> : vector<16x32xf32>
    %1318 = tpu.matmul %1317, %1310, %cst_903 {dimension_numbers = #tpu.dot_dimension_numbers<[1], [0], [0], [1], [0, 0, 1, 1], [], []>} : vector<16x64xf32>, vector<64x32xf32>, vector<16x32xf32> -> vector<16x32xf32>
    %1319 = vector.broadcast %1312 : vector<1x32xf32> to vector<16x32xf32>
    %1320 = arith.addf %1318, %1319 : vector<16x32xf32>
    %1321 = arith.addf %1277, %1320 : vector<16x32xf32>
    %c0_904 = arith.constant 0 : index
    %c0_905 = arith.constant 0 : index
    %1322 = vector.load %arg45[%c0_904, %c0_905] : memref<1x32xf32, #tpu.memory_space<vmem>>, vector<1x32xf32>
    %c0_906 = arith.constant 0 : index
    %c0_907 = arith.constant 0 : index
    %1323 = vector.load %arg46[%c0_906, %c0_907] : memref<1x32xf32, #tpu.memory_space<vmem>>, vector<1x32xf32>
    %cst_908 = arith.constant dense<0.000000e+00> : vector<16xf32>
    %1324 = vector.multi_reduction <add>, %1321, %cst_908 [1] : vector<16x32xf32> to vector<16xf32>
    %1325 = vector.shape_cast %1324 : vector<16xf32> to vector<16x1xf32>
    %cst_909 = arith.constant 3.200000e+01 : f32
    %1326 = vector.broadcast %cst_909 : f32 to vector<16x1xf32>
    %1327 = arith.divf %1325, %1326 : vector<16x1xf32>
    %1328 = vector.broadcast %1327 : vector<16x1xf32> to vector<16x32xf32>
    %1329 = arith.subf %1321, %1328 : vector<16x32xf32>
    %1330 = arith.mulf %1329, %1329 : vector<16x32xf32>
    %cst_910 = arith.constant dense<0.000000e+00> : vector<16xf32>
    %1331 = vector.multi_reduction <add>, %1330, %cst_910 [1] : vector<16x32xf32> to vector<16xf32>
    %1332 = vector.shape_cast %1331 : vector<16xf32> to vector<16x1xf32>
    %cst_911 = arith.constant 0.0322580636 : f32
    %1333 = vector.broadcast %cst_911 : f32 to vector<16x1xf32>
    %1334 = arith.mulf %1332, %1333 : vector<16x1xf32>
    %1335 = math.sqrt %1334 : vector<16x1xf32>
    %cst_912 = arith.constant 9.99999997E-7 : f32
    %1336 = vector.broadcast %cst_912 : f32 to vector<16x1xf32>
    %1337 = arith.addf %1335, %1336 : vector<16x1xf32>
    %1338 = tpu.reciprocal %1337 {approx = true} : vector<16x1xf32> -> vector<16x1xf32>
    %1339 = vector.broadcast %1327 : vector<16x1xf32> to vector<16x32xf32>
    %1340 = arith.subf %1321, %1339 : vector<16x32xf32>
    %1341 = vector.broadcast %1322 : vector<1x32xf32> to vector<16x32xf32>
    %1342 = arith.mulf %1341, %1340 : vector<16x32xf32>
    %1343 = vector.broadcast %1338 : vector<16x1xf32> to vector<16x32xf32>
    %1344 = arith.mulf %1342, %1343 : vector<16x32xf32>
    %1345 = vector.broadcast %1323 : vector<1x32xf32> to vector<16x32xf32>
    %1346 = arith.addf %1344, %1345 : vector<16x32xf32>
    %c0_913 = arith.constant 0 : index
    %c0_914 = arith.constant 0 : index
    %1347 = vector.load %arg47[%c0_913, %c0_914] : memref<32x128xf32, #tpu.memory_space<vmem>>, vector<32x128xf32>
    %cst_915 = arith.constant dense<0.000000e+00> : vector<16x128xf32>
    %1348 = tpu.matmul %1346, %1347, %cst_915 {dimension_numbers = #tpu.dot_dimension_numbers<[1], [0], [0], [1], [0, 0, 1, 1], [], []>} : vector<16x32xf32>, vector<32x128xf32>, vector<16x128xf32> -> vector<16x128xf32>
    %c0_916 = arith.constant 0 : index
    %c0_917 = arith.constant 0 : index
    %1349 = vector.load %arg48[%c0_916, %c0_917] : memref<1x128xf32, #tpu.memory_space<vmem>>, vector<1x128xf32>
    %1350 = vector.broadcast %1349 : vector<1x128xf32> to vector<16x128xf32>
    %1351 = arith.addf %1348, %1350 : vector<16x128xf32>
    %c0_918 = arith.constant 0 : index
    %c0_919 = arith.constant 0 : index
    %1352 = vector.load %arg49[%c0_918, %c0_919] : memref<16x128xf32, #tpu.memory_space<vmem>>, vector<16x128xf32>
    tpu.vector_store %arg49[%c0_918, %c0_919], %1351 {strides = array<i32>} : memref<16x128xf32, #tpu.memory_space<vmem>>, vector<16x128xf32>,
    return
  }
}

</mosaic_0001>

<bundles_post_ra>
// kernel: transformer_forward.1
= control target key start
LH: loop header
LB: loop body
LE: loop exit
PB: predicated region body
PF: predicated region fallthrough
CT: control target
= control target key end

     0   :  { %v18460_v0 = vmov 0   ;;  %s18461_s6 = smov 4   ;;  %v218_v11 = vlaneseq  ;;  %vm230_vm0 = vcmask 523264   ;;  %v18462_v14 = vmov 0.0   ;;  %s18463_s10 = smov 6   ;;  %s20294_s0 = inlined_call_operand.smem [shape: u32[50], index: -1, kind: input, shape index: {}] }
   0x1   :  { %18160 = vset.pattern.permute.xlu0 %v18460_v0  ;;  %s1_s5 = sld [smem:[%s20294_s0]]   ;;  %18161 = vset.pattern.permute.xlu1 %v18460_v0  ;;  %vm415_vm3 = vcmask 261120   ;;  %s18464_s14 = smov 1   ;;  %vm738_vm10 = vcmask 64512   ;;  %vm826_vm11 = vcmask 130048  }
   0x2   :  { %s15008_s9 = sld [smem:[%s20294_s0 + %s18461_s6]]   ;;  %v18522_v12 = vand.u32 127, %v218_v11  ;;  %s18465_s18 = smov 5  }
   0x3   :  { %s18533_s13 = sld [smem:[%s20294_s0 + %s18463_s10]]   ;;  %s18466_s22 = smov 7  }
   0x4   :  { %s15005_s17 = sld [smem:[%s20294_s0 + %s18464_s14]]   ;;  %s18467_s26 = smov 9  }
   0x5   :  { %s15009_s21 = sld [smem:[%s20294_s0 + %s18465_s18]]   ;;  %s18468_s30 = smov 11  }
   0x6   :  { %s18566_s25 = sld [smem:[%s20294_s0 + %s18466_s22]]   ;;  %s18469_s4 = smov 19  }
   0x7   :  { %v208_v1 = vld [vmem:[%s1_s5] sm:$0xff]  ;;  %v209_v4 = vld [vmem:[%s1_s5 + $0x8] sm:$0xff]  ;;  %s18571_s29 = sld [smem:[%s20294_s0 + %s18467_s26]]   ;;  %s18470_s8 = smov 20  }
   0x8   :  { %221 = vperm.xlu0 %18160, %v208_v1   ;;  %v217_v2 = vld [vmem:[%s15008_s9 + $0x38] sm:$0xff]  ;;  %v216_v3 = vld [vmem:[%s15008_s9 + $0x30] sm:$0xff]  ;;  %v215_v5 = vld [vmem:[%s15008_s9 + $0x28] sm:$0xff]  ;;  %s18579_s3 = sld [smem:[%s20294_s0 + %s18468_s30]]   ;;  %s18471_s12 = smov 10  }
   0x9   :  { %16692 = vmatprep.subr.mxu0 %v217_v2  ;;  %v214_v6 = vld [vmem:[%s15008_s9 + $0x20] sm:$0xff]  ;;  %v213_v7 = vld [vmem:[%s15008_s9 + $0x18] sm:$0xff]  ;;  %v212_v8 = vld [vmem:[%s15008_s9 + $0x10] sm:$0xff]  ;;  %s18599_s7 = sld [smem:[%s20294_s0 + %s18469_s4]]   ;;  %s18474_s26 = smov 2  }
   0xa   :  { %16693 = vmatpush3.msra.mxu0 %v217_v2  ;;  %v211_v9 = vld [vmem:[%s15008_s9 + $0x8] sm:$0xff]  ;;  %v210_v10 = vld [vmem:[%s15008_s9] sm:$0xff]  ;;  %s18604_s11 = sld [smem:[%s20294_s0 + %s18470_s8]]   ;;  %s18475_s1 = smov 13  }
   0xb   :  { %16694 = vmatprep.subr.mxu0 %v216_v3  ;;  %v206_v19 = vld [vmem:[%s18533_s13] sm:$0xff]  ;;  %v207_v20 = vld [vmem:[%s18533_s13 + $0x8] sm:$0xff]  ;;  %v321_v38 = vld [vmem:[%s15009_s21 + $0x38] sm:$0xff]  ;;  %s18633_s16 = sld [smem:[%s20294_s0 + %s18471_s12]]   ;;  %s18476_s6 = smov 14  }
   0xc   :  { %224 = vperm.xlu0 %18160, %v209_v4   ;;  %16695 = vmatpush3.msra.mxu0 %v216_v3  ;;  %v312_v36 = vld [vmem:[%s15005_s17] sm:$0xff]  ;;  %v313_v37 = vld [vmem:[%s15005_s17 + $0x8] sm:$0xff]  ;;  %v320_v39 = vld [vmem:[%s15009_s21 + $0x30] sm:$0xff]  ;;  %s18472_s17 = smov 8   ;;  %s18677_s30 = sld [smem:[%s20294_s0 + %s18474_s26]]  }
   0xd   :  { %16696 = vmatprep.subr.mxu0 %v215_v5  ;;  %16711 = vmatprep.subr.mxu1 %v321_v38  ;;  %v319_v40 = vld [vmem:[%s15009_s21 + $0x28] sm:$0xff]  ;;  %v318_v41 = vld [vmem:[%s15009_s21 + $0x20] sm:$0xff]  ;;  %v317_v42 = vld [vmem:[%s15009_s21 + $0x18] sm:$0xff]  ;;  %s18640_s20 = sld [smem:[%s20294_s0 + %s18472_s17]]   ;;  %s18477_s12 = smov 15  }
   0xe   :  { %16697 = vmatpush3.msra.mxu0 %v215_v5  ;;  %16712 = vmatpush3.msra.mxu1 %v321_v38  ;;  %v316_v43 = vld [vmem:[%s15009_s21 + $0x10] sm:$0xff]  ;;  %v315_v44 = vld [vmem:[%s15009_s21 + $0x8] sm:$0xff]  ;;  %v314_v45 = vld [vmem:[%s15009_s21] sm:$0xff]  ;;  %s18473_s21 = smov 12   ;;  %s18719_s5 = sld [smem:[%s20294_s0 + %s18475_s1]]  }
   0xf   :  { %16698 = vmatprep.subr.mxu0 %v214_v6  ;;  %16713 = vmatprep.subr.mxu1 %v320_v39  ;;  %v477_v46 = vld [vmem:[%s18566_s25 + $0x18] sm:$0xff]  ;;  %v476_v48 = vld [vmem:[%s18566_s25 + $0x10] sm:$0xff]  ;;  %v475_v49 = vld [vmem:[%s18566_s25 + $0x8] sm:$0xff]  ;;  %s18648_s24 = sld [smem:[%s20294_s0 + %s18473_s21]]   ;;  %s18478_s18 = smov 17  }
  0x10   :  { %16699 = vmatpush3.msra.mxu0 %v214_v6  ;;  %16714 = vmatpush3.msra.mxu1 %v320_v39  ;;  %v569_v47 = vld [vmem:[%s18571_s29 + $0x18] sm:$0xff]  ;;  %v474_v50 = vld [vmem:[%s18566_s25] sm:$0xff]  ;;  %v568_v60 = vld [vmem:[%s18571_s29 + $0x10] sm:$0xff]  ;;  %s18830_s10 = sld [smem:[%s20294_s0 + %s18476_s6]]   ;;  %s18479_s23 = smov 16  }
  0x11   :  { %16700 = vmatprep.subr.mxu0 %v213_v7  ;;  %16715 = vmatprep.subr.mxu1 %v319_v40  ;;  %v18584_v51 = vld [vmem:[%s18579_s3 + $0x18] sm:$0xff]  ;;  %v567_v62 = vld [vmem:[%s18571_s29 + $0x8] sm:$0xff]  ;;  %v566_v1 = vld [vmem:[%s18571_s29] sm:$0xff]  ;;  %s18856_s17 = sld [smem:[%s20294_s0 + %s18477_s12]]   ;;  %s18480_s1 = smov 18  }
  0x12   :  { %16701 = vmatpush3.msra.mxu0 %v213_v7  ;;  %16716 = vmatpush3.msra.mxu1 %v319_v40  ;;  %v15058_v11 = vld [vmem:[%s18599_s7] ss:$0 sm:$0xff]  ;;  %v15078_v38 = vld [vmem:[%s18566_s25 + $0x38] sm:$0xff]  ;;  %s18865_s22 = sld [smem:[%s20294_s0 + %s18478_s18]]   ;;  %s18483_s8 = smov 42  }
  0x13   :  { %16702 = vmatprep.subr.mxu0 %v212_v8  ;;  %16717 = vmatprep.subr.mxu1 %v318_v41  ;;  %s18883_s28 = sld [smem:[%s20294_s0 + %s18479_s23]]   ;;  %s18486_s23 = smov 22  }
  0x14   :  { %16703 = vmatpush3.msra.mxu0 %v212_v8  ;;  %16718 = vmatpush3.msra.mxu1 %v318_v41  ;;  %s18891_s6 = sld [smem:[%s20294_s0 + %s18480_s1]]   ;;  %s18493_s2 = smov 43  }
  0x15   :  { %16704 = vmatprep.subr.mxu0 %v211_v9  ;;  %16719 = vmatprep.subr.mxu1 %v317_v42  ;;  %s19183_s12 = sld [smem:[%s20294_s0 + %s18483_s8]]   ;;  %s18497_s27 = smov 32  }
  0x16   :  { %16705 = vmatpush3.msra.mxu0 %v211_v9  ;;  %16720 = vmatpush3.msra.mxu1 %v317_v42  ;;  %s19231_s1 = sld [smem:[%s20294_s0 + %s18486_s23]]   ;;  %s18492_s23 = smov 31  }
  0x17   :  { %16706 = vmatprep.subr.mxu0 %v210_v10  ;;  %16721 = vmatprep.subr.mxu1 %v316_v43  ;;  %s18504_s4 = smov 38  }
  0x18   :  { %16707 = vmatpush3.msra.mxu0 %v210_v10  ;;  %16722 = vmatpush3.msra.mxu1 %v316_v43 }
  0x19   :  { %16723 = vmatprep.subr.mxu1 %v315_v44  ;;  %16730 = vmatprep.subr.mxu0 %v477_v46 }
  0x1a   :  { %16724 = vmatpush3.msra.mxu1 %v315_v44  ;;  %v15077_v44 = vld [vmem:[%s18566_s25 + $0x30] sm:$0xff] }
  0x1b   :  { %16725 = vmatprep.subr.mxu1 %v314_v45 }
  0x1c   :  { %16726 = vmatpush3.msra.mxu1 %v314_v45  ;;  %v15076_v45 = vld [vmem:[%s18566_s25 + $0x28] sm:$0xff] }
  0x1d   :  { %16741 = vmatprep.subr.mxu1 %v569_v47 }
  0x83   :  { %v222_v13 = vpop.permute.xlu0 %221 }
  0x84   :  { %vm226_vm1 = vcmp.eq.s32.totalorder %v222_v13, %v18522_v12 }
  0x85   :  { %v228_v15 = vsel %vm226_vm1, 1.0, %v18462_v14 }
  0x86   :  { %16708 = vmatprep.mubr.msk.f32.mxu0 %vm230_vm0, %v228_v15 }
  0x87   :  { %v225_v16 = vpop.permute.xlu0 %224 }
  0x88   :  { %vm227_vm2 = vcmp.eq.s32.totalorder %v225_v16, %v18522_v12 }
  0x89   :  { %v229_v17 = vsel %vm227_vm2, 1.0, %v18462_v14 }
  0x8a   :  { %16709 = vmatmul.mubr.msk.f32.vlgmr.msra.gmra.mxu0 %vm230_vm0, %v229_v17 }
  0x8b   :  { %16731 = vmatpush3.msra.mxu0 %v477_v46  ;;  %v15075_v46 = vld [vmem:[%s18566_s25 + $0x20] sm:$0xff] }
  0x8c   :  { %16732 = vmatprep.subr.mxu0 %v476_v48 }
  0x8d   :  { %16733 = vmatpush3.msra.mxu0 %v476_v48  ;;  %v15093_v48 = vld [vmem:[%s18579_s3 + $0x30] sm:$0xff] }
  0x8e   :  { %16734 = vmatprep.subr.mxu0 %v475_v49 }
  0x8f   :  { %16735 = vmatpush3.msra.mxu0 %v475_v49  ;;  %v15092_v49 = vld [vmem:[%s18579_s3 + $0x28] sm:$0xff] }
  0x90   :  { %16736 = vmatprep.subr.mxu0 %v474_v50 }
  0x91   :  { %16737 = vmatpush3.msra.mxu0 %v474_v50  ;;  %v15091_v50 = vld [vmem:[%s18579_s3 + $0x20] sm:$0xff] }
  0x92   :  { %16752 = vmatprep.subr.mxu0 %v18584_v51 }
 0x14a   :  { %v16710_v18 = vpop.f32.mrf.mxu0 }
 0x14b   :  { %v18539_v23 = vadd.f32 %v16710_v18, %v207_v20 }
 0x14c   :  { %v303_v21 = vpop.f32.mrf.mxu0 }
 0x14d   :  { %v18537_v22 = vadd.f32 %v303_v21, %v206_v19  ;;  %v419_v25 = vsel %vm415_vm3, %v18539_v23, 0.0  ;;  %v654_v21 = vld [vmem:[%s18579_s3 + $0x10] sm:$0xff] }
 0x14f   :  { %v416_v24 = vsel %vm415_vm3, %v18537_v22, 0.0 }
 0x150   :  { %417 = vadd.xlane.f32.xlu1 %v416_v24  ;;  %v653_v24 = vld [vmem:[%s18579_s3 + $0x8] sm:$0xff] }
 0x154   :  { %420 = vadd.xlane.f32.xlu1 %v419_v25  ;;  %v652_v25 = vld [vmem:[%s18579_s3] sm:$0xff] }
 0x1d9   :  { %v418_v26 = vpop.xlane.xlu1 %417 }
 0x1da   :  { %v423_v27 = vmul.f32 0.03125, %v418_v26 }
 0x1dc   :  { %v18546_v28 = vsub.f32 %v18537_v22, %v423_v27 }
 0x1dd   :  { %v421_v29 = vpop.xlane.xlu1 %420 }
 0x1de   :  { %v424_v30 = vmul.f32 0.03125, %v421_v29  ;;  %v427_v31 = vmul.f32 %v18546_v28, %v18546_v28 }
 0x1e0   :  { %v18551_v32 = vsub.f32 %v18539_v23, %v424_v30  ;;  %v429_v33 = vsel %vm415_vm3, %v427_v31, 0.0 }
 0x1e1   :  { %430 = vadd.xlane.f32.xlu0 %v429_v33 }
 0x1e2   :  { %v428_v34 = vmul.f32 %v18551_v32, %v18551_v32  ;;  %v462_v16 = vmul.f32 %v15058_v11, %v18551_v32  ;;  %v15060_v32 = vld [vmem:[%s18640_s20] ss:$0 sm:$0xff] }
 0x1e4   :  { %v432_v35 = vsel %vm415_vm3, %v428_v34, 0.0 }
 0x1e5   :  { %433 = vadd.xlane.f32.xlu1 %v432_v35 }
 0x1f6   :  { %323 = vperm.xlu1 %18161, %v312_v36  }
 0x1fa   :  { %326 = vperm.xlu1 %18161, %v313_v37   ;;  %v15066_v37 = vld [vmem:[%s18648_s24] ss:$0 sm:$0xff] }
 0x26a   :  { %v431_v52 = vpop.xlane.xlu0 %430 }
 0x26b   :  { %v435_v53 = vmul.f32 0.032258064, %v431_v52 }
 0x26d   :  { %18162 = vrsqrt.f32 %v435_v53  ;;  %vm439_vm6 = vcmp.eq.f32.partialorder %v435_v53, inf  ;;  %v442_v0 = vand.u32 2147483648, %v435_v53  ;;  %vm441_vm7 = vcmp.eq.f32.partialorder %v435_v53, 0.0 }
 0x26e   :  { %v434_v54 = vpop.xlane.xlu1 %433 }
 0x26f   :  { %v436_v55 = vmul.f32 0.032258064, %v434_v54 }
 0x271   :  { %18164 = vrsqrt.f32 %v436_v55  ;;  %vm446_vm8 = vcmp.eq.f32.partialorder %v436_v55, inf  ;;  %v449_v7 = vand.u32 2147483648, %v436_v55  ;;  %vm448_vm9 = vcmp.eq.f32.partialorder %v436_v55, 0.0 }
 0x272   :  { %v324_v56 = vpop.permute.xlu1 %323 }
 0x273   :  { %vm328_vm4 = vcmp.eq.s32.totalorder %v324_v56, %v18522_v12 }
 0x274   :  { %v330_v57 = vsel %vm328_vm4, 1.0, %v18462_v14 }
 0x275   :  { %16727 = vmatprep.mubr.msk.f32.mxu1 %vm230_vm0, %v330_v57 }
 0x276   :  { %v327_v58 = vpop.permute.xlu1 %326 }
 0x277   :  { %vm329_vm5 = vcmp.eq.s32.totalorder %v327_v58, %v18522_v12  ;;  %v461_v12 = vmul.f32 %v15058_v11, %v18546_v28  ;;  %v15063_v28 = vld [vmem:[%s18633_s16] ss:$0 sm:$0xff] }
 0x278   :  { %v331_v59 = vsel %vm329_vm5, 1.0, %v18462_v14  ;;  %v15059_v14 = vld [vmem:[%s18604_s11] ss:$0 sm:$0xff] }
 0x279   :  { %16728 = vmatmul.mubr.msk.f32.vlgmr.msra.gmra.mxu1 %vm230_vm0, %v331_v59  ;;  %v15080_v59 = vld [vmem:[%s18640_s20 + $0x1] ss:$0 sm:$0xff] }
 0x27a   :  { %v18163_v61 = vpop.eup %18162  ;;  %16742 = vmatpush3.msra.mxu1 %v569_v47  ;;  %v15094_v47 = vld [vmem:[%s18579_s3 + $0x38] sm:$0xff] }
 0x27b   :  { %v438_v63 = vmul.f32 %v18163_v61, %v435_v53  ;;  %16743 = vmatprep.subr.mxu1 %v568_v60 }
 0x27c   :  { %16744 = vmatpush3.msra.mxu1 %v568_v60 }
 0x27d   :  { %v440_v2 = vsel %vm439_vm6, %v435_v53, %v438_v63  ;;  %16745 = vmatprep.subr.mxu1 %v567_v62  ;;  %v18683_v53 = vld [vmem:[%s18677_s30] sm:$0xff] }
 0x27e   :  { %v18165_v3 = vpop.eup %18164  ;;  %v443_v4 = vsel %vm441_vm7, %v442_v0, %v440_v2  ;;  %16746 = vmatpush3.msra.mxu1 %v567_v62  ;;  %v15096_v63 = vld [vmem:[%s18648_s24 + $0x1] ss:$0 sm:$0xff] }
 0x27f   :  { %v451_v5 = vadd.f32 1e-06, %v443_v4  ;;  %v445_v6 = vmul.f32 %v18165_v3, %v436_v55  ;;  %16747 = vmatprep.subr.mxu1 %v566_v1 }
 0x280   :  { %16748 = vmatpush3.msra.mxu1 %v566_v1 }
 0x281   :  { %18166 = vrcp.f32 %v451_v5  ;;  %v447_v8 = vsel %vm446_vm8, %v436_v55, %v445_v6 }
 0x282   :  { %v450_v9 = vsel %vm448_vm9, %v449_v7, %v447_v8 }
 0x283   :  { %v452_v10 = vadd.f32 1e-06, %v450_v9 }
 0x285   :  { %18168 = vrcp.f32 %v452_v10 }
 0x28e   :  { %v18167_v13 = vpop.eup %18166 }
 0x28f   :  { %v463_v15 = vmul.f32 %v18167_v13, %v461_v12 }
 0x291   :  { %v18610_v17 = vadd.f32 %v15059_v14, %v463_v15 }
 0x292   :  { %v18169_v18 = vpop.eup %18168 }
 0x293   :  { %v464_v19 = vmul.f32 %v18169_v18, %v462_v16  ;;  %16738 = vmatprep.mubr.msk.f32.mxu0 %vm415_vm3, %v18610_v17  ;;  %16749 = vmatprep.mubr.msk.f32.mxu1 %vm415_vm3, %v18610_v17 }
 0x295   :  { %v18616_v20 = vadd.f32 %v15059_v14, %v464_v19  ;;  %v15086_v14 = vld [vmem:[%s18571_s29 + $0x38] sm:$0xff] }
 0x297   :  { %16739 = vmatmul.mubr.msk.f32.vlgmr.msra.gmra.mxu0 %vm415_vm3, %v18616_v20  ;;  %16750 = vmatmul.mubr.msk.f32.vlgmr.msra.gmra.mxu1 %vm415_vm3, %v18616_v20 }
 0x298   :  { %16753 = vmatpush3.msra.mxu0 %v18584_v51  ;;  %16760 = vmatprep.mubr.msk.f32.mxu0 %vm415_vm3, %v18610_v17  ;;  %v18680_v51 = vld [vmem:[%s18677_s30 + $0x8] sm:$0xff] }
 0x299   :  { %16754 = vmatprep.subr.mxu0 %v654_v21 }
 0x29a   :  { %16755 = vmatpush3.msra.mxu0 %v654_v21 }
 0x29b   :  { %16756 = vmatprep.subr.mxu0 %v653_v24 }
 0x29c   :  { %16757 = vmatpush3.msra.mxu0 %v653_v24 }
 0x29d   :  { %16758 = vmatprep.subr.mxu0 %v652_v25 }
 0x29e   :  { %16759 = vmatpush3.msra.mxu0 %v652_v25  ;;  %v15085_v25 = vld [vmem:[%s18571_s29 + $0x30] sm:$0xff] }
 0x29f   :  { %16761 = vmatmul.mubr.msk.f32.vlgmr.msra.gmra.mxu0 %vm415_vm3, %v18616_v20 }
 0x339   :  { %v18635_v26 = vpop.f32.mrf.mxu1 }
 0x33b   :  { %v18642_v27 = vpop.f32.mrf.mxu1 }
 0x357   :  { %v16740_v29 = vpop.f32.mrf.mxu0  ;;  %v16751_v30 = vpop.f32.mrf.mxu1 }
 0x358   :  { %v649_v31 = vadd.f32 %v16751_v30, %v15063_v28  ;;  %v563_v40 = vadd.f32 %v16740_v29, %v15060_v32  ;;  %v15083_v29 = vld [vmem:[%s18571_s29 + $0x20] sm:$0xff] }
 0x359   :  { %v557_v33 = vpop.f32.mrf.mxu0  ;;  %v643_v34 = vpop.f32.mrf.mxu1 }
 0x35a   :  { %v558_v35 = vadd.f32 %v15060_v32, %v557_v33  ;;  %v644_v36 = vadd.f32 %v15063_v28, %v643_v34  ;;  %16763 = vmatprep.subr.msk.mxu1 %vm738_vm10, %v649_v31  ;;  %v15084_v28 = vld [vmem:[%s18571_s29 + $0x28] sm:$0xff]  ;;  %v15088_v33 = vld [vmem:[%s18633_s16 + $0x1] ss:$0 sm:$0xff] }
 0x35b   :  { %16764 = vmatpush3.xpose.msk.msra.mxu1 %vm738_vm10, %v649_v31 }
 0x35c   :  { %16765 = vmatprep.subr.msk.mxu1 %vm738_vm10, %v644_v36  ;;  %16767 = vmatprep.mubr.msk.f32.mxu1 %vm738_vm10, %v558_v35 }
 0x35f   :  { %v16762_v39 = vpop.f32.mrf.mxu0  ;;  %16766 = vmatpush3.xpose.msk.msra.mxu1 %vm738_vm10, %v644_v36 }
 0x360   :  { %v735_v41 = vadd.f32 %v16762_v39, %v15066_v37  ;;  %16777 = vmatprep.subr.mxu1 %v15078_v38 }
 0x361   :  { %v729_v42 = vpop.f32.mrf.mxu0 }
 0x362   :  { %v730_v43 = vadd.f32 %v15066_v37, %v729_v42  ;;  %16770 = vmatprep.subr.mxu0 %v735_v41  ;;  %16768 = vmatmul.mubr.msk.f32.vlgmr.msra.gmra.mxu1 %vm738_vm10, %v563_v40 }
 0x363   :  { %16771 = vmatpush3.msra.mxu0 %v735_v41  ;;  %16778 = vmatpush3.msra.mxu1 %v15078_v38 }
 0x364   :  { %16772 = vmatprep.subr.mxu0 %v730_v43  ;;  %16785 = vmatprep.mubr.msk.f32.mxu1 %vm415_vm3, %v18610_v17 }
 0x365   :  { %16773 = vmatpush3.msra.mxu0 %v730_v43  ;;  %16779 = vmatprep.subr.mxu1 %v15077_v44 }
 0x366   :  { %16780 = vmatpush3.msra.mxu1 %v15077_v44  ;;  %16788 = vmatprep.subr.mxu0 %v15086_v14 }
 0x367   :  { %16781 = vmatprep.subr.mxu1 %v15076_v45 }
 0x368   :  { %16782 = vmatpush3.msra.mxu1 %v15076_v45 }
 0x369   :  { %16783 = vmatprep.subr.mxu1 %v15075_v46 }
 0x36a   :  { %16784 = vmatpush3.msra.mxu1 %v15075_v46 }
 0x36b   :  { %16786 = vmatmul.mubr.msk.f32.vlgmr.msra.gmra.mxu1 %vm415_vm3, %v18616_v20  ;;  %16799 = vmatprep.subr.mxu1 %v15094_v47 }
 0x36c   :  { %16800 = vmatpush3.msra.mxu1 %v15094_v47  ;;  %16807 = vmatprep.mubr.msk.f32.mxu1 %vm415_vm3, %v18610_v17 }
 0x36d   :  { %16801 = vmatprep.subr.mxu1 %v15093_v48 }
 0x36e   :  { %16802 = vmatpush3.msra.mxu1 %v15093_v48 }
 0x36f   :  { %16803 = vmatprep.subr.mxu1 %v15092_v49 }
 0x370   :  { %16804 = vmatpush3.msra.mxu1 %v15092_v49 }
 0x371   :  { %16805 = vmatprep.subr.mxu1 %v15091_v50 }
 0x372   :  { %16806 = vmatpush3.msra.mxu1 %v15091_v50 }
 0x373   :  { %16808 = vmatmul.mubr.msk.f32.vlgmr.msra.gmra.mxu1 %vm415_vm3, %v18616_v20 }
 0x422   :  { %v16769_v52 = vpop.f32.mrf.mxu1 }
 0x423   :  { %v823_v54 = vadd.f32 %v16769_v52, %v18680_v51 }
 0x424   :  { %v817_v55 = vpop.f32.mrf.mxu1 }
 0x425   :  { %v818_v56 = vadd.f32 %v817_v55, %v18683_v53  ;;  %v830_v57 = vsel %vm826_vm11, %v823_v54, -inf }
 0x426   :  { %831 = vmax.xlane.f32.xlu0 %v830_v57  ;;  %v15105_v57 = vld [vmem:[%s18719_s5 + $0x8] sm:$0xff] }
 0x427   :  { %v827_v58 = vsel %vm826_vm11, %v818_v56, -inf }
 0x428   :  { %828 = vmax.xlane.f32.xlu1 %v827_v58 }
 0x42b   :  { %v16787_v60 = vpop.f32.mrf.mxu1 }
 0x42c   :  { %v1016_v61 = vadd.f32 %v16787_v60, %v15080_v59 }
 0x42d   :  { %v1010_v62 = vpop.f32.mrf.mxu1 }
 0x42e   :  { %v1011_v30 = vadd.f32 %v15080_v59, %v1010_v62 }
 0x433   :  { %v16809_v0 = vpop.f32.mrf.mxu1 }
 0x434   :  { %v1192_v1 = vadd.f32 %v16809_v0, %v15096_v63  ;;  %v15121_v0 = vld [vmem:[%s18571_s29 + $0x58] sm:$0xff] }
 0x435   :  { %v1186_v2 = vpop.f32.mrf.mxu1 }
 0x436   :  { %v1187_v3 = vadd.f32 %v15096_v63, %v1186_v2  ;;  %16817 = vmatprep.subr.mxu1 %v1192_v1  ;;  %v15119_v2 = vld [vmem:[%s18571_s29 + $0x48] sm:$0xff] }
 0x437   :  { %16818 = vmatpush3.msra.mxu1 %v1192_v1  ;;  %v15120_v1 = vld [vmem:[%s18571_s29 + $0x50] sm:$0xff] }
 0x438   :  { %16819 = vmatprep.subr.mxu1 %v1187_v3 }
 0x439   :  { %16820 = vmatpush3.msra.mxu1 %v1187_v3  ;;  %v15118_v3 = vld [vmem:[%s18571_s29 + $0x40] sm:$0xff] }
 0x4af   :  { %v832_v4 = vpop.xlane.xlu0 %831 }
 0x4b0   :  { %v834_v5 = vsub.f32 %v823_v54, %v832_v4  ;;  %v15113_v4 = vld [vmem:[%s18566_s25 + $0x58] sm:$0xff] }
 0x4b1   :  { %v829_v6 = vpop.xlane.xlu1 %828 }
 0x4b2   :  { %v833_v7 = vsub.f32 %v818_v56, %v829_v6  ;;  %v837_v8 = vmul.f32 1.442695, %v834_v5  ;;  %v930_v56 = vld [vmem:[%s18719_s5] sm:$0xff] }
 0x4b3   :  { %16829 = vmatprep.subr.mxu1 %v930_v56 }
 0x4b4   :  { %v835_v9 = vmul.f32 1.442695, %v833_v7  ;;  %v15112_v7 = vld [vmem:[%s18566_s25 + $0x50] sm:$0xff] }
 0x4b6   :  { %18170 = vpow2.f32 %v835_v9 }
 0x4b7   :  { %18172 = vpow2.f32 %v837_v8  ;;  %v15111_v8 = vld [vmem:[%s18566_s25 + $0x48] sm:$0xff] }
 0x4c3   :  { %v18171_v10 = vpop.eup %18170 }
 0x4c4   :  { %v839_v11 = vsel %vm826_vm11, %v18171_v10, 0.0  ;;  %v18173_v12 = vpop.eup %18172 }
 0x4c5   :  { %840 = vadd.xlane.f32.xlu0 %v839_v11  ;;  %v842_v13 = vsel %vm826_vm11, %v18173_v12, 0.0  ;;  %v15129_v11 = vld [vmem:[%s18579_s3 + $0x58] sm:$0xff] }
 0x4c9   :  { %843 = vadd.xlane.f32.xlu0 %v842_v13  ;;  %v15123_v13 = vld [vmem:[%s18633_s16 + $0x2] ss:$0 sm:$0xff] }
 0x54e   :  { %v841_v15 = vpop.xlane.xlu0 %840 }
 0x54f   :  { %18174 = vrcp.f32 %v841_v15 }
 0x552   :  { %v844_v16 = vpop.xlane.xlu0 %843 }
 0x553   :  { %18176 = vrcp.f32 %v844_v16 }
 0x55c   :  { %v18175_v18 = vpop.eup %18174 }
 0x55d   :  { %v847_v19 = vmul.f32 %v18175_v18, %v18171_v10  ;;  %v15110_v10 = vld [vmem:[%s18566_s25 + $0x40] sm:$0xff]  ;;  %v15127_v18 = vld [vmem:[%s18579_s3 + $0x48] sm:$0xff] }
 0x55f   :  { %16774 = vmatprep.mubr.msk.f32.mxu0 %vm826_vm11, %v847_v19 }
 0x560   :  { %v18177_v21 = vpop.eup %18176 }
 0x561   :  { %v848_v24 = vmul.f32 %v18177_v21, %v18173_v12 }
 0x563   :  { %16775 = vmatmul.mubr.msk.f32.vlgmr.msra.gmra.mxu0 %vm826_vm11, %v848_v24  ;;  %v15126_v24 = vld [vmem:[%s18579_s3 + $0x40] sm:$0xff] }
 0x564   :  { %16789 = vmatpush3.msra.mxu0 %v15086_v14  ;;  %16796 = vmatprep.mubr.msk.f32.mxu0 %vm415_vm3, %v18610_v17  ;;  %v15128_v14 = vld [vmem:[%s18579_s3 + $0x50] sm:$0xff] }
 0x565   :  { %16790 = vmatprep.subr.mxu0 %v15085_v25 }
 0x566   :  { %16791 = vmatpush3.msra.mxu0 %v15085_v25 }
 0x567   :  { %16792 = vmatprep.subr.mxu0 %v15084_v28 }
 0x568   :  { %16793 = vmatpush3.msra.mxu0 %v15084_v28 }
 0x569   :  { %16794 = vmatprep.subr.mxu0 %v15083_v29 }
 0x56a   :  { %16795 = vmatpush3.msra.mxu0 %v15083_v29 }
 0x56b   :  { %16797 = vmatmul.mubr.msk.f32.vlgmr.msra.gmra.mxu0 %vm415_vm3, %v18616_v20 }
 0x56c   :  { %16814 = vmatprep.mubr.msk.f32.mxu0 %vm738_vm10, %v1011_v30  ;;  %v15115_v30 = vld [vmem:[%s18640_s20 + $0x2] ss:$0 sm:$0xff] }
 0x623   :  { %v16776_v31 = vpop.f32.mrf.mxu0 }
 0x625   :  { %v921_v32 = vpop.f32.mrf.mxu0 }
 0x62b   :  { %v16798_v34 = vpop.f32.mrf.mxu0 }
 0x62c   :  { %v1104_v35 = vadd.f32 %v16798_v34, %v15088_v33  ;;  %v15131_v34 = vld [vmem:[%s18648_s24 + $0x2] ss:$0 sm:$0xff] }
 0x62d   :  { %v1098_v36 = vpop.f32.mrf.mxu0 }
 0x62e   :  { %v1099_v37 = vadd.f32 %v15088_v33, %v1098_v36  ;;  %16810 = vmatprep.subr.msk.mxu0 %vm738_vm10, %v1104_v35 }
 0x62f   :  { %16811 = vmatpush3.xpose.msk.msra.mxu0 %vm738_vm10, %v1104_v35 }
 0x630   :  { %16812 = vmatprep.subr.msk.mxu0 %vm738_vm10, %v1099_v37 }
 0x633   :  { %16813 = vmatpush3.xpose.msk.msra.mxu0 %vm738_vm10, %v1099_v37 }
 0x634   :  { %16824 = vmatprep.subr.mxu0 %v15105_v57 }
 0x636   :  { %16815 = vmatmul.mubr.msk.f32.vlgmr.msra.gmra.mxu0 %vm738_vm10, %v1016_v61 }
 0x637   :  { %16825 = vmatpush3.msra.mxu0 %v15105_v57  ;;  %v15146_v57 = vld [vmem:[%s18566_s25 + $0x78] sm:$0xff] }
 0x638   :  { %16834 = vmatprep.subr.mxu0 %v15113_v4 }
 0x6f6   :  { %v16816_v38 = vpop.f32.mrf.mxu0 }
 0x6f7   :  { %v1279_v41 = vadd.f32 %v16816_v38, %v18680_v51 }
 0x6f8   :  { %v1273_v39 = vpop.f32.mrf.mxu0 }
 0x6f9   :  { %v1274_v40 = vadd.f32 %v1273_v39, %v18683_v53  ;;  %v1285_v43 = vsel %vm826_vm11, %v1279_v41, -inf }
 0x6fb   :  { %v1282_v42 = vsel %vm826_vm11, %v1274_v40, -inf }
 0x6fc   :  { %1283 = vmax.xlane.f32.xlu0 %v1282_v42 }
 0x700   :  { %1286 = vmax.xlane.f32.xlu0 %v1285_v43 }
 0x785   :  { %v1284_v44 = vpop.xlane.xlu0 %1283 }
 0x786   :  { %v1288_v45 = vsub.f32 %v1274_v40, %v1284_v44 }
 0x788   :  { %v1290_v46 = vmul.f32 1.442695, %v1288_v45 }
 0x789   :  { %v1287_v47 = vpop.xlane.xlu0 %1286 }
 0x78a   :  { %18178 = vpow2.f32 %v1290_v46  ;;  %v1289_v48 = vsub.f32 %v1279_v41, %v1287_v47 }
 0x78c   :  { %v1292_v49 = vmul.f32 1.442695, %v1289_v48 }
 0x78e   :  { %18180 = vpow2.f32 %v1292_v49 }
 0x797   :  { %v18179_v50 = vpop.eup %18178 }
 0x798   :  { %v1294_v52 = vsel %vm826_vm11, %v18179_v50, 0.0 }
 0x799   :  { %1295 = vadd.xlane.f32.xlu0 %v1294_v52 }
 0x79b   :  { %v18181_v54 = vpop.eup %18180 }
 0x79c   :  { %v1297_v55 = vsel %vm826_vm11, %v18181_v54, 0.0 }
 0x79d   :  { %1298 = vadd.xlane.f32.xlu0 %v1297_v55 }
 0x822   :  { %v1296_v58 = vpop.xlane.xlu0 %1295 }
 0x823   :  { %18182 = vrcp.f32 %v1296_v58  ;;  %v15140_v58 = vld [vmem:[%s18719_s5 + $0x10] sm:$0xff] }
 0x826   :  { %v1299_v59 = vpop.xlane.xlu0 %1298 }
 0x827   :  { %18184 = vrcp.f32 %v1299_v59 }
 0x830   :  { %v18183_v60 = vpop.eup %18182 }
 0x831   :  { %v1302_v61 = vmul.f32 %v18183_v60, %v18179_v50 }
 0x833   :  { %16821 = vmatprep.mubr.msk.f32.mxu1 %vm826_vm11, %v1302_v61 }
 0x834   :  { %v18185_v62 = vpop.eup %18184 }
 0x835   :  { %v1303_v63 = vmul.f32 %v18185_v62, %v18181_v54 }
 0x837   :  { %16822 = vmatmul.mubr.msk.f32.vlgmr.msra.gmra.mxu1 %vm826_vm11, %v1303_v63 }
 0x838   :  { %16831 = vmatprep.mubr.msk.f32.mxu1 %vm738_vm10, %v921_v32  ;;  %16830 = vmatpush3.msra.mxu1 %v930_v56 }
 0x839   :  { %16845 = vmatprep.subr.mxu1 %v15121_v0 }
 0x83b   :  { %16832 = vmatmul.mubr.msk.f32.vlgmr.msra.gmra.mxu1 %vm738_vm10, %v16776_v31 }
 0x83c   :  { %16846 = vmatpush3.msra.mxu1 %v15121_v0  ;;  %16853 = vmatprep.mubr.msk.f32.mxu1 %vm415_vm3, %v18610_v17 }
 0x83d   :  { %16847 = vmatprep.subr.mxu1 %v15120_v1 }
 0x83e   :  { %16848 = vmatpush3.msra.mxu1 %v15120_v1  ;;  %v15145_v1 = vld [vmem:[%s18566_s25 + $0x70] sm:$0xff] }
 0x83f   :  { %16849 = vmatprep.subr.mxu1 %v15119_v2 }
 0x840   :  { %16850 = vmatpush3.msra.mxu1 %v15119_v2  ;;  %v15144_v2 = vld [vmem:[%s18566_s25 + $0x68] sm:$0xff] }
 0x841   :  { %16851 = vmatprep.subr.mxu1 %v15118_v3 }
 0x842   :  { %16852 = vmatpush3.msra.mxu1 %v15118_v3  ;;  %v15143_v3 = vld [vmem:[%s18566_s25 + $0x60] sm:$0xff] }
 0x843   :  { %16854 = vmatmul.mubr.msk.f32.vlgmr.msra.gmra.mxu1 %vm415_vm3, %v18616_v20 }
 0x8f7   :  { %v16823_v5 = vpop.f32.mrf.mxu1 }
 0x8f9   :  { %v1376_v6 = vpop.f32.mrf.mxu1 }
 0x8fa   :  { %16826 = vmatprep.mubr.msk.f32.mxu0 %vm738_vm10, %v1376_v6  ;;  %v15160_v6 = vld [vmem:[%s18579_s3 + $0x68] sm:$0xff] }
 0x8fb   :  { %16827 = vmatmul.mubr.msk.f32.vlgmr.msra.gmra.mxu0 %vm738_vm10, %v16823_v5  ;;  %v18742_v9 = vpop.f32.mrf.mxu1  ;;  %v15161_v5 = vld [vmem:[%s18579_s3 + $0x70] sm:$0xff] }
 0x8fc   :  { %16835 = vmatpush3.msra.mxu0 %v15113_v4  ;;  %16842 = vmatprep.mubr.msk.f32.mxu0 %vm415_vm3, %v18610_v17  ;;  %v15162_v4 = vld [vmem:[%s18579_s3 + $0x78] sm:$0xff] }
 0x8fd   :  { %16836 = vmatprep.subr.mxu0 %v15112_v7  ;;  %v18746_v12 = vpop.f32.mrf.mxu1 }
 0x8fe   :  { %16837 = vmatpush3.msra.mxu0 %v15112_v7  ;;  %v15159_v7 = vld [vmem:[%s18579_s3 + $0x60] sm:$0xff] }
 0x8ff   :  { %16838 = vmatprep.subr.mxu0 %v15111_v8 }
 0x900   :  { %16839 = vmatpush3.msra.mxu0 %v15111_v8  ;;  %v15154_v8 = vld [vmem:[%s18571_s29 + $0x78] sm:$0xff] }
 0x901   :  { %16840 = vmatprep.subr.mxu0 %v15110_v10 }
 0x902   :  { %16841 = vmatpush3.msra.mxu0 %v15110_v10 }
 0x903   :  { %16843 = vmatmul.mubr.msk.f32.vlgmr.msra.gmra.mxu0 %vm415_vm3, %v18616_v20  ;;  %v16855_v15 = vpop.f32.mrf.mxu1  ;;  %16856 = vmatprep.subr.mxu0 %v15129_v11 }
 0x904   :  { %v1722_v16 = vadd.f32 %v16855_v15, %v15123_v13  ;;  %16857 = vmatpush3.msra.mxu0 %v15129_v11  ;;  %16864 = vmatprep.mubr.msk.f32.mxu0 %vm415_vm3, %v18610_v17  ;;  %v15148_v15 = vld [vmem:[%s18640_s20 + $0x3] ss:$0 sm:$0xff] }
 0x905   :  { %v1716_v19 = vpop.f32.mrf.mxu1  ;;  %16858 = vmatprep.subr.mxu0 %v15128_v14 }
 0x906   :  { %v1717_v21 = vadd.f32 %v15123_v13, %v1716_v19  ;;  %16859 = vmatpush3.msra.mxu0 %v15128_v14  ;;  %16867 = vmatprep.subr.msk.mxu1 %vm738_vm10, %v1722_v16  ;;  %v15153_v13 = vld [vmem:[%s18571_s29 + $0x70] sm:$0xff]  ;;  %v15152_v14 = vld [vmem:[%s18571_s29 + $0x68] sm:$0xff] }
 0x907   :  { %16860 = vmatprep.subr.mxu0 %v15127_v18  ;;  %16868 = vmatpush3.xpose.msk.msra.mxu1 %vm738_vm10, %v1722_v16  ;;  %v15151_v16 = vld [vmem:[%s18571_s29 + $0x60] sm:$0xff] }
 0x908   :  { %16861 = vmatpush3.msra.mxu0 %v15127_v18  ;;  %16869 = vmatprep.subr.msk.mxu1 %vm738_vm10, %v1717_v21 }
 0x909   :  { %16862 = vmatprep.subr.mxu0 %v15126_v24 }
 0x90a   :  { %16863 = vmatpush3.msra.mxu0 %v15126_v24 }
 0x90b   :  { %16865 = vmatmul.mubr.msk.f32.vlgmr.msra.gmra.mxu0 %vm415_vm3, %v18616_v20  ;;  %16870 = vmatpush3.xpose.msk.msra.mxu1 %vm738_vm10, %v1717_v21 }
 0x90c   :  { %16881 = vmatprep.subr.mxu1 %v15140_v58 }
 0x9bb   :  { %v18762_v25 = vpop.f32.mrf.mxu0 }
 0x9bd   :  { %v18764_v28 = vpop.f32.mrf.mxu0 }
 0x9c3   :  { %v16844_v29 = vpop.f32.mrf.mxu0 }
 0x9c4   :  { %v1634_v33 = vadd.f32 %v16844_v29, %v15115_v30 }
 0x9c5   :  { %v1628_v31 = vpop.f32.mrf.mxu0 }
 0x9c6   :  { %v1629_v32 = vadd.f32 %v15115_v30, %v1628_v31 }
 0x9c8   :  { %16871 = vmatprep.mubr.msk.f32.mxu1 %vm738_vm10, %v1629_v32 }
 0x9c9   :  { %16872 = vmatmul.mubr.msk.f32.vlgmr.msra.gmra.mxu1 %vm738_vm10, %v1634_v33  ;;  %v1546_v33 = vadd.f32 %v18742_v9, %v18762_v25 }
 0x9ca   :  { %16882 = vmatpush3.msra.mxu1 %v15140_v58 }
 0x9cb   :  { %v16866_v35 = vpop.f32.mrf.mxu0  ;;  %16897 = vmatprep.subr.mxu1 %v15154_v8 }
 0x9cc   :  { %v1810_v36 = vadd.f32 %v16866_v35, %v15131_v34 }
 0x9cd   :  { %v1804_v37 = vpop.f32.mrf.mxu0 }
 0x9ce   :  { %v1805_v38 = vadd.f32 %v15131_v34, %v1804_v37  ;;  %16874 = vmatprep.subr.mxu0 %v1810_v36  ;;  %v15156_v37 = vld [vmem:[%s18633_s16 + $0x3] ss:$0 sm:$0xff] }
 0x9cf   :  { %16875 = vmatpush3.msra.mxu0 %v1810_v36 }
 0x9d0   :  { %16876 = vmatprep.subr.mxu0 %v1805_v38 }
 0x9d1   :  { %16877 = vmatpush3.msra.mxu0 %v1805_v38 }
 0x9d2   :  { %16886 = vmatprep.subr.mxu0 %v15146_v57 }
 0xa89   :  { %v16873_v39 = vpop.f32.mrf.mxu1 }
 0xa8a   :  { %v1897_v40 = vadd.f32 %v16873_v39, %v18680_v51 }
 0xa8b   :  { %v1891_v41 = vpop.f32.mrf.mxu1 }
 0xa8c   :  { %v1892_v42 = vadd.f32 %v1891_v41, %v18683_v53  ;;  %v1903_v43 = vsel %vm826_vm11, %v1897_v40, -inf }
 0xa8d   :  { %1904 = vmax.xlane.f32.xlu1 %v1903_v43 }
 0xa8e   :  { %v1900_v44 = vsel %vm826_vm11, %v1892_v42, -inf }
 0xa8f   :  { %1901 = vmax.xlane.f32.xlu0 %v1900_v44 }
 0xb16   :  { %v1905_v45 = vpop.xlane.xlu1 %1904 }
 0xb17   :  { %v1907_v46 = vsub.f32 %v1897_v40, %v1905_v45 }
 0xb18   :  { %v1902_v47 = vpop.xlane.xlu0 %1901 }
 0xb19   :  { %v1910_v48 = vmul.f32 1.442695, %v1907_v46  ;;  %v1906_v49 = vsub.f32 %v1892_v42, %v1902_v47 }
 0xb1b   :  { %18186 = vpow2.f32 %v1910_v48  ;;  %v1908_v50 = vmul.f32 1.442695, %v1906_v49 }
 0xb1d   :  { %18188 = vpow2.f32 %v1908_v50 }
 0xb28   :  { %v18187_v52 = vpop.eup %18186 }
 0xb29   :  { %v1915_v54 = vsel %vm826_vm11, %v18187_v52, 0.0 }
 0xb2a   :  { %v18189_v55 = vpop.eup %18188  ;;  %1916 = vadd.xlane.f32.xlu1 %v1915_v54 }
 0xb2b   :  { %v1912_v56 = vsel %vm826_vm11, %v18189_v55, 0.0 }
 0xb2c   :  { %1913 = vadd.xlane.f32.xlu0 %v1912_v56 }
 0xbb3   :  { %v1917_v59 = vpop.xlane.xlu1 %1916 }
 0xbb4   :  { %18190 = vrcp.f32 %v1917_v59 }
 0xbb5   :  { %v1914_v60 = vpop.xlane.xlu0 %1913 }
 0xbb6   :  { %18192 = vrcp.f32 %v1914_v60 }
 0xbc1   :  { %v18191_v61 = vpop.eup %18190 }
 0xbc2   :  { %v1921_v0 = vmul.f32 %v18191_v61, %v18187_v52 }
 0xbc3   :  { %v18193_v62 = vpop.eup %18192 }
 0xbc4   :  { %v1920_v63 = vmul.f32 %v18193_v62, %v18189_v55  ;;  %v15173_v55 = vld [vmem:[%s18719_s5 + $0x18] sm:$0xff] }
 0xbc6   :  { %16878 = vmatprep.mubr.msk.f32.mxu0 %vm826_vm11, %v1920_v63 }
 0xbc7   :  { %16879 = vmatmul.mubr.msk.f32.vlgmr.msra.gmra.mxu0 %vm826_vm11, %v1921_v0  ;;  %v1541_v0 = vadd.f32 %v18746_v12, %v18764_v28 }
 0xbc8   :  { %16887 = vmatpush3.msra.mxu0 %v15146_v57  ;;  %16894 = vmatprep.mubr.msk.f32.mxu0 %vm415_vm3, %v18610_v17 }
 0xbc9   :  { %16888 = vmatprep.subr.mxu0 %v15145_v1 }
 0xbca   :  { %16889 = vmatpush3.msra.mxu0 %v15145_v1  ;;  %v15176_v1 = vld [vmem:[%s18830_s10] ss:$0 sm:$0xff] }
 0xbcb   :  { %16890 = vmatprep.subr.mxu0 %v15144_v2 }
 0xbcc   :  { %16891 = vmatpush3.msra.mxu0 %v15144_v2 }
 0xbcd   :  { %16892 = vmatprep.subr.mxu0 %v15143_v3 }
 0xbce   :  { %16893 = vmatpush3.msra.mxu0 %v15143_v3 }
 0xbcf   :  { %16895 = vmatmul.mubr.msk.f32.vlgmr.msra.gmra.mxu0 %vm415_vm3, %v18616_v20  ;;  %16908 = vmatprep.subr.mxu0 %v15162_v4 }
 0xbd0   :  { %16909 = vmatpush3.msra.mxu0 %v15162_v4  ;;  %16916 = vmatprep.mubr.msk.f32.mxu0 %vm415_vm3, %v18610_v17 }
 0xbd1   :  { %16910 = vmatprep.subr.mxu0 %v15161_v5 }
 0xbd2   :  { %16911 = vmatpush3.msra.mxu0 %v15161_v5 }
 0xbd3   :  { %16912 = vmatprep.subr.mxu0 %v15160_v6 }
 0xbd4   :  { %16913 = vmatpush3.msra.mxu0 %v15160_v6 }
 0xbd5   :  { %16914 = vmatprep.subr.mxu0 %v15159_v7 }
 0xbd6   :  { %16915 = vmatpush3.msra.mxu0 %v15159_v7 }
 0xbd7   :  { %16917 = vmatmul.mubr.msk.f32.vlgmr.msra.gmra.mxu0 %vm415_vm3, %v18616_v20 }
 0xc87   :  { %v16880_v10 = vpop.f32.mrf.mxu0 }
 0xc89   :  { %v1994_v11 = vpop.f32.mrf.mxu0 }
 0xc8a   :  { %16883 = vmatprep.mubr.msk.f32.mxu1 %vm738_vm10, %v1994_v11 }
 0xc8b   :  { %16884 = vmatmul.mubr.msk.f32.vlgmr.msra.gmra.mxu1 %vm738_vm10, %v16880_v10 }
 0xc8c   :  { %16898 = vmatpush3.msra.mxu1 %v15154_v8  ;;  %16905 = vmatprep.mubr.msk.f32.mxu1 %vm415_vm3, %v18610_v17  ;;  %v15164_v17 = vld [vmem:[%s18648_s24 + $0x3] ss:$0 sm:$0xff] }
 0xc8d   :  { %16899 = vmatprep.subr.mxu1 %v15153_v13 }
 0xc8e   :  { %16900 = vmatpush3.msra.mxu1 %v15153_v13 }
 0xc8f   :  { %v16896_v18 = vpop.f32.mrf.mxu0  ;;  %16901 = vmatprep.subr.mxu1 %v15152_v14 }
 0xc90   :  { %v2173_v19 = vadd.f32 %v16896_v18, %v15148_v15  ;;  %16902 = vmatpush3.msra.mxu1 %v15152_v14 }
 0xc91   :  { %v2167_v21 = vpop.f32.mrf.mxu0  ;;  %16903 = vmatprep.subr.mxu1 %v15151_v16 }
 0xc92   :  { %v2168_v24 = vadd.f32 %v15148_v15, %v2167_v21  ;;  %16904 = vmatpush3.msra.mxu1 %v15151_v16 }
 0xc93   :  { %16906 = vmatmul.mubr.msk.f32.vlgmr.msra.gmra.mxu1 %vm415_vm3, %v18616_v20 }
 0xc94   :  { %16923 = vmatprep.mubr.msk.f32.mxu1 %vm738_vm10, %v2168_v24 }
 0xc97   :  { %v16918_v29 = vpop.f32.mrf.mxu0 }
 0xc98   :  { %v2349_v30 = vadd.f32 %v16918_v29, %v15164_v17  ;;  %v2699_v29 = vld [vmem:[%s18856_s17 + $0x10] sm:$0xff] }
 0xc99   :  { %v2343_v31 = vpop.f32.mrf.mxu0 }
 0xc9a   :  { %v2344_v32 = vadd.f32 %v15164_v17, %v2343_v31  ;;  %16926 = vmatprep.subr.mxu0 %v2349_v30  ;;  %v2700_v17 = vld [vmem:[%s18856_s17 + $0x18] sm:$0xff]  ;;  %v2697_v31 = vld [vmem:[%s18856_s17] sm:$0xff] }
 0xc9b   :  { %16927 = vmatpush3.msra.mxu0 %v2349_v30  ;;  %v2698_v30 = vld [vmem:[%s18856_s17 + $0x8] sm:$0xff] }
 0xc9c   :  { %16928 = vmatprep.subr.mxu0 %v2344_v32 }
 0xc9d   :  { %16929 = vmatpush3.msra.mxu0 %v2344_v32  ;;  %v2709_v32 = vld [vmem:[%s18865_s22 + $0x38] sm:$0xff] }
 0xc9e   :  { %16938 = vmatprep.subr.mxu0 %v2700_v17 }
 0xd4b   :  { %v16885_v34 = vpop.f32.mrf.mxu1 }
 0xd4c   :  { %v2087_v35 = vadd.f32 %v16885_v34, %v1546_v33  ;;  %v2708_v33 = vld [vmem:[%s18865_s22 + $0x30] sm:$0xff]  ;;  %v2707_v34 = vld [vmem:[%s18865_s22 + $0x28] sm:$0xff] }
 0xd4d   :  { %v2077_v36 = vpop.f32.mrf.mxu1 }
 0xd4e   :  { %v2086_v3 = vadd.f32 %v2077_v36, %v1541_v0 }
 0xd53   :  { %v16907_v38 = vpop.f32.mrf.mxu1 }
 0xd54   :  { %v2261_v20 = vadd.f32 %v16907_v38, %v15156_v37 }
 0xd55   :  { %v2255_v39 = vpop.f32.mrf.mxu1 }
 0xd56   :  { %v2256_v40 = vadd.f32 %v15156_v37, %v2255_v39  ;;  %16919 = vmatprep.subr.msk.mxu1 %vm738_vm10, %v2261_v20 }
 0xd57   :  { %16920 = vmatpush3.xpose.msk.msra.mxu1 %vm738_vm10, %v2261_v20 }
 0xd58   :  { %16921 = vmatprep.subr.msk.mxu1 %vm738_vm10, %v2256_v40 }
 0xd5b   :  { %16922 = vmatpush3.xpose.msk.msra.mxu1 %vm738_vm10, %v2256_v40 }
 0xd5c   :  { %16933 = vmatprep.subr.mxu1 %v15173_v55 }
 0xd5e   :  { %16924 = vmatmul.mubr.msk.f32.vlgmr.msra.gmra.mxu1 %vm738_vm10, %v2173_v19 }
 0xd5f   :  { %16934 = vmatpush3.msra.mxu1 %v15173_v55  ;;  %v15180_v55 = vld [vmem:[%s18604_s11 + $0x1] ss:$0 sm:$0xff] }
 0xd60   :  { %16949 = vmatprep.subr.mxu1 %v2709_v32 }
 0xe1e   :  { %v16925_v41 = vpop.f32.mrf.mxu1 }
 0xe1f   :  { %v2436_v9 = vadd.f32 %v16925_v41, %v18680_v51 }
 0xe20   :  { %v2430_v25 = vpop.f32.mrf.mxu1 }
 0xe21   :  { %v2431_v42 = vadd.f32 %v2430_v25, %v18683_v53  ;;  %v2442_v43 = vsel %vm826_vm11, %v2436_v9, -inf }
 0xe22   :  { %2443 = vmax.xlane.f32.xlu1 %v2442_v43 }
 0xe23   :  { %v2439_v44 = vsel %vm826_vm11, %v2431_v42, -inf }
 0xe24   :  { %2440 = vmax.xlane.f32.xlu0 %v2439_v44 }
 0xeab   :  { %v2444_v45 = vpop.xlane.xlu1 %2443 }
 0xeac   :  { %v2446_v46 = vsub.f32 %v2436_v9, %v2444_v45 }
 0xead   :  { %v2441_v47 = vpop.xlane.xlu0 %2440 }
 0xeae   :  { %v2449_v48 = vmul.f32 1.442695, %v2446_v46  ;;  %v2445_v49 = vsub.f32 %v2431_v42, %v2441_v47 }
 0xeb0   :  { %18194 = vpow2.f32 %v2449_v48  ;;  %v2447_v50 = vmul.f32 1.442695, %v2445_v49  ;;  %v15179_v49 = vld [vmem:[%s18599_s7 + $0x1] ss:$0 sm:$0xff] }
 0xeb2   :  { %18196 = vpow2.f32 %v2447_v50 }
 0xebd   :  { %v18195_v52 = vpop.eup %18194 }
 0xebe   :  { %v2454_v51 = vsel %vm826_vm11, %v18195_v52, 0.0 }
 0xebf   :  { %v18197_v54 = vpop.eup %18196  ;;  %2455 = vadd.xlane.f32.xlu1 %v2454_v51 }
 0xec0   :  { %v2451_v53 = vsel %vm826_vm11, %v18197_v54, 0.0 }
 0xec1   :  { %2452 = vadd.xlane.f32.xlu0 %v2451_v53 }
 0xf48   :  { %v2456_v56 = vpop.xlane.xlu1 %2455 }
 0xf49   :  { %18198 = vrcp.f32 %v2456_v56 }
 0xf4a   :  { %v2453_v57 = vpop.xlane.xlu0 %2452 }
 0xf4b   :  { %18200 = vrcp.f32 %v2453_v57 }
 0xf56   :  { %v18199_v58 = vpop.eup %18198 }
 0xf57   :  { %v2460_v61 = vmul.f32 %v18199_v58, %v18195_v52 }
 0xf58   :  { %v18201_v59 = vpop.eup %18200 }
 0xf59   :  { %v2459_v60 = vmul.f32 %v18201_v59, %v18197_v54  ;;  %v2705_v59 = vld [vmem:[%s18865_s22 + $0x18] sm:$0xff] }
 0xf5b   :  { %16930 = vmatprep.mubr.msk.f32.mxu0 %vm826_vm11, %v2459_v60  ;;  %v2704_v60 = vld [vmem:[%s18865_s22 + $0x10] sm:$0xff] }
 0xf5c   :  { %16931 = vmatmul.mubr.msk.f32.vlgmr.msra.gmra.mxu0 %vm826_vm11, %v2460_v61  ;;  %v2703_v61 = vld [vmem:[%s18865_s22 + $0x8] sm:$0xff] }
 0xf5d   :  { %16939 = vmatpush3.msra.mxu0 %v2700_v17 }
 0xf5e   :  { %16940 = vmatprep.subr.mxu0 %v2699_v29 }
 0xf5f   :  { %16941 = vmatpush3.msra.mxu0 %v2699_v29 }
 0xf60   :  { %16942 = vmatprep.subr.mxu0 %v2698_v30 }
 0xf61   :  { %16943 = vmatpush3.msra.mxu0 %v2698_v30  ;;  %v15195_v30 = vld [vmem:[%s18566_s25 + $0x98] sm:$0xff] }
 0xf62   :  { %16944 = vmatprep.subr.mxu0 %v2697_v31 }
 0xf63   :  { %16945 = vmatpush3.msra.mxu0 %v2697_v31  ;;  %v15211_v31 = vld [vmem:[%s18579_s3 + $0x98] sm:$0xff] }
 0xf64   :  { %16968 = vmatprep.subr.mxu0 %v15195_v30 }
0x101c   :  { %v16932_v62 = vpop.f32.mrf.mxu0 }
0x101e   :  { %v2533_v63 = vpop.f32.mrf.mxu0 }
0x101f   :  { %16935 = vmatprep.mubr.msk.f32.mxu1 %vm738_vm10, %v2533_v63  ;;  %v15181_v63 = vld [vmem:[%s18883_s28] ss:$0 sm:$0xff] }
0x1020   :  { %16936 = vmatmul.mubr.msk.f32.vlgmr.msra.gmra.mxu1 %vm738_vm10, %v16932_v62  ;;  %v2702_v62 = vld [vmem:[%s18865_s22] sm:$0xff] }
0x1021   :  { %16950 = vmatpush3.msra.mxu1 %v2709_v32  ;;  %v15194_v32 = vld [vmem:[%s18566_s25 + $0x90] sm:$0xff] }
0x1022   :  { %16951 = vmatprep.subr.mxu1 %v2708_v33 }
0x1023   :  { %16952 = vmatpush3.msra.mxu1 %v2708_v33  ;;  %v15210_v33 = vld [vmem:[%s18579_s3 + $0x90] sm:$0xff] }
0x1024   :  { %16953 = vmatprep.subr.mxu1 %v2707_v34 }
0x1025   :  { %16954 = vmatpush3.msra.mxu1 %v2707_v34  ;;  %v15193_v34 = vld [vmem:[%s18566_s25 + $0x88] sm:$0xff] }
0x10e0   :  { %v16937_v2 = vpop.f32.mrf.mxu1 }
0x10e1   :  { %v2626_v4 = vadd.f32 %v16937_v2, %v2087_v35  ;;  %v2706_v35 = vld [vmem:[%s18865_s22 + $0x20] sm:$0xff] }
0x10e2   :  { %v2616_v5 = vpop.f32.mrf.mxu1  ;;  %16955 = vmatprep.subr.mxu1 %v2706_v35 }
0x10e3   :  { %v2634_v6 = vadd.f32 %v15176_v1, %v2626_v4  ;;  %v2625_v7 = vadd.f32 %v2616_v5, %v2086_v3  ;;  %16956 = vmatpush3.msra.mxu1 %v2706_v35  ;;  %v15209_v35 = vld [vmem:[%s18579_s3 + $0x88] sm:$0xff] }
0x10e4   :  { %16957 = vmatprep.subr.mxu1 %v2705_v59 }
0x10e5   :  { %v18836_v8 = vadd.f32 %v2634_v6, %v18539_v23  ;;  %v2633_v10 = vadd.f32 %v15176_v1, %v2625_v7  ;;  %16958 = vmatpush3.msra.mxu1 %v2705_v59  ;;  %v15184_v6 = vld [vmem:[%s18891_s6] ss:$0 sm:$0xff] }
0x10e6   :  { %16959 = vmatprep.subr.mxu1 %v2704_v60 }
0x10e7   :  { %v2644_v11 = vsel %vm415_vm3, %v18836_v8, 0.0  ;;  %v18841_v13 = vadd.f32 %v2633_v10, %v18537_v22  ;;  %16960 = vmatpush3.msra.mxu1 %v2704_v60 }
0x10e8   :  { %2645 = vadd.xlane.f32.xlu1 %v2644_v11  ;;  %16961 = vmatprep.subr.mxu1 %v2703_v61 }
0x10e9   :  { %v2641_v12 = vsel %vm415_vm3, %v18841_v13, 0.0  ;;  %16962 = vmatpush3.msra.mxu1 %v2703_v61 }
0x10ea   :  { %2642 = vadd.xlane.f32.xlu0 %v2641_v12  ;;  %16963 = vmatprep.subr.mxu1 %v2702_v62 }
0x10eb   :  { %16964 = vmatpush3.msra.mxu1 %v2702_v62  ;;  %v15202_v62 = vld [vmem:[%s18571_s29 + $0x90] sm:$0xff] }
0x10ec   :  { %16990 = vmatprep.subr.mxu1 %v15211_v31 }
0x1171   :  { %v2646_v28 = vpop.xlane.xlu1 %2645 }
0x1172   :  { %v2648_v14 = vmul.f32 0.03125, %v2646_v28 }
0x1173   :  { %v2643_v15 = vpop.xlane.xlu0 %2642 }
0x1174   :  { %v18846_v16 = vsub.f32 %v18836_v8, %v2648_v14  ;;  %v2647_v23 = vmul.f32 0.03125, %v2643_v15 }
0x1176   :  { %v2649_v18 = vsub.f32 %v18841_v13, %v2647_v23  ;;  %v2652_v19 = vmul.f32 %v18846_v16, %v18846_v16  ;;  %v2686_v52 = vmul.f32 %v15179_v49, %v18846_v16 }
0x1178   :  { %v2656_v22 = vsel %vm415_vm3, %v2652_v19, 0.0  ;;  %v2651_v21 = vmul.f32 %v2649_v18, %v2649_v18  ;;  %v2685_v51 = vmul.f32 %v15179_v49, %v2649_v18 }
0x1179   :  { %2657 = vadd.xlane.f32.xlu1 %v2656_v22 }
0x117a   :  { %v2653_v24 = vsel %vm415_vm3, %v2651_v21, 0.0 }
0x117b   :  { %2654 = vadd.xlane.f32.xlu0 %v2653_v24 }
0x1202   :  { %v2658_v36 = vpop.xlane.xlu1 %2657 }
0x1203   :  { %v2660_v37 = vmul.f32 0.032258064, %v2658_v36  ;;  %v15192_v36 = vld [vmem:[%s18566_s25 + $0x80] sm:$0xff] }
0x1204   :  { %v2655_v38 = vpop.xlane.xlu0 %2654 }
0x1205   :  { %18202 = vrsqrt.f32 %v2660_v37  ;;  %v2659_v20 = vmul.f32 0.032258064, %v2655_v38  ;;  %vm2670_vm12 = vcmp.eq.f32.partialorder %v2660_v37, inf  ;;  %v2673_v41 = vand.u32 2147483648, %v2660_v37  ;;  %v15203_v38 = vld [vmem:[%s18571_s29 + $0x98] sm:$0xff] }
0x1206   :  { %vm2672_vm13 = vcmp.eq.f32.partialorder %v2660_v37, 0.0 }
0x1207   :  { %18204 = vrsqrt.f32 %v2659_v20  ;;  %vm2663_vm14 = vcmp.eq.f32.partialorder %v2659_v20, inf  ;;  %v2666_v45 = vand.u32 2147483648, %v2659_v20  ;;  %vm2665_vm15 = vcmp.eq.f32.partialorder %v2659_v20, 0.0 }
0x1212   :  { %v18203_v39 = vpop.eup %18202 }
0x1213   :  { %v2669_v40 = vmul.f32 %v18203_v39, %v2660_v37 }
0x1214   :  { %v18205_v9 = vpop.eup %18204 }
0x1215   :  { %v2671_v25 = vsel %vm2670_vm12, %v2660_v37, %v2669_v40  ;;  %v2662_v43 = vmul.f32 %v18205_v9, %v2659_v20  ;;  %v15208_v37 = vld [vmem:[%s18579_s3 + $0x80] sm:$0xff] }
0x1216   :  { %v2674_v42 = vsel %vm2672_vm13, %v2673_v41, %v2671_v25 }
0x1217   :  { %v2676_v44 = vadd.f32 1e-06, %v2674_v42  ;;  %v2664_v46 = vsel %vm2663_vm14, %v2659_v20, %v2662_v43 }
0x1218   :  { %v2667_v47 = vsel %vm2665_vm15, %v2666_v45, %v2664_v46 }
0x1219   :  { %18206 = vrcp.f32 %v2676_v44  ;;  %v2675_v48 = vadd.f32 1e-06, %v2667_v47 }
0x121b   :  { %18208 = vrcp.f32 %v2675_v48 }
0x1226   :  { %v18207_v50 = vpop.eup %18206 }
0x1227   :  { %v2688_v53 = vmul.f32 %v18207_v50, %v2686_v52 }
0x1228   :  { %v18209_v54 = vpop.eup %18208 }
0x1229   :  { %v2687_v56 = vmul.f32 %v18209_v54, %v2685_v51  ;;  %v2696_v58 = vadd.f32 %v15180_v55, %v2688_v53  ;;  %v15189_v51 = vld [vmem:[%s18599_s7 + $0x2] ss:$0 sm:$0xff] }
0x122b   :  { %v2695_v57 = vadd.f32 %v15180_v55, %v2687_v56 }
0x122d   :  { %16946 = vmatprep.mubr.msk.f32.mxu0 %vm415_vm3, %v2695_v57 }
0x122e   :  { %16947 = vmatmul.mubr.msk.f32.vlgmr.msra.gmra.mxu0 %vm415_vm3, %v2696_v58  ;;  %v15190_v58 = vld [vmem:[%s18604_s11 + $0x2] ss:$0 sm:$0xff] }
0x122f   :  { %16969 = vmatpush3.msra.mxu0 %v15195_v30 }
0x1230   :  { %16970 = vmatprep.subr.mxu0 %v15194_v32 }
0x1231   :  { %16971 = vmatpush3.msra.mxu0 %v15194_v32 }
0x1232   :  { %16972 = vmatprep.subr.mxu0 %v15193_v34 }
0x1233   :  { %16973 = vmatpush3.msra.mxu0 %v15193_v34 }
0x1234   :  { %16974 = vmatprep.subr.mxu0 %v15192_v36 }
0x1235   :  { %16975 = vmatpush3.msra.mxu0 %v15192_v36 }
0x1236   :  { %16979 = vmatprep.subr.mxu0 %v15203_v38 }
0x12ee   :  { %v16948_v0 = vpop.f32.mrf.mxu0 }
0x12ef   :  { %v2795_v1 = vadd.f32 %v16948_v0, %v15181_v63  ;;  %v15200_v0 = vld [vmem:[%s18571_s29 + $0x80] sm:$0xff] }
0x12f0   :  { %v2789_v2 = vpop.f32.mrf.mxu0 }
0x12f1   :  { %v2790_v3 = vadd.f32 %v15181_v63, %v2789_v2  ;;  %v2799_v5 = vmax.f32 %v2795_v1, 0.0  ;;  %v15201_v63 = vld [vmem:[%s18571_s29 + $0x88] sm:$0xff]  ;;  %v15213_v1 = vld [vmem:[%s18648_s24 + $0x4] ss:$0 sm:$0xff] }
0x12f3   :  { %v2798_v4 = vmax.f32 %v2790_v3, 0.0 }
0x12f5   :  { %16965 = vmatprep.mubr.msk.f32.mxu1 %vm230_vm0, %v2798_v4 }
0x12f6   :  { %16966 = vmatmul.mubr.msk.f32.vlgmr.msra.gmra.mxu1 %vm230_vm0, %v2799_v5  ;;  %v15197_v5 = vld [vmem:[%s18640_s20 + $0x4] ss:$0 sm:$0xff] }
0x12f7   :  { %16991 = vmatpush3.msra.mxu1 %v15211_v31  ;;  %v18960_v31 = vld [vmem:[%s18677_s30] sm:$0xff] }
0x12f8   :  { %16992 = vmatprep.subr.mxu1 %v15210_v33 }
0x12f9   :  { %16993 = vmatpush3.msra.mxu1 %v15210_v33 }
0x12fa   :  { %16994 = vmatprep.subr.mxu1 %v15209_v35 }
0x12fb   :  { %16995 = vmatpush3.msra.mxu1 %v15209_v35  ;;  %v15236_v35 = vld [vmem:[%s18633_s16 + $0x5] ss:$0 sm:$0xff] }
0x12fc   :  { %16996 = vmatprep.subr.mxu1 %v15208_v37 }
0x12fd   :  { %16997 = vmatpush3.msra.mxu1 %v15208_v37 }
0x13b6   :  { %v16967_v7 = vpop.f32.mrf.mxu1 }
0x13b7   :  { %v2884_v10 = vadd.f32 %v16967_v7, %v15184_v6 }
0x13b8   :  { %v2878_v11 = vpop.f32.mrf.mxu1 }
0x13b9   :  { %v18895_v12 = vadd.f32 %v2884_v10, %v18836_v8  ;;  %v2879_v28 = vadd.f32 %v15184_v6, %v2878_v11 }
0x13bb   :  { %v18898_v14 = vadd.f32 %v2879_v28, %v18841_v13  ;;  %v2896_v15 = vsel %vm415_vm3, %v18895_v12, 0.0  ;;  %v15205_v28 = vld [vmem:[%s18633_s16 + $0x4] ss:$0 sm:$0xff] }
0x13bc   :  { %2897 = vadd.xlane.f32.xlu1 %v2896_v15 }
0x13bd   :  { %v2893_v16 = vsel %vm415_vm3, %v18898_v14, 0.0 }
0x13be   :  { %2894 = vadd.xlane.f32.xlu0 %v2893_v16 }
0x1445   :  { %v2898_v23 = vpop.xlane.xlu1 %2897 }
0x1446   :  { %v2900_v18 = vmul.f32 0.03125, %v2898_v23 }
0x1447   :  { %v2895_v19 = vpop.xlane.xlu0 %2894 }
0x1448   :  { %v2902_v8 = vsub.f32 %v18895_v12, %v2900_v18  ;;  %v2899_v22 = vmul.f32 0.03125, %v2895_v19  ;;  %v15234_v19 = vld [vmem:[%s18571_s29 + $0xb8] sm:$0xff] }
0x144a   :  { %v2901_v13 = vsub.f32 %v18898_v14, %v2899_v22  ;;  %v2904_v21 = vmul.f32 %v2902_v8, %v2902_v8  ;;  %v2938_v53 = vmul.f32 %v15189_v51, %v2902_v8  ;;  %v15233_v22 = vld [vmem:[%s18571_s29 + $0xb0] sm:$0xff] }
0x144c   :  { %v2908_v24 = vsel %vm415_vm3, %v2904_v21, 0.0  ;;  %v2903_v17 = vmul.f32 %v2901_v13, %v2901_v13  ;;  %v2937_v55 = vmul.f32 %v15189_v51, %v2901_v13  ;;  %v15232_v13 = vld [vmem:[%s18571_s29 + $0xa8] sm:$0xff]  ;;  %v15231_v21 = vld [vmem:[%s18571_s29 + $0xa0] sm:$0xff] }
0x144d   :  { %2909 = vadd.xlane.f32.xlu1 %v2908_v24 }
0x144e   :  { %v2905_v29 = vsel %vm415_vm3, %v2903_v17, 0.0  ;;  %v18956_v17 = vld [vmem:[%s18677_s30 + $0x8] sm:$0xff] }
0x144f   :  { %2906 = vadd.xlane.f32.xlu0 %v2905_v29 }
0x14d6   :  { %v2910_v20 = vpop.xlane.xlu1 %2909 }
0x14d7   :  { %v2912_v39 = vmul.f32 0.032258064, %v2910_v20 }
0x14d8   :  { %v2907_v40 = vpop.xlane.xlu0 %2906 }
0x14d9   :  { %18210 = vrsqrt.f32 %v2912_v39  ;;  %v2911_v41 = vmul.f32 0.032258064, %v2907_v40  ;;  %vm2922_vm1 = vcmp.eq.f32.partialorder %v2912_v39, inf  ;;  %v2925_v42 = vand.u32 2147483648, %v2912_v39 }
0x14da   :  { %vm2924_vm2 = vcmp.eq.f32.partialorder %v2912_v39, 0.0 }
0x14db   :  { %18212 = vrsqrt.f32 %v2911_v41  ;;  %vm2915_vm4 = vcmp.eq.f32.partialorder %v2911_v41, inf  ;;  %v2918_v48 = vand.u32 2147483648, %v2911_v41  ;;  %vm2917_vm5 = vcmp.eq.f32.partialorder %v2911_v41, 0.0 }
0x14e6   :  { %v18211_v9 = vpop.eup %18210 }
0x14e7   :  { %v2921_v25 = vmul.f32 %v18211_v9, %v2912_v39 }
0x14e8   :  { %v18213_v43 = vpop.eup %18212 }
0x14e9   :  { %v2923_v44 = vsel %vm2922_vm1, %v2912_v39, %v2921_v25  ;;  %v2914_v46 = vmul.f32 %v18213_v43, %v2911_v41 }
0x14ea   :  { %v2926_v45 = vsel %vm2924_vm2, %v2925_v42, %v2923_v44 }
0x14eb   :  { %v2928_v47 = vadd.f32 1e-06, %v2926_v45  ;;  %v2916_v49 = vsel %vm2915_vm4, %v2911_v41, %v2914_v46 }
0x14ec   :  { %v2919_v50 = vsel %vm2917_vm5, %v2918_v48, %v2916_v49 }
0x14ed   :  { %18214 = vrcp.f32 %v2928_v47  ;;  %v2927_v52 = vadd.f32 1e-06, %v2919_v50  ;;  %v15226_v47 = vld [vmem:[%s18566_s25 + $0xb8] sm:$0xff] }
0x14ef   :  { %18216 = vrcp.f32 %v2927_v52 }
0x14fa   :  { %v18215_v54 = vpop.eup %18214 }
0x14fb   :  { %v2940_v57 = vmul.f32 %v18215_v54, %v2938_v53  ;;  %v15225_v53 = vld [vmem:[%s18566_s25 + $0xb0] sm:$0xff] }
0x14fc   :  { %v18217_v56 = vpop.eup %18216 }
0x14fd   :  { %v2939_v59 = vmul.f32 %v18217_v56, %v2937_v55  ;;  %v18921_v61 = vadd.f32 %v15190_v58, %v2940_v57  ;;  %v15224_v55 = vld [vmem:[%s18566_s25 + $0xa8] sm:$0xff]  ;;  %v15223_v56 = vld [vmem:[%s18566_s25 + $0xa0] sm:$0xff]  ;;  %v15242_v57 = vld [vmem:[%s18579_s3 + $0xb8] sm:$0xff] }
0x14ff   :  { %v18919_v60 = vadd.f32 %v15190_v58, %v2939_v59  ;;  %v15241_v58 = vld [vmem:[%s18579_s3 + $0xb0] sm:$0xff]  ;;  %v15240_v59 = vld [vmem:[%s18579_s3 + $0xa8] sm:$0xff] }
0x1501   :  { %16976 = vmatprep.mubr.msk.f32.mxu0 %vm415_vm3, %v18919_v60  ;;  %16998 = vmatprep.mubr.msk.f32.mxu1 %vm415_vm3, %v18919_v60 }
0x1502   :  { %16977 = vmatmul.mubr.msk.f32.vlgmr.msra.gmra.mxu0 %vm415_vm3, %v18921_v61  ;;  %16999 = vmatmul.mubr.msk.f32.vlgmr.msra.gmra.mxu1 %vm415_vm3, %v18921_v61 }
0x1503   :  { %16980 = vmatpush3.msra.mxu0 %v15203_v38  ;;  %16987 = vmatprep.mubr.msk.f32.mxu0 %vm415_vm3, %v18919_v60 }
0x1504   :  { %16981 = vmatprep.subr.mxu0 %v15202_v62 }
0x1505   :  { %16982 = vmatpush3.msra.mxu0 %v15202_v62  ;;  %v15239_v62 = vld [vmem:[%s18579_s3 + $0xa0] sm:$0xff] }
0x1506   :  { %16983 = vmatprep.subr.mxu0 %v15201_v63 }
0x1507   :  { %16984 = vmatpush3.msra.mxu0 %v15201_v63 }
0x1508   :  { %16985 = vmatprep.subr.mxu0 %v15200_v0 }
0x1509   :  { %16986 = vmatpush3.msra.mxu0 %v15200_v0 }
0x150a   :  { %16988 = vmatmul.mubr.msk.f32.vlgmr.msra.gmra.mxu0 %vm415_vm3, %v18921_v61 }
0x15c2   :  { %v16978_v2 = vpop.f32.mrf.mxu0  ;;  %v17000_v3 = vpop.f32.mrf.mxu1 }
0x15c3   :  { %v3218_v4 = vadd.f32 %v17000_v3, %v15213_v1  ;;  %v3042_v8 = vadd.f32 %v16978_v2, %v15197_v5  ;;  %v15228_v2 = vld [vmem:[%s18640_s20 + $0x5] ss:$0 sm:$0xff] }
0x15c4   :  { %v3036_v6 = vpop.f32.mrf.mxu0  ;;  %v3212_v7 = vpop.f32.mrf.mxu1 }
0x15c5   :  { %v3037_v10 = vadd.f32 %v15197_v5, %v3036_v6  ;;  %v3213_v11 = vadd.f32 %v15213_v1, %v3212_v7  ;;  %17008 = vmatprep.subr.mxu1 %v3218_v4  ;;  %v15244_v6 = vld [vmem:[%s18648_s24 + $0x5] ss:$0 sm:$0xff] }
0x15c6   :  { %17009 = vmatpush3.msra.mxu1 %v3218_v4 }
0x15c7   :  { %17005 = vmatprep.mubr.msk.f32.mxu0 %vm738_vm10, %v3037_v10  ;;  %17010 = vmatprep.subr.mxu1 %v3213_v11 }
0x15c8   :  { %17011 = vmatpush3.msra.mxu1 %v3213_v11 }
0x15c9   :  { %17015 = vmatprep.subr.mxu1 %v15226_v47 }
0x15ca   :  { %v16989_v15 = vpop.f32.mrf.mxu0 }
0x15cb   :  { %v3130_v16 = vadd.f32 %v16989_v15, %v15205_v28 }
0x15cc   :  { %v3124_v23 = vpop.f32.mrf.mxu0 }
0x15cd   :  { %v3125_v18 = vadd.f32 %v15205_v28, %v3124_v23  ;;  %17001 = vmatprep.subr.msk.mxu0 %vm738_vm10, %v3130_v16 }
0x15ce   :  { %17002 = vmatpush3.xpose.msk.msra.mxu0 %vm738_vm10, %v3130_v16 }
0x15cf   :  { %17003 = vmatprep.subr.msk.mxu0 %vm738_vm10, %v3125_v18 }
0x15d2   :  { %17004 = vmatpush3.xpose.msk.msra.mxu0 %vm738_vm10, %v3125_v18 }
0x15d3   :  { %17026 = vmatprep.subr.mxu0 %v15234_v19 }
0x15d5   :  { %17006 = vmatmul.mubr.msk.f32.vlgmr.msra.gmra.mxu0 %vm738_vm10, %v3042_v8 }
0x15d6   :  { %17027 = vmatpush3.msra.mxu0 %v15234_v19  ;;  %17034 = vmatprep.mubr.msk.f32.mxu0 %vm415_vm3, %v18919_v60 }
0x15d7   :  { %17028 = vmatprep.subr.mxu0 %v15233_v22 }
0x15d8   :  { %17029 = vmatpush3.msra.mxu0 %v15233_v22 }
0x15d9   :  { %17030 = vmatprep.subr.mxu0 %v15232_v13 }
0x15da   :  { %17031 = vmatpush3.msra.mxu0 %v15232_v13 }
0x15db   :  { %17032 = vmatprep.subr.mxu0 %v15231_v21 }
0x15dc   :  { %17033 = vmatpush3.msra.mxu0 %v15231_v21 }
0x15dd   :  { %17035 = vmatmul.mubr.msk.f32.vlgmr.msra.gmra.mxu0 %vm415_vm3, %v18921_v61 }
0x1695   :  { %v17007_v24 = vpop.f32.mrf.mxu0 }
0x1696   :  { %v3305_v29 = vadd.f32 %v18956_v17, %v17007_v24 }
0x1697   :  { %v3299_v30 = vpop.f32.mrf.mxu0 }
0x1698   :  { %v3300_v32 = vadd.f32 %v18960_v31, %v3299_v30  ;;  %v3311_v33 = vsel %vm826_vm11, %v3305_v29, -inf }
0x1699   :  { %3312 = vmax.xlane.f32.xlu1 %v3311_v33 }
0x169a   :  { %v3308_v34 = vsel %vm826_vm11, %v3300_v32, -inf }
0x169b   :  { %3309 = vmax.xlane.f32.xlu0 %v3308_v34 }
0x169d   :  { %v17036_v36 = vpop.f32.mrf.mxu0 }
0x169e   :  { %v3586_v37 = vadd.f32 %v17036_v36, %v15236_v35  ;;  %v15222_v36 = vld [vmem:[%s18719_s5 + $0x20] sm:$0xff] }
0x169f   :  { %v3580_v38 = vpop.f32.mrf.mxu0 }
0x16a0   :  { %v3581_v20 = vadd.f32 %v15236_v35, %v3580_v38  ;;  %17048 = vmatprep.subr.msk.mxu0 %vm738_vm10, %v3586_v37 }
0x16a1   :  { %17049 = vmatpush3.xpose.msk.msra.mxu0 %vm738_vm10, %v3586_v37  ;;  %v15253_v37 = vld [vmem:[%s18719_s5 + $0x28] sm:$0xff] }
0x16a2   :  { %17050 = vmatprep.subr.msk.mxu0 %vm738_vm10, %v3581_v20 }
0x16a5   :  { %17051 = vmatpush3.xpose.msk.msra.mxu0 %vm738_vm10, %v3581_v20 }
0x16a6   :  { %17062 = vmatprep.subr.mxu0 %v15253_v37 }
0x1722   :  { %v3313_v39 = vpop.xlane.xlu1 %3312 }
0x1723   :  { %v3315_v40 = vsub.f32 %v3305_v29, %v3313_v39 }
0x1724   :  { %v3310_v41 = vpop.xlane.xlu0 %3309 }
0x1725   :  { %v3318_v9 = vmul.f32 1.442695, %v3315_v40  ;;  %v3314_v25 = vsub.f32 %v3300_v32, %v3310_v41 }
0x1727   :  { %18218 = vpow2.f32 %v3318_v9  ;;  %v3316_v42 = vmul.f32 1.442695, %v3314_v25  ;;  %v15269_v25 = vld [vmem:[%s18571_s29 + $0xd8] sm:$0xff] }
0x1729   :  { %18220 = vpow2.f32 %v3316_v42  ;;  %v15268_v42 = vld [vmem:[%s18571_s29 + $0xd0] sm:$0xff] }
0x1734   :  { %v18219_v43 = vpop.eup %18218 }
0x1735   :  { %v3323_v44 = vsel %vm826_vm11, %v18219_v43, 0.0 }
0x1736   :  { %v18221_v45 = vpop.eup %18220  ;;  %3324 = vadd.xlane.f32.xlu1 %v3323_v44  ;;  %v15266_v44 = vld [vmem:[%s18571_s29 + $0xc0] sm:$0xff] }
0x1737   :  { %v3320_v46 = vsel %vm826_vm11, %v18221_v45, 0.0 }
0x1738   :  { %3321 = vadd.xlane.f32.xlu0 %v3320_v46 }
0x17bf   :  { %v3325_v48 = vpop.xlane.xlu1 %3324 }
0x17c0   :  { %18222 = vrcp.f32 %v3325_v48  ;;  %v15260_v48 = vld [vmem:[%s18566_s25 + $0xd0] sm:$0xff] }
0x17c1   :  { %v3322_v49 = vpop.xlane.xlu0 %3321 }
0x17c2   :  { %18224 = vrcp.f32 %v3322_v49  ;;  %v15259_v49 = vld [vmem:[%s18566_s25 + $0xc8] sm:$0xff] }
0x17cd   :  { %v18223_v50 = vpop.eup %18222 }
0x17ce   :  { %v3329_v54 = vmul.f32 %v18223_v50, %v18219_v43  ;;  %v15267_v43 = vld [vmem:[%s18571_s29 + $0xc8] sm:$0xff] }
0x17cf   :  { %v18225_v52 = vpop.eup %18224 }
0x17d0   :  { %v3328_v51 = vmul.f32 %v18225_v52, %v18221_v45  ;;  %v15261_v45 = vld [vmem:[%s18566_s25 + $0xd8] sm:$0xff]  ;;  %v15258_v52 = vld [vmem:[%s18566_s25 + $0xc0] sm:$0xff] }
0x17d2   :  { %17012 = vmatprep.mubr.msk.f32.mxu1 %vm826_vm11, %v3328_v51  ;;  %v15277_v51 = vld [vmem:[%s18579_s3 + $0xd8] sm:$0xff] }
0x17d3   :  { %17013 = vmatmul.mubr.msk.f32.vlgmr.msra.gmra.mxu1 %vm826_vm11, %v3329_v54 }
0x17d4   :  { %17016 = vmatpush3.msra.mxu1 %v15226_v47  ;;  %17023 = vmatprep.mubr.msk.f32.mxu1 %vm415_vm3, %v18919_v60 }
0x17d5   :  { %17017 = vmatprep.subr.mxu1 %v15225_v53 }
0x17d6   :  { %17018 = vmatpush3.msra.mxu1 %v15225_v53  ;;  %v15271_v53 = vld [vmem:[%s18633_s16 + $0x6] ss:$0 sm:$0xff] }
0x17d7   :  { %17019 = vmatprep.subr.mxu1 %v15224_v55 }
0x17d8   :  { %17020 = vmatpush3.msra.mxu1 %v15224_v55  ;;  %v15276_v55 = vld [vmem:[%s18579_s3 + $0xd0] sm:$0xff] }
0x17d9   :  { %17021 = vmatprep.subr.mxu1 %v15223_v56 }
0x17da   :  { %17022 = vmatpush3.msra.mxu1 %v15223_v56 }
0x17db   :  { %17024 = vmatmul.mubr.msk.f32.vlgmr.msra.gmra.mxu1 %vm415_vm3, %v18921_v61  ;;  %17037 = vmatprep.subr.mxu1 %v15242_v57 }
0x17dc   :  { %17038 = vmatpush3.msra.mxu1 %v15242_v57  ;;  %17045 = vmatprep.mubr.msk.f32.mxu1 %vm415_vm3, %v18919_v60 }
0x17dd   :  { %17039 = vmatprep.subr.mxu1 %v15241_v58 }
0x17de   :  { %17040 = vmatpush3.msra.mxu1 %v15241_v58  ;;  %v15275_v58 = vld [vmem:[%s18579_s3 + $0xc8] sm:$0xff] }
0x17df   :  { %17041 = vmatprep.subr.mxu1 %v15240_v59 }
0x17e0   :  { %17042 = vmatpush3.msra.mxu1 %v15240_v59 }
0x17e1   :  { %17043 = vmatprep.subr.mxu1 %v15239_v62 }
0x17e2   :  { %17044 = vmatpush3.msra.mxu1 %v15239_v62 }
0x17e3   :  { %17046 = vmatmul.mubr.msk.f32.vlgmr.msra.gmra.mxu1 %vm415_vm3, %v18921_v61 }
0x1893   :  { %v17014_v63 = vpop.f32.mrf.mxu1 }
0x1895   :  { %v3402_v0 = vpop.f32.mrf.mxu1 }
0x189b   :  { %v17025_v1 = vpop.f32.mrf.mxu1 }
0x189c   :  { %v3498_v5 = vadd.f32 %v17025_v1, %v15228_v2 }
0x189d   :  { %v3492_v3 = vpop.f32.mrf.mxu1 }
0x189e   :  { %v3493_v4 = vadd.f32 %v15228_v2, %v3492_v3  ;;  %v15263_v3 = vld [vmem:[%s18640_s20 + $0x6] ss:$0 sm:$0xff] }
0x18a0   :  { %17052 = vmatprep.mubr.msk.f32.mxu0 %vm738_vm10, %v3493_v4 }
0x18a1   :  { %17053 = vmatmul.mubr.msk.f32.vlgmr.msra.gmra.mxu0 %vm738_vm10, %v3498_v5 }
0x18a2   :  { %17063 = vmatpush3.msra.mxu0 %v15253_v37  ;;  %v15294_v37 = vld [vmem:[%s18566_s25 + $0xf8] sm:$0xff] }
0x18a3   :  { %v17047_v7 = vpop.f32.mrf.mxu1  ;;  %17072 = vmatprep.subr.mxu0 %v15261_v45 }
0x18a4   :  { %v3674_v10 = vadd.f32 %v17047_v7, %v15244_v6  ;;  %v15279_v7 = vld [vmem:[%s18648_s24 + $0x6] ss:$0 sm:$0xff] }
0x18a5   :  { %v3668_v11 = vpop.f32.mrf.mxu1 }
0x18a6   :  { %v3669_v28 = vadd.f32 %v15244_v6, %v3668_v11  ;;  %17055 = vmatprep.subr.mxu1 %v3674_v10 }
0x18a7   :  { %17056 = vmatpush3.msra.mxu1 %v3674_v10 }
0x18a8   :  { %17057 = vmatprep.subr.mxu1 %v3669_v28 }
0x18a9   :  { %17058 = vmatpush3.msra.mxu1 %v3669_v28 }
0x18aa   :  { %17067 = vmatprep.subr.mxu1 %v15222_v36 }
0x1961   :  { %v17054_v15 = vpop.f32.mrf.mxu0 }
0x1962   :  { %v3761_v16 = vadd.f32 %v18956_v17, %v17054_v15 }
0x1963   :  { %v3755_v23 = vpop.f32.mrf.mxu0 }
0x1964   :  { %v3756_v18 = vadd.f32 %v18960_v31, %v3755_v23  ;;  %v3767_v19 = vsel %vm826_vm11, %v3761_v16, -inf }
0x1965   :  { %3768 = vmax.xlane.f32.xlu1 %v3767_v19 }
0x1966   :  { %v3764_v8 = vsel %vm826_vm11, %v3756_v18, -inf }
0x1967   :  { %3765 = vmax.xlane.f32.xlu0 %v3764_v8 }
0x19ee   :  { %v3769_v22 = vpop.xlane.xlu1 %3768 }
0x19ef   :  { %v3771_v13 = vsub.f32 %v3761_v16, %v3769_v22 }
0x19f0   :  { %v3766_v21 = vpop.xlane.xlu0 %3765 }
0x19f1   :  { %v3774_v24 = vmul.f32 1.442695, %v3771_v13  ;;  %v3770_v29 = vsub.f32 %v3756_v18, %v3766_v21 }
0x19f3   :  { %18226 = vpow2.f32 %v3774_v24  ;;  %v3772_v30 = vmul.f32 1.442695, %v3770_v29 }
0x19f5   :  { %18228 = vpow2.f32 %v3772_v30 }
0x1a00   :  { %v18227_v32 = vpop.eup %18226 }
0x1a01   :  { %v3779_v33 = vsel %vm826_vm11, %v18227_v32, 0.0 }
0x1a02   :  { %v18229_v34 = vpop.eup %18228  ;;  %3780 = vadd.xlane.f32.xlu1 %v3779_v33 }
0x1a03   :  { %v3776_v35 = vsel %vm826_vm11, %v18229_v34, 0.0 }
0x1a04   :  { %3777 = vadd.xlane.f32.xlu0 %v3776_v35 }
0x1a8b   :  { %v3781_v38 = vpop.xlane.xlu1 %3780 }
0x1a8c   :  { %18230 = vrcp.f32 %v3781_v38  ;;  %v15288_v38 = vld [vmem:[%s18719_s5 + $0x30] sm:$0xff] }
0x1a8d   :  { %v3778_v20 = vpop.xlane.xlu0 %3777 }
0x1a8e   :  { %18232 = vrcp.f32 %v3778_v20 }
0x1a99   :  { %v18231_v39 = vpop.eup %18230 }
0x1a9a   :  { %v3785_v9 = vmul.f32 %v18231_v39, %v18227_v32 }
0x1a9b   :  { %v18233_v40 = vpop.eup %18232 }
0x1a9c   :  { %v3784_v41 = vmul.f32 %v18233_v40, %v18229_v34 }
0x1a9e   :  { %17059 = vmatprep.mubr.msk.f32.mxu1 %vm826_vm11, %v3784_v41 }
0x1a9f   :  { %17060 = vmatmul.mubr.msk.f32.vlgmr.msra.gmra.mxu1 %vm826_vm11, %v3785_v9 }
0x1aa0   :  { %17069 = vmatprep.mubr.msk.f32.mxu1 %vm738_vm10, %v3402_v0  ;;  %17068 = vmatpush3.msra.mxu1 %v15222_v36 }
0x1aa1   :  { %17083 = vmatprep.subr.mxu1 %v15269_v25 }
0x1aa3   :  { %17070 = vmatmul.mubr.msk.f32.vlgmr.msra.gmra.mxu1 %vm738_vm10, %v17014_v63  ;;  %v15274_v63 = vld [vmem:[%s18579_s3 + $0xc0] sm:$0xff] }
0x1aa4   :  { %17084 = vmatpush3.msra.mxu1 %v15269_v25  ;;  %17091 = vmatprep.mubr.msk.f32.mxu1 %vm415_vm3, %v18919_v60 }
0x1aa5   :  { %17085 = vmatprep.subr.mxu1 %v15268_v42 }
0x1aa6   :  { %17086 = vmatpush3.msra.mxu1 %v15268_v42  ;;  %v15293_v42 = vld [vmem:[%s18566_s25 + $0xf0] sm:$0xff] }
0x1aa7   :  { %17087 = vmatprep.subr.mxu1 %v15267_v43 }
0x1aa8   :  { %17088 = vmatpush3.msra.mxu1 %v15267_v43  ;;  %v15292_v43 = vld [vmem:[%s18566_s25 + $0xe8] sm:$0xff] }
0x1aa9   :  { %17089 = vmatprep.subr.mxu1 %v15266_v44 }
0x1aaa   :  { %17090 = vmatpush3.msra.mxu1 %v15266_v44  ;;  %v15291_v44 = vld [vmem:[%s18566_s25 + $0xe0] sm:$0xff]  ;;  %s15047_s25 = sld [smem:[%s20294_s0 + %s18493_s2]]   ;;  %s18501_s2 = smov 36  }
0x1aab   :  { %17092 = vmatmul.mubr.msk.f32.vlgmr.msra.gmra.mxu1 %vm415_vm3, %v18921_v61 }
0x1b5f   :  { %v17061_v46 = vpop.f32.mrf.mxu1 }
0x1b61   :  { %v3858_v47 = vpop.f32.mrf.mxu1 }
0x1b62   :  { %17064 = vmatprep.mubr.msk.f32.mxu0 %vm738_vm10, %v3858_v47  ;;  %v15308_v47 = vld [vmem:[%s18579_s3 + $0xe8] sm:$0xff] }
0x1b63   :  { %17065 = vmatmul.mubr.msk.f32.vlgmr.msra.gmra.mxu0 %vm738_vm10, %v17061_v46  ;;  %v19021_v50 = vpop.f32.mrf.mxu1  ;;  %v15309_v46 = vld [vmem:[%s18579_s3 + $0xf0] sm:$0xff] }
0x1b64   :  { %17073 = vmatpush3.msra.mxu0 %v15261_v45  ;;  %17080 = vmatprep.mubr.msk.f32.mxu0 %vm415_vm3, %v18919_v60  ;;  %v15310_v45 = vld [vmem:[%s18579_s3 + $0xf8] sm:$0xff] }
0x1b65   :  { %17074 = vmatprep.subr.mxu0 %v15260_v48  ;;  %v19025_v54 = vpop.f32.mrf.mxu1 }
0x1b66   :  { %17075 = vmatpush3.msra.mxu0 %v15260_v48  ;;  %v15307_v48 = vld [vmem:[%s18579_s3 + $0xe0] sm:$0xff] }
0x1b67   :  { %17076 = vmatprep.subr.mxu0 %v15259_v49 }
0x1b68   :  { %17077 = vmatpush3.msra.mxu0 %v15259_v49  ;;  %v15302_v49 = vld [vmem:[%s18571_s29 + $0xf8] sm:$0xff] }
0x1b69   :  { %17078 = vmatprep.subr.mxu0 %v15258_v52 }
0x1b6a   :  { %17079 = vmatpush3.msra.mxu0 %v15258_v52 }
0x1b6b   :  { %17081 = vmatmul.mubr.msk.f32.vlgmr.msra.gmra.mxu0 %vm415_vm3, %v18921_v61  ;;  %v17093_v56 = vpop.f32.mrf.mxu1  ;;  %17094 = vmatprep.subr.mxu0 %v15277_v51 }
0x1b6c   :  { %v4204_v57 = vadd.f32 %v17093_v56, %v15271_v53  ;;  %17095 = vmatpush3.msra.mxu0 %v15277_v51  ;;  %17102 = vmatprep.mubr.msk.f32.mxu0 %vm415_vm3, %v18919_v60  ;;  %v15296_v56 = vld [vmem:[%s18640_s20 + $0x7] ss:$0 sm:$0xff]  ;;  %s18489_s20 = smov 3  }
0x1b6d   :  { %v4198_v59 = vpop.f32.mrf.mxu1  ;;  %17096 = vmatprep.subr.mxu0 %v15276_v55  ;;  %s19276_s9 = sld [smem:[%s20294_s0 + %s18489_s20]]   ;;  %s18502_s20 = smov 37  }
0x1b6e   :  { %v4199_v62 = vadd.f32 %v15271_v53, %v4198_v59  ;;  %17097 = vmatpush3.msra.mxu0 %v15276_v55  ;;  %17105 = vmatprep.subr.msk.mxu1 %vm738_vm10, %v4204_v57  ;;  %v15301_v53 = vld [vmem:[%s18571_s29 + $0xf0] sm:$0xff]  ;;  %v15300_v55 = vld [vmem:[%s18571_s29 + $0xe8] sm:$0xff] }
0x1b6f   :  { %17098 = vmatprep.subr.mxu0 %v15275_v58  ;;  %17106 = vmatpush3.xpose.msk.msra.mxu1 %vm738_vm10, %v4204_v57  ;;  %v15299_v57 = vld [vmem:[%s18571_s29 + $0xe0] sm:$0xff]  ;;  %s18494_s29 = smov 44  }
0x1b70   :  { %17099 = vmatpush3.msra.mxu0 %v15275_v58  ;;  %17107 = vmatprep.subr.msk.mxu1 %vm738_vm10, %v4199_v62  ;;  %s15048_s8 = sld [smem:[%s20294_s0 + %s18494_s29]]  }
0x1b71   :  { %17100 = vmatprep.subr.mxu0 %v15274_v63  ;;  %s19739_s29 = sld [smem:[%s20294_s0 + %s18501_s2]]  }
0x1b72   :  { %17101 = vmatpush3.msra.mxu0 %v15274_v63 }
0x1b73   :  { %17103 = vmatmul.mubr.msk.f32.vlgmr.msra.gmra.mxu0 %vm415_vm3, %v18921_v61  ;;  %17108 = vmatpush3.xpose.msk.msra.mxu1 %vm738_vm10, %v4199_v62 }
0x1b74   :  { %17119 = vmatprep.subr.mxu1 %v15288_v38 }
0x1c23   :  { %v19041_v0 = vpop.f32.mrf.mxu0 }
0x1c25   :  { %v19043_v1 = vpop.f32.mrf.mxu0 }
0x1c2b   :  { %v17082_v2 = vpop.f32.mrf.mxu0 }
0x1c2c   :  { %v4116_v6 = vadd.f32 %v17082_v2, %v15263_v3 }
0x1c2d   :  { %v4110_v4 = vpop.f32.mrf.mxu0 }
0x1c2e   :  { %v4111_v5 = vadd.f32 %v15263_v3, %v4110_v4 }
0x1c30   :  { %17109 = vmatprep.mubr.msk.f32.mxu1 %vm738_vm10, %v4111_v5 }
0x1c31   :  { %17110 = vmatmul.mubr.msk.f32.vlgmr.msra.gmra.mxu1 %vm738_vm10, %v4116_v6  ;;  %v4028_v6 = vadd.f32 %v19021_v50, %v19041_v0 }
0x1c32   :  { %17120 = vmatpush3.msra.mxu1 %v15288_v38 }
0x1c33   :  { %v17104_v10 = vpop.f32.mrf.mxu0  ;;  %17135 = vmatprep.subr.mxu1 %v15302_v49 }
0x1c34   :  { %v4292_v11 = vadd.f32 %v17104_v10, %v15279_v7 }
0x1c35   :  { %v4286_v28 = vpop.f32.mrf.mxu0 }
0x1c36   :  { %v4287_v15 = vadd.f32 %v15279_v7, %v4286_v28  ;;  %17112 = vmatprep.subr.mxu0 %v4292_v11  ;;  %v15304_v28 = vld [vmem:[%s18633_s16 + $0x7] ss:$0 sm:$0xff]  ;;  %s18482_s16 = smov 41  }
0x1c37   :  { %17113 = vmatpush3.msra.mxu0 %v4292_v11 }
0x1c38   :  { %17114 = vmatprep.subr.mxu0 %v4287_v15 }
0x1c39   :  { %17115 = vmatpush3.msra.mxu0 %v4287_v15 }
0x1c3a   :  { %17124 = vmatprep.subr.mxu0 %v15294_v37 }
0x1cf1   :  { %v17111_v16 = vpop.f32.mrf.mxu1 }
0x1cf2   :  { %v4379_v23 = vadd.f32 %v18956_v17, %v17111_v16 }
0x1cf3   :  { %v4373_v18 = vpop.f32.mrf.mxu1 }
0x1cf4   :  { %v4374_v19 = vadd.f32 %v18960_v31, %v4373_v18  ;;  %v4385_v8 = vsel %vm826_vm11, %v4379_v23, -inf }
0x1cf5   :  { %4386 = vmax.xlane.f32.xlu1 %v4385_v8 }
0x1cf6   :  { %v4382_v22 = vsel %vm826_vm11, %v4374_v19, -inf }
0x1cf7   :  { %4383 = vmax.xlane.f32.xlu0 %v4382_v22 }
0x1d7e   :  { %v4387_v13 = vpop.xlane.xlu1 %4386 }
0x1d7f   :  { %v4389_v21 = vsub.f32 %v4379_v23, %v4387_v13 }
0x1d80   :  { %v4384_v24 = vpop.xlane.xlu0 %4383 }
0x1d81   :  { %v4392_v29 = vmul.f32 1.442695, %v4389_v21  ;;  %v4388_v30 = vsub.f32 %v4374_v19, %v4384_v24 }
0x1d83   :  { %18234 = vpow2.f32 %v4392_v29  ;;  %v4390_v32 = vmul.f32 1.442695, %v4388_v30 }
0x1d85   :  { %18236 = vpow2.f32 %v4390_v32 }
0x1d90   :  { %v18235_v33 = vpop.eup %18234 }
0x1d91   :  { %v4397_v34 = vsel %vm826_vm11, %v18235_v33, 0.0 }
0x1d92   :  { %v18237_v35 = vpop.eup %18236  ;;  %4398 = vadd.xlane.f32.xlu1 %v4397_v34 }
0x1d93   :  { %v4394_v36 = vsel %vm826_vm11, %v18237_v35, 0.0 }
0x1d94   :  { %4395 = vadd.xlane.f32.xlu0 %v4394_v36 }
0x1e1b   :  { %v4399_v20 = vpop.xlane.xlu1 %4398 }
0x1e1c   :  { %18238 = vrcp.f32 %v4399_v20 }
0x1e1d   :  { %v4396_v39 = vpop.xlane.xlu0 %4395 }
0x1e1e   :  { %18240 = vrcp.f32 %v4396_v39 }
0x1e29   :  { %v18239_v40 = vpop.eup %18238 }
0x1e2a   :  { %v4403_v25 = vmul.f32 %v18239_v40, %v18235_v33 }
0x1e2b   :  { %v18241_v41 = vpop.eup %18240 }
0x1e2c   :  { %v4402_v9 = vmul.f32 %v18241_v41, %v18237_v35  ;;  %v15321_v35 = vld [vmem:[%s18719_s5 + $0x38] sm:$0xff]  ;;  %s19176_s5 = sld [smem:[%s20294_s0 + %s18482_s16]]  }
0x1e2e   :  { %17116 = vmatprep.mubr.msk.f32.mxu0 %vm826_vm11, %v4402_v9 }
0x1e2f   :  { %17117 = vmatmul.mubr.msk.f32.vlgmr.msra.gmra.mxu0 %vm826_vm11, %v4403_v25  ;;  %v4023_v25 = vadd.f32 %v19025_v54, %v19043_v1  ;;  %v18453_v1 = vld [vmem:[%s18533_s13] sm:$0xff] }
0x1e30   :  { %17125 = vmatpush3.msra.mxu0 %v15294_v37  ;;  %17132 = vmatprep.mubr.msk.f32.mxu0 %vm415_vm3, %v18919_v60 }
0x1e31   :  { %17126 = vmatprep.subr.mxu0 %v15293_v42 }
0x1e32   :  { %17127 = vmatpush3.msra.mxu0 %v15293_v42  ;;  %v15324_v42 = vld [vmem:[%s18830_s10 + $0x1] ss:$0 sm:$0xff]  ;;  %s18490_s10 = smov 27  }
0x1e33   :  { %17128 = vmatprep.subr.mxu0 %v15292_v43  ;;  %s19326_s15 = sld [smem:[%s20294_s0 + %s18490_s10]]   ;;  %s18495_s10 = smov 29  }
0x1e34   :  { %17129 = vmatpush3.msra.mxu0 %v15292_v43 }
0x1e35   :  { %17130 = vmatprep.subr.mxu0 %v15291_v44 }
0x1e36   :  { %17131 = vmatpush3.msra.mxu0 %v15291_v44 }
0x1e37   :  { %17133 = vmatmul.mubr.msk.f32.vlgmr.msra.gmra.mxu0 %vm415_vm3, %v18921_v61  ;;  %17146 = vmatprep.subr.mxu0 %v15310_v45 }
0x1e38   :  { %17147 = vmatpush3.msra.mxu0 %v15310_v45  ;;  %17154 = vmatprep.mubr.msk.f32.mxu0 %vm415_vm3, %v18919_v60 }
0x1e39   :  { %17148 = vmatprep.subr.mxu0 %v15309_v46 }
0x1e3a   :  { %17149 = vmatpush3.msra.mxu0 %v15309_v46 }
0x1e3b   :  { %17150 = vmatprep.subr.mxu0 %v15308_v47 }
0x1e3c   :  { %17151 = vmatpush3.msra.mxu0 %v15308_v47 }
0x1e3d   :  { %17152 = vmatprep.subr.mxu0 %v15307_v48 }
0x1e3e   :  { %17153 = vmatpush3.msra.mxu0 %v15307_v48 }
0x1e3f   :  { %17155 = vmatmul.mubr.msk.f32.vlgmr.msra.gmra.mxu0 %vm415_vm3, %v18921_v61 }
0x1eef   :  { %v17118_v52 = vpop.f32.mrf.mxu0 }
0x1ef1   :  { %v4476_v51 = vpop.f32.mrf.mxu0 }
0x1ef2   :  { %17121 = vmatprep.mubr.msk.f32.mxu1 %vm738_vm10, %v4476_v51  ;;  %v18452_v51 = vld [vmem:[%s18533_s13 + $0x8] sm:$0xff]  ;;  %s18481_s13 = smov 21  }
0x1ef3   :  { %17122 = vmatmul.mubr.msk.f32.vlgmr.msra.gmra.mxu1 %vm738_vm10, %v17118_v52  ;;  %s19160_s3 = sld [smem:[%s20294_s0 + %s18481_s13]]   ;;  %s18488_s13 = smov 26  }
0x1ef4   :  { %17136 = vmatpush3.msra.mxu1 %v15302_v49  ;;  %17143 = vmatprep.mubr.msk.f32.mxu1 %vm415_vm3, %v18919_v60  ;;  %v15312_v60 = vld [vmem:[%s18648_s24 + $0x7] ss:$0 sm:$0xff]  ;;  %s19266_s16 = sld [smem:[%s20294_s0 + %s18488_s13]]  }
0x1ef5   :  { %17137 = vmatprep.subr.mxu1 %v15301_v53  ;;  %s19549_s13 = sld [smem:[%s20294_s0 + %s18497_s27]]  }
0x1ef6   :  { %17138 = vmatpush3.msra.mxu1 %v15301_v53  ;;  %v19114_v53 = vadd.f32 %v18452_v51, %v18635_v26 }
0x1ef7   :  { %v17134_v58 = vpop.f32.mrf.mxu0  ;;  %17139 = vmatprep.subr.mxu1 %v15300_v55 }
0x1ef8   :  { %v4655_v59 = vadd.f32 %v17134_v58, %v15296_v56  ;;  %17140 = vmatpush3.msra.mxu1 %v15300_v55 }
0x1ef9   :  { %v4649_v62 = vpop.f32.mrf.mxu0  ;;  %17141 = vmatprep.subr.mxu1 %v15299_v57 }
0x1efa   :  { %v4650_v63 = vadd.f32 %v15296_v56, %v4649_v62  ;;  %17142 = vmatpush3.msra.mxu1 %v15299_v57  ;;  %v19123_v56 = vadd.f32 %v18453_v1, %v18642_v27  ;;  %v5438_v57 = vsel %vm415_vm3, %v19114_v53, 0.0 }
0x1efb   :  { %17144 = vmatmul.mubr.msk.f32.vlgmr.msra.gmra.mxu1 %vm415_vm3, %v18921_v61 }
0x1efc   :  { %17161 = vmatprep.mubr.msk.f32.mxu1 %vm738_vm10, %v4650_v63  ;;  %v5435_v26 = vsel %vm415_vm3, %v19123_v56, 0.0 }
0x1eff   :  { %v17156_v2 = vpop.f32.mrf.mxu0 }
0x1f00   :  { %v4831_v3 = vadd.f32 %v17156_v2, %v15312_v60 }
0x1f01   :  { %v4825_v4 = vpop.f32.mrf.mxu0 }
0x1f02   :  { %v4826_v5 = vadd.f32 %v15312_v60, %v4825_v4  ;;  %17164 = vmatprep.subr.mxu0 %v4831_v3 }
0x1f03   :  { %17165 = vmatpush3.msra.mxu0 %v4831_v3 }
0x1f04   :  { %17166 = vmatprep.subr.mxu0 %v4826_v5 }
0x1f05   :  { %17167 = vmatpush3.msra.mxu0 %v4826_v5 }
0x1fb3   :  { %v17123_v7 = vpop.f32.mrf.mxu1 }
0x1fb4   :  { %v4569_v10 = vadd.f32 %v17123_v7, %v4028_v6 }
0x1fb5   :  { %v4559_v11 = vpop.f32.mrf.mxu1 }
0x1fb6   :  { %v4568_v44 = vadd.f32 %v4559_v11, %v4023_v25 }
0x1fbb   :  { %v17145_v15 = vpop.f32.mrf.mxu1 }
0x1fbc   :  { %v4743_v61 = vadd.f32 %v17145_v15, %v15304_v28 }
0x1fbd   :  { %v4737_v16 = vpop.f32.mrf.mxu1 }
0x1fbe   :  { %v4738_v23 = vadd.f32 %v15304_v28, %v4737_v16  ;;  %17157 = vmatprep.subr.msk.mxu1 %vm738_vm10, %v4743_v61 }
0x1fbf   :  { %17158 = vmatpush3.xpose.msk.msra.mxu1 %vm738_vm10, %v4743_v61 }
0x1fc0   :  { %17159 = vmatprep.subr.msk.mxu1 %vm738_vm10, %v4738_v23 }
0x1fc3   :  { %17160 = vmatpush3.xpose.msk.msra.mxu1 %vm738_vm10, %v4738_v23 }
0x1fc4   :  { %17171 = vmatprep.subr.mxu1 %v15321_v35 }
0x1fc6   :  { %17162 = vmatmul.mubr.msk.f32.vlgmr.msra.gmra.mxu1 %vm738_vm10, %v4655_v59 }
0x1fc7   :  { %17172 = vmatpush3.msra.mxu1 %v15321_v35 }
0x2086   :  { %v17163_v18 = vpop.f32.mrf.mxu1 }
0x2087   :  { %v4918_v50 = vadd.f32 %v18956_v17, %v17163_v18  ;;  %v15332_v18 = vld [vmem:[%s18856_s17 + $0x38] sm:$0xff] }
0x2088   :  { %v4912_v0 = vpop.f32.mrf.mxu1  ;;  %17176 = vmatprep.subr.mxu0 %v15332_v18 }
0x2089   :  { %v4913_v19 = vadd.f32 %v18960_v31, %v4912_v0  ;;  %v4924_v8 = vsel %vm826_vm11, %v4918_v50, -inf  ;;  %v15330_v0 = vld [vmem:[%s18856_s17 + $0x28] sm:$0xff] }
0x208a   :  { %4925 = vmax.xlane.f32.xlu1 %v4924_v8  ;;  %v19165_v8 = vld [vmem:[%s19160_s3 + $0x18] sm:$0xff] }
0x208b   :  { %v4921_v22 = vsel %vm826_vm11, %v4913_v19, -inf }
0x208c   :  { %4922 = vmax.xlane.f32.xlu0 %v4921_v22  ;;  %v15341_v22 = vld [vmem:[%s18865_s22 + $0x78] sm:$0xff] }
0x208d   :  { %17187 = vmatprep.subr.mxu1 %v15341_v22 }
0x2113   :  { %v4926_v13 = vpop.xlane.xlu1 %4925 }
0x2114   :  { %v4928_v21 = vsub.f32 %v4918_v50, %v4926_v13  ;;  %v15331_v50 = vld [vmem:[%s18856_s17 + $0x30] sm:$0xff] }
0x2115   :  { %v4923_v24 = vpop.xlane.xlu0 %4922  ;;  %v15340_v13 = vld [vmem:[%s18865_s22 + $0x70] sm:$0xff] }
0x2116   :  { %v4931_v29 = vmul.f32 1.442695, %v4928_v21  ;;  %v4927_v30 = vsub.f32 %v4913_v19, %v4923_v24  ;;  %v15329_v19 = vld [vmem:[%s18856_s17 + $0x20] sm:$0xff]  ;;  %v15339_v21 = vld [vmem:[%s18865_s22 + $0x68] sm:$0xff] }
0x2117   :  { %v15338_v24 = vld [vmem:[%s18865_s22 + $0x60] sm:$0xff] }
0x2118   :  { %18242 = vpow2.f32 %v4931_v29  ;;  %v4929_v32 = vmul.f32 1.442695, %v4927_v30  ;;  %v15337_v29 = vld [vmem:[%s18865_s22 + $0x58] sm:$0xff] }
0x211a   :  { %18244 = vpow2.f32 %v4929_v32 }
0x2125   :  { %v18243_v33 = vpop.eup %18242 }
0x2126   :  { %v4936_v17 = vsel %vm826_vm11, %v18243_v33, 0.0 }
0x2127   :  { %v18245_v34 = vpop.eup %18244  ;;  %4937 = vadd.xlane.f32.xlu1 %v4936_v17 }
0x2128   :  { %v4933_v31 = vsel %vm826_vm11, %v18245_v34, 0.0 }
0x2129   :  { %4934 = vadd.xlane.f32.xlu0 %v4933_v31 }
0x21b0   :  { %v4938_v36 = vpop.xlane.xlu1 %4937 }
0x21b1   :  { %18246 = vrcp.f32 %v4938_v36 }
0x21b2   :  { %v4935_v37 = vpop.xlane.xlu0 %4934 }
0x21b3   :  { %18248 = vrcp.f32 %v4935_v37 }
0x21be   :  { %v18247_v38 = vpop.eup %18246 }
0x21bf   :  { %v4942_v40 = vmul.f32 %v18247_v38, %v18243_v33 }
0x21c0   :  { %v18249_v20 = vpop.eup %18248 }
0x21c1   :  { %v4941_v39 = vmul.f32 %v18249_v20, %v18245_v34 }
0x21c3   :  { %17168 = vmatprep.mubr.msk.f32.mxu0 %vm826_vm11, %v4941_v39 }
0x21c4   :  { %17169 = vmatmul.mubr.msk.f32.vlgmr.msra.gmra.mxu0 %vm826_vm11, %v4942_v40 }
0x21c5   :  { %17177 = vmatpush3.msra.mxu0 %v15332_v18 }
0x21c6   :  { %17178 = vmatprep.subr.mxu0 %v15331_v50 }
0x21c7   :  { %17179 = vmatpush3.msra.mxu0 %v15331_v50  ;;  %v15352_v50 = vld [vmem:[%s19183_s12] ss:$0 sm:$0xff] }
0x21c8   :  { %17180 = vmatprep.subr.mxu0 %v15330_v0 }
0x21c9   :  { %17181 = vmatpush3.msra.mxu0 %v15330_v0  ;;  %v5493_v0 = vld [vmem:[%s19160_s3 + $0x8] sm:$0xff] }
0x21ca   :  { %17182 = vmatprep.subr.mxu0 %v15329_v19 }
0x21cb   :  { %17183 = vmatpush3.msra.mxu0 %v15329_v19 }
0x21cc   :  { %17206 = vmatprep.subr.mxu0 %v19165_v8 }
0x2284   :  { %v17170_v41 = vpop.f32.mrf.mxu0 }
0x2286   :  { %v5015_v9 = vpop.f32.mrf.mxu0 }
0x2287   :  { %17173 = vmatprep.mubr.msk.f32.mxu1 %vm738_vm10, %v5015_v9 }
0x2288   :  { %17174 = vmatmul.mubr.msk.f32.vlgmr.msra.gmra.mxu1 %vm738_vm10, %v17170_v41 }
0x2289   :  { %17188 = vmatpush3.msra.mxu1 %v15341_v22  ;;  %v5492_v22 = vld [vmem:[%s19160_s3] sm:$0xff] }
0x228a   :  { %17189 = vmatprep.subr.mxu1 %v15340_v13 }
0x228b   :  { %17190 = vmatpush3.msra.mxu1 %v15340_v13 }
0x228c   :  { %17191 = vmatprep.subr.mxu1 %v15339_v21 }
0x228d   :  { %17192 = vmatpush3.msra.mxu1 %v15339_v21 }
0x228e   :  { %17193 = vmatprep.subr.mxu1 %v15338_v24 }
0x228f   :  { %17194 = vmatpush3.msra.mxu1 %v15338_v24 }
0x2290   :  { %17195 = vmatprep.subr.mxu1 %v15337_v29 }
0x2291   :  { %17196 = vmatpush3.msra.mxu1 %v15337_v29  ;;  %v15336_v29 = vld [vmem:[%s18865_s22 + $0x50] sm:$0xff] }
0x2292   :  { %17197 = vmatprep.subr.mxu1 %v15336_v29 }
0x2293   :  { %17198 = vmatpush3.msra.mxu1 %v15336_v29  ;;  %v15371_v29 = vld [vmem:[%s19160_s3 + $0x38] sm:$0xff] }
0x2348   :  { %v17175_v43 = vpop.f32.mrf.mxu1 }
0x2349   :  { %v5108_v45 = vadd.f32 %v17175_v43, %v4569_v10 }
0x234a   :  { %v5098_v46 = vpop.f32.mrf.mxu1 }
0x234b   :  { %v5116_v47 = vadd.f32 %v15324_v42, %v5108_v45  ;;  %v5107_v48 = vadd.f32 %v5098_v46, %v4568_v44 }
0x234d   :  { %v19110_v49 = vadd.f32 %v5116_v47, %v18895_v12  ;;  %v5115_v52 = vadd.f32 %v15324_v42, %v5107_v48 }
0x234f   :  { %v19117_v55 = vadd.f32 %v5115_v52, %v18898_v14  ;;  %v5126_v54 = vsel %vm415_vm3, %v19110_v49, 0.0 }
0x2350   :  { %5127 = vadd.xlane.f32.xlu1 %v5126_v54 }
0x2351   :  { %v5123_v12 = vsel %vm415_vm3, %v19117_v55, 0.0 }
0x2352   :  { %5124 = vadd.xlane.f32.xlu0 %v5123_v12 }
0x2354   :  { %5439 = vadd.xlane.f32.xlu1 %v5438_v57 }
0x2356   :  { %5436 = vadd.xlane.f32.xlu0 %v5435_v26 }
0x23d9   :  { %v5128_v14 = vpop.xlane.xlu1 %5127 }
0x23da   :  { %v5130_v58 = vmul.f32 0.03125, %v5128_v14 }
0x23db   :  { %v5125_v59 = vpop.xlane.xlu0 %5124 }
0x23dc   :  { %v19132_v62 = vsub.f32 %v19110_v49, %v5130_v58  ;;  %v5129_v27 = vmul.f32 0.03125, %v5125_v59  ;;  %v15327_v59 = vld [vmem:[%s18599_s7 + $0x3] ss:$0 sm:$0xff]  ;;  %s18484_s7 = smov 23  }
0x23dd   :  { %v5440_v63 = vpop.xlane.xlu1 %5439  ;;  %s19192_s17 = sld [smem:[%s20294_s0 + %s18484_s7]]  }
0x23de   :  { %v19135_v60 = vsub.f32 %v19117_v55, %v5129_v27  ;;  %v5442_v2 = vmul.f32 0.03125, %v5440_v63  ;;  %v5134_v3 = vmul.f32 %v19132_v62, %v19132_v62  ;;  %v5168_v63 = vmul.f32 %v15327_v59, %v19132_v62  ;;  %s19763_s7 = sld [smem:[%s20294_s0 + %s18502_s20]]  }
0x23df   :  { %v5437_v4 = vpop.xlane.xlu0 %5436 }
0x23e0   :  { %v19140_v5 = vsub.f32 %v19114_v53, %v5442_v2  ;;  %v5441_v6 = vmul.f32 0.03125, %v5437_v4  ;;  %v5138_v7 = vsel %vm415_vm3, %v5134_v3, 0.0  ;;  %v5133_v10 = vmul.f32 %v19135_v60, %v19135_v60 }
0x23e1   :  { %5139 = vadd.xlane.f32.xlu1 %v5138_v7  ;;  %v5167_v2 = vmul.f32 %v15327_v59, %v19135_v60 }
0x23e2   :  { %v19146_v11 = vsub.f32 %v19123_v56, %v5441_v6  ;;  %v5446_v28 = vmul.f32 %v19140_v5, %v19140_v5  ;;  %v5135_v15 = vsel %vm415_vm3, %v5133_v10, 0.0  ;;  %v15328_v6 = vld [vmem:[%s18604_s11 + $0x3] ss:$0 sm:$0xff]  ;;  %v15351_v10 = vld [vmem:[%s19176_s5] ss:$0 sm:$0xff]  ;;  %s18485_s11 = smov 25  }
0x23e3   :  { %5136 = vadd.xlane.f32.xlu0 %v5135_v15  ;;  %v5480_v18 = vmul.f32 %v15351_v10, %v19140_v5  ;;  %v5587_v5 = vld [vmem:[%s19192_s17 + $0x18] sm:$0xff]  ;;  %v5586_v21 = vld [vmem:[%s19192_s17 + $0x10] sm:$0xff]  ;;  %v5584_v24 = vld [vmem:[%s19192_s17] sm:$0xff]  ;;  %s19222_s21 = sld [smem:[%s20294_s0 + %s18485_s11]]   ;;  %s18496_s11 = smov 33  }
0x23e4   :  { %v5450_v61 = vsel %vm415_vm3, %v5446_v28, 0.0  ;;  %v5445_v16 = vmul.f32 %v19146_v11, %v19146_v11  ;;  %v5479_v28 = vmul.f32 %v15351_v10, %v19146_v11  ;;  %s19524_s26 = sld [smem:[%s20294_s0 + %s18496_s11]]   ;;  %s18500_s11 = smov 35  }
0x23e5   :  { %5451 = vadd.xlane.f32.xlu1 %v5450_v61  ;;  %s19626_s27 = sld [smem:[%s20294_s0 + %s18500_s11]]   ;;  %s18503_s11 = smov 39  }
0x23e6   :  { %v5447_v23 = vsel %vm415_vm3, %v5445_v16, 0.0  ;;  %s19772_s2 = sld [smem:[%s20294_s0 + %s18503_s11]]  }
0x23e7   :  { %5448 = vadd.xlane.f32.xlu0 %v5447_v23  ;;  %v5494_v23 = vld [vmem:[%s19160_s3 + $0x10] sm:$0xff] }
0x246a   :  { %v5140_v30 = vpop.xlane.xlu1 %5139 }
0x246b   :  { %v5142_v32 = vmul.f32 0.032258064, %v5140_v30  ;;  %v15335_v30 = vld [vmem:[%s18865_s22 + $0x48] sm:$0xff] }
0x246c   :  { %v5137_v33 = vpop.xlane.xlu0 %5136  ;;  %17199 = vmatprep.subr.mxu1 %v15335_v30 }
0x246d   :  { %18250 = vrsqrt.f32 %v5142_v32  ;;  %v5141_v17 = vmul.f32 0.032258064, %v5137_v33  ;;  %vm5152_vm6 = vcmp.eq.f32.partialorder %v5142_v32, inf  ;;  %v5155_v20 = vand.u32 2147483648, %v5142_v32  ;;  %17200 = vmatpush3.msra.mxu1 %v15335_v30  ;;  %v5673_v33 = vld [vmem:[%s19222_s21 + $0x18] sm:$0xff] }
0x246e   :  { %v5452_v34 = vpop.xlane.xlu1 %5451  ;;  %vm5154_vm7 = vcmp.eq.f32.partialorder %v5142_v32, 0.0 }
0x246f   :  { %v5454_v31 = vmul.f32 0.032258064, %v5452_v34  ;;  %18252 = vrsqrt.f32 %v5141_v17  ;;  %vm5145_vm8 = vcmp.eq.f32.partialorder %v5141_v17, inf  ;;  %v5148_v43 = vand.u32 2147483648, %v5141_v17 }
0x2470   :  { %v5449_v35 = vpop.xlane.xlu0 %5448  ;;  %vm5147_vm9 = vcmp.eq.f32.partialorder %v5141_v17, 0.0 }
0x2471   :  { %18254 = vrsqrt.f32 %v5454_v31  ;;  %v5453_v36 = vmul.f32 0.032258064, %v5449_v35  ;;  %vm5464_vm12 = vcmp.eq.f32.partialorder %v5454_v31, inf  ;;  %v5467_v46 = vand.u32 2147483648, %v5454_v31 }
0x2472   :  { %vm5466_vm13 = vcmp.eq.f32.partialorder %v5454_v31, 0.0 }
0x2473   :  { %18256 = vrsqrt.f32 %v5453_v36  ;;  %vm5457_vm14 = vcmp.eq.f32.partialorder %v5453_v36, inf  ;;  %v5460_v12 = vand.u32 2147483648, %v5453_v36  ;;  %vm5459_vm15 = vcmp.eq.f32.partialorder %v5453_v36, 0.0 }
0x247a   :  { %v18251_v37 = vpop.eup %18250 }
0x247b   :  { %v5151_v38 = vmul.f32 %v18251_v37, %v5142_v32 }
0x247c   :  { %v18253_v39 = vpop.eup %18252 }
0x247d   :  { %v5153_v40 = vsel %vm5152_vm6, %v5142_v32, %v5151_v38  ;;  %v5144_v25 = vmul.f32 %v18253_v39, %v5141_v17  ;;  %v15334_v32 = vld [vmem:[%s18865_s22 + $0x40] sm:$0xff]  ;;  %s18487_s22 = smov 24  }
0x247e   :  { %v18255_v41 = vpop.eup %18254  ;;  %v5156_v9 = vsel %vm5154_vm7, %v5155_v20, %v5153_v40  ;;  %17201 = vmatprep.subr.mxu1 %v15334_v32  ;;  %v5672_v20 = vld [vmem:[%s19222_s21 + $0x10] sm:$0xff]  ;;  %v5671_v40 = vld [vmem:[%s19222_s21 + $0x8] sm:$0xff] }
0x247f   :  { %v5158_v42 = vadd.f32 1e-06, %v5156_v9  ;;  %v5463_v44 = vmul.f32 %v18255_v41, %v5454_v31  ;;  %v5146_v45 = vsel %vm5145_vm8, %v5141_v17, %v5144_v25  ;;  %17202 = vmatpush3.msra.mxu1 %v15334_v32  ;;  %v15343_v17 = vld [vmem:[%s18883_s28 + $0x1] ss:$0 sm:$0xff]  ;;  %s19236_s28 = sld [smem:[%s20294_s0 + %s18487_s22]]   ;;  %v15353_v41 = vld [vmem:[%s19231_s1] ss:$0 sm:$0xff] }
0x2480   :  { %v18257_v47 = vpop.eup %18256  ;;  %v5149_v48 = vsel %vm5147_vm9, %v5148_v43, %v5146_v45  ;;  %17228 = vmatprep.subr.mxu1 %v5673_v33  ;;  %s19478_s22 = sld [smem:[%s20294_s0 + %s18492_s23]]  }
0x2481   :  { %18258 = vrcp.f32 %v5158_v42  ;;  %v5465_v52 = vsel %vm5464_vm12, %v5454_v31, %v5463_v44  ;;  %v5157_v51 = vadd.f32 1e-06, %v5149_v48  ;;  %v5456_v1 = vmul.f32 %v18257_v47, %v5453_v36  ;;  %v5670_v42 = vld [vmem:[%s19222_s21] sm:$0xff]  ;;  %v15379_v48 = vld [vmem:[%s19192_s17 + $0x38] sm:$0xff] }
0x2482   :  { %v5468_v54 = vsel %vm5466_vm13, %v5467_v46, %v5465_v52 }
0x2483   :  { %18260 = vrcp.f32 %v5157_v51  ;;  %v5458_v57 = vsel %vm5457_vm14, %v5453_v36, %v5456_v1  ;;  %v5470_v26 = vadd.f32 1e-06, %v5468_v54  ;;  %v15378_v51 = vld [vmem:[%s19192_s17 + $0x30] sm:$0xff]  ;;  %v15377_v54 = vld [vmem:[%s19192_s17 + $0x28] sm:$0xff]  ;;  %v15376_v1 = vld [vmem:[%s19192_s17 + $0x20] sm:$0xff] }
0x2484   :  { %v5461_v14 = vsel %vm5459_vm15, %v5460_v12, %v5458_v57 }
0x2485   :  { %v5469_v58 = vadd.f32 1e-06, %v5461_v14  ;;  %v15356_v43 = vld [vmem:[%s19236_s28] ss:$0 sm:$0xff] }
0x2487   :  { %18262 = vrcp.f32 %v5469_v58 }
0x2488   :  { %18264 = vrcp.f32 %v5470_v26  ;;  %v15359_v26 = vld [vmem:[%s19266_s16] ss:$0 sm:$0xff] }
0x248e   :  { %v18259_v27 = vpop.eup %18258 }
0x248f   :  { %v5170_v4 = vmul.f32 %v18259_v27, %v5168_v63  ;;  %v19279_v63 = vld [vmem:[%s19276_s9 + $0x8] sm:$0xff] }
0x2490   :  { %v18261_v3 = vpop.eup %18260 }
0x2491   :  { %v5169_v7 = vmul.f32 %v18261_v3, %v5167_v2  ;;  %v5178_v61 = vadd.f32 %v15328_v6, %v5170_v4  ;;  %v19282_v3 = vld [vmem:[%s19276_s9] sm:$0xff] }
0x2493   :  { %v5177_v15 = vadd.f32 %v15328_v6, %v5169_v7 }
0x2494   :  { %v18263_v62 = vpop.eup %18262 }
0x2495   :  { %v18265_v60 = vpop.eup %18264  ;;  %v5481_v16 = vmul.f32 %v18263_v62, %v5479_v28  ;;  %17184 = vmatprep.mubr.msk.f32.mxu0 %vm415_vm3, %v5177_v15  ;;  %v15381_v15 = vld [vmem:[%s19236_s28 + $0x1] ss:$0 sm:$0xff] }
0x2496   :  { %17185 = vmatmul.mubr.msk.f32.vlgmr.msra.gmra.mxu0 %vm415_vm3, %v5178_v61  ;;  %v5482_v19 = vmul.f32 %v18265_v60, %v5480_v18 }
0x2497   :  { %v19199_v11 = vadd.f32 %v15352_v50, %v5481_v16  ;;  %17207 = vmatpush3.msra.mxu0 %v19165_v8  ;;  %v5585_v8 = vld [vmem:[%s19192_s17 + $0x8] sm:$0xff] }
0x2498   :  { %17208 = vmatprep.subr.mxu0 %v5494_v23  ;;  %v19207_v13 = vadd.f32 %v15352_v50, %v5482_v19 }
0x2499   :  { %17209 = vmatpush3.msra.mxu0 %v5494_v23  ;;  %17214 = vmatprep.mubr.msk.f32.mxu0 %vm415_vm3, %v19199_v11 }
0x249a   :  { %17210 = vmatprep.subr.mxu0 %v5493_v0 }
0x249b   :  { %17211 = vmatpush3.msra.mxu0 %v5493_v0 }
0x249c   :  { %17212 = vmatprep.subr.mxu0 %v5492_v22 }
0x249d   :  { %17213 = vmatpush3.msra.mxu0 %v5492_v22 }
0x249e   :  { %17215 = vmatmul.mubr.msk.f32.vlgmr.msra.gmra.mxu0 %vm415_vm3, %v19207_v13  ;;  %17217 = vmatprep.subr.mxu0 %v5587_v5 }
0x249f   :  { %17218 = vmatpush3.msra.mxu0 %v5587_v5  ;;  %17225 = vmatprep.mubr.msk.f32.mxu0 %vm415_vm3, %v19199_v11 }
0x24a0   :  { %17219 = vmatprep.subr.mxu0 %v5586_v21 }
0x24a1   :  { %17220 = vmatpush3.msra.mxu0 %v5586_v21 }
0x24a2   :  { %17221 = vmatprep.subr.mxu0 %v5585_v8 }
0x24a3   :  { %17222 = vmatpush3.msra.mxu0 %v5585_v8 }
0x24a4   :  { %17223 = vmatprep.subr.mxu0 %v5584_v24 }
0x24a5   :  { %17224 = vmatpush3.msra.mxu0 %v5584_v24 }
0x24a6   :  { %17226 = vmatmul.mubr.msk.f32.vlgmr.msra.gmra.mxu0 %vm415_vm3, %v19207_v13 }
0x2556   :  { %v17186_v34 = vpop.f32.mrf.mxu0 }
0x2557   :  { %v5281_v31 = vadd.f32 %v17186_v34, %v15343_v17 }
0x2558   :  { %v5275_v35 = vpop.f32.mrf.mxu0 }
0x2559   :  { %v5276_v36 = vadd.f32 %v15343_v17, %v5275_v35  ;;  %v5285_v38 = vmax.f32 %v5281_v31, 0.0  ;;  %v15370_v35 = vld [vmem:[%s19160_s3 + $0x30] sm:$0xff] }
0x255b   :  { %v5284_v37 = vmax.f32 %v5276_v36, 0.0  ;;  %v15369_v36 = vld [vmem:[%s19160_s3 + $0x28] sm:$0xff] }
0x255d   :  { %17203 = vmatprep.mubr.msk.f32.mxu1 %vm230_vm0, %v5284_v37  ;;  %v15368_v37 = vld [vmem:[%s19160_s3 + $0x20] sm:$0xff] }
0x255e   :  { %v17216_v39 = vpop.f32.mrf.mxu0  ;;  %17204 = vmatmul.mubr.msk.f32.vlgmr.msra.gmra.mxu1 %vm230_vm0, %v5285_v38  ;;  %v15387_v38 = vld [vmem:[%s19222_s21 + $0x38] sm:$0xff] }
0x255f   :  { %17229 = vmatpush3.msra.mxu1 %v5673_v33  ;;  %17236 = vmatprep.mubr.msk.f32.mxu1 %vm415_vm3, %v19199_v11  ;;  %v5581_v52 = vadd.f32 %v17216_v39, %v15353_v41  ;;  %v15385_v39 = vld [vmem:[%s19222_s21 + $0x28] sm:$0xff] }
0x2560   :  { %v5575_v9 = vpop.f32.mrf.mxu0  ;;  %17230 = vmatprep.subr.mxu1 %v5672_v20 }
0x2561   :  { %v5576_v25 = vadd.f32 %v15353_v41, %v5575_v9  ;;  %17231 = vmatpush3.msra.mxu1 %v5672_v20  ;;  %v15386_v20 = vld [vmem:[%s19222_s21 + $0x30] sm:$0xff] }
0x2562   :  { %17232 = vmatprep.subr.mxu1 %v5671_v40 }
0x2563   :  { %17233 = vmatpush3.msra.mxu1 %v5671_v40  ;;  %17243 = vmatprep.mubr.msk.f32.mxu0 %vm738_vm10, %v5576_v25  ;;  %v15384_v40 = vld [vmem:[%s19222_s21 + $0x20] sm:$0xff] }
0x2564   :  { %17234 = vmatprep.subr.mxu1 %v5670_v42 }
0x2565   :  { %17235 = vmatpush3.msra.mxu1 %v5670_v42  ;;  %v15373_v42 = vld [vmem:[%s19231_s1 + $0x1] ss:$0 sm:$0xff] }
0x2566   :  { %v17227_v44 = vpop.f32.mrf.mxu0  ;;  %17237 = vmatmul.mubr.msk.f32.vlgmr.msra.gmra.mxu1 %vm415_vm3, %v19207_v13 }
0x2567   :  { %v5667_v45 = vadd.f32 %v17227_v44, %v15356_v43 }
0x2568   :  { %v5661_v46 = vpop.f32.mrf.mxu0 }
0x2569   :  { %v5662_v47 = vadd.f32 %v15356_v43, %v5661_v46  ;;  %17239 = vmatprep.subr.msk.mxu0 %vm738_vm10, %v5667_v45  ;;  %v15389_v46 = vld [vmem:[%s19266_s16 + $0x1] ss:$0 sm:$0xff] }
0x256a   :  { %17240 = vmatpush3.xpose.msk.msra.mxu0 %vm738_vm10, %v5667_v45 }
0x256b   :  { %17241 = vmatprep.subr.msk.mxu0 %vm738_vm10, %v5662_v47 }
0x256e   :  { %17242 = vmatpush3.xpose.msk.msra.mxu0 %vm738_vm10, %v5662_v47 }
0x256f   :  { %17264 = vmatprep.subr.mxu0 %v15379_v48 }
0x2571   :  { %17244 = vmatmul.mubr.msk.f32.vlgmr.msra.gmra.mxu0 %vm738_vm10, %v5581_v52 }
0x2572   :  { %17265 = vmatpush3.msra.mxu0 %v15379_v48  ;;  %17272 = vmatprep.mubr.msk.f32.mxu0 %vm415_vm3, %v19199_v11 }
0x2573   :  { %17266 = vmatprep.subr.mxu0 %v15378_v51 }
0x2574   :  { %17267 = vmatpush3.msra.mxu0 %v15378_v51 }
0x2575   :  { %17268 = vmatprep.subr.mxu0 %v15377_v54 }
0x2576   :  { %17269 = vmatpush3.msra.mxu0 %v15377_v54 }
0x2577   :  { %17270 = vmatprep.subr.mxu0 %v15376_v1 }
0x2578   :  { %17271 = vmatpush3.msra.mxu0 %v15376_v1 }
0x2579   :  { %17273 = vmatmul.mubr.msk.f32.vlgmr.msra.gmra.mxu0 %vm415_vm3, %v19207_v13 }
0x261e   :  { %v19268_v12 = vpop.f32.mrf.mxu1 }
0x2620   :  { %v19270_v57 = vpop.f32.mrf.mxu1 }
0x2626   :  { %v17238_v14 = vpop.f32.mrf.mxu1 }
0x2627   :  { %v5753_v58 = vadd.f32 %v17238_v14, %v15359_v26 }
0x2628   :  { %v5747_v59 = vpop.f32.mrf.mxu1 }
0x2629   :  { %v5748_v27 = vadd.f32 %v15359_v26, %v5747_v59  ;;  %17246 = vmatprep.subr.mxu1 %v5753_v58 }
0x262a   :  { %17247 = vmatpush3.msra.mxu1 %v5753_v58 }
0x262b   :  { %17248 = vmatprep.subr.mxu1 %v5748_v27 }
0x262c   :  { %17249 = vmatpush3.msra.mxu1 %v5748_v27 }
0x262d   :  { %17253 = vmatprep.subr.mxu1 %v15371_v29 }
0x2631   :  { %v17245_v2 = vpop.f32.mrf.mxu0 }
0x2632   :  { %v5840_v4 = vadd.f32 %v17245_v2, %v19279_v63 }
0x2633   :  { %v5834_v6 = vpop.f32.mrf.mxu0 }
0x2634   :  { %v5835_v7 = vadd.f32 %v5834_v6, %v19282_v3  ;;  %v5846_v10 = vsel %vm826_vm11, %v5840_v4, -inf }
0x2635   :  { %5847 = vmax.xlane.f32.xlu1 %v5846_v10 }
0x2636   :  { %v5843_v28 = vsel %vm826_vm11, %v5835_v7, -inf }
0x2637   :  { %5844 = vmax.xlane.f32.xlu0 %v5843_v28 }
0x2639   :  { %v17274_v62 = vpop.f32.mrf.mxu0 }
0x263a   :  { %v6120_v61 = vadd.f32 %v17274_v62, %v15381_v15 }
0x263b   :  { %v6114_v60 = vpop.f32.mrf.mxu0 }
0x263c   :  { %v6115_v16 = vadd.f32 %v15381_v15, %v6114_v60  ;;  %17286 = vmatprep.subr.msk.mxu0 %vm738_vm10, %v6120_v61  ;;  %v5946_v60 = vld [vmem:[%s19326_s15] sm:$0xff] }
0x263d   :  { %17287 = vmatpush3.xpose.msk.msra.mxu0 %vm738_vm10, %v6120_v61 }
0x263e   :  { %17288 = vmatprep.subr.msk.mxu0 %vm738_vm10, %v6115_v16 }
0x2641   :  { %17289 = vmatpush3.xpose.msk.msra.mxu0 %vm738_vm10, %v6115_v16  ;;  %v15398_v16 = vld [vmem:[%s19326_s15 + $0x8] sm:$0xff] }
0x2642   :  { %17300 = vmatprep.subr.mxu0 %v15398_v16 }
0x26be   :  { %v5848_v23 = vpop.xlane.xlu1 %5847 }
0x26bf   :  { %v5850_v18 = vsub.f32 %v5840_v4, %v5848_v23 }
0x26c0   :  { %v5845_v50 = vpop.xlane.xlu0 %5844 }
0x26c1   :  { %v5853_v0 = vmul.f32 1.442695, %v5850_v18  ;;  %v5849_v19 = vsub.f32 %v5835_v7, %v5845_v50 }
0x26c3   :  { %18266 = vpow2.f32 %v5853_v0  ;;  %v5851_v22 = vmul.f32 1.442695, %v5849_v19 }
0x26c5   :  { %18268 = vpow2.f32 %v5851_v22 }
0x26d0   :  { %v18267_v5 = vpop.eup %18266 }
0x26d1   :  { %v5858_v21 = vsel %vm826_vm11, %v18267_v5, 0.0 }
0x26d2   :  { %v18269_v8 = vpop.eup %18268  ;;  %5859 = vadd.xlane.f32.xlu1 %v5858_v21  ;;  %v15413_v21 = vld [vmem:[%s19192_s17 + $0x50] sm:$0xff] }
0x26d3   :  { %v5855_v24 = vsel %vm826_vm11, %v18269_v8, 0.0 }
0x26d4   :  { %5856 = vadd.xlane.f32.xlu0 %v5855_v24  ;;  %v15411_v24 = vld [vmem:[%s19192_s17 + $0x40] sm:$0xff] }
0x275b   :  { %v5860_v30 = vpop.xlane.xlu1 %5859 }
0x275c   :  { %18270 = vrcp.f32 %v5860_v30 }
0x275d   :  { %v5857_v32 = vpop.xlane.xlu0 %5856 }
0x275e   :  { %18272 = vrcp.f32 %v5857_v32 }
0x2769   :  { %v18271_v33 = vpop.eup %18270 }
0x276a   :  { %v5864_v31 = vmul.f32 %v18271_v33, %v18267_v5  ;;  %v15414_v5 = vld [vmem:[%s19192_s17 + $0x58] sm:$0xff]  ;;  %v15405_v33 = vld [vmem:[%s19160_s3 + $0x50] sm:$0xff] }
0x276b   :  { %v18273_v17 = vpop.eup %18272 }
0x276c   :  { %v5863_v34 = vmul.f32 %v18273_v17, %v18269_v8  ;;  %v15412_v8 = vld [vmem:[%s19192_s17 + $0x48] sm:$0xff] }
0x276d   :  { %v15404_v17 = vld [vmem:[%s19160_s3 + $0x48] sm:$0xff] }
0x276e   :  { %17250 = vmatprep.mubr.msk.f32.mxu1 %vm826_vm11, %v5863_v34 }
0x276f   :  { %17251 = vmatmul.mubr.msk.f32.vlgmr.msra.gmra.mxu1 %vm826_vm11, %v5864_v31  ;;  %v15403_v31 = vld [vmem:[%s19160_s3 + $0x40] sm:$0xff] }
0x2770   :  { %17254 = vmatpush3.msra.mxu1 %v15371_v29  ;;  %17261 = vmatprep.mubr.msk.f32.mxu1 %vm415_vm3, %v19199_v11  ;;  %v15406_v29 = vld [vmem:[%s19160_s3 + $0x58] sm:$0xff] }
0x2771   :  { %17255 = vmatprep.subr.mxu1 %v15370_v35 }
0x2772   :  { %17256 = vmatpush3.msra.mxu1 %v15370_v35  ;;  %v15422_v35 = vld [vmem:[%s19222_s21 + $0x58] sm:$0xff] }
0x2773   :  { %17257 = vmatprep.subr.mxu1 %v15369_v36 }
0x2774   :  { %17258 = vmatpush3.msra.mxu1 %v15369_v36 }
0x2775   :  { %17259 = vmatprep.subr.mxu1 %v15368_v37 }
0x2776   :  { %17260 = vmatpush3.msra.mxu1 %v15368_v37  ;;  %v15416_v37 = vld [vmem:[%s19236_s28 + $0x2] ss:$0 sm:$0xff] }
0x2777   :  { %17262 = vmatmul.mubr.msk.f32.vlgmr.msra.gmra.mxu1 %vm415_vm3, %v19207_v13  ;;  %17275 = vmatprep.subr.mxu1 %v15387_v38 }
0x2778   :  { %17276 = vmatpush3.msra.mxu1 %v15387_v38  ;;  %17283 = vmatprep.mubr.msk.f32.mxu1 %vm415_vm3, %v19199_v11  ;;  %v15421_v38 = vld [vmem:[%s19222_s21 + $0x50] sm:$0xff] }
0x2779   :  { %17277 = vmatprep.subr.mxu1 %v15386_v20 }
0x277a   :  { %17278 = vmatpush3.msra.mxu1 %v15386_v20 }
0x277b   :  { %17279 = vmatprep.subr.mxu1 %v15385_v39 }
0x277c   :  { %17280 = vmatpush3.msra.mxu1 %v15385_v39 }
0x277d   :  { %17281 = vmatprep.subr.mxu1 %v15384_v40 }
0x277e   :  { %17282 = vmatpush3.msra.mxu1 %v15384_v40  ;;  %v15420_v40 = vld [vmem:[%s19222_s21 + $0x48] sm:$0xff] }
0x277f   :  { %17284 = vmatmul.mubr.msk.f32.vlgmr.msra.gmra.mxu1 %vm415_vm3, %v19207_v13 }
0x282f   :  { %v17252_v41 = vpop.f32.mrf.mxu1 }
0x2831   :  { %v5937_v9 = vpop.f32.mrf.mxu1 }
0x2837   :  { %v17263_v25 = vpop.f32.mrf.mxu1 }
0x2838   :  { %v6032_v45 = vadd.f32 %v17263_v25, %v15373_v42  ;;  %v15419_v25 = vld [vmem:[%s19222_s21 + $0x40] sm:$0xff] }
0x2839   :  { %v6026_v43 = vpop.f32.mrf.mxu1 }
0x283a   :  { %v6027_v44 = vadd.f32 %v15373_v42, %v6026_v43 }
0x283c   :  { %17290 = vmatprep.mubr.msk.f32.mxu0 %vm738_vm10, %v6027_v44 }
0x283d   :  { %17291 = vmatmul.mubr.msk.f32.vlgmr.msra.gmra.mxu0 %vm738_vm10, %v6032_v45  ;;  %v15408_v45 = vld [vmem:[%s19231_s1 + $0x2] ss:$0 sm:$0xff] }
0x283e   :  { %17301 = vmatpush3.msra.mxu0 %v15398_v16 }
0x283f   :  { %v17285_v47 = vpop.f32.mrf.mxu1  ;;  %17310 = vmatprep.subr.mxu0 %v15406_v29 }
0x2840   :  { %v6208_v48 = vadd.f32 %v17285_v47, %v15389_v46 }
0x2841   :  { %v6202_v52 = vpop.f32.mrf.mxu1 }
0x2842   :  { %v6203_v51 = vadd.f32 %v15389_v46, %v6202_v52  ;;  %17293 = vmatprep.subr.mxu1 %v6208_v48  ;;  %v15424_v52 = vld [vmem:[%s19266_s16 + $0x2] ss:$0 sm:$0xff] }
0x2843   :  { %17294 = vmatpush3.msra.mxu1 %v6208_v48 }
0x2844   :  { %17295 = vmatprep.subr.mxu1 %v6203_v51 }
0x2845   :  { %17296 = vmatpush3.msra.mxu1 %v6203_v51 }
0x2846   :  { %17305 = vmatprep.subr.mxu1 %v5946_v60 }
0x28fd   :  { %v17292_v54 = vpop.f32.mrf.mxu0 }
0x28fe   :  { %v6295_v1 = vadd.f32 %v17292_v54, %v19279_v63 }
0x28ff   :  { %v6289_v26 = vpop.f32.mrf.mxu0 }
0x2900   :  { %v6290_v14 = vadd.f32 %v6289_v26, %v19282_v3  ;;  %v6301_v58 = vsel %vm826_vm11, %v6295_v1, -inf }
0x2901   :  { %6302 = vmax.xlane.f32.xlu1 %v6301_v58 }
0x2902   :  { %v6298_v59 = vsel %vm826_vm11, %v6290_v14, -inf }
0x2903   :  { %6299 = vmax.xlane.f32.xlu0 %v6298_v59 }
0x298a   :  { %v6303_v27 = vpop.xlane.xlu1 %6302 }
0x298b   :  { %v6305_v2 = vsub.f32 %v6295_v1, %v6303_v27 }
0x298c   :  { %v6300_v4 = vpop.xlane.xlu0 %6299 }
0x298d   :  { %v6308_v6 = vmul.f32 1.442695, %v6305_v2  ;;  %v6304_v7 = vsub.f32 %v6290_v14, %v6300_v4 }
0x298f   :  { %18274 = vpow2.f32 %v6308_v6  ;;  %v6306_v10 = vmul.f32 1.442695, %v6304_v7 }
0x2991   :  { %18276 = vpow2.f32 %v6306_v10 }
0x299c   :  { %v18275_v28 = vpop.eup %18274 }
0x299d   :  { %v6313_v15 = vsel %vm826_vm11, %v18275_v28, 0.0 }
0x299e   :  { %v18277_v62 = vpop.eup %18276  ;;  %6314 = vadd.xlane.f32.xlu1 %v6313_v15 }
0x299f   :  { %v6310_v61 = vsel %vm826_vm11, %v18277_v62, 0.0 }
0x29a0   :  { %6311 = vadd.xlane.f32.xlu0 %v6310_v61 }
0x2a27   :  { %v6315_v23 = vpop.xlane.xlu1 %6314 }
0x2a28   :  { %18278 = vrcp.f32 %v6315_v23 }
0x2a29   :  { %v6312_v18 = vpop.xlane.xlu0 %6311 }
0x2a2a   :  { %18280 = vrcp.f32 %v6312_v18  ;;  %v15439_v18 = vld [vmem:[%s19160_s3 + $0x78] sm:$0xff] }
0x2a35   :  { %v18279_v50 = vpop.eup %18278 }
0x2a36   :  { %v6319_v22 = vmul.f32 %v18279_v50, %v18275_v28  ;;  %v15433_v50 = vld [vmem:[%s19326_s15 + $0x10] sm:$0xff] }
0x2a37   :  { %v18281_v0 = vpop.eup %18280 }
0x2a38   :  { %v6318_v19 = vmul.f32 %v18281_v0, %v18277_v62 }
0x2a3a   :  { %17297 = vmatprep.mubr.msk.f32.mxu1 %vm826_vm11, %v6318_v19 }
0x2a3b   :  { %17298 = vmatmul.mubr.msk.f32.vlgmr.msra.gmra.mxu1 %vm826_vm11, %v6319_v22 }
0x2a3c   :  { %17307 = vmatprep.mubr.msk.f32.mxu1 %vm738_vm10, %v5937_v9  ;;  %17306 = vmatpush3.msra.mxu1 %v5946_v60 }
0x2a3d   :  { %17321 = vmatprep.subr.mxu1 %v15414_v5 }
0x2a3f   :  { %17308 = vmatmul.mubr.msk.f32.vlgmr.msra.gmra.mxu1 %vm738_vm10, %v17252_v41 }
0x2a40   :  { %17322 = vmatpush3.msra.mxu1 %v15414_v5  ;;  %17329 = vmatprep.mubr.msk.f32.mxu1 %vm415_vm3, %v19199_v11 }
0x2a41   :  { %17323 = vmatprep.subr.mxu1 %v15413_v21 }
0x2a42   :  { %17324 = vmatpush3.msra.mxu1 %v15413_v21 }
0x2a43   :  { %17325 = vmatprep.subr.mxu1 %v15412_v8 }
0x2a44   :  { %17326 = vmatpush3.msra.mxu1 %v15412_v8 }
0x2a45   :  { %17327 = vmatprep.subr.mxu1 %v15411_v24 }
0x2a46   :  { %17328 = vmatpush3.msra.mxu1 %v15411_v24  ;;  %v15438_v24 = vld [vmem:[%s19160_s3 + $0x70] sm:$0xff] }
0x2a47   :  { %17330 = vmatmul.mubr.msk.f32.vlgmr.msra.gmra.mxu1 %vm415_vm3, %v19207_v13 }
0x2afb   :  { %v17299_v30 = vpop.f32.mrf.mxu1 }
0x2afd   :  { %v6392_v32 = vpop.f32.mrf.mxu1 }
0x2afe   :  { %17302 = vmatprep.mubr.msk.f32.mxu0 %vm738_vm10, %v6392_v32  ;;  %v15455_v32 = vld [vmem:[%s19222_s21 + $0x78] sm:$0xff] }
0x2aff   :  { %17303 = vmatmul.mubr.msk.f32.vlgmr.msra.gmra.mxu0 %vm738_vm10, %v17299_v30  ;;  %v19349_v34 = vpop.f32.mrf.mxu1  ;;  %v15436_v30 = vld [vmem:[%s19160_s3 + $0x60] sm:$0xff] }
0x2b00   :  { %17311 = vmatpush3.msra.mxu0 %v15406_v29  ;;  %17318 = vmatprep.mubr.msk.f32.mxu0 %vm415_vm3, %v19199_v11  ;;  %v15437_v29 = vld [vmem:[%s19160_s3 + $0x68] sm:$0xff] }
0x2b01   :  { %17312 = vmatprep.subr.mxu0 %v15405_v33  ;;  %v19353_v36 = vpop.f32.mrf.mxu1 }
0x2b02   :  { %17313 = vmatpush3.msra.mxu0 %v15405_v33  ;;  %v15454_v33 = vld [vmem:[%s19222_s21 + $0x70] sm:$0xff] }
0x2b03   :  { %17314 = vmatprep.subr.mxu0 %v15404_v17 }
0x2b04   :  { %17315 = vmatpush3.msra.mxu0 %v15404_v17  ;;  %v15453_v17 = vld [vmem:[%s19222_s21 + $0x68] sm:$0xff] }
0x2b05   :  { %17316 = vmatprep.subr.mxu0 %v15403_v31 }
0x2b06   :  { %17317 = vmatpush3.msra.mxu0 %v15403_v31  ;;  %v15452_v31 = vld [vmem:[%s19222_s21 + $0x60] sm:$0xff] }
0x2b07   :  { %17319 = vmatmul.mubr.msk.f32.vlgmr.msra.gmra.mxu0 %vm415_vm3, %v19207_v13  ;;  %v17331_v20 = vpop.f32.mrf.mxu1  ;;  %17332 = vmatprep.subr.mxu0 %v15422_v35 }
0x2b08   :  { %v6738_v39 = vadd.f32 %v17331_v20, %v15416_v37  ;;  %17333 = vmatpush3.msra.mxu0 %v15422_v35  ;;  %17340 = vmatprep.mubr.msk.f32.mxu0 %vm415_vm3, %v19199_v11  ;;  %v15447_v35 = vld [vmem:[%s19192_s17 + $0x78] sm:$0xff]  ;;  %v15446_v20 = vld [vmem:[%s19192_s17 + $0x70] sm:$0xff] }
0x2b09   :  { %v6732_v41 = vpop.f32.mrf.mxu1  ;;  %17334 = vmatprep.subr.mxu0 %v15421_v38 }
0x2b0a   :  { %v6733_v9 = vadd.f32 %v15416_v37, %v6732_v41  ;;  %17335 = vmatpush3.msra.mxu0 %v15421_v38  ;;  %17343 = vmatprep.subr.msk.mxu1 %vm738_vm10, %v6738_v39  ;;  %v15444_v41 = vld [vmem:[%s19192_s17 + $0x60] sm:$0xff] }
0x2b0b   :  { %17336 = vmatprep.subr.mxu0 %v15420_v40  ;;  %17344 = vmatpush3.xpose.msk.msra.mxu1 %vm738_vm10, %v6738_v39  ;;  %v15445_v39 = vld [vmem:[%s19192_s17 + $0x68] sm:$0xff] }
0x2b0c   :  { %17337 = vmatpush3.msra.mxu0 %v15420_v40  ;;  %17345 = vmatprep.subr.msk.mxu1 %vm738_vm10, %v6733_v9  ;;  %v15441_v40 = vld [vmem:[%s19231_s1 + $0x3] ss:$0 sm:$0xff] }
0x2b0d   :  { %17338 = vmatprep.subr.mxu0 %v15419_v25 }
0x2b0e   :  { %17339 = vmatpush3.msra.mxu0 %v15419_v25 }
0x2b0f   :  { %17341 = vmatmul.mubr.msk.f32.vlgmr.msra.gmra.mxu0 %vm415_vm3, %v19207_v13  ;;  %17346 = vmatpush3.xpose.msk.msra.mxu1 %vm738_vm10, %v6733_v9 }
0x2b10   :  { %17357 = vmatprep.subr.mxu1 %v15433_v50 }
0x2bbf   :  { %v19369_v42 = vpop.f32.mrf.mxu0 }
0x2bc1   :  { %v19371_v43 = vpop.f32.mrf.mxu0 }
0x2bc7   :  { %v17320_v44 = vpop.f32.mrf.mxu0 }
0x2bc8   :  { %v6650_v48 = vadd.f32 %v17320_v44, %v15408_v45 }
0x2bc9   :  { %v6644_v46 = vpop.f32.mrf.mxu0 }
0x2bca   :  { %v6645_v47 = vadd.f32 %v15408_v45, %v6644_v46 }
0x2bcc   :  { %17347 = vmatprep.mubr.msk.f32.mxu1 %vm738_vm10, %v6645_v47 }
0x2bcd   :  { %17348 = vmatmul.mubr.msk.f32.vlgmr.msra.gmra.mxu1 %vm738_vm10, %v6650_v48 }
0x2bce   :  { %17358 = vmatpush3.msra.mxu1 %v15433_v50 }
0x2bcf   :  { %v17342_v51 = vpop.f32.mrf.mxu0  ;;  %17373 = vmatprep.subr.mxu1 %v15447_v35 }
0x2bd0   :  { %v6826_v54 = vadd.f32 %v17342_v51, %v15424_v52  ;;  %v6562_v51 = vadd.f32 %v19349_v34, %v19369_v42 }
0x2bd1   :  { %v6820_v1 = vpop.f32.mrf.mxu0 }
0x2bd2   :  { %v6821_v26 = vadd.f32 %v15424_v52, %v6820_v1  ;;  %17350 = vmatprep.subr.mxu0 %v6826_v54  ;;  %v6557_v1 = vadd.f32 %v19353_v36, %v19371_v43 }
0x2bd3   :  { %17351 = vmatpush3.msra.mxu0 %v6826_v54 }
0x2bd4   :  { %17352 = vmatprep.subr.mxu0 %v6821_v26 }
0x2bd5   :  { %17353 = vmatpush3.msra.mxu0 %v6821_v26 }
0x2bd6   :  { %17362 = vmatprep.subr.mxu0 %v15439_v18 }
0x2c8d   :  { %v17349_v14 = vpop.f32.mrf.mxu1 }
0x2c8e   :  { %v6913_v58 = vadd.f32 %v17349_v14, %v19279_v63 }
0x2c8f   :  { %v6907_v59 = vpop.f32.mrf.mxu1 }
0x2c90   :  { %v6908_v27 = vadd.f32 %v6907_v59, %v19282_v3  ;;  %v6919_v2 = vsel %vm826_vm11, %v6913_v58, -inf }
0x2c91   :  { %6920 = vmax.xlane.f32.xlu1 %v6919_v2 }
0x2c92   :  { %v6916_v4 = vsel %vm826_vm11, %v6908_v27, -inf }
0x2c93   :  { %6917 = vmax.xlane.f32.xlu0 %v6916_v4 }
0x2d1a   :  { %v6921_v6 = vpop.xlane.xlu1 %6920 }
0x2d1b   :  { %v6923_v7 = vsub.f32 %v6913_v58, %v6921_v6  ;;  %v15449_v58 = vld [vmem:[%s19236_s28 + $0x3] ss:$0 sm:$0xff] }
0x2d1c   :  { %v6918_v10 = vpop.xlane.xlu0 %6917 }
0x2d1d   :  { %v6926_v28 = vmul.f32 1.442695, %v6923_v7  ;;  %v6922_v15 = vsub.f32 %v6908_v27, %v6918_v10 }
0x2d1f   :  { %18282 = vpow2.f32 %v6926_v28  ;;  %v6924_v62 = vmul.f32 1.442695, %v6922_v15 }
0x2d21   :  { %18284 = vpow2.f32 %v6924_v62 }
0x2d2c   :  { %v18283_v61 = vpop.eup %18282 }
0x2d2d   :  { %v6931_v60 = vsel %vm826_vm11, %v18283_v61, 0.0 }
0x2d2e   :  { %v18285_v16 = vpop.eup %18284  ;;  %6932 = vadd.xlane.f32.xlu1 %v6931_v60 }
0x2d2f   :  { %v6928_v23 = vsel %vm826_vm11, %v18285_v16, 0.0 }
0x2d30   :  { %6929 = vadd.xlane.f32.xlu0 %v6928_v23 }
0x2db7   :  { %v6933_v0 = vpop.xlane.xlu1 %6932 }
0x2db8   :  { %18286 = vrcp.f32 %v6933_v0 }
0x2db9   :  { %v6930_v19 = vpop.xlane.xlu0 %6929 }
0x2dba   :  { %18288 = vrcp.f32 %v6930_v19 }
0x2dc5   :  { %v18287_v22 = vpop.eup %18286 }
0x2dc6   :  { %v6937_v8 = vmul.f32 %v18287_v22, %v18283_v61 }
0x2dc7   :  { %v18289_v5 = vpop.eup %18288 }
0x2dc8   :  { %v6936_v21 = vmul.f32 %v18289_v5, %v18285_v16  ;;  %v15346_v16 = vld [vmem:[%s18891_s6 + $0x1] ss:$0 sm:$0xff]  ;;  %s18491_s6 = smov 28  }
0x2dc9   :  { %s19450_s19 = sld [smem:[%s20294_s0 + %s18491_s6]]  }
0x2dca   :  { %17354 = vmatprep.mubr.msk.f32.mxu0 %vm826_vm11, %v6936_v21  ;;  %s19507_s6 = sld [smem:[%s20294_s0 + %s18495_s10]]   ;;  %s18505_s10 = smov 40  }
0x2dcb   :  { %17355 = vmatmul.mubr.msk.f32.vlgmr.msra.gmra.mxu0 %vm826_vm11, %v6937_v8  ;;  %s19798_s23 = sld [smem:[%s20294_s0 + %s18505_s10]]  }
0x2dcc   :  { %17363 = vmatpush3.msra.mxu0 %v15439_v18  ;;  %17370 = vmatprep.mubr.msk.f32.mxu0 %vm415_vm3, %v19199_v11 }
0x2dcd   :  { %17364 = vmatprep.subr.mxu0 %v15438_v24 }
0x2dce   :  { %17365 = vmatpush3.msra.mxu0 %v15438_v24 }
0x2dcf   :  { %17366 = vmatprep.subr.mxu0 %v15437_v29 }
0x2dd0   :  { %17367 = vmatpush3.msra.mxu0 %v15437_v29 }
0x2dd1   :  { %17368 = vmatprep.subr.mxu0 %v15436_v30 }
0x2dd2   :  { %17369 = vmatpush3.msra.mxu0 %v15436_v30 }
0x2dd3   :  { %17371 = vmatmul.mubr.msk.f32.vlgmr.msra.gmra.mxu0 %vm415_vm3, %v19207_v13  ;;  %17384 = vmatprep.subr.mxu0 %v15455_v32 }
0x2dd4   :  { %17385 = vmatpush3.msra.mxu0 %v15455_v32  ;;  %17392 = vmatprep.mubr.msk.f32.mxu0 %vm415_vm3, %v19199_v11 }
0x2dd5   :  { %17386 = vmatprep.subr.mxu0 %v15454_v33 }
0x2dd6   :  { %17387 = vmatpush3.msra.mxu0 %v15454_v33 }
0x2dd7   :  { %17388 = vmatprep.subr.mxu0 %v15453_v17 }
0x2dd8   :  { %17389 = vmatpush3.msra.mxu0 %v15453_v17 }
0x2dd9   :  { %17390 = vmatprep.subr.mxu0 %v15452_v31 }
0x2dda   :  { %17391 = vmatpush3.msra.mxu0 %v15452_v31 }
0x2ddb   :  { %17393 = vmatmul.mubr.msk.f32.vlgmr.msra.gmra.mxu0 %vm415_vm3, %v19207_v13 }
0x2e8b   :  { %v17356_v37 = vpop.f32.mrf.mxu0 }
0x2e8d   :  { %v7010_v38 = vpop.f32.mrf.mxu0 }
0x2e8e   :  { %17359 = vmatprep.mubr.msk.f32.mxu1 %vm738_vm10, %v7010_v38 }
0x2e8f   :  { %17360 = vmatmul.mubr.msk.f32.vlgmr.msra.gmra.mxu1 %vm738_vm10, %v17356_v37 }
0x2e90   :  { %17374 = vmatpush3.msra.mxu1 %v15447_v35  ;;  %17381 = vmatprep.mubr.msk.f32.mxu1 %vm415_vm3, %v19199_v11  ;;  %v15457_v11 = vld [vmem:[%s19266_s16 + $0x3] ss:$0 sm:$0xff]  ;;  %v15469_v35 = vld [vmem:[%s19450_s19] ss:$0 sm:$0xff] }
0x2e91   :  { %17375 = vmatprep.subr.mxu1 %v15446_v20 }
0x2e92   :  { %17376 = vmatpush3.msra.mxu1 %v15446_v20 }
0x2e93   :  { %v17372_v9 = vpop.f32.mrf.mxu0  ;;  %17377 = vmatprep.subr.mxu1 %v15445_v39 }
0x2e94   :  { %v7189_v25 = vadd.f32 %v17372_v9, %v15441_v40  ;;  %17378 = vmatpush3.msra.mxu1 %v15445_v39 }
0x2e95   :  { %v7183_v44 = vpop.f32.mrf.mxu0  ;;  %17379 = vmatprep.subr.mxu1 %v15444_v41 }
0x2e96   :  { %v7184_v45 = vadd.f32 %v15441_v40, %v7183_v44  ;;  %17380 = vmatpush3.msra.mxu1 %v15444_v41 }
0x2e97   :  { %17382 = vmatmul.mubr.msk.f32.vlgmr.msra.gmra.mxu1 %vm415_vm3, %v19207_v13 }
0x2e98   :  { %17399 = vmatprep.mubr.msk.f32.mxu1 %vm738_vm10, %v7184_v45 }
0x2e9b   :  { %v17394_v46 = vpop.f32.mrf.mxu0 }
0x2e9c   :  { %v7365_v47 = vadd.f32 %v17394_v46, %v15457_v11 }
0x2e9d   :  { %v7359_v48 = vpop.f32.mrf.mxu0 }
0x2e9e   :  { %v7360_v52 = vadd.f32 %v15457_v11, %v7359_v48  ;;  %17402 = vmatprep.subr.mxu0 %v7365_v47 }
0x2e9f   :  { %17403 = vmatpush3.msra.mxu0 %v7365_v47 }
0x2ea0   :  { %17404 = vmatprep.subr.mxu0 %v7360_v52 }
0x2ea1   :  { %17405 = vmatpush3.msra.mxu0 %v7360_v52 }
0x2f4f   :  { %v17361_v54 = vpop.f32.mrf.mxu1 }
0x2f50   :  { %v19419_v13 = vadd.f32 %v17361_v54, %v6562_v51  ;;  %v7809_v51 = vld [vmem:[%s19478_s22 + $0x18] sm:$0xff]  ;;  %v7808_v54 = vld [vmem:[%s19478_s22 + $0x10] sm:$0xff] }
0x2f51   :  { %v7093_v26 = vpop.f32.mrf.mxu1 }
0x2f52   :  { %v19421_v14 = vadd.f32 %v7093_v26, %v6557_v1  ;;  %v7807_v1 = vld [vmem:[%s19478_s22 + $0x8] sm:$0xff] }
0x2f57   :  { %v17383_v59 = vpop.f32.mrf.mxu1 }
0x2f58   :  { %v7277_v27 = vadd.f32 %v17383_v59, %v15449_v58 }
0x2f59   :  { %v7271_v2 = vpop.f32.mrf.mxu1 }
0x2f5a   :  { %v7272_v4 = vadd.f32 %v15449_v58, %v7271_v2  ;;  %17395 = vmatprep.subr.msk.mxu1 %vm738_vm10, %v7277_v27 }
0x2f5b   :  { %17396 = vmatpush3.xpose.msk.msra.mxu1 %vm738_vm10, %v7277_v27 }
0x2f5c   :  { %17397 = vmatprep.subr.msk.mxu1 %vm738_vm10, %v7272_v4 }
0x2f5f   :  { %17398 = vmatpush3.xpose.msk.msra.mxu1 %vm738_vm10, %v7272_v4 }
0x2f62   :  { %17400 = vmatmul.mubr.msk.f32.vlgmr.msra.gmra.mxu1 %vm738_vm10, %v7189_v25 }
0x3022   :  { %v17401_v34 = vpop.f32.mrf.mxu1 }
0x3023   :  { %v7452_v36 = vadd.f32 %v17401_v34, %v19279_v63  ;;  %v5370_v63 = vadd.f32 %v19268_v12, %v15346_v16  ;;  %v15466_v12 = vld [vmem:[%s19326_s15 + $0x18] sm:$0xff] }
0x3024   :  { %v7446_v42 = vpop.f32.mrf.mxu1  ;;  %17409 = vmatprep.subr.mxu1 %v15466_v12 }
0x3025   :  { %v7447_v43 = vadd.f32 %v7446_v42, %v19282_v3  ;;  %v7458_v6 = vsel %vm826_vm11, %v7452_v36, -inf  ;;  %v5365_v3 = vadd.f32 %v15346_v16, %v19270_v57  ;;  %v5374_v50 = vadd.f32 %v5370_v63, %v19110_v49  ;;  %17410 = vmatpush3.msra.mxu1 %v15466_v12 }
0x3026   :  { %7459 = vmax.xlane.f32.xlu1 %v7458_v6  ;;  %17425 = vmatprep.subr.mxu1 %v7809_v51 }
0x3027   :  { %v7455_v7 = vsel %vm826_vm11, %v7447_v43, -inf  ;;  %v5373_v22 = vadd.f32 %v5365_v3, %v19117_v55  ;;  %v5380_v5 = vsel %vm415_vm3, %v5374_v50, 0.0 }
0x3028   :  { %7456 = vmax.xlane.f32.xlu0 %v7455_v7 }
0x3029   :  { %v5377_v21 = vsel %vm415_vm3, %v5373_v22, 0.0 }
0x30af   :  { %v7460_v10 = vpop.xlane.xlu1 %7459 }
0x30b0   :  { %v7462_v28 = vsub.f32 %v7452_v36, %v7460_v10 }
0x30b1   :  { %v7457_v15 = vpop.xlane.xlu0 %7456 }
0x30b2   :  { %v7465_v62 = vmul.f32 1.442695, %v7462_v28  ;;  %v7461_v61 = vsub.f32 %v7447_v43, %v7457_v15 }
0x30b4   :  { %18290 = vpow2.f32 %v7465_v62  ;;  %v7463_v60 = vmul.f32 1.442695, %v7461_v61 }
0x30b6   :  { %18292 = vpow2.f32 %v7463_v60 }
0x30c1   :  { %v18291_v23 = vpop.eup %18290 }
0x30c2   :  { %v7470_v18 = vsel %vm826_vm11, %v18291_v23, 0.0 }
0x30c3   :  { %v18293_v0 = vpop.eup %18292  ;;  %7471 = vadd.xlane.f32.xlu1 %v7470_v18 }
0x30c4   :  { %v7467_v19 = vsel %vm826_vm11, %v18293_v0, 0.0 }
0x30c5   :  { %7468 = vadd.xlane.f32.xlu0 %v7467_v19  ;;  %v15349_v19 = vld [vmem:[%s15047_s25] ss:$0 sm:$0xff]  ;;  %s18498_s25 = smov 30  }
0x30c6   :  { %s19560_s24 = sld [smem:[%s20294_s0 + %s18498_s25]]  }
0x30c7   :  { %5381 = vadd.xlane.f32.xlu1 %v5380_v5 }
0x30c9   :  { %5378 = vadd.xlane.f32.xlu0 %v5377_v21 }
0x314c   :  { %v7472_v57 = vpop.xlane.xlu1 %7471 }
0x314d   :  { %18294 = vrcp.f32 %v7472_v57 }
0x314e   :  { %v7469_v8 = vpop.xlane.xlu0 %7468 }
0x314f   :  { %18296 = vrcp.f32 %v7469_v8  ;;  %v15350_v8 = vld [vmem:[%s15048_s8] ss:$0 sm:$0xff]  ;;  %s18499_s8 = smov 34  }
0x3150   :  { %v5382_v33 = vpop.xlane.xlu1 %5381  ;;  %s19565_s14 = sld [smem:[%s20294_s0 + %s18499_s8]]  }
0x3151   :  { %v5384_v31 = vmul.f32 0.03125, %v5382_v33  ;;  %v7714_v33 = vld [vmem:[%s19507_s6] sm:$0xff]  ;;  %s19790_s8 = sld [smem:[%s20294_s0 + %s18504_s4]]  }
0x3152   :  { %v5379_v17 = vpop.xlane.xlu0 %5378 }
0x3153   :  { %v5383_v38 = vmul.f32 0.03125, %v5379_v17  ;;  %v19454_v40 = vsub.f32 %v5374_v50, %v5384_v31  ;;  %v7901_v17 = vld [vmem:[%s19524_s26 + $0x18] sm:$0xff] }
0x3155   :  { %v19457_v25 = vsub.f32 %v5373_v22, %v5383_v38  ;;  %v5388_v47 = vmul.f32 %v19454_v40, %v19454_v40  ;;  %v5422_v5 = vmul.f32 %v15349_v19, %v19454_v40 }
0x3157   :  { %v5387_v52 = vmul.f32 %v19457_v25, %v19457_v25  ;;  %v5421_v21 = vmul.f32 %v15349_v19, %v19457_v25 }
0x315a   :  { %v18295_v49 = vpop.eup %18294 }
0x315b   :  { %v7476_v30 = vmul.f32 %v18295_v49, %v18291_v23 }
0x315c   :  { %v18297_v24 = vpop.eup %18296 }
0x315d   :  { %v7475_v29 = vmul.f32 %v18297_v24, %v18293_v0 }
0x315f   :  { %17406 = vmatprep.mubr.msk.f32.mxu0 %vm826_vm11, %v7475_v29 }
0x3160   :  { %17407 = vmatmul.mubr.msk.f32.vlgmr.msra.gmra.mxu0 %vm826_vm11, %v7476_v30  ;;  %v7717_v30 = vld [vmem:[%s19507_s6 + $0x18] sm:$0xff] }
0x3161   :  { %17414 = vmatprep.subr.mxu0 %v7717_v30 }
0x3162   :  { %17415 = vmatpush3.msra.mxu0 %v7717_v30 }
0x3220   :  { %v17408_v55 = vpop.f32.mrf.mxu0 }
0x3222   :  { %v7549_v32 = vpop.f32.mrf.mxu0 }
0x3223   :  { %17411 = vmatprep.mubr.msk.f32.mxu1 %vm738_vm10, %v7549_v32  ;;  %v7715_v32 = vld [vmem:[%s19507_s6 + $0x8] sm:$0xff] }
0x3224   :  { %17412 = vmatmul.mubr.msk.f32.vlgmr.msra.gmra.mxu1 %vm738_vm10, %v17408_v55  ;;  %v7716_v55 = vld [vmem:[%s19507_s6 + $0x10] sm:$0xff] }
0x3225   :  { %17426 = vmatpush3.msra.mxu1 %v7809_v51  ;;  %17416 = vmatprep.subr.mxu0 %v7716_v55 }
0x3226   :  { %17427 = vmatprep.subr.mxu1 %v7808_v54  ;;  %17417 = vmatpush3.msra.mxu0 %v7716_v55  ;;  %v19591_v55 = vld [vmem:[%s18677_s30] sm:$0xff] }
0x3227   :  { %17428 = vmatpush3.msra.mxu1 %v7808_v54  ;;  %17418 = vmatprep.subr.mxu0 %v7715_v32 }
0x3228   :  { %17429 = vmatprep.subr.mxu1 %v7807_v1  ;;  %17419 = vmatpush3.msra.mxu0 %v7715_v32 }
0x3229   :  { %17430 = vmatpush3.msra.mxu1 %v7807_v1  ;;  %17420 = vmatprep.subr.mxu0 %v7714_v33 }
0x322a   :  { %17421 = vmatpush3.msra.mxu0 %v7714_v33 }
0x322b   :  { %17436 = vmatprep.subr.mxu0 %v7901_v17 }
0x32e4   :  { %v17413_v37 = vpop.f32.mrf.mxu1 }
0x32e5   :  { %v7642_v20 = vadd.f32 %v17413_v37, %v19419_v13  ;;  %v7806_v13 = vld [vmem:[%s19478_s22] sm:$0xff] }
0x32e6   :  { %v7632_v39 = vpop.f32.mrf.mxu1  ;;  %17431 = vmatprep.subr.mxu1 %v7806_v13 }
0x32e7   :  { %v7650_v41 = vadd.f32 %v15469_v35, %v7642_v20  ;;  %v7641_v9 = vadd.f32 %v7632_v39, %v19421_v14  ;;  %17432 = vmatpush3.msra.mxu1 %v7806_v13 }
0x32e9   :  { %v19460_v44 = vadd.f32 %v7650_v41, %v19114_v53  ;;  %v7649_v45 = vadd.f32 %v15469_v35, %v7641_v9  ;;  %v5392_v53 = vsel %vm415_vm3, %v5388_v47, 0.0 }
0x32eb   :  { %v19463_v11 = vadd.f32 %v7649_v45, %v19123_v56  ;;  %v7660_v46 = vsel %vm415_vm3, %v19460_v44, 0.0  ;;  %v5389_v56 = vsel %vm415_vm3, %v5387_v52, 0.0 }
0x32ec   :  { %7661 = vadd.xlane.f32.xlu1 %v7660_v46 }
0x32ed   :  { %v7657_v48 = vsel %vm415_vm3, %v19463_v11, 0.0 }
0x32ee   :  { %7658 = vadd.xlane.f32.xlu0 %v7657_v48 }
0x32f0   :  { %5393 = vadd.xlane.f32.xlu1 %v5392_v53 }
0x32f2   :  { %5390 = vadd.xlane.f32.xlu0 %v5389_v56  ;;  %v15472_v56 = vld [vmem:[%s19176_s5 + $0x1] ss:$0 sm:$0xff] }
0x3375   :  { %v7662_v26 = vpop.xlane.xlu1 %7661 }
0x3376   :  { %v7664_v14 = vmul.f32 0.03125, %v7662_v26 }
0x3377   :  { %v7659_v58 = vpop.xlane.xlu0 %7658 }
0x3378   :  { %v19485_v59 = vsub.f32 %v19460_v44, %v7664_v14  ;;  %v7663_v27 = vmul.f32 0.03125, %v7659_v58  ;;  %v15473_v14 = vld [vmem:[%s19183_s12 + $0x1] ss:$0 sm:$0xff] }
0x3379   :  { %v5394_v2 = vpop.xlane.xlu1 %5393 }
0x337a   :  { %v19488_v4 = vsub.f32 %v19463_v11, %v7663_v27  ;;  %v5396_v34 = vmul.f32 0.032258064, %v5394_v2  ;;  %v7668_v36 = vmul.f32 %v19485_v59, %v19485_v59  ;;  %v7702_v54 = vmul.f32 %v15472_v56, %v19485_v59  ;;  %v7899_v59 = vld [vmem:[%s19524_s26 + $0x8] sm:$0xff] }
0x337b   :  { %v5391_v42 = vpop.xlane.xlu0 %5390 }
0x337c   :  { %18298 = vrsqrt.f32 %v5396_v34  ;;  %v5395_v43 = vmul.f32 0.032258064, %v5391_v42  ;;  %v7672_v6 = vsel %vm415_vm3, %v7668_v36, 0.0  ;;  %v7667_v7 = vmul.f32 %v19488_v4, %v19488_v4  ;;  %v15477_v36 = vld [vmem:[%s19549_s13] ss:$0 sm:$0xff] }
0x337d   :  { %7673 = vadd.xlane.f32.xlu1 %v7672_v6  ;;  %vm5406_vm1 = vcmp.eq.f32.partialorder %v5396_v34, inf  ;;  %v5409_v62 = vand.u32 2147483648, %v5396_v34  ;;  %vm5408_vm2 = vcmp.eq.f32.partialorder %v5396_v34, 0.0  ;;  %v7701_v1 = vmul.f32 %v15472_v56, %v19488_v4  ;;  %v7898_v4 = vld [vmem:[%s19524_s26] sm:$0xff] }
0x337e   :  { %18300 = vrsqrt.f32 %v5395_v43  ;;  %v7669_v10 = vsel %vm415_vm3, %v7667_v7, 0.0  ;;  %vm5399_vm4 = vcmp.eq.f32.partialorder %v5395_v43, inf  ;;  %v5402_v23 = vand.u32 2147483648, %v5395_v43 }
0x337f   :  { %7670 = vadd.xlane.f32.xlu0 %v7669_v10  ;;  %vm5401_vm5 = vcmp.eq.f32.partialorder %v5395_v43, 0.0  ;;  %v15492_v10 = vld [vmem:[%s19507_s6 + $0x38] sm:$0xff] }
0x3389   :  { %v18299_v28 = vpop.eup %18298 }
0x338a   :  { %v5405_v15 = vmul.f32 %v18299_v28, %v5396_v34 }
0x338b   :  { %v18301_v61 = vpop.eup %18300 }
0x338c   :  { %v5407_v60 = vsel %vm5406_vm1, %v5396_v34, %v5405_v15  ;;  %v5398_v63 = vmul.f32 %v18301_v61, %v5395_v43  ;;  %v7900_v34 = vld [vmem:[%s19524_s26 + $0x10] sm:$0xff]  ;;  %v15474_v15 = vld [vmem:[%s19560_s24] ss:$0 sm:$0xff] }
0x338d   :  { %v5410_v16 = vsel %vm5408_vm2, %v5409_v62, %v5407_v60 }
0x338e   :  { %v5412_v3 = vadd.f32 1e-06, %v5410_v16  ;;  %v5400_v18 = vsel %vm5399_vm4, %v5395_v43, %v5398_v63  ;;  %v15491_v16 = vld [vmem:[%s19507_s6 + $0x30] sm:$0xff]  ;;  %v15480_v63 = vld [vmem:[%s19565_s14] ss:$0 sm:$0xff] }
0x338f   :  { %v5403_v50 = vsel %vm5401_vm5, %v5402_v23, %v5400_v18 }
0x3390   :  { %18302 = vrcp.f32 %v5412_v3  ;;  %v5411_v0 = vadd.f32 1e-06, %v5403_v50  ;;  %v15490_v3 = vld [vmem:[%s19507_s6 + $0x28] sm:$0xff]  ;;  %v15489_v50 = vld [vmem:[%s19507_s6 + $0x20] sm:$0xff] }
0x3392   :  { %18304 = vrcp.f32 %v5411_v0 }
0x339d   :  { %v18303_v22 = vpop.eup %18302 }
0x339e   :  { %v5424_v57 = vmul.f32 %v18303_v22, %v5422_v5  ;;  %v15508_v22 = vld [vmem:[%s19524_s26 + $0x38] sm:$0xff]  ;;  %v15507_v5 = vld [vmem:[%s19524_s26 + $0x30] sm:$0xff] }
0x339f   :  { %v18305_v12 = vpop.eup %18304 }
0x33a0   :  { %v5423_v49 = vmul.f32 %v18305_v12, %v5421_v21  ;;  %v19511_v29 = vadd.f32 %v15350_v8, %v5424_v57  ;;  %v15506_v21 = vld [vmem:[%s19524_s26 + $0x28] sm:$0xff]  ;;  %v15505_v12 = vld [vmem:[%s19524_s26 + $0x20] sm:$0xff] }
0x33a2   :  { %v19509_v24 = vadd.f32 %v15350_v8, %v5423_v49  ;;  %v19587_v8 = vld [vmem:[%s18677_s30 + $0x8] sm:$0xff] }
0x33a4   :  { %17433 = vmatprep.mubr.msk.f32.mxu1 %vm415_vm3, %v19509_v24 }
0x33a5   :  { %17434 = vmatmul.mubr.msk.f32.vlgmr.msra.gmra.mxu1 %vm415_vm3, %v19511_v29 }
0x3406   :  { %v7674_v31 = vpop.xlane.xlu1 %7673 }
0x3407   :  { %v7676_v35 = vmul.f32 0.032258064, %v7674_v31  ;;  %v15494_v31 = vld [vmem:[%s19560_s24 + $0x1] ss:$0 sm:$0xff] }
0x3408   :  { %v7671_v37 = vpop.xlane.xlu0 %7670 }
0x3409   :  { %18306 = vrsqrt.f32 %v7676_v35  ;;  %v7675_v38 = vmul.f32 0.032258064, %v7671_v37  ;;  %vm7686_vm6 = vcmp.eq.f32.partialorder %v7676_v35, inf  ;;  %v7689_v40 = vand.u32 2147483648, %v7676_v35 }
0x340a   :  { %vm7688_vm7 = vcmp.eq.f32.partialorder %v7676_v35, 0.0 }
0x340b   :  { %18308 = vrsqrt.f32 %v7675_v38  ;;  %vm7679_vm8 = vcmp.eq.f32.partialorder %v7675_v38, inf  ;;  %v7682_v47 = vand.u32 2147483648, %v7675_v38  ;;  %vm7681_vm9 = vcmp.eq.f32.partialorder %v7675_v38, 0.0 }
0x3416   :  { %v18307_v20 = vpop.eup %18306 }
0x3417   :  { %v7685_v39 = vmul.f32 %v18307_v20, %v7676_v35  ;;  %v15510_v20 = vld [vmem:[%s19565_s14 + $0x1] ss:$0 sm:$0xff] }
0x3418   :  { %v18309_v41 = vpop.eup %18308 }
0x3419   :  { %v7687_v9 = vsel %vm7686_vm6, %v7676_v35, %v7685_v39  ;;  %v7678_v45 = vmul.f32 %v18309_v41, %v7675_v38 }
0x341a   :  { %v7690_v25 = vsel %vm7688_vm7, %v7689_v40, %v7687_v9 }
0x341b   :  { %v7692_v46 = vadd.f32 1e-06, %v7690_v25  ;;  %v7680_v48 = vsel %vm7679_vm8, %v7675_v38, %v7678_v45 }
0x341c   :  { %v7683_v52 = vsel %vm7681_vm9, %v7682_v47, %v7680_v48 }
0x341d   :  { %18310 = vrcp.f32 %v7692_v46  ;;  %v7691_v53 = vadd.f32 1e-06, %v7683_v52 }
0x341f   :  { %18312 = vrcp.f32 %v7691_v53 }
0x342a   :  { %v18311_v51 = vpop.eup %18310 }
0x342b   :  { %v7704_v26 = vmul.f32 %v18311_v51, %v7702_v54 }
0x342c   :  { %v18313_v13 = vpop.eup %18312 }
0x342d   :  { %v7703_v58 = vmul.f32 %v18313_v13, %v7701_v1  ;;  %v19533_v2 = vadd.f32 %v15473_v14, %v7704_v26  ;;  %v15500_v1 = vld [vmem:[%s19478_s22 + $0x38] sm:$0xff] }
0x342f   :  { %v19531_v27 = vadd.f32 %v15473_v14, %v7703_v58 }
0x3431   :  { %17422 = vmatprep.mubr.msk.f32.mxu0 %vm415_vm3, %v19531_v27 }
0x3432   :  { %17423 = vmatmul.mubr.msk.f32.vlgmr.msra.gmra.mxu0 %vm415_vm3, %v19533_v2 }
0x3433   :  { %17437 = vmatpush3.msra.mxu0 %v7901_v17  ;;  %17444 = vmatprep.mubr.msk.f32.mxu0 %vm415_vm3, %v19509_v24 }
0x3434   :  { %17438 = vmatprep.subr.mxu0 %v7900_v34 }
0x3435   :  { %17439 = vmatpush3.msra.mxu0 %v7900_v34 }
0x3436   :  { %17440 = vmatprep.subr.mxu0 %v7899_v59 }
0x3437   :  { %17441 = vmatpush3.msra.mxu0 %v7899_v59 }
0x3438   :  { %17442 = vmatprep.subr.mxu0 %v7898_v4 }
0x3439   :  { %17443 = vmatpush3.msra.mxu0 %v7898_v4  ;;  %v15499_v4 = vld [vmem:[%s19478_s22 + $0x30] sm:$0xff] }
0x343a   :  { %17445 = vmatmul.mubr.msk.f32.vlgmr.msra.gmra.mxu0 %vm415_vm3, %v19511_v29 }
0x3465   :  { %v17435_v42 = vpop.f32.mrf.mxu1 }
0x3466   :  { %v7895_v43 = vadd.f32 %v17435_v42, %v15477_v36  ;;  %v15497_v42 = vld [vmem:[%s19478_s22 + $0x20] sm:$0xff] }
0x3467   :  { %v7889_v6 = vpop.f32.mrf.mxu1 }
0x3468   :  { %v7890_v7 = vadd.f32 %v15477_v36, %v7889_v6  ;;  %17447 = vmatprep.subr.msk.mxu1 %vm738_vm10, %v7895_v43  ;;  %v15498_v36 = vld [vmem:[%s19478_s22 + $0x28] sm:$0xff] }
0x3469   :  { %17448 = vmatpush3.xpose.msk.msra.mxu1 %vm738_vm10, %v7895_v43 }
0x346a   :  { %17449 = vmatprep.subr.msk.mxu1 %vm738_vm10, %v7890_v7 }
0x346d   :  { %17450 = vmatpush3.xpose.msk.msra.mxu1 %vm738_vm10, %v7890_v7 }
0x346e   :  { %17461 = vmatprep.subr.mxu1 %v15492_v10 }
0x34f2   :  { %v17424_v28 = vpop.f32.mrf.mxu0 }
0x34f3   :  { %v7803_v60 = vadd.f32 %v17424_v28, %v15474_v15 }
0x34f4   :  { %v7797_v62 = vpop.f32.mrf.mxu0 }
0x34f5   :  { %v7798_v61 = vadd.f32 %v15474_v15, %v7797_v62 }
0x34f7   :  { %17451 = vmatprep.mubr.msk.f32.mxu1 %vm738_vm10, %v7798_v61 }
0x34f8   :  { %17452 = vmatmul.mubr.msk.f32.vlgmr.msra.gmra.mxu1 %vm738_vm10, %v7803_v60 }
0x34f9   :  { %17462 = vmatpush3.msra.mxu1 %v15492_v10  ;;  %17469 = vmatprep.mubr.msk.f32.mxu1 %vm415_vm3, %v19531_v27  ;;  %v15502_v10 = vld [vmem:[%s19549_s13 + $0x1] ss:$0 sm:$0xff] }
0x34fa   :  { %v17446_v23 = vpop.f32.mrf.mxu0  ;;  %17463 = vmatprep.subr.mxu1 %v15491_v16 }
0x34fb   :  { %v7981_v18 = vadd.f32 %v17446_v23, %v15480_v63  ;;  %17464 = vmatpush3.msra.mxu1 %v15491_v16 }
0x34fc   :  { %v7975_v0 = vpop.f32.mrf.mxu0  ;;  %17465 = vmatprep.subr.mxu1 %v15490_v3 }
0x34fd   :  { %v7976_v19 = vadd.f32 %v15480_v63, %v7975_v0  ;;  %17454 = vmatprep.subr.mxu0 %v7981_v18  ;;  %17466 = vmatpush3.msra.mxu1 %v15490_v3 }
0x34fe   :  { %17455 = vmatpush3.msra.mxu0 %v7981_v18  ;;  %17467 = vmatprep.subr.mxu1 %v15489_v50 }
0x34ff   :  { %17456 = vmatprep.subr.mxu0 %v7976_v19  ;;  %17468 = vmatpush3.msra.mxu1 %v15489_v50 }
0x3500   :  { %17457 = vmatpush3.msra.mxu0 %v7976_v19  ;;  %17470 = vmatmul.mubr.msk.f32.vlgmr.msra.gmra.mxu1 %vm415_vm3, %v19533_v2 }
0x3501   :  { %17483 = vmatprep.subr.mxu1 %v15508_v22  ;;  %17491 = vmatprep.mubr.msk.f32.mxu1 %vm415_vm3, %v19509_v24 }
0x3502   :  { %17484 = vmatpush3.msra.mxu1 %v15508_v22  ;;  %17472 = vmatprep.subr.mxu0 %v15500_v1 }
0x3503   :  { %17485 = vmatprep.subr.mxu1 %v15507_v5 }
0x3504   :  { %17486 = vmatpush3.msra.mxu1 %v15507_v5 }
0x3505   :  { %17487 = vmatprep.subr.mxu1 %v15506_v21 }
0x3506   :  { %17488 = vmatpush3.msra.mxu1 %v15506_v21 }
0x3507   :  { %17489 = vmatprep.subr.mxu1 %v15505_v12 }
0x3508   :  { %17490 = vmatpush3.msra.mxu1 %v15505_v12 }
0x3509   :  { %17492 = vmatmul.mubr.msk.f32.vlgmr.msra.gmra.mxu1 %vm415_vm3, %v19511_v29 }
0x35b8   :  { %v17453_v57 = vpop.f32.mrf.mxu1 }
0x35b9   :  { %v8068_v49 = vadd.f32 %v19587_v8, %v17453_v57 }
0x35ba   :  { %v8062_v30 = vpop.f32.mrf.mxu1 }
0x35bb   :  { %v8063_v32 = vadd.f32 %v19591_v55, %v8062_v30  ;;  %v8074_v33 = vsel %vm826_vm11, %v8068_v49, -inf }
0x35bc   :  { %8075 = vmax.xlane.f32.xlu1 %v8074_v33  ;;  %v15519_v33 = vld [vmem:[%s19626_s27 + $0x8] sm:$0xff] }
0x35bd   :  { %v8071_v17 = vsel %vm826_vm11, %v8063_v32, -inf }
0x35be   :  { %8072 = vmax.xlane.f32.xlu0 %v8071_v17 }
0x35c0   :  { %v17471_v35 = vpop.f32.mrf.mxu1 }
0x35c1   :  { %v8260_v37 = vadd.f32 %v17471_v35, %v15494_v31 }
0x35c2   :  { %v8254_v38 = vpop.f32.mrf.mxu1 }
0x35c3   :  { %v8255_v43 = vadd.f32 %v15494_v31, %v8254_v38 }
0x35c9   :  { %v17493_v39 = vpop.f32.mrf.mxu1 }
0x35ca   :  { %v8436_v40 = vadd.f32 %v17493_v39, %v15510_v20  ;;  %v15535_v39 = vld [vmem:[%s19478_s22 + $0x58] sm:$0xff] }
0x35cb   :  { %v8430_v41 = vpop.f32.mrf.mxu1 }
0x35cc   :  { %v8431_v9 = vadd.f32 %v15510_v20, %v8430_v41  ;;  %17501 = vmatprep.subr.mxu1 %v8436_v40  ;;  %v15533_v41 = vld [vmem:[%s19478_s22 + $0x48] sm:$0xff] }
0x35cd   :  { %17502 = vmatpush3.msra.mxu1 %v8436_v40  ;;  %v15534_v40 = vld [vmem:[%s19478_s22 + $0x50] sm:$0xff] }
0x35ce   :  { %17503 = vmatprep.subr.mxu1 %v8431_v9 }
0x35cf   :  { %17504 = vmatpush3.msra.mxu1 %v8431_v9  ;;  %v15532_v9 = vld [vmem:[%s19478_s22 + $0x40] sm:$0xff] }
0x3645   :  { %v8076_v25 = vpop.xlane.xlu1 %8075 }
0x3646   :  { %v8078_v45 = vsub.f32 %v8068_v49, %v8076_v25  ;;  %v15527_v25 = vld [vmem:[%s19507_s6 + $0x58] sm:$0xff] }
0x3647   :  { %v8073_v46 = vpop.xlane.xlu0 %8072 }
0x3648   :  { %v8081_v47 = vmul.f32 1.442695, %v8078_v45  ;;  %v8077_v48 = vsub.f32 %v8063_v32, %v8073_v46  ;;  %v8174_v32 = vld [vmem:[%s19626_s27] sm:$0xff] }
0x3649   :  { %17513 = vmatprep.subr.mxu1 %v8174_v32 }
0x364a   :  { %18314 = vpow2.f32 %v8081_v47  ;;  %v8079_v52 = vmul.f32 1.442695, %v8077_v48  ;;  %v15526_v47 = vld [vmem:[%s19507_s6 + $0x50] sm:$0xff]  ;;  %v15525_v48 = vld [vmem:[%s19507_s6 + $0x48] sm:$0xff] }
0x364c   :  { %18316 = vpow2.f32 %v8079_v52 }
0x3657   :  { %v18315_v53 = vpop.eup %18314 }
0x3658   :  { %v8086_v56 = vsel %vm826_vm11, %v18315_v53, 0.0 }
0x3659   :  { %v18317_v51 = vpop.eup %18316  ;;  %8087 = vadd.xlane.f32.xlu1 %v8086_v56  ;;  %v15543_v56 = vld [vmem:[%s19524_s26 + $0x58] sm:$0xff] }
0x365a   :  { %v8083_v54 = vsel %vm826_vm11, %v18317_v51, 0.0 }
0x365b   :  { %8084 = vadd.xlane.f32.xlu0 %v8083_v54  ;;  %v15537_v54 = vld [vmem:[%s19549_s13 + $0x2] ss:$0 sm:$0xff] }
0x36e2   :  { %v8088_v13 = vpop.xlane.xlu1 %8087 }
0x36e3   :  { %18318 = vrcp.f32 %v8088_v13 }
0x36e4   :  { %v8085_v26 = vpop.xlane.xlu0 %8084 }
0x36e5   :  { %18320 = vrcp.f32 %v8085_v26 }
0x36f0   :  { %v18319_v14 = vpop.eup %18318 }
0x36f1   :  { %v8092_v59 = vmul.f32 %v18319_v14, %v18315_v53  ;;  %v15524_v53 = vld [vmem:[%s19507_s6 + $0x40] sm:$0xff]  ;;  %v15541_v14 = vld [vmem:[%s19524_s26 + $0x48] sm:$0xff] }
0x36f2   :  { %v18321_v58 = vpop.eup %18320 }
0x36f3   :  { %v8091_v34 = vmul.f32 %v18321_v58, %v18317_v51 }
0x36f5   :  { %17458 = vmatprep.mubr.msk.f32.mxu0 %vm826_vm11, %v8091_v34 }
0x36f6   :  { %17459 = vmatmul.mubr.msk.f32.vlgmr.msra.gmra.mxu0 %vm826_vm11, %v8092_v59  ;;  %v15540_v59 = vld [vmem:[%s19524_s26 + $0x40] sm:$0xff] }
0x36f7   :  { %17473 = vmatpush3.msra.mxu0 %v15500_v1  ;;  %17480 = vmatprep.mubr.msk.f32.mxu0 %vm415_vm3, %v19509_v24  ;;  %v15542_v1 = vld [vmem:[%s19524_s26 + $0x50] sm:$0xff] }
0x36f8   :  { %17474 = vmatprep.subr.mxu0 %v15499_v4 }
0x36f9   :  { %17475 = vmatpush3.msra.mxu0 %v15499_v4 }
0x36fa   :  { %17476 = vmatprep.subr.mxu0 %v15498_v36 }
0x36fb   :  { %17477 = vmatpush3.msra.mxu0 %v15498_v36 }
0x36fc   :  { %17478 = vmatprep.subr.mxu0 %v15497_v42 }
0x36fd   :  { %17479 = vmatpush3.msra.mxu0 %v15497_v42 }
0x36fe   :  { %17481 = vmatmul.mubr.msk.f32.vlgmr.msra.gmra.mxu0 %vm415_vm3, %v19511_v29 }
0x36ff   :  { %17498 = vmatprep.mubr.msk.f32.mxu0 %vm738_vm10, %v8255_v43  ;;  %v15529_v43 = vld [vmem:[%s19560_s24 + $0x2] ss:$0 sm:$0xff] }
0x37b6   :  { %v17460_v6 = vpop.f32.mrf.mxu0 }
0x37b8   :  { %v8165_v7 = vpop.f32.mrf.mxu0 }
0x37be   :  { %v17482_v28 = vpop.f32.mrf.mxu0 }
0x37bf   :  { %v8348_v15 = vadd.f32 %v17482_v28, %v15502_v10  ;;  %v15545_v28 = vld [vmem:[%s19565_s14 + $0x2] ss:$0 sm:$0xff] }
0x37c0   :  { %v8342_v62 = vpop.f32.mrf.mxu0 }
0x37c1   :  { %v8343_v61 = vadd.f32 %v15502_v10, %v8342_v62  ;;  %17494 = vmatprep.subr.msk.mxu0 %vm738_vm10, %v8348_v15 }
0x37c2   :  { %17495 = vmatpush3.xpose.msk.msra.mxu0 %vm738_vm10, %v8348_v15 }
0x37c3   :  { %17496 = vmatprep.subr.msk.mxu0 %vm738_vm10, %v8343_v61 }
0x37c6   :  { %17497 = vmatpush3.xpose.msk.msra.mxu0 %vm738_vm10, %v8343_v61 }
0x37c7   :  { %17508 = vmatprep.subr.mxu0 %v15519_v33 }
0x37c9   :  { %17499 = vmatmul.mubr.msk.f32.vlgmr.msra.gmra.mxu0 %vm738_vm10, %v8260_v37 }
0x37ca   :  { %17509 = vmatpush3.msra.mxu0 %v15519_v33  ;;  %v15560_v33 = vld [vmem:[%s19507_s6 + $0x78] sm:$0xff] }
0x37cb   :  { %17518 = vmatprep.subr.mxu0 %v15527_v25 }
0x3889   :  { %v17500_v60 = vpop.f32.mrf.mxu0 }
0x388a   :  { %v8523_v16 = vadd.f32 %v19587_v8, %v17500_v60 }
0x388b   :  { %v8517_v63 = vpop.f32.mrf.mxu0 }
0x388c   :  { %v8518_v3 = vadd.f32 %v19591_v55, %v8517_v63  ;;  %v8529_v23 = vsel %vm826_vm11, %v8523_v16, -inf }
0x388d   :  { %8530 = vmax.xlane.f32.xlu1 %v8529_v23 }
0x388e   :  { %v8526_v18 = vsel %vm826_vm11, %v8518_v3, -inf }
0x388f   :  { %8527 = vmax.xlane.f32.xlu0 %v8526_v18 }
0x3916   :  { %v8531_v50 = vpop.xlane.xlu1 %8530 }
0x3917   :  { %v8533_v0 = vsub.f32 %v8523_v16, %v8531_v50 }
0x3918   :  { %v8528_v19 = vpop.xlane.xlu0 %8527 }
0x3919   :  { %v8536_v22 = vmul.f32 1.442695, %v8533_v0  ;;  %v8532_v5 = vsub.f32 %v8518_v3, %v8528_v19 }
0x391b   :  { %18322 = vpow2.f32 %v8536_v22  ;;  %v8534_v21 = vmul.f32 1.442695, %v8532_v5 }
0x391d   :  { %18324 = vpow2.f32 %v8534_v21 }
0x3928   :  { %v18323_v12 = vpop.eup %18322 }
0x3929   :  { %v8541_v57 = vsel %vm826_vm11, %v18323_v12, 0.0 }
0x392a   :  { %v18325_v49 = vpop.eup %18324  ;;  %8542 = vadd.xlane.f32.xlu1 %v8541_v57 }
0x392b   :  { %v8538_v30 = vsel %vm826_vm11, %v18325_v49, 0.0 }
0x392c   :  { %8539 = vadd.xlane.f32.xlu0 %v8538_v30 }
0x39b3   :  { %v8543_v17 = vpop.xlane.xlu1 %8542 }
0x39b4   :  { %18326 = vrcp.f32 %v8543_v17  ;;  %v15554_v17 = vld [vmem:[%s19626_s27 + $0x10] sm:$0xff] }
0x39b5   :  { %v8540_v31 = vpop.xlane.xlu0 %8539 }
0x39b6   :  { %18328 = vrcp.f32 %v8540_v31 }
0x39c1   :  { %v18327_v35 = vpop.eup %18326 }
0x39c2   :  { %v8547_v20 = vmul.f32 %v18327_v35, %v18323_v12 }
0x39c3   :  { %v18329_v37 = vpop.eup %18328 }
0x39c4   :  { %v8546_v38 = vmul.f32 %v18329_v37, %v18325_v49 }
0x39c6   :  { %17505 = vmatprep.mubr.msk.f32.mxu1 %vm826_vm11, %v8546_v38 }
0x39c7   :  { %17506 = vmatmul.mubr.msk.f32.vlgmr.msra.gmra.mxu1 %vm826_vm11, %v8547_v20 }
0x39c8   :  { %17515 = vmatprep.mubr.msk.f32.mxu1 %vm738_vm10, %v8165_v7  ;;  %17514 = vmatpush3.msra.mxu1 %v8174_v32 }
0x39c9   :  { %17529 = vmatprep.subr.mxu1 %v15535_v39 }
0x39cb   :  { %17516 = vmatmul.mubr.msk.f32.vlgmr.msra.gmra.mxu1 %vm738_vm10, %v17460_v6 }
0x39cc   :  { %17530 = vmatpush3.msra.mxu1 %v15535_v39  ;;  %17537 = vmatprep.mubr.msk.f32.mxu1 %vm415_vm3, %v19509_v24 }
0x39cd   :  { %17531 = vmatprep.subr.mxu1 %v15534_v40 }
0x39ce   :  { %17532 = vmatpush3.msra.mxu1 %v15534_v40  ;;  %v15559_v40 = vld [vmem:[%s19507_s6 + $0x70] sm:$0xff] }
0x39cf   :  { %17533 = vmatprep.subr.mxu1 %v15533_v41 }
0x39d0   :  { %17534 = vmatpush3.msra.mxu1 %v15533_v41  ;;  %v15558_v41 = vld [vmem:[%s19507_s6 + $0x68] sm:$0xff] }
0x39d1   :  { %17535 = vmatprep.subr.mxu1 %v15532_v9 }
0x39d2   :  { %17536 = vmatpush3.msra.mxu1 %v15532_v9  ;;  %v15557_v9 = vld [vmem:[%s19507_s6 + $0x60] sm:$0xff] }
0x39d3   :  { %17538 = vmatmul.mubr.msk.f32.vlgmr.msra.gmra.mxu1 %vm415_vm3, %v19511_v29 }
0x3a87   :  { %v17507_v45 = vpop.f32.mrf.mxu1 }
0x3a89   :  { %v8620_v46 = vpop.f32.mrf.mxu1 }
0x3a8a   :  { %17510 = vmatprep.mubr.msk.f32.mxu0 %vm738_vm10, %v8620_v46  ;;  %v15573_v46 = vld [vmem:[%s19524_s26 + $0x60] sm:$0xff] }
0x3a8b   :  { %17511 = vmatmul.mubr.msk.f32.vlgmr.msra.gmra.mxu0 %vm738_vm10, %v17507_v45  ;;  %v19649_v52 = vpop.f32.mrf.mxu1  ;;  %v15575_v45 = vld [vmem:[%s19524_s26 + $0x70] sm:$0xff] }
0x3a8c   :  { %17519 = vmatpush3.msra.mxu0 %v15527_v25  ;;  %17526 = vmatprep.mubr.msk.f32.mxu0 %vm415_vm3, %v19531_v27  ;;  %v15576_v25 = vld [vmem:[%s19524_s26 + $0x78] sm:$0xff] }
0x3a8d   :  { %17520 = vmatprep.subr.mxu0 %v15526_v47  ;;  %v19653_v51 = vpop.f32.mrf.mxu1 }
0x3a8e   :  { %17521 = vmatpush3.msra.mxu0 %v15526_v47 }
0x3a8f   :  { %17522 = vmatprep.subr.mxu0 %v15525_v48 }
0x3a90   :  { %17523 = vmatpush3.msra.mxu0 %v15525_v48 }
0x3a91   :  { %17524 = vmatprep.subr.mxu0 %v15524_v53 }
0x3a92   :  { %17525 = vmatpush3.msra.mxu0 %v15524_v53  ;;  %v15567_v53 = vld [vmem:[%s19478_s22 + $0x70] sm:$0xff] }
0x3a93   :  { %17527 = vmatmul.mubr.msk.f32.vlgmr.msra.gmra.mxu0 %vm415_vm3, %v19533_v2  ;;  %v17539_v13 = vpop.f32.mrf.mxu1  ;;  %17540 = vmatprep.subr.mxu0 %v15543_v56 }
0x3a94   :  { %v8966_v26 = vadd.f32 %v17539_v13, %v15537_v54  ;;  %17541 = vmatpush3.msra.mxu0 %v15543_v56  ;;  %17548 = vmatprep.mubr.msk.f32.mxu0 %vm415_vm3, %v19509_v24  ;;  %v15566_v56 = vld [vmem:[%s19478_s22 + $0x68] sm:$0xff] }
0x3a95   :  { %v8960_v58 = vpop.f32.mrf.mxu1  ;;  %17542 = vmatprep.subr.mxu0 %v15542_v1 }
0x3a96   :  { %v8961_v34 = vadd.f32 %v15537_v54, %v8960_v58  ;;  %17543 = vmatpush3.msra.mxu0 %v15542_v1  ;;  %17551 = vmatprep.subr.msk.mxu1 %vm738_vm10, %v8966_v26  ;;  %v15562_v54 = vld [vmem:[%s19560_s24 + $0x3] ss:$0 sm:$0xff] }
0x3a97   :  { %17544 = vmatprep.subr.mxu0 %v15541_v14  ;;  %17552 = vmatpush3.xpose.msk.msra.mxu1 %vm738_vm10, %v8966_v26  ;;  %v15565_v1 = vld [vmem:[%s19478_s22 + $0x60] sm:$0xff] }
0x3a98   :  { %17545 = vmatpush3.msra.mxu0 %v15541_v14  ;;  %17553 = vmatprep.subr.msk.mxu1 %vm738_vm10, %v8961_v34 }
0x3a99   :  { %17546 = vmatprep.subr.mxu0 %v15540_v59 }
0x3a9a   :  { %17547 = vmatpush3.msra.mxu0 %v15540_v59 }
0x3a9b   :  { %17549 = vmatmul.mubr.msk.f32.vlgmr.msra.gmra.mxu0 %vm415_vm3, %v19511_v29  ;;  %17554 = vmatpush3.xpose.msk.msra.mxu1 %vm738_vm10, %v8961_v34  ;;  %v15578_v34 = vld [vmem:[%s19565_s14 + $0x3] ss:$0 sm:$0xff] }
0x3a9c   :  { %17565 = vmatprep.subr.mxu1 %v15554_v17 }
0x3b4b   :  { %v19669_v4 = vpop.f32.mrf.mxu0 }
0x3b4d   :  { %v19671_v36 = vpop.f32.mrf.mxu0 }
0x3b53   :  { %v17528_v42 = vpop.f32.mrf.mxu0 }
0x3b54   :  { %v8878_v10 = vadd.f32 %v17528_v42, %v15529_v43 }
0x3b55   :  { %v8872_v6 = vpop.f32.mrf.mxu0 }
0x3b56   :  { %v8873_v7 = vadd.f32 %v15529_v43, %v8872_v6 }
0x3b58   :  { %17555 = vmatprep.mubr.msk.f32.mxu1 %vm738_vm10, %v8873_v7  ;;  %v8790_v7 = vadd.f32 %v19649_v52, %v19669_v4 }
0x3b59   :  { %17556 = vmatmul.mubr.msk.f32.vlgmr.msra.gmra.mxu1 %vm738_vm10, %v8878_v10 }
0x3b5a   :  { %17566 = vmatpush3.msra.mxu1 %v15554_v17 }
0x3b5b   :  { %v17550_v15 = vpop.f32.mrf.mxu0 }
0x3b5c   :  { %v9054_v62 = vadd.f32 %v17550_v15, %v15545_v28 }
0x3b5d   :  { %v9048_v61 = vpop.f32.mrf.mxu0 }
0x3b5e   :  { %v9049_v60 = vadd.f32 %v15545_v28, %v9048_v61  ;;  %17558 = vmatprep.subr.mxu0 %v9054_v62  ;;  %v8785_v28 = vadd.f32 %v19653_v51, %v19671_v36 }
0x3b5f   :  { %17559 = vmatpush3.msra.mxu0 %v9054_v62 }
0x3b60   :  { %17560 = vmatprep.subr.mxu0 %v9049_v60 }
0x3b61   :  { %17561 = vmatpush3.msra.mxu0 %v9049_v60  ;;  %v15570_v60 = vld [vmem:[%s19549_s13 + $0x3] ss:$0 sm:$0xff] }
0x3b62   :  { %17570 = vmatprep.subr.mxu0 %v15560_v33 }
0x3c19   :  { %v17557_v16 = vpop.f32.mrf.mxu1 }
0x3c1a   :  { %v9141_v63 = vadd.f32 %v19587_v8, %v17557_v16 }
0x3c1b   :  { %v9135_v3 = vpop.f32.mrf.mxu1 }
0x3c1c   :  { %v9136_v23 = vadd.f32 %v19591_v55, %v9135_v3  ;;  %v9147_v18 = vsel %vm826_vm11, %v9141_v63, -inf }
0x3c1d   :  { %9148 = vmax.xlane.f32.xlu1 %v9147_v18 }
0x3c1e   :  { %v9144_v50 = vsel %vm826_vm11, %v9136_v23, -inf }
0x3c1f   :  { %9145 = vmax.xlane.f32.xlu0 %v9144_v50 }
0x3ca6   :  { %v9149_v0 = vpop.xlane.xlu1 %9148 }
0x3ca7   :  { %v9151_v19 = vsub.f32 %v9141_v63, %v9149_v0 }
0x3ca8   :  { %v9146_v22 = vpop.xlane.xlu0 %9145 }
0x3ca9   :  { %v9154_v5 = vmul.f32 1.442695, %v9151_v19  ;;  %v9150_v21 = vsub.f32 %v9136_v23, %v9146_v22 }
0x3cab   :  { %18330 = vpow2.f32 %v9154_v5  ;;  %v9152_v12 = vmul.f32 1.442695, %v9150_v21 }
0x3cad   :  { %18332 = vpow2.f32 %v9152_v12 }
0x3cb8   :  { %v18331_v57 = vpop.eup %18330 }
0x3cb9   :  { %v9159_v49 = vsel %vm826_vm11, %v18331_v57, 0.0 }
0x3cba   :  { %v18333_v30 = vpop.eup %18332  ;;  %9160 = vadd.xlane.f32.xlu1 %v9159_v49 }
0x3cbb   :  { %v9156_v32 = vsel %vm826_vm11, %v18333_v30, 0.0 }
0x3cbc   :  { %9157 = vadd.xlane.f32.xlu0 %v9156_v32 }
0x3d43   :  { %v9161_v31 = vpop.xlane.xlu1 %9160 }
0x3d44   :  { %18334 = vrcp.f32 %v9161_v31 }
0x3d45   :  { %v9158_v35 = vpop.xlane.xlu0 %9157 }
0x3d46   :  { %18336 = vrcp.f32 %v9158_v35 }
0x3d51   :  { %v18335_v37 = vpop.eup %18334 }
0x3d52   :  { %v9165_v39 = vmul.f32 %v18335_v37, %v18331_v57 }
0x3d53   :  { %v18337_v38 = vpop.eup %18336 }
0x3d54   :  { %v9164_v20 = vmul.f32 %v18337_v38, %v18333_v30  ;;  %v15587_v30 = vld [vmem:[%s19626_s27 + $0x18] sm:$0xff] }
0x3d56   :  { %17562 = vmatprep.mubr.msk.f32.mxu0 %vm826_vm11, %v9164_v20 }
0x3d57   :  { %17563 = vmatmul.mubr.msk.f32.vlgmr.msra.gmra.mxu0 %vm826_vm11, %v9165_v39  ;;  %v15590_v39 = vld [vmem:[%s19739_s29] ss:$0 sm:$0xff] }
0x3d58   :  { %17571 = vmatpush3.msra.mxu0 %v15560_v33  ;;  %17578 = vmatprep.mubr.msk.f32.mxu0 %vm415_vm3, %v19531_v27  ;;  %v15574_v27 = vld [vmem:[%s19524_s26 + $0x68] sm:$0xff] }
0x3d59   :  { %17572 = vmatprep.subr.mxu0 %v15559_v40 }
0x3d5a   :  { %17573 = vmatpush3.msra.mxu0 %v15559_v40 }
0x3d5b   :  { %17574 = vmatprep.subr.mxu0 %v15558_v41 }
0x3d5c   :  { %17575 = vmatpush3.msra.mxu0 %v15558_v41 }
0x3d5d   :  { %17576 = vmatprep.subr.mxu0 %v15557_v9 }
0x3d5e   :  { %17577 = vmatpush3.msra.mxu0 %v15557_v9 }
0x3d5f   :  { %17579 = vmatmul.mubr.msk.f32.vlgmr.msra.gmra.mxu0 %vm415_vm3, %v19533_v2  ;;  %17592 = vmatprep.subr.mxu0 %v15576_v25  ;;  %v15568_v2 = vld [vmem:[%s19478_s22 + $0x78] sm:$0xff] }
0x3d60   :  { %17593 = vmatpush3.msra.mxu0 %v15576_v25  ;;  %17600 = vmatprep.mubr.msk.f32.mxu0 %vm415_vm3, %v19509_v24 }
0x3d61   :  { %17594 = vmatprep.subr.mxu0 %v15575_v45  ;;  %17581 = vmatprep.subr.mxu1 %v15568_v2 }
0x3d62   :  { %17595 = vmatpush3.msra.mxu0 %v15575_v45 }
0x3d63   :  { %17596 = vmatprep.subr.mxu0 %v15574_v27 }
0x3d64   :  { %17597 = vmatpush3.msra.mxu0 %v15574_v27 }
0x3d65   :  { %17598 = vmatprep.subr.mxu0 %v15573_v46 }
0x3d66   :  { %17599 = vmatpush3.msra.mxu0 %v15573_v46 }
0x3d67   :  { %17601 = vmatmul.mubr.msk.f32.vlgmr.msra.gmra.mxu0 %vm415_vm3, %v19511_v29 }
0x3e17   :  { %v17564_v47 = vpop.f32.mrf.mxu0 }
0x3e19   :  { %v9238_v48 = vpop.f32.mrf.mxu0 }
0x3e1a   :  { %17567 = vmatprep.mubr.msk.f32.mxu1 %vm738_vm10, %v9238_v48 }
0x3e1b   :  { %17568 = vmatmul.mubr.msk.f32.vlgmr.msra.gmra.mxu1 %vm738_vm10, %v17564_v47 }
0x3e1c   :  { %17582 = vmatpush3.msra.mxu1 %v15568_v2  ;;  %17589 = vmatprep.mubr.msk.f32.mxu1 %vm415_vm3, %v19509_v24 }
0x3e1d   :  { %17583 = vmatprep.subr.mxu1 %v15567_v53 }
0x3e1e   :  { %17584 = vmatpush3.msra.mxu1 %v15567_v53 }
0x3e1f   :  { %v17580_v13 = vpop.f32.mrf.mxu0  ;;  %17585 = vmatprep.subr.mxu1 %v15566_v56 }
0x3e20   :  { %v9417_v26 = vadd.f32 %v17580_v13, %v15562_v54  ;;  %17586 = vmatpush3.msra.mxu1 %v15566_v56 }
0x3e21   :  { %v9411_v14 = vpop.f32.mrf.mxu0  ;;  %17587 = vmatprep.subr.mxu1 %v15565_v1 }
0x3e22   :  { %v9412_v58 = vadd.f32 %v15562_v54, %v9411_v14  ;;  %17588 = vmatpush3.msra.mxu1 %v15565_v1 }
0x3e23   :  { %17590 = vmatmul.mubr.msk.f32.vlgmr.msra.gmra.mxu1 %vm415_vm3, %v19511_v29 }
0x3e24   :  { %17607 = vmatprep.mubr.msk.f32.mxu1 %vm738_vm10, %v9412_v58 }
0x3e27   :  { %v17602_v59 = vpop.f32.mrf.mxu0 }
0x3e28   :  { %v9593_v42 = vadd.f32 %v17602_v59, %v15578_v34  ;;  %v9943_v59 = vld [vmem:[%s19763_s7 + $0x10] sm:$0xff] }
0x3e29   :  { %v9587_v43 = vpop.f32.mrf.mxu0 }
0x3e2a   :  { %v9588_v6 = vadd.f32 %v15578_v34, %v9587_v43  ;;  %17610 = vmatprep.subr.mxu0 %v9593_v42  ;;  %v9944_v34 = vld [vmem:[%s19763_s7 + $0x18] sm:$0xff]  ;;  %v9941_v43 = vld [vmem:[%s19763_s7] sm:$0xff] }
0x3e2b   :  { %17611 = vmatpush3.msra.mxu0 %v9593_v42  ;;  %v9942_v42 = vld [vmem:[%s19763_s7 + $0x8] sm:$0xff] }
0x3e2c   :  { %17612 = vmatprep.subr.mxu0 %v9588_v6 }
0x3e2d   :  { %17613 = vmatpush3.msra.mxu0 %v9588_v6  ;;  %v9953_v6 = vld [vmem:[%s19772_s2 + $0x38] sm:$0xff] }
0x3e2e   :  { %17622 = vmatprep.subr.mxu0 %v9944_v34 }
0x3edb   :  { %v17569_v10 = vpop.f32.mrf.mxu1 }
0x3edc   :  { %v9331_v15 = vadd.f32 %v17569_v10, %v8790_v7  ;;  %v9952_v7 = vld [vmem:[%s19772_s2 + $0x30] sm:$0xff]  ;;  %v9951_v10 = vld [vmem:[%s19772_s2 + $0x28] sm:$0xff] }
0x3edd   :  { %v9321_v62 = vpop.f32.mrf.mxu1 }
0x3ede   :  { %v9330_v61 = vadd.f32 %v9321_v62, %v8785_v28  ;;  %v9950_v28 = vld [vmem:[%s19772_s2 + $0x20] sm:$0xff] }
0x3ee3   :  { %v17591_v16 = vpop.f32.mrf.mxu1 }
0x3ee4   :  { %v9505_v63 = vadd.f32 %v17591_v16, %v15570_v60 }
0x3ee5   :  { %v9499_v3 = vpop.f32.mrf.mxu1 }
0x3ee6   :  { %v9500_v23 = vadd.f32 %v15570_v60, %v9499_v3  ;;  %17603 = vmatprep.subr.msk.mxu1 %vm738_vm10, %v9505_v63 }
0x3ee7   :  { %17604 = vmatpush3.xpose.msk.msra.mxu1 %vm738_vm10, %v9505_v63 }
0x3ee8   :  { %17605 = vmatprep.subr.msk.mxu1 %vm738_vm10, %v9500_v23 }
0x3eeb   :  { %17606 = vmatpush3.xpose.msk.msra.mxu1 %vm738_vm10, %v9500_v23 }
0x3eec   :  { %17617 = vmatprep.subr.mxu1 %v15587_v30 }
0x3eee   :  { %17608 = vmatmul.mubr.msk.f32.vlgmr.msra.gmra.mxu1 %vm738_vm10, %v9417_v26 }
0x3eef   :  { %17618 = vmatpush3.msra.mxu1 %v15587_v30 }
0x3ef0   :  { %17633 = vmatprep.subr.mxu1 %v9953_v6 }
0x3fae   :  { %v17609_v52 = vpop.f32.mrf.mxu1 }
0x3faf   :  { %v9680_v51 = vadd.f32 %v19587_v8, %v17609_v52 }
0x3fb0   :  { %v9674_v4 = vpop.f32.mrf.mxu1 }
0x3fb1   :  { %v9675_v36 = vadd.f32 %v19591_v55, %v9674_v4  ;;  %v9686_v18 = vsel %vm826_vm11, %v9680_v51, -inf }
0x3fb2   :  { %9687 = vmax.xlane.f32.xlu1 %v9686_v18 }
0x3fb3   :  { %v9683_v50 = vsel %vm826_vm11, %v9675_v36, -inf }
0x3fb4   :  { %9684 = vmax.xlane.f32.xlu0 %v9683_v50 }
0x403b   :  { %v9688_v0 = vpop.xlane.xlu1 %9687 }
0x403c   :  { %v9690_v19 = vsub.f32 %v9680_v51, %v9688_v0 }
0x403d   :  { %v9685_v22 = vpop.xlane.xlu0 %9684 }
0x403e   :  { %v9693_v5 = vmul.f32 1.442695, %v9690_v19  ;;  %v9689_v21 = vsub.f32 %v9675_v36, %v9685_v22  ;;  %v15593_v22 = vld [vmem:[%s19176_s5 + $0x2] ss:$0 sm:$0xff] }
0x4040   :  { %18338 = vpow2.f32 %v9693_v5  ;;  %v9691_v12 = vmul.f32 1.442695, %v9689_v21 }
0x4042   :  { %18340 = vpow2.f32 %v9691_v12 }
0x404d   :  { %v18339_v57 = vpop.eup %18338 }
0x404e   :  { %v9698_v8 = vsel %vm826_vm11, %v18339_v57, 0.0 }
0x404f   :  { %v18341_v49 = vpop.eup %18340  ;;  %9699 = vadd.xlane.f32.xlu1 %v9698_v8 }
0x4050   :  { %v9695_v55 = vsel %vm826_vm11, %v18341_v49, 0.0 }
0x4051   :  { %9696 = vadd.xlane.f32.xlu0 %v9695_v55 }
0x40d8   :  { %v9700_v32 = vpop.xlane.xlu1 %9699 }
0x40d9   :  { %18342 = vrcp.f32 %v9700_v32 }
0x40da   :  { %v9697_v33 = vpop.xlane.xlu0 %9696 }
0x40db   :  { %18344 = vrcp.f32 %v9697_v33  ;;  %v9949_v33 = vld [vmem:[%s19772_s2 + $0x18] sm:$0xff] }
0x40e6   :  { %v18343_v17 = vpop.eup %18342 }
0x40e7   :  { %v9704_v37 = vmul.f32 %v18343_v17, %v18339_v57  ;;  %v9948_v17 = vld [vmem:[%s19772_s2 + $0x10] sm:$0xff] }
0x40e8   :  { %v18345_v31 = vpop.eup %18344 }
0x40e9   :  { %v9703_v35 = vmul.f32 %v18345_v31, %v18341_v49  ;;  %v15594_v49 = vld [vmem:[%s19183_s12 + $0x2] ss:$0 sm:$0xff]  ;;  %v9947_v31 = vld [vmem:[%s19772_s2 + $0x8] sm:$0xff] }
0x40eb   :  { %17614 = vmatprep.mubr.msk.f32.mxu0 %vm826_vm11, %v9703_v35  ;;  %v9946_v35 = vld [vmem:[%s19772_s2] sm:$0xff] }
0x40ec   :  { %17615 = vmatmul.mubr.msk.f32.vlgmr.msra.gmra.mxu0 %vm826_vm11, %v9704_v37  ;;  %v15595_v37 = vld [vmem:[%s19790_s8] ss:$0 sm:$0xff] }
0x40ed   :  { %17623 = vmatpush3.msra.mxu0 %v9944_v34 }
0x40ee   :  { %17624 = vmatprep.subr.mxu0 %v9943_v59 }
0x40ef   :  { %17625 = vmatpush3.msra.mxu0 %v9943_v59 }
0x40f0   :  { %17626 = vmatprep.subr.mxu0 %v9942_v42 }
0x40f1   :  { %17627 = vmatpush3.msra.mxu0 %v9942_v42  ;;  %v15609_v42 = vld [vmem:[%s19160_s3 + $0x98] sm:$0xff] }
0x40f2   :  { %17628 = vmatprep.subr.mxu0 %v9941_v43 }
0x40f3   :  { %17629 = vmatpush3.msra.mxu0 %v9941_v43  ;;  %v15625_v43 = vld [vmem:[%s19222_s21 + $0x98] sm:$0xff] }
0x40f4   :  { %17652 = vmatprep.subr.mxu0 %v15609_v42 }
0x41ac   :  { %v17616_v38 = vpop.f32.mrf.mxu0 }
0x41ae   :  { %v9777_v20 = vpop.f32.mrf.mxu0 }
0x41af   :  { %17619 = vmatprep.mubr.msk.f32.mxu1 %vm738_vm10, %v9777_v20 }
0x41b0   :  { %17620 = vmatmul.mubr.msk.f32.vlgmr.msra.gmra.mxu1 %vm738_vm10, %v17616_v38 }
0x41b1   :  { %17634 = vmatpush3.msra.mxu1 %v9953_v6  ;;  %v15608_v6 = vld [vmem:[%s19160_s3 + $0x90] sm:$0xff] }
0x41b2   :  { %17635 = vmatprep.subr.mxu1 %v9952_v7 }
0x41b3   :  { %17636 = vmatpush3.msra.mxu1 %v9952_v7  ;;  %v15624_v7 = vld [vmem:[%s19222_s21 + $0x90] sm:$0xff] }
0x41b4   :  { %17637 = vmatprep.subr.mxu1 %v9951_v10 }
0x41b5   :  { %17638 = vmatpush3.msra.mxu1 %v9951_v10  ;;  %v15607_v10 = vld [vmem:[%s19160_s3 + $0x88] sm:$0xff] }
0x41b6   :  { %17639 = vmatprep.subr.mxu1 %v9950_v28 }
0x41b7   :  { %17640 = vmatpush3.msra.mxu1 %v9950_v28  ;;  %v15623_v28 = vld [vmem:[%s19222_s21 + $0x88] sm:$0xff] }
0x41b8   :  { %17641 = vmatprep.subr.mxu1 %v9949_v33 }
0x41b9   :  { %17642 = vmatpush3.msra.mxu1 %v9949_v33 }
0x41ba   :  { %17643 = vmatprep.subr.mxu1 %v9948_v17 }
0x41bb   :  { %17644 = vmatpush3.msra.mxu1 %v9948_v17 }
0x41bc   :  { %17645 = vmatprep.subr.mxu1 %v9947_v31 }
0x41bd   :  { %17646 = vmatpush3.msra.mxu1 %v9947_v31 }
0x41be   :  { %17647 = vmatprep.subr.mxu1 %v9946_v35 }
0x41bf   :  { %17648 = vmatpush3.msra.mxu1 %v9946_v35  ;;  %v15616_v35 = vld [vmem:[%s19192_s17 + $0x90] sm:$0xff] }
0x41c0   :  { %17674 = vmatprep.subr.mxu1 %v15625_v43 }
0x4270   :  { %v17621_v40 = vpop.f32.mrf.mxu1 }
0x4271   :  { %v9870_v41 = vadd.f32 %v17621_v40, %v9331_v15 }
0x4272   :  { %v9860_v9 = vpop.f32.mrf.mxu1 }
0x4273   :  { %v9878_v25 = vadd.f32 %v15590_v39, %v9870_v41  ;;  %v9869_v45 = vadd.f32 %v9860_v9, %v9330_v61 }
0x4275   :  { %v19743_v27 = vadd.f32 %v9878_v25, %v19460_v44  ;;  %v9877_v46 = vadd.f32 %v15590_v39, %v9869_v45  ;;  %v15598_v25 = vld [vmem:[%s19798_s23] ss:$0 sm:$0xff] }
0x4277   :  { %v19746_v2 = vadd.f32 %v9877_v46, %v19463_v11  ;;  %v9888_v47 = vsel %vm415_vm3, %v19743_v27, 0.0 }
0x4278   :  { %9889 = vadd.xlane.f32.xlu1 %v9888_v47 }
0x4279   :  { %v9885_v48 = vsel %vm415_vm3, %v19746_v2, 0.0 }
0x427a   :  { %9886 = vadd.xlane.f32.xlu0 %v9885_v48 }
0x4301   :  { %v9890_v53 = vpop.xlane.xlu1 %9889 }
0x4302   :  { %v9892_v56 = vmul.f32 0.03125, %v9890_v53 }
0x4303   :  { %v9887_v54 = vpop.xlane.xlu0 %9886 }
0x4304   :  { %v19753_v1 = vsub.f32 %v19743_v27, %v9892_v56  ;;  %v9891_v44 = vmul.f32 0.03125, %v9887_v54 }
0x4306   :  { %v9893_v13 = vsub.f32 %v19746_v2, %v9891_v44  ;;  %v9896_v11 = vmul.f32 %v19753_v1, %v19753_v1  ;;  %v9930_v21 = vmul.f32 %v15593_v22, %v19753_v1 }
0x4308   :  { %v9900_v26 = vsel %vm415_vm3, %v9896_v11, 0.0  ;;  %v9895_v14 = vmul.f32 %v9893_v13, %v9893_v13  ;;  %v9929_v12 = vmul.f32 %v15593_v22, %v9893_v13 }
0x4309   :  { %9901 = vadd.xlane.f32.xlu1 %v9900_v26 }
0x430a   :  { %v9897_v58 = vsel %vm415_vm3, %v9895_v14, 0.0 }
0x430b   :  { %9898 = vadd.xlane.f32.xlu0 %v9897_v58 }
0x4392   :  { %v9902_v15 = vpop.xlane.xlu1 %9901 }
0x4393   :  { %v9904_v62 = vmul.f32 0.032258064, %v9902_v15  ;;  %v15606_v15 = vld [vmem:[%s19160_s3 + $0x80] sm:$0xff] }
0x4394   :  { %v9899_v61 = vpop.xlane.xlu0 %9898 }
0x4395   :  { %18346 = vrsqrt.f32 %v9904_v62  ;;  %v9903_v60 = vmul.f32 0.032258064, %v9899_v61  ;;  %vm9914_vm12 = vcmp.eq.f32.partialorder %v9904_v62, inf  ;;  %v9917_v3 = vand.u32 2147483648, %v9904_v62  ;;  %v15617_v61 = vld [vmem:[%s19192_s17 + $0x98] sm:$0xff] }
0x4396   :  { %vm9916_vm13 = vcmp.eq.f32.partialorder %v9904_v62, 0.0 }
0x4397   :  { %18348 = vrsqrt.f32 %v9903_v60  ;;  %vm9907_vm14 = vcmp.eq.f32.partialorder %v9903_v60, inf  ;;  %v9910_v18 = vand.u32 2147483648, %v9903_v60  ;;  %vm9909_vm15 = vcmp.eq.f32.partialorder %v9903_v60, 0.0 }
0x43a2   :  { %v18347_v16 = vpop.eup %18346 }
0x43a3   :  { %v9913_v63 = vmul.f32 %v18347_v16, %v9904_v62 }
0x43a4   :  { %v18349_v23 = vpop.eup %18348 }
0x43a5   :  { %v9915_v52 = vsel %vm9914_vm12, %v9904_v62, %v9913_v63  ;;  %v9906_v4 = vmul.f32 %v18349_v23, %v9903_v60  ;;  %v15622_v62 = vld [vmem:[%s19222_s21 + $0x80] sm:$0xff] }
0x43a6   :  { %v9918_v51 = vsel %vm9916_vm13, %v9917_v3, %v9915_v52 }
0x43a7   :  { %v9920_v36 = vadd.f32 1e-06, %v9918_v51  ;;  %v9908_v50 = vsel %vm9907_vm14, %v9903_v60, %v9906_v4 }
0x43a8   :  { %v9911_v0 = vsel %vm9909_vm15, %v9910_v18, %v9908_v50 }
0x43a9   :  { %18350 = vrcp.f32 %v9920_v36  ;;  %v9919_v19 = vadd.f32 1e-06, %v9911_v0 }
0x43ab   :  { %18352 = vrcp.f32 %v9919_v19 }
0x43b6   :  { %v18351_v5 = vpop.eup %18350 }
0x43b7   :  { %v9932_v8 = vmul.f32 %v18351_v5, %v9930_v21 }
0x43b8   :  { %v18353_v57 = vpop.eup %18352 }
0x43b9   :  { %v9931_v55 = vmul.f32 %v18353_v57, %v9929_v12  ;;  %v9940_v32 = vadd.f32 %v15594_v49, %v9932_v8  ;;  %v15603_v12 = vld [vmem:[%s19176_s5 + $0x3] ss:$0 sm:$0xff] }
0x43bb   :  { %v9939_v30 = vadd.f32 %v15594_v49, %v9931_v55 }
0x43bd   :  { %17630 = vmatprep.mubr.msk.f32.mxu0 %vm415_vm3, %v9939_v30 }
0x43be   :  { %17631 = vmatmul.mubr.msk.f32.vlgmr.msra.gmra.mxu0 %vm415_vm3, %v9940_v32  ;;  %v15604_v32 = vld [vmem:[%s19183_s12 + $0x3] ss:$0 sm:$0xff] }
0x43bf   :  { %17653 = vmatpush3.msra.mxu0 %v15609_v42 }
0x43c0   :  { %17654 = vmatprep.subr.mxu0 %v15608_v6 }
0x43c1   :  { %17655 = vmatpush3.msra.mxu0 %v15608_v6 }
0x43c2   :  { %17656 = vmatprep.subr.mxu0 %v15607_v10 }
0x43c3   :  { %17657 = vmatpush3.msra.mxu0 %v15607_v10 }
0x43c4   :  { %17658 = vmatprep.subr.mxu0 %v15606_v15 }
0x43c5   :  { %17659 = vmatpush3.msra.mxu0 %v15606_v15 }
0x43c6   :  { %17663 = vmatprep.subr.mxu0 %v15617_v61 }
0x447e   :  { %v17632_v38 = vpop.f32.mrf.mxu0 }
0x447f   :  { %v10039_v20 = vadd.f32 %v17632_v38, %v15595_v37  ;;  %v15614_v38 = vld [vmem:[%s19192_s17 + $0x80] sm:$0xff] }
0x4480   :  { %v10033_v39 = vpop.f32.mrf.mxu0 }
0x4481   :  { %v10034_v40 = vadd.f32 %v15595_v37, %v10033_v39  ;;  %v10043_v9 = vmax.f32 %v10039_v20, 0.0  ;;  %v15615_v37 = vld [vmem:[%s19192_s17 + $0x88] sm:$0xff]  ;;  %v15627_v20 = vld [vmem:[%s19266_s16 + $0x4] ss:$0 sm:$0xff] }
0x4483   :  { %v10042_v41 = vmax.f32 %v10034_v40, 0.0 }
0x4485   :  { %17649 = vmatprep.mubr.msk.f32.mxu1 %vm230_vm0, %v10042_v41 }
0x4486   :  { %17650 = vmatmul.mubr.msk.f32.vlgmr.msra.gmra.mxu1 %vm230_vm0, %v10043_v9  ;;  %v15611_v9 = vld [vmem:[%s19231_s1 + $0x4] ss:$0 sm:$0xff] }
0x4487   :  { %17675 = vmatpush3.msra.mxu1 %v15625_v43  ;;  %v19867_v43 = vld [vmem:[%s19276_s9] sm:$0xff] }
0x4488   :  { %17676 = vmatprep.subr.mxu1 %v15624_v7 }
0x4489   :  { %17677 = vmatpush3.msra.mxu1 %v15624_v7 }
0x448a   :  { %17678 = vmatprep.subr.mxu1 %v15623_v28 }
0x448b   :  { %17679 = vmatpush3.msra.mxu1 %v15623_v28  ;;  %v15650_v28 = vld [vmem:[%s19236_s28 + $0x5] ss:$0 sm:$0xff] }
0x448c   :  { %17680 = vmatprep.subr.mxu1 %v15622_v62 }
0x448d   :  { %17681 = vmatpush3.msra.mxu1 %v15622_v62 }
0x4546   :  { %v17651_v45 = vpop.f32.mrf.mxu1 }
0x4547   :  { %v10128_v46 = vadd.f32 %v17651_v45, %v15598_v25 }
0x4548   :  { %v10122_v47 = vpop.f32.mrf.mxu1 }
0x4549   :  { %v19802_v48 = vadd.f32 %v10128_v46, %v19743_v27  ;;  %v10123_v53 = vadd.f32 %v15598_v25, %v10122_v47 }
0x454b   :  { %v19805_v56 = vadd.f32 %v10123_v53, %v19746_v2  ;;  %v10140_v54 = vsel %vm415_vm3, %v19802_v48, 0.0  ;;  %v15619_v53 = vld [vmem:[%s19236_s28 + $0x4] ss:$0 sm:$0xff] }
0x454c   :  { %10141 = vadd.xlane.f32.xlu1 %v10140_v54 }
0x454d   :  { %v10137_v1 = vsel %vm415_vm3, %v19805_v56, 0.0 }
0x454e   :  { %10138 = vadd.xlane.f32.xlu0 %v10137_v1 }
0x45d5   :  { %v10142_v44 = vpop.xlane.xlu1 %10141 }
0x45d6   :  { %v10144_v13 = vmul.f32 0.03125, %v10142_v44 }
0x45d7   :  { %v10139_v11 = vpop.xlane.xlu0 %10138 }
0x45d8   :  { %v10146_v27 = vsub.f32 %v19802_v48, %v10144_v13  ;;  %v10143_v26 = vmul.f32 0.03125, %v10139_v11  ;;  %v15648_v11 = vld [vmem:[%s19192_s17 + $0xb8] sm:$0xff] }
0x45da   :  { %v10145_v2 = vsub.f32 %v19805_v56, %v10143_v26  ;;  %v10148_v14 = vmul.f32 %v10146_v27, %v10146_v27  ;;  %v10182_v8 = vmul.f32 %v15603_v12, %v10146_v27  ;;  %v15647_v26 = vld [vmem:[%s19192_s17 + $0xb0] sm:$0xff] }
0x45dc   :  { %v10152_v58 = vsel %vm415_vm3, %v10148_v14, 0.0  ;;  %v10147_v34 = vmul.f32 %v10145_v2, %v10145_v2  ;;  %v10181_v49 = vmul.f32 %v15603_v12, %v10145_v2  ;;  %v15646_v2 = vld [vmem:[%s19192_s17 + $0xa8] sm:$0xff]  ;;  %v15645_v14 = vld [vmem:[%s19192_s17 + $0xa0] sm:$0xff] }
0x45dd   :  { %10153 = vadd.xlane.f32.xlu1 %v10152_v58 }
0x45de   :  { %v10149_v59 = vsel %vm415_vm3, %v10147_v34, 0.0  ;;  %v19863_v34 = vld [vmem:[%s19276_s9 + $0x8] sm:$0xff] }
0x45df   :  { %10150 = vadd.xlane.f32.xlu0 %v10149_v59 }
0x4666   :  { %v10154_v60 = vpop.xlane.xlu1 %10153 }
0x4667   :  { %v10156_v16 = vmul.f32 0.032258064, %v10154_v60 }
0x4668   :  { %v10151_v63 = vpop.xlane.xlu0 %10150 }
0x4669   :  { %18354 = vrsqrt.f32 %v10156_v16  ;;  %v10155_v3 = vmul.f32 0.032258064, %v10151_v63  ;;  %vm10166_vm1 = vcmp.eq.f32.partialorder %v10156_v16, inf  ;;  %v10169_v51 = vand.u32 2147483648, %v10156_v16 }
0x466a   :  { %vm10168_vm2 = vcmp.eq.f32.partialorder %v10156_v16, 0.0 }
0x466b   :  { %18356 = vrsqrt.f32 %v10155_v3  ;;  %vm10159_vm4 = vcmp.eq.f32.partialorder %v10155_v3, inf  ;;  %v10162_v19 = vand.u32 2147483648, %v10155_v3  ;;  %vm10161_vm5 = vcmp.eq.f32.partialorder %v10155_v3, 0.0 }
0x4676   :  { %v18355_v23 = vpop.eup %18354 }
0x4677   :  { %v10165_v52 = vmul.f32 %v18355_v23, %v10156_v16 }
0x4678   :  { %v18357_v4 = vpop.eup %18356 }
0x4679   :  { %v10167_v36 = vsel %vm10166_vm1, %v10156_v16, %v10165_v52  ;;  %v10158_v50 = vmul.f32 %v18357_v4, %v10155_v3 }
0x467a   :  { %v10170_v18 = vsel %vm10168_vm2, %v10169_v51, %v10167_v36 }
0x467b   :  { %v10172_v0 = vadd.f32 1e-06, %v10170_v18  ;;  %v10160_v22 = vsel %vm10159_vm4, %v10155_v3, %v10158_v50 }
0x467c   :  { %v10163_v5 = vsel %vm10161_vm5, %v10162_v19, %v10160_v22 }
0x467d   :  { %18358 = vrcp.f32 %v10172_v0  ;;  %v10171_v21 = vadd.f32 1e-06, %v10163_v5  ;;  %v15640_v0 = vld [vmem:[%s19160_s3 + $0xb8] sm:$0xff] }
0x467f   :  { %18360 = vrcp.f32 %v10171_v21 }
0x468a   :  { %v18359_v57 = vpop.eup %18358 }
0x468b   :  { %v10184_v30 = vmul.f32 %v18359_v57, %v10182_v8  ;;  %v15639_v8 = vld [vmem:[%s19160_s3 + $0xb0] sm:$0xff] }
0x468c   :  { %v18361_v55 = vpop.eup %18360 }
0x468d   :  { %v10183_v33 = vmul.f32 %v18361_v55, %v10181_v49  ;;  %v19828_v31 = vadd.f32 %v15604_v32, %v10184_v30  ;;  %v15638_v49 = vld [vmem:[%s19160_s3 + $0xa8] sm:$0xff]  ;;  %v15637_v55 = vld [vmem:[%s19160_s3 + $0xa0] sm:$0xff]  ;;  %v15656_v30 = vld [vmem:[%s19222_s21 + $0xb8] sm:$0xff] }
0x468f   :  { %v19826_v17 = vadd.f32 %v15604_v32, %v10183_v33  ;;  %v15655_v32 = vld [vmem:[%s19222_s21 + $0xb0] sm:$0xff]  ;;  %v15654_v33 = vld [vmem:[%s19222_s21 + $0xa8] sm:$0xff] }
0x4691   :  { %17660 = vmatprep.mubr.msk.f32.mxu0 %vm415_vm3, %v19826_v17  ;;  %17682 = vmatprep.mubr.msk.f32.mxu1 %vm415_vm3, %v19826_v17 }
0x4692   :  { %17661 = vmatmul.mubr.msk.f32.vlgmr.msra.gmra.mxu0 %vm415_vm3, %v19828_v31  ;;  %17683 = vmatmul.mubr.msk.f32.vlgmr.msra.gmra.mxu1 %vm415_vm3, %v19828_v31 }
0x4693   :  { %17664 = vmatpush3.msra.mxu0 %v15617_v61  ;;  %17671 = vmatprep.mubr.msk.f32.mxu0 %vm415_vm3, %v19826_v17 }
0x4694   :  { %17665 = vmatprep.subr.mxu0 %v15616_v35 }
0x4695   :  { %17666 = vmatpush3.msra.mxu0 %v15616_v35  ;;  %v15653_v35 = vld [vmem:[%s19222_s21 + $0xa0] sm:$0xff] }
0x4696   :  { %17667 = vmatprep.subr.mxu0 %v15615_v37 }
0x4697   :  { %17668 = vmatpush3.msra.mxu0 %v15615_v37 }
0x4698   :  { %17669 = vmatprep.subr.mxu0 %v15614_v38 }
0x4699   :  { %17670 = vmatpush3.msra.mxu0 %v15614_v38 }
0x469a   :  { %17672 = vmatmul.mubr.msk.f32.vlgmr.msra.gmra.mxu0 %vm415_vm3, %v19828_v31 }
0x4752   :  { %v17662_v39 = vpop.f32.mrf.mxu0  ;;  %v17684_v40 = vpop.f32.mrf.mxu1 }
0x4753   :  { %v10462_v41 = vadd.f32 %v17684_v40, %v15627_v20  ;;  %v10286_v27 = vadd.f32 %v17662_v39, %v15611_v9  ;;  %v15642_v39 = vld [vmem:[%s19231_s1 + $0x5] ss:$0 sm:$0xff] }
0x4754   :  { %v10280_v25 = vpop.f32.mrf.mxu0  ;;  %v10456_v45 = vpop.f32.mrf.mxu1 }
0x4755   :  { %v10281_v46 = vadd.f32 %v15611_v9, %v10280_v25  ;;  %v10457_v47 = vadd.f32 %v15627_v20, %v10456_v45  ;;  %17692 = vmatprep.subr.mxu1 %v10462_v41  ;;  %v15658_v25 = vld [vmem:[%s19266_s16 + $0x5] ss:$0 sm:$0xff] }
0x4756   :  { %17693 = vmatpush3.msra.mxu1 %v10462_v41 }
0x4757   :  { %17689 = vmatprep.mubr.msk.f32.mxu0 %vm738_vm10, %v10281_v46  ;;  %17694 = vmatprep.subr.mxu1 %v10457_v47 }
0x4758   :  { %17695 = vmatpush3.msra.mxu1 %v10457_v47 }
0x4759   :  { %17699 = vmatprep.subr.mxu1 %v15640_v0 }
0x475a   :  { %v17673_v54 = vpop.f32.mrf.mxu0 }
0x475b   :  { %v10374_v1 = vadd.f32 %v17673_v54, %v15619_v53 }
0x475c   :  { %v10368_v44 = vpop.f32.mrf.mxu0 }
0x475d   :  { %v10369_v13 = vadd.f32 %v15619_v53, %v10368_v44  ;;  %17685 = vmatprep.subr.msk.mxu0 %vm738_vm10, %v10374_v1 }
0x475e   :  { %17686 = vmatpush3.xpose.msk.msra.mxu0 %vm738_vm10, %v10374_v1 }
0x475f   :  { %17687 = vmatprep.subr.msk.mxu0 %vm738_vm10, %v10369_v13 }
0x4762   :  { %17688 = vmatpush3.xpose.msk.msra.mxu0 %vm738_vm10, %v10369_v13 }
0x4763   :  { %17710 = vmatprep.subr.mxu0 %v15648_v11 }
0x4765   :  { %17690 = vmatmul.mubr.msk.f32.vlgmr.msra.gmra.mxu0 %vm738_vm10, %v10286_v27 }
0x4766   :  { %17711 = vmatpush3.msra.mxu0 %v15648_v11  ;;  %17718 = vmatprep.mubr.msk.f32.mxu0 %vm415_vm3, %v19826_v17 }
0x4767   :  { %17712 = vmatprep.subr.mxu0 %v15647_v26 }
0x4768   :  { %17713 = vmatpush3.msra.mxu0 %v15647_v26 }
0x4769   :  { %17714 = vmatprep.subr.mxu0 %v15646_v2 }
0x476a   :  { %17715 = vmatpush3.msra.mxu0 %v15646_v2 }
0x476b   :  { %17716 = vmatprep.subr.mxu0 %v15645_v14 }
0x476c   :  { %17717 = vmatpush3.msra.mxu0 %v15645_v14 }
0x476d   :  { %17719 = vmatmul.mubr.msk.f32.vlgmr.msra.gmra.mxu0 %vm415_vm3, %v19828_v31 }
0x4825   :  { %v17691_v58 = vpop.f32.mrf.mxu0 }
0x4826   :  { %v10549_v59 = vadd.f32 %v19863_v34, %v17691_v58 }
0x4827   :  { %v10543_v42 = vpop.f32.mrf.mxu0 }
0x4828   :  { %v10544_v6 = vadd.f32 %v19867_v43, %v10543_v42  ;;  %v10555_v7 = vsel %vm826_vm11, %v10549_v59, -inf }
0x4829   :  { %10556 = vmax.xlane.f32.xlu1 %v10555_v7 }
0x482a   :  { %v10552_v10 = vsel %vm826_vm11, %v10544_v6, -inf }
0x482b   :  { %10553 = vmax.xlane.f32.xlu0 %v10552_v10 }
0x482d   :  { %v17720_v15 = vpop.f32.mrf.mxu0 }
0x482e   :  { %v10830_v62 = vadd.f32 %v17720_v15, %v15650_v28  ;;  %v15636_v15 = vld [vmem:[%s19326_s15 + $0x20] sm:$0xff] }
0x482f   :  { %v10824_v61 = vpop.f32.mrf.mxu0 }
0x4830   :  { %v10825_v60 = vadd.f32 %v15650_v28, %v10824_v61  ;;  %17732 = vmatprep.subr.msk.mxu0 %vm738_vm10, %v10830_v62 }
0x4831   :  { %17733 = vmatpush3.xpose.msk.msra.mxu0 %vm738_vm10, %v10830_v62  ;;  %v15667_v62 = vld [vmem:[%s19326_s15 + $0x28] sm:$0xff] }
0x4832   :  { %17734 = vmatprep.subr.msk.mxu0 %vm738_vm10, %v10825_v60 }
0x4835   :  { %17735 = vmatpush3.xpose.msk.msra.mxu0 %vm738_vm10, %v10825_v60 }
0x4836   :  { %17746 = vmatprep.subr.mxu0 %v15667_v62 }
0x48b2   :  { %v10557_v16 = vpop.xlane.xlu1 %10556 }
0x48b3   :  { %v10559_v63 = vsub.f32 %v10549_v59, %v10557_v16 }
0x48b4   :  { %v10554_v3 = vpop.xlane.xlu0 %10553 }
0x48b5   :  { %v10562_v23 = vmul.f32 1.442695, %v10559_v63  ;;  %v10558_v52 = vsub.f32 %v10544_v6, %v10554_v3 }
0x48b7   :  { %18362 = vpow2.f32 %v10562_v23  ;;  %v10560_v51 = vmul.f32 1.442695, %v10558_v52  ;;  %v15683_v52 = vld [vmem:[%s19192_s17 + $0xd8] sm:$0xff] }
0x48b9   :  { %18364 = vpow2.f32 %v10560_v51  ;;  %v15682_v51 = vld [vmem:[%s19192_s17 + $0xd0] sm:$0xff] }
0x48c4   :  { %v18363_v4 = vpop.eup %18362 }
0x48c5   :  { %v10567_v36 = vsel %vm826_vm11, %v18363_v4, 0.0 }
0x48c6   :  { %v18365_v18 = vpop.eup %18364  ;;  %10568 = vadd.xlane.f32.xlu1 %v10567_v36  ;;  %v15680_v36 = vld [vmem:[%s19192_s17 + $0xc0] sm:$0xff] }
0x48c7   :  { %v10564_v50 = vsel %vm826_vm11, %v18365_v18, 0.0 }
0x48c8   :  { %10565 = vadd.xlane.f32.xlu0 %v10564_v50 }
0x494f   :  { %v10569_v19 = vpop.xlane.xlu1 %10568 }
0x4950   :  { %18366 = vrcp.f32 %v10569_v19  ;;  %v15674_v19 = vld [vmem:[%s19160_s3 + $0xd0] sm:$0xff] }
0x4951   :  { %v10566_v22 = vpop.xlane.xlu0 %10565 }
0x4952   :  { %18368 = vrcp.f32 %v10566_v22  ;;  %v15673_v22 = vld [vmem:[%s19160_s3 + $0xc8] sm:$0xff] }
0x495d   :  { %v18367_v5 = vpop.eup %18366 }
0x495e   :  { %v10573_v57 = vmul.f32 %v18367_v5, %v18363_v4  ;;  %v15681_v4 = vld [vmem:[%s19192_s17 + $0xc8] sm:$0xff] }
0x495f   :  { %v18369_v21 = vpop.eup %18368 }
0x4960   :  { %v10572_v12 = vmul.f32 %v18369_v21, %v18365_v18  ;;  %v15675_v18 = vld [vmem:[%s19160_s3 + $0xd8] sm:$0xff]  ;;  %v15672_v21 = vld [vmem:[%s19160_s3 + $0xc0] sm:$0xff] }
0x4962   :  { %17696 = vmatprep.mubr.msk.f32.mxu1 %vm826_vm11, %v10572_v12  ;;  %v15691_v12 = vld [vmem:[%s19222_s21 + $0xd8] sm:$0xff] }
0x4963   :  { %17697 = vmatmul.mubr.msk.f32.vlgmr.msra.gmra.mxu1 %vm826_vm11, %v10573_v57 }
0x4964   :  { %17700 = vmatpush3.msra.mxu1 %v15640_v0  ;;  %17707 = vmatprep.mubr.msk.f32.mxu1 %vm415_vm3, %v19826_v17 }
0x4965   :  { %17701 = vmatprep.subr.mxu1 %v15639_v8 }
0x4966   :  { %17702 = vmatpush3.msra.mxu1 %v15639_v8  ;;  %v15685_v8 = vld [vmem:[%s19236_s28 + $0x6] ss:$0 sm:$0xff] }
0x4967   :  { %17703 = vmatprep.subr.mxu1 %v15638_v49 }
0x4968   :  { %17704 = vmatpush3.msra.mxu1 %v15638_v49  ;;  %v15690_v49 = vld [vmem:[%s19222_s21 + $0xd0] sm:$0xff] }
0x4969   :  { %17705 = vmatprep.subr.mxu1 %v15637_v55 }
0x496a   :  { %17706 = vmatpush3.msra.mxu1 %v15637_v55 }
0x496b   :  { %17708 = vmatmul.mubr.msk.f32.vlgmr.msra.gmra.mxu1 %vm415_vm3, %v19828_v31  ;;  %17721 = vmatprep.subr.mxu1 %v15656_v30 }
0x496c   :  { %17722 = vmatpush3.msra.mxu1 %v15656_v30  ;;  %17729 = vmatprep.mubr.msk.f32.mxu1 %vm415_vm3, %v19826_v17 }
0x496d   :  { %17723 = vmatprep.subr.mxu1 %v15655_v32 }
0x496e   :  { %17724 = vmatpush3.msra.mxu1 %v15655_v32  ;;  %v15689_v32 = vld [vmem:[%s19222_s21 + $0xc8] sm:$0xff] }
0x496f   :  { %17725 = vmatprep.subr.mxu1 %v15654_v33 }
0x4970   :  { %17726 = vmatpush3.msra.mxu1 %v15654_v33 }
0x4971   :  { %17727 = vmatprep.subr.mxu1 %v15653_v35 }
0x4972   :  { %17728 = vmatpush3.msra.mxu1 %v15653_v35 }
0x4973   :  { %17730 = vmatmul.mubr.msk.f32.vlgmr.msra.gmra.mxu1 %vm415_vm3, %v19828_v31 }
0x4a23   :  { %v17698_v37 = vpop.f32.mrf.mxu1 }
0x4a25   :  { %v10646_v38 = vpop.f32.mrf.mxu1 }
0x4a2b   :  { %v17709_v20 = vpop.f32.mrf.mxu1 }
0x4a2c   :  { %v10742_v9 = vadd.f32 %v17709_v20, %v15642_v39 }
0x4a2d   :  { %v10736_v40 = vpop.f32.mrf.mxu1 }
0x4a2e   :  { %v10737_v41 = vadd.f32 %v15642_v39, %v10736_v40  ;;  %v15677_v40 = vld [vmem:[%s19231_s1 + $0x6] ss:$0 sm:$0xff] }
0x4a30   :  { %17736 = vmatprep.mubr.msk.f32.mxu0 %vm738_vm10, %v10737_v41 }
0x4a31   :  { %17737 = vmatmul.mubr.msk.f32.vlgmr.msra.gmra.mxu0 %vm738_vm10, %v10742_v9 }
0x4a32   :  { %17747 = vmatpush3.msra.mxu0 %v15667_v62  ;;  %v15708_v62 = vld [vmem:[%s19160_s3 + $0xf8] sm:$0xff] }
0x4a33   :  { %v17731_v45 = vpop.f32.mrf.mxu1  ;;  %17756 = vmatprep.subr.mxu0 %v15675_v18 }
0x4a34   :  { %v10918_v46 = vadd.f32 %v17731_v45, %v15658_v25  ;;  %v15693_v45 = vld [vmem:[%s19266_s16 + $0x6] ss:$0 sm:$0xff] }
0x4a35   :  { %v10912_v47 = vpop.f32.mrf.mxu1 }
0x4a36   :  { %v10913_v53 = vadd.f32 %v15658_v25, %v10912_v47  ;;  %17739 = vmatprep.subr.mxu1 %v10918_v46 }
0x4a37   :  { %17740 = vmatpush3.msra.mxu1 %v10918_v46 }
0x4a38   :  { %17741 = vmatprep.subr.mxu1 %v10913_v53 }
0x4a39   :  { %17742 = vmatpush3.msra.mxu1 %v10913_v53 }
0x4a3a   :  { %17751 = vmatprep.subr.mxu1 %v15636_v15 }
0x4af1   :  { %v17738_v54 = vpop.f32.mrf.mxu0 }
0x4af2   :  { %v11005_v1 = vadd.f32 %v19863_v34, %v17738_v54 }
0x4af3   :  { %v10999_v44 = vpop.f32.mrf.mxu0 }
0x4af4   :  { %v11000_v13 = vadd.f32 %v19867_v43, %v10999_v44  ;;  %v11011_v11 = vsel %vm826_vm11, %v11005_v1, -inf }
0x4af5   :  { %11012 = vmax.xlane.f32.xlu1 %v11011_v11 }
0x4af6   :  { %v11008_v27 = vsel %vm826_vm11, %v11000_v13, -inf }
0x4af7   :  { %11009 = vmax.xlane.f32.xlu0 %v11008_v27 }
0x4b7e   :  { %v11013_v26 = vpop.xlane.xlu1 %11012 }
0x4b7f   :  { %v11015_v2 = vsub.f32 %v11005_v1, %v11013_v26 }
0x4b80   :  { %v11010_v14 = vpop.xlane.xlu0 %11009 }
0x4b81   :  { %v11018_v58 = vmul.f32 1.442695, %v11015_v2  ;;  %v11014_v59 = vsub.f32 %v11000_v13, %v11010_v14 }
0x4b83   :  { %18370 = vpow2.f32 %v11018_v58  ;;  %v11016_v42 = vmul.f32 1.442695, %v11014_v59 }
0x4b85   :  { %18372 = vpow2.f32 %v11016_v42 }
0x4b90   :  { %v18371_v6 = vpop.eup %18370 }
0x4b91   :  { %v11023_v7 = vsel %vm826_vm11, %v18371_v6, 0.0 }
0x4b92   :  { %v18373_v10 = vpop.eup %18372  ;;  %11024 = vadd.xlane.f32.xlu1 %v11023_v7 }
0x4b93   :  { %v11020_v28 = vsel %vm826_vm11, %v18373_v10, 0.0 }
0x4b94   :  { %11021 = vadd.xlane.f32.xlu0 %v11020_v28 }
0x4c1b   :  { %v11025_v61 = vpop.xlane.xlu1 %11024 }
0x4c1c   :  { %18374 = vrcp.f32 %v11025_v61  ;;  %v15702_v61 = vld [vmem:[%s19326_s15 + $0x30] sm:$0xff] }
0x4c1d   :  { %v11022_v60 = vpop.xlane.xlu0 %11021 }
0x4c1e   :  { %18376 = vrcp.f32 %v11022_v60 }
0x4c29   :  { %v18375_v16 = vpop.eup %18374 }
0x4c2a   :  { %v11029_v23 = vmul.f32 %v18375_v16, %v18371_v6 }
0x4c2b   :  { %v18377_v63 = vpop.eup %18376 }
0x4c2c   :  { %v11028_v3 = vmul.f32 %v18377_v63, %v18373_v10 }
0x4c2e   :  { %17743 = vmatprep.mubr.msk.f32.mxu1 %vm826_vm11, %v11028_v3 }
0x4c2f   :  { %17744 = vmatmul.mubr.msk.f32.vlgmr.msra.gmra.mxu1 %vm826_vm11, %v11029_v23 }
0x4c30   :  { %17753 = vmatprep.mubr.msk.f32.mxu1 %vm738_vm10, %v10646_v38  ;;  %17752 = vmatpush3.msra.mxu1 %v15636_v15 }
0x4c31   :  { %17767 = vmatprep.subr.mxu1 %v15683_v52 }
0x4c33   :  { %17754 = vmatmul.mubr.msk.f32.vlgmr.msra.gmra.mxu1 %vm738_vm10, %v17698_v37  ;;  %v15688_v37 = vld [vmem:[%s19222_s21 + $0xc0] sm:$0xff] }
0x4c34   :  { %17768 = vmatpush3.msra.mxu1 %v15683_v52  ;;  %17775 = vmatprep.mubr.msk.f32.mxu1 %vm415_vm3, %v19826_v17 }
0x4c35   :  { %17769 = vmatprep.subr.mxu1 %v15682_v51 }
0x4c36   :  { %17770 = vmatpush3.msra.mxu1 %v15682_v51  ;;  %v15707_v51 = vld [vmem:[%s19160_s3 + $0xf0] sm:$0xff] }
0x4c37   :  { %17771 = vmatprep.subr.mxu1 %v15681_v4 }
0x4c38   :  { %17772 = vmatpush3.msra.mxu1 %v15681_v4  ;;  %v15706_v4 = vld [vmem:[%s19160_s3 + $0xe8] sm:$0xff] }
0x4c39   :  { %17773 = vmatprep.subr.mxu1 %v15680_v36 }
0x4c3a   :  { %17774 = vmatpush3.msra.mxu1 %v15680_v36  ;;  %v15705_v36 = vld [vmem:[%s19160_s3 + $0xe0] sm:$0xff] }
0x4c3b   :  { %17776 = vmatmul.mubr.msk.f32.vlgmr.msra.gmra.mxu1 %vm415_vm3, %v19828_v31 }
0x4cef   :  { %v17745_v50 = vpop.f32.mrf.mxu1 }
0x4cf1   :  { %v11102_v0 = vpop.f32.mrf.mxu1 }
0x4cf2   :  { %17748 = vmatprep.mubr.msk.f32.mxu0 %vm738_vm10, %v11102_v0  ;;  %v15722_v0 = vld [vmem:[%s19222_s21 + $0xe8] sm:$0xff] }
0x4cf3   :  { %17749 = vmatmul.mubr.msk.f32.vlgmr.msra.gmra.mxu0 %vm738_vm10, %v17745_v50  ;;  %v19928_v5 = vpop.f32.mrf.mxu1  ;;  %v15723_v50 = vld [vmem:[%s19222_s21 + $0xf0] sm:$0xff] }
0x4cf4   :  { %17757 = vmatpush3.msra.mxu0 %v15675_v18  ;;  %17764 = vmatprep.mubr.msk.f32.mxu0 %vm415_vm3, %v19826_v17  ;;  %v15724_v18 = vld [vmem:[%s19222_s21 + $0xf8] sm:$0xff] }
0x4cf5   :  { %17758 = vmatprep.subr.mxu0 %v15674_v19  ;;  %v19932_v57 = vpop.f32.mrf.mxu1 }
0x4cf6   :  { %17759 = vmatpush3.msra.mxu0 %v15674_v19  ;;  %v15721_v19 = vld [vmem:[%s19222_s21 + $0xe0] sm:$0xff] }
0x4cf7   :  { %17760 = vmatprep.subr.mxu0 %v15673_v22 }
0x4cf8   :  { %17761 = vmatpush3.msra.mxu0 %v15673_v22  ;;  %v15716_v22 = vld [vmem:[%s19192_s17 + $0xf8] sm:$0xff] }
0x4cf9   :  { %17762 = vmatprep.subr.mxu0 %v15672_v21 }
0x4cfa   :  { %17763 = vmatpush3.msra.mxu0 %v15672_v21 }
0x4cfb   :  { %17765 = vmatmul.mubr.msk.f32.vlgmr.msra.gmra.mxu0 %vm415_vm3, %v19828_v31  ;;  %v17777_v55 = vpop.f32.mrf.mxu1  ;;  %17778 = vmatprep.subr.mxu0 %v15691_v12 }
0x4cfc   :  { %v11448_v30 = vadd.f32 %v17777_v55, %v15685_v8  ;;  %17779 = vmatpush3.msra.mxu0 %v15691_v12  ;;  %17786 = vmatprep.mubr.msk.f32.mxu0 %vm415_vm3, %v19826_v17  ;;  %v15710_v55 = vld [vmem:[%s19231_s1 + $0x7] ss:$0 sm:$0xff] }
0x4cfd   :  { %v11442_v33 = vpop.f32.mrf.mxu1  ;;  %17780 = vmatprep.subr.mxu0 %v15690_v49 }
0x4cfe   :  { %v11443_v35 = vadd.f32 %v15685_v8, %v11442_v33  ;;  %17781 = vmatpush3.msra.mxu0 %v15690_v49  ;;  %17789 = vmatprep.subr.msk.mxu1 %vm738_vm10, %v11448_v30  ;;  %v15715_v8 = vld [vmem:[%s19192_s17 + $0xf0] sm:$0xff]  ;;  %v15714_v49 = vld [vmem:[%s19192_s17 + $0xe8] sm:$0xff] }
0x4cff   :  { %17782 = vmatprep.subr.mxu0 %v15689_v32  ;;  %17790 = vmatpush3.xpose.msk.msra.mxu1 %vm738_vm10, %v11448_v30  ;;  %v15713_v30 = vld [vmem:[%s19192_s17 + $0xe0] sm:$0xff]  ;;  %s18507_s17 = smov 45  }
0x4d00   :  { %17783 = vmatpush3.msra.mxu0 %v15689_v32  ;;  %17791 = vmatprep.subr.msk.mxu1 %vm738_vm10, %v11443_v35 }
0x4d01   :  { %17784 = vmatprep.subr.mxu0 %v15688_v37 }
0x4d02   :  { %17785 = vmatpush3.msra.mxu0 %v15688_v37 }
0x4d03   :  { %17787 = vmatmul.mubr.msk.f32.vlgmr.msra.gmra.mxu0 %vm415_vm3, %v19828_v31  ;;  %17792 = vmatpush3.xpose.msk.msra.mxu1 %vm738_vm10, %v11443_v35 }
0x4d04   :  { %17803 = vmatprep.subr.mxu1 %v15702_v61 }
0x4db3   :  { %v19948_v38 = vpop.f32.mrf.mxu0 }
0x4db5   :  { %v19950_v20 = vpop.f32.mrf.mxu0 }
0x4dbb   :  { %v17766_v39 = vpop.f32.mrf.mxu0 }
0x4dbc   :  { %v11360_v25 = vadd.f32 %v17766_v39, %v15677_v40 }
0x4dbd   :  { %v11354_v41 = vpop.f32.mrf.mxu0 }
0x4dbe   :  { %v11355_v9 = vadd.f32 %v15677_v40, %v11354_v41 }
0x4dc0   :  { %17793 = vmatprep.mubr.msk.f32.mxu1 %vm738_vm10, %v11355_v9 }
0x4dc1   :  { %17794 = vmatmul.mubr.msk.f32.vlgmr.msra.gmra.mxu1 %vm738_vm10, %v11360_v25  ;;  %v11272_v25 = vadd.f32 %v19928_v5, %v19948_v38 }
0x4dc2   :  { %17804 = vmatpush3.msra.mxu1 %v15702_v61 }
0x4dc3   :  { %v17788_v46 = vpop.f32.mrf.mxu0  ;;  %17819 = vmatprep.subr.mxu1 %v15716_v22 }
0x4dc4   :  { %v11536_v47 = vadd.f32 %v17788_v46, %v15693_v45  ;;  %v11267_v46 = vadd.f32 %v19932_v57, %v19950_v20 }
0x4dc5   :  { %v11530_v53 = vpop.f32.mrf.mxu0 }
0x4dc6   :  { %v11531_v54 = vadd.f32 %v15693_v45, %v11530_v53  ;;  %17796 = vmatprep.subr.mxu0 %v11536_v47 }
0x4dc7   :  { %17797 = vmatpush3.msra.mxu0 %v11536_v47 }
0x4dc8   :  { %17798 = vmatprep.subr.mxu0 %v11531_v54 }
0x4dc9   :  { %17799 = vmatpush3.msra.mxu0 %v11531_v54  ;;  %v15718_v54 = vld [vmem:[%s19236_s28 + $0x7] ss:$0 sm:$0xff]  ;;  %s15049_s28 = sld [smem:[%s20294_s0 + %s18507_s17]]  }
0x4dca   :  { %17808 = vmatprep.subr.mxu0 %v15708_v62 }
0x4e81   :  { %v17795_v1 = vpop.f32.mrf.mxu1 }
0x4e82   :  { %v11623_v44 = vadd.f32 %v19863_v34, %v17795_v1 }
0x4e83   :  { %v11617_v13 = vpop.f32.mrf.mxu1 }
0x4e84   :  { %v11618_v11 = vadd.f32 %v19867_v43, %v11617_v13  ;;  %v11629_v27 = vsel %vm826_vm11, %v11623_v44, -inf }
0x4e85   :  { %11630 = vmax.xlane.f32.xlu1 %v11629_v27 }
0x4e86   :  { %v11626_v26 = vsel %vm826_vm11, %v11618_v11, -inf }
0x4e87   :  { %11627 = vmax.xlane.f32.xlu0 %v11626_v26 }
0x4f0e   :  { %v11631_v2 = vpop.xlane.xlu1 %11630 }
0x4f0f   :  { %v11633_v14 = vsub.f32 %v11623_v44, %v11631_v2 }
0x4f10   :  { %v11628_v58 = vpop.xlane.xlu0 %11627 }
0x4f11   :  { %v11636_v59 = vmul.f32 1.442695, %v11633_v14  ;;  %v11632_v42 = vsub.f32 %v11618_v11, %v11628_v58 }
0x4f13   :  { %18378 = vpow2.f32 %v11636_v59  ;;  %v11634_v6 = vmul.f32 1.442695, %v11632_v42 }
0x4f15   :  { %18380 = vpow2.f32 %v11634_v6 }
0x4f20   :  { %v18379_v7 = vpop.eup %18378 }
0x4f21   :  { %v11641_v10 = vsel %vm826_vm11, %v18379_v7, 0.0 }
0x4f22   :  { %v18381_v28 = vpop.eup %18380  ;;  %11642 = vadd.xlane.f32.xlu1 %v11641_v10 }
0x4f23   :  { %v11638_v15 = vsel %vm826_vm11, %v18381_v28, 0.0 }
0x4f24   :  { %11639 = vadd.xlane.f32.xlu0 %v11638_v15 }
0x4fab   :  { %v11643_v60 = vpop.xlane.xlu1 %11642 }
0x4fac   :  { %18382 = vrcp.f32 %v11643_v60 }
0x4fad   :  { %v11640_v16 = vpop.xlane.xlu0 %11639 }
0x4fae   :  { %18384 = vrcp.f32 %v11640_v16 }
0x4fb9   :  { %v18383_v63 = vpop.eup %18382 }
0x4fba   :  { %v11647_v52 = vmul.f32 %v18383_v63, %v18379_v7 }
0x4fbb   :  { %v18385_v3 = vpop.eup %18384 }
0x4fbc   :  { %v11646_v23 = vmul.f32 %v18385_v3, %v18381_v28  ;;  %v15735_v28 = vld [vmem:[%s19326_s15 + $0x38] sm:$0xff] }
0x4fbd   :  { %v15755_v3 = vld [vmem:[%s19478_s22 + $0x98] sm:$0xff] }
0x4fbe   :  { %17800 = vmatprep.mubr.msk.f32.mxu0 %vm826_vm11, %v11646_v23 }
0x4fbf   :  { %17801 = vmatmul.mubr.msk.f32.vlgmr.msra.gmra.mxu0 %vm826_vm11, %v11647_v52 }
0x4fc0   :  { %17809 = vmatpush3.msra.mxu0 %v15708_v62  ;;  %17816 = vmatprep.mubr.msk.f32.mxu0 %vm415_vm3, %v19826_v17 }
0x4fc1   :  { %17810 = vmatprep.subr.mxu0 %v15707_v51 }
0x4fc2   :  { %17811 = vmatpush3.msra.mxu0 %v15707_v51  ;;  %v15754_v51 = vld [vmem:[%s19478_s22 + $0x90] sm:$0xff] }
0x4fc3   :  { %17812 = vmatprep.subr.mxu0 %v15706_v4 }
0x4fc4   :  { %17813 = vmatpush3.msra.mxu0 %v15706_v4  ;;  %v15753_v4 = vld [vmem:[%s19478_s22 + $0x88] sm:$0xff] }
0x4fc5   :  { %17814 = vmatprep.subr.mxu0 %v15705_v36 }
0x4fc6   :  { %17815 = vmatpush3.msra.mxu0 %v15705_v36  ;;  %v15752_v36 = vld [vmem:[%s19478_s22 + $0x80] sm:$0xff] }
0x4fc7   :  { %17817 = vmatmul.mubr.msk.f32.vlgmr.msra.gmra.mxu0 %vm415_vm3, %v19828_v31  ;;  %17830 = vmatprep.subr.mxu0 %v15724_v18 }
0x4fc8   :  { %17831 = vmatpush3.msra.mxu0 %v15724_v18  ;;  %17838 = vmatprep.mubr.msk.f32.mxu0 %vm415_vm3, %v19826_v17  ;;  %v15738_v18 = vld [vmem:[%s19450_s19 + $0x1] ss:$0 sm:$0xff] }
0x4fc9   :  { %17832 = vmatprep.subr.mxu0 %v15723_v50 }
0x4fca   :  { %17833 = vmatpush3.msra.mxu0 %v15723_v50 }
0x4fcb   :  { %17834 = vmatprep.subr.mxu0 %v15722_v0 }
0x4fcc   :  { %17835 = vmatpush3.msra.mxu0 %v15722_v0 }
0x4fcd   :  { %17836 = vmatprep.subr.mxu0 %v15721_v19 }
0x4fce   :  { %17837 = vmatpush3.msra.mxu0 %v15721_v19 }
0x4fcf   :  { %17839 = vmatmul.mubr.msk.f32.vlgmr.msra.gmra.mxu0 %vm415_vm3, %v19828_v31 }
0x507f   :  { %v17802_v21 = vpop.f32.mrf.mxu0 }
0x5081   :  { %v11720_v12 = vpop.f32.mrf.mxu0 }
0x5082   :  { %17805 = vmatprep.mubr.msk.f32.mxu1 %vm738_vm10, %v11720_v12 }
0x5083   :  { %17806 = vmatmul.mubr.msk.f32.vlgmr.msra.gmra.mxu1 %vm738_vm10, %v17802_v21 }
0x5084   :  { %17820 = vmatpush3.msra.mxu1 %v15716_v22  ;;  %17827 = vmatprep.mubr.msk.f32.mxu1 %vm415_vm3, %v19826_v17  ;;  %v15726_v17 = vld [vmem:[%s19266_s16 + $0x7] ss:$0 sm:$0xff]  ;;  %s18508_s16 = smov 46  }
0x5085   :  { %17821 = vmatprep.subr.mxu1 %v15715_v8  ;;  %s15050_s19 = sld [smem:[%s20294_s0 + %s18508_s16]]  }
0x5086   :  { %17822 = vmatpush3.msra.mxu1 %v15715_v8 }
0x5087   :  { %v17818_v32 = vpop.f32.mrf.mxu0  ;;  %17823 = vmatprep.subr.mxu1 %v15714_v49 }
0x5088   :  { %v11899_v33 = vadd.f32 %v17818_v32, %v15710_v55  ;;  %17824 = vmatpush3.msra.mxu1 %v15714_v49  ;;  %v15757_v49 = vld [vmem:[%s19549_s13 + $0x4] ss:$0 sm:$0xff] }
0x5089   :  { %v11893_v35 = vpop.f32.mrf.mxu0  ;;  %17825 = vmatprep.subr.mxu1 %v15713_v30 }
0x508a   :  { %v11894_v37 = vadd.f32 %v15710_v55, %v11893_v35  ;;  %17826 = vmatpush3.msra.mxu1 %v15713_v30 }
0x508b   :  { %17828 = vmatmul.mubr.msk.f32.vlgmr.msra.gmra.mxu1 %vm415_vm3, %v19828_v31 }
0x508c   :  { %17845 = vmatprep.mubr.msk.f32.mxu1 %vm738_vm10, %v11894_v37 }
0x508f   :  { %v17840_v39 = vpop.f32.mrf.mxu0 }
0x5090   :  { %v12075_v40 = vadd.f32 %v17840_v39, %v15726_v17 }
0x5091   :  { %v12069_v41 = vpop.f32.mrf.mxu0 }
0x5092   :  { %v12070_v9 = vadd.f32 %v15726_v17, %v12069_v41  ;;  %17848 = vmatprep.subr.mxu0 %v12075_v40 }
0x5093   :  { %17849 = vmatpush3.msra.mxu0 %v12075_v40 }
0x5094   :  { %17850 = vmatprep.subr.mxu0 %v12070_v9 }
0x5095   :  { %17851 = vmatpush3.msra.mxu0 %v12070_v9 }
0x5143   :  { %v17807_v45 = vpop.f32.mrf.mxu1 }
0x5144   :  { %v19998_v31 = vadd.f32 %v17807_v45, %v11272_v25 }
0x5145   :  { %v11803_v47 = vpop.f32.mrf.mxu1 }
0x5146   :  { %v20000_v53 = vadd.f32 %v11803_v47, %v11267_v46  ;;  %v15747_v47 = vld [vmem:[%s19507_s6 + $0x98] sm:$0xff] }
0x5147   :  { %17860 = vmatprep.subr.mxu0 %v15747_v47 }
0x514b   :  { %v17829_v1 = vpop.f32.mrf.mxu1 }
0x514c   :  { %v11987_v44 = vadd.f32 %v17829_v1, %v15718_v54  ;;  %v15744_v1 = vld [vmem:[%s19507_s6 + $0x80] sm:$0xff] }
0x514d   :  { %v11981_v13 = vpop.f32.mrf.mxu1 }
0x514e   :  { %v11982_v11 = vadd.f32 %v15718_v54, %v11981_v13  ;;  %17841 = vmatprep.subr.msk.mxu1 %vm738_vm10, %v11987_v44  ;;  %v15745_v54 = vld [vmem:[%s19507_s6 + $0x88] sm:$0xff] }
0x514f   :  { %17842 = vmatpush3.xpose.msk.msra.mxu1 %vm738_vm10, %v11987_v44  ;;  %v15763_v44 = vld [vmem:[%s19524_s26 + $0x98] sm:$0xff] }
0x5150   :  { %17843 = vmatprep.subr.msk.mxu1 %vm738_vm10, %v11982_v11 }
0x5153   :  { %17844 = vmatpush3.xpose.msk.msra.mxu1 %vm738_vm10, %v11982_v11 }
0x5154   :  { %17855 = vmatprep.subr.mxu1 %v15735_v28 }
0x5156   :  { %17846 = vmatmul.mubr.msk.f32.vlgmr.msra.gmra.mxu1 %vm738_vm10, %v11899_v33 }
0x5157   :  { %17856 = vmatpush3.msra.mxu1 %v15735_v28 }
0x5158   :  { %17871 = vmatprep.subr.mxu1 %v15755_v3 }
0x5216   :  { %v17847_v5 = vpop.f32.mrf.mxu1 }
0x5217   :  { %v12162_v57 = vadd.f32 %v19863_v34, %v17847_v5 }
0x5218   :  { %v12156_v38 = vpop.f32.mrf.mxu1 }
0x5219   :  { %v12157_v20 = vadd.f32 %v19867_v43, %v12156_v38  ;;  %v12168_v27 = vsel %vm826_vm11, %v12162_v57, -inf }
0x521a   :  { %12169 = vmax.xlane.f32.xlu1 %v12168_v27 }
0x521b   :  { %v12165_v26 = vsel %vm826_vm11, %v12157_v20, -inf }
0x521c   :  { %12166 = vmax.xlane.f32.xlu0 %v12165_v26 }
0x52a3   :  { %v12170_v2 = vpop.xlane.xlu1 %12169 }
0x52a4   :  { %v12172_v14 = vsub.f32 %v12162_v57, %v12170_v2 }
0x52a5   :  { %v12167_v58 = vpop.xlane.xlu0 %12166 }
0x52a6   :  { %v12175_v59 = vmul.f32 1.442695, %v12172_v14  ;;  %v12171_v42 = vsub.f32 %v12157_v20, %v12167_v58 }
0x52a8   :  { %18386 = vpow2.f32 %v12175_v59  ;;  %v12173_v6 = vmul.f32 1.442695, %v12171_v42 }
0x52aa   :  { %18388 = vpow2.f32 %v12173_v6 }
0x52b5   :  { %v18387_v7 = vpop.eup %18386 }
0x52b6   :  { %v12180_v34 = vsel %vm826_vm11, %v18387_v7, 0.0 }
0x52b7   :  { %v18389_v10 = vpop.eup %18388  ;;  %12181 = vadd.xlane.f32.xlu1 %v12180_v34 }
0x52b8   :  { %v12177_v43 = vsel %vm826_vm11, %v18389_v10, 0.0 }
0x52b9   :  { %12178 = vadd.xlane.f32.xlu0 %v12177_v43 }
0x5340   :  { %v12182_v15 = vpop.xlane.xlu1 %12181 }
0x5341   :  { %18390 = vrcp.f32 %v12182_v15 }
0x5342   :  { %v12179_v62 = vpop.xlane.xlu0 %12178 }
0x5343   :  { %18392 = vrcp.f32 %v12179_v62 }
0x534e   :  { %v18391_v61 = vpop.eup %18390 }
0x534f   :  { %v12186_v63 = vmul.f32 %v18391_v61, %v18387_v7 }
0x5350   :  { %v18393_v60 = vpop.eup %18392 }
0x5351   :  { %v12185_v16 = vmul.f32 %v18393_v60, %v18389_v10  ;;  %v15741_v10 = vld [vmem:[%s19176_s5 + $0x4] ss:$0 sm:$0xff] }
0x5352   :  { %v15742_v60 = vld [vmem:[%s19183_s12 + $0x4] ss:$0 sm:$0xff] }
0x5353   :  { %17852 = vmatprep.mubr.msk.f32.mxu0 %vm826_vm11, %v12185_v16 }
0x5354   :  { %17853 = vmatmul.mubr.msk.f32.vlgmr.msra.gmra.mxu0 %vm826_vm11, %v12186_v63 }
0x5355   :  { %17861 = vmatpush3.msra.mxu0 %v15747_v47  ;;  %v15780_v47 = vld [vmem:[%s19560_s24 + $0x5] ss:$0 sm:$0xff] }
0x5414   :  { %v17854_v23 = vpop.f32.mrf.mxu0 }
0x5416   :  { %v12259_v52 = vpop.f32.mrf.mxu0 }
0x5417   :  { %17857 = vmatprep.mubr.msk.f32.mxu1 %vm738_vm10, %v12259_v52  ;;  %v15761_v52 = vld [vmem:[%s19524_s26 + $0x88] sm:$0xff] }
0x5418   :  { %17858 = vmatmul.mubr.msk.f32.vlgmr.msra.gmra.mxu1 %vm738_vm10, %v17854_v23  ;;  %v15762_v23 = vld [vmem:[%s19524_s26 + $0x90] sm:$0xff] }
0x5419   :  { %17872 = vmatpush3.msra.mxu1 %v15755_v3  ;;  %17879 = vmatprep.mubr.msk.f32.mxu1 %vm415_vm3, %v19509_v24 }
0x541a   :  { %17873 = vmatprep.subr.mxu1 %v15754_v51 }
0x541b   :  { %17874 = vmatpush3.msra.mxu1 %v15754_v51  ;;  %v15760_v51 = vld [vmem:[%s19524_s26 + $0x80] sm:$0xff] }
0x541c   :  { %17875 = vmatprep.subr.mxu1 %v15753_v4 }
0x541d   :  { %17876 = vmatpush3.msra.mxu1 %v15753_v4  ;;  %v15778_v4 = vld [vmem:[%s19507_s6 + $0xb8] sm:$0xff] }
0x541e   :  { %17877 = vmatprep.subr.mxu1 %v15752_v36 }
0x541f   :  { %17878 = vmatpush3.msra.mxu1 %v15752_v36 }
0x5420   :  { %17880 = vmatmul.mubr.msk.f32.vlgmr.msra.gmra.mxu1 %vm415_vm3, %v19511_v29 }
0x54d8   :  { %v17859_v50 = vpop.f32.mrf.mxu1 }
0x54d9   :  { %v12352_v0 = vadd.f32 %v17859_v50, %v19998_v31 }
0x54da   :  { %v12342_v19 = vpop.f32.mrf.mxu1 }
0x54db   :  { %v12360_v22 = vadd.f32 %v15738_v18, %v12352_v0  ;;  %v12351_v21 = vadd.f32 %v12342_v19, %v20000_v53  ;;  %v15746_v53 = vld [vmem:[%s19507_s6 + $0x90] sm:$0xff] }
0x54dc   :  { %17862 = vmatprep.subr.mxu0 %v15746_v53 }
0x54dd   :  { %v20031_v12 = vadd.f32 %v12360_v22, %v19802_v48  ;;  %v12359_v8 = vadd.f32 %v15738_v18, %v12351_v21  ;;  %17863 = vmatpush3.msra.mxu0 %v15746_v53  ;;  %v15749_v18 = vld [vmem:[%s19560_s24 + $0x4] ss:$0 sm:$0xff]  ;;  %v15777_v22 = vld [vmem:[%s19507_s6 + $0xb0] sm:$0xff] }
0x54de   :  { %17864 = vmatprep.subr.mxu0 %v15745_v54  ;;  %v15765_v21 = vld [vmem:[%s19565_s14 + $0x4] ss:$0 sm:$0xff] }
0x54df   :  { %v20035_v55 = vadd.f32 %v12359_v8, %v19805_v56  ;;  %v12370_v30 = vsel %vm415_vm3, %v20031_v12, 0.0  ;;  %17865 = vmatpush3.msra.mxu0 %v15745_v54  ;;  %v15776_v8 = vld [vmem:[%s19507_s6 + $0xa8] sm:$0xff] }
0x54e0   :  { %v17881_v32 = vpop.f32.mrf.mxu1  ;;  %12371 = vadd.xlane.f32.xlu1 %v12370_v30  ;;  %17866 = vmatprep.subr.mxu0 %v15744_v1 }
0x54e1   :  { %v12604_v33 = vadd.f32 %v17881_v32, %v15757_v49  ;;  %v12367_v35 = vsel %vm415_vm3, %v20035_v55, 0.0  ;;  %17867 = vmatpush3.msra.mxu0 %v15744_v1  ;;  %v15775_v32 = vld [vmem:[%s19507_s6 + $0xa0] sm:$0xff] }
0x54e2   :  { %v12598_v37 = vpop.f32.mrf.mxu1  ;;  %12368 = vadd.xlane.f32.xlu0 %v12367_v35  ;;  %17882 = vmatprep.subr.mxu0 %v15763_v44 }
0x54e3   :  { %v12599_v17 = vadd.f32 %v15757_v49, %v12598_v37  ;;  %17893 = vmatprep.subr.msk.mxu1 %vm738_vm10, %v12604_v33  ;;  %v15794_v37 = vld [vmem:[%s19524_s26 + $0xb8] sm:$0xff] }
0x54e4   :  { %17894 = vmatpush3.xpose.msk.msra.mxu1 %vm738_vm10, %v12604_v33 }
0x54e5   :  { %17895 = vmatprep.subr.msk.mxu1 %vm738_vm10, %v12599_v17 }
0x54e8   :  { %17896 = vmatpush3.xpose.msk.msra.mxu1 %vm738_vm10, %v12599_v17  ;;  %v15793_v17 = vld [vmem:[%s19524_s26 + $0xb0] sm:$0xff] }
0x54e9   :  { %17907 = vmatprep.subr.mxu1 %v15778_v4 }
0x5569   :  { %v12372_v48 = vpop.xlane.xlu1 %12371 }
0x556a   :  { %v12374_v56 = vmul.f32 0.03125, %v12372_v48  ;;  %v15792_v48 = vld [vmem:[%s19524_s26 + $0xa8] sm:$0xff] }
0x556b   :  { %v12369_v39 = vpop.xlane.xlu0 %12368 }
0x556c   :  { %v12376_v40 = vsub.f32 %v20031_v12, %v12374_v56  ;;  %v12373_v41 = vmul.f32 0.03125, %v12369_v39  ;;  %v15791_v56 = vld [vmem:[%s19524_s26 + $0xa0] sm:$0xff] }
0x556e   :  { %v12375_v9 = vsub.f32 %v20035_v55, %v12373_v41  ;;  %v12378_v25 = vmul.f32 %v12376_v40, %v12376_v40  ;;  %v12412_v28 = vmul.f32 %v15741_v10, %v12376_v40  ;;  %v20092_v40 = vld [vmem:[%s18677_s30 + $0x8] sm:$0xff] }
0x5570   :  { %v12382_v45 = vsel %vm415_vm3, %v12378_v25, 0.0  ;;  %v12377_v46 = vmul.f32 %v12375_v9, %v12375_v9  ;;  %v12411_v15 = vmul.f32 %v15741_v10, %v12375_v9  ;;  %v20096_v25 = vld [vmem:[%s18677_s30] sm:$0xff]  ;;  %s18506_s30 = smov 47  }
0x5571   :  { %12383 = vadd.xlane.f32.xlu1 %v12382_v45 }
0x5572   :  { %v12379_v31 = vsel %vm415_vm3, %v12377_v46, 0.0 }
0x5573   :  { %12380 = vadd.xlane.f32.xlu0 %v12379_v31 }
0x55fa   :  { %v12384_v13 = vpop.xlane.xlu1 %12383 }
0x55fb   :  { %v12386_v11 = vmul.f32 0.032258064, %v12384_v13 }
0x55fc   :  { %v12381_v5 = vpop.xlane.xlu0 %12380 }
0x55fd   :  { %18394 = vrsqrt.f32 %v12386_v11  ;;  %v12385_v57 = vmul.f32 0.032258064, %v12381_v5  ;;  %vm12396_vm6 = vcmp.eq.f32.partialorder %v12386_v11, inf  ;;  %v12399_v27 = vand.u32 2147483648, %v12386_v11 }
0x55fe   :  { %vm12398_vm7 = vcmp.eq.f32.partialorder %v12386_v11, 0.0 }
0x55ff   :  { %18396 = vrsqrt.f32 %v12385_v57  ;;  %vm12389_vm8 = vcmp.eq.f32.partialorder %v12385_v57, inf  ;;  %v12392_v42 = vand.u32 2147483648, %v12385_v57  ;;  %vm12391_vm9 = vcmp.eq.f32.partialorder %v12385_v57, 0.0 }
0x560a   :  { %v18395_v38 = vpop.eup %18394 }
0x560b   :  { %v12395_v20 = vmul.f32 %v18395_v38, %v12386_v11 }
0x560c   :  { %v18397_v26 = vpop.eup %18396 }
0x560d   :  { %v12397_v2 = vsel %vm12396_vm6, %v12386_v11, %v12395_v20  ;;  %v12388_v58 = vmul.f32 %v18397_v26, %v12385_v57 }
0x560e   :  { %v12400_v14 = vsel %vm12398_vm7, %v12399_v27, %v12397_v2 }
0x560f   :  { %v12402_v59 = vadd.f32 1e-06, %v12400_v14  ;;  %v12390_v6 = vsel %vm12389_vm8, %v12385_v57, %v12388_v58 }
0x5610   :  { %v12393_v7 = vsel %vm12391_vm9, %v12392_v42, %v12390_v6 }
0x5611   :  { %18398 = vrcp.f32 %v12402_v59  ;;  %v12401_v34 = vadd.f32 1e-06, %v12393_v7  ;;  %v15786_v7 = vld [vmem:[%s19478_s22 + $0xb8] sm:$0xff] }
0x5613   :  { %18400 = vrcp.f32 %v12401_v34 }
0x561e   :  { %v18399_v43 = vpop.eup %18398 }
0x561f   :  { %v12414_v61 = vmul.f32 %v18399_v43, %v12412_v28 }
0x5620   :  { %v18401_v62 = vpop.eup %18400 }
0x5621   :  { %v12413_v16 = vmul.f32 %v18401_v62, %v12411_v15  ;;  %v20058_v3 = vadd.f32 %v15742_v60, %v12414_v61  ;;  %v15785_v61 = vld [vmem:[%s19478_s22 + $0xb0] sm:$0xff] }
0x5623   :  { %v20056_v63 = vadd.f32 %v15742_v60, %v12413_v16  ;;  %v15784_v60 = vld [vmem:[%s19478_s22 + $0xa8] sm:$0xff]  ;;  %v15783_v16 = vld [vmem:[%s19478_s22 + $0xa0] sm:$0xff] }
0x5625   :  { %17868 = vmatprep.mubr.msk.f32.mxu0 %vm415_vm3, %v20056_v63 }
0x5626   :  { %17869 = vmatmul.mubr.msk.f32.vlgmr.msra.gmra.mxu0 %vm415_vm3, %v20058_v3 }
0x5627   :  { %17883 = vmatpush3.msra.mxu0 %v15763_v44  ;;  %17890 = vmatprep.mubr.msk.f32.mxu0 %vm415_vm3, %v19509_v24  ;;  %v15796_v44 = vld [vmem:[%s19565_s14 + $0x5] ss:$0 sm:$0xff] }
0x5628   :  { %17884 = vmatprep.subr.mxu0 %v15762_v23 }
0x5629   :  { %17885 = vmatpush3.msra.mxu0 %v15762_v23 }
0x562a   :  { %17886 = vmatprep.subr.mxu0 %v15761_v52 }
0x562b   :  { %17887 = vmatpush3.msra.mxu0 %v15761_v52 }
0x562c   :  { %17888 = vmatprep.subr.mxu0 %v15760_v51 }
0x562d   :  { %17889 = vmatpush3.msra.mxu0 %v15760_v51 }
0x562e   :  { %17891 = vmatmul.mubr.msk.f32.vlgmr.msra.gmra.mxu0 %vm415_vm3, %v19511_v29 }
0x56e6   :  { %v17870_v36 = vpop.f32.mrf.mxu0 }
0x56e7   :  { %v12516_v19 = vadd.f32 %v17870_v36, %v15749_v18 }
0x56e8   :  { %v12510_v50 = vpop.f32.mrf.mxu0 }
0x56e9   :  { %v12511_v0 = vadd.f32 %v15749_v18, %v12510_v50 }
0x56eb   :  { %17897 = vmatprep.mubr.msk.f32.mxu1 %vm738_vm10, %v12511_v0 }
0x56ec   :  { %17898 = vmatmul.mubr.msk.f32.vlgmr.msra.gmra.mxu1 %vm738_vm10, %v12516_v19 }
0x56ed   :  { %17908 = vmatpush3.msra.mxu1 %v15778_v4  ;;  %17915 = vmatprep.mubr.msk.f32.mxu1 %vm415_vm3, %v20056_v63  ;;  %v15788_v4 = vld [vmem:[%s19549_s13 + $0x5] ss:$0 sm:$0xff] }
0x56ee   :  { %v17892_v49 = vpop.f32.mrf.mxu0  ;;  %17909 = vmatprep.subr.mxu1 %v15777_v22 }
0x56ef   :  { %v12692_v30 = vadd.f32 %v17892_v49, %v15765_v21  ;;  %17910 = vmatpush3.msra.mxu1 %v15777_v22 }
0x56f0   :  { %v12686_v33 = vpop.f32.mrf.mxu0  ;;  %17911 = vmatprep.subr.mxu1 %v15776_v8 }
0x56f1   :  { %v12687_v35 = vadd.f32 %v15765_v21, %v12686_v33  ;;  %17900 = vmatprep.subr.mxu0 %v12692_v30  ;;  %17912 = vmatpush3.msra.mxu1 %v15776_v8 }
0x56f2   :  { %17901 = vmatpush3.msra.mxu0 %v12692_v30  ;;  %17913 = vmatprep.subr.mxu1 %v15775_v32 }
0x56f3   :  { %17902 = vmatprep.subr.mxu0 %v12687_v35  ;;  %17914 = vmatpush3.msra.mxu1 %v15775_v32 }
0x56f4   :  { %17903 = vmatpush3.msra.mxu0 %v12687_v35  ;;  %17916 = vmatmul.mubr.msk.f32.vlgmr.msra.gmra.mxu1 %vm415_vm3, %v20058_v3 }
0x56f5   :  { %17929 = vmatprep.subr.mxu1 %v15794_v37  ;;  %17937 = vmatprep.mubr.msk.f32.mxu1 %vm415_vm3, %v19509_v24 }
0x56f6   :  { %17930 = vmatpush3.msra.mxu1 %v15794_v37  ;;  %17918 = vmatprep.subr.mxu0 %v15786_v7 }
0x56f7   :  { %17931 = vmatprep.subr.mxu1 %v15793_v17 }
0x56f8   :  { %17932 = vmatpush3.msra.mxu1 %v15793_v17 }
0x56f9   :  { %17933 = vmatprep.subr.mxu1 %v15792_v48 }
0x56fa   :  { %17934 = vmatpush3.msra.mxu1 %v15792_v48 }
0x56fb   :  { %17935 = vmatprep.subr.mxu1 %v15791_v56 }
0x56fc   :  { %17936 = vmatpush3.msra.mxu1 %v15791_v56 }
0x56fd   :  { %17938 = vmatmul.mubr.msk.f32.vlgmr.msra.gmra.mxu1 %vm415_vm3, %v19511_v29 }
0x57ac   :  { %v17899_v39 = vpop.f32.mrf.mxu1 }
0x57ad   :  { %v12779_v41 = vadd.f32 %v20092_v40, %v17899_v39 }
0x57ae   :  { %v12773_v9 = vpop.f32.mrf.mxu1 }
0x57af   :  { %v12774_v45 = vadd.f32 %v20096_v25, %v12773_v9  ;;  %v12785_v46 = vsel %vm826_vm11, %v12779_v41, -inf }
0x57b0   :  { %12786 = vmax.xlane.f32.xlu1 %v12785_v46  ;;  %v15805_v46 = vld [vmem:[%s19626_s27 + $0x28] sm:$0xff] }
0x57b1   :  { %v12782_v31 = vsel %vm826_vm11, %v12774_v45, -inf }
0x57b2   :  { %12783 = vmax.xlane.f32.xlu0 %v12782_v31 }
0x57b4   :  { %v17917_v53 = vpop.f32.mrf.mxu1 }
0x57b5   :  { %v12972_v54 = vadd.f32 %v17917_v53, %v15780_v47 }
0x57b6   :  { %v12966_v1 = vpop.f32.mrf.mxu1 }
0x57b7   :  { %v12967_v23 = vadd.f32 %v15780_v47, %v12966_v1 }
0x57bd   :  { %v17939_v13 = vpop.f32.mrf.mxu1 }
0x57be   :  { %v13148_v11 = vadd.f32 %v17939_v13, %v15796_v44  ;;  %v15821_v13 = vld [vmem:[%s19478_s22 + $0xd8] sm:$0xff] }
0x57bf   :  { %v13142_v5 = vpop.f32.mrf.mxu1 }
0x57c0   :  { %v13143_v57 = vadd.f32 %v15796_v44, %v13142_v5  ;;  %17947 = vmatprep.subr.mxu1 %v13148_v11  ;;  %v15819_v5 = vld [vmem:[%s19478_s22 + $0xc8] sm:$0xff] }
0x57c1   :  { %17948 = vmatpush3.msra.mxu1 %v13148_v11  ;;  %v15820_v11 = vld [vmem:[%s19478_s22 + $0xd0] sm:$0xff] }
0x57c2   :  { %17949 = vmatprep.subr.mxu1 %v13143_v57 }
0x57c3   :  { %17950 = vmatpush3.msra.mxu1 %v13143_v57  ;;  %v15818_v57 = vld [vmem:[%s19478_s22 + $0xc0] sm:$0xff] }
0x5839   :  { %v12787_v38 = vpop.xlane.xlu1 %12786 }
0x583a   :  { %v12789_v20 = vsub.f32 %v12779_v41, %v12787_v38  ;;  %v15813_v38 = vld [vmem:[%s19507_s6 + $0xd8] sm:$0xff] }
0x583b   :  { %v12784_v27 = vpop.xlane.xlu0 %12783 }
0x583c   :  { %v12792_v26 = vmul.f32 1.442695, %v12789_v20  ;;  %v12788_v2 = vsub.f32 %v12774_v45, %v12784_v27  ;;  %v15774_v45 = vld [vmem:[%s19626_s27 + $0x20] sm:$0xff] }
0x583d   :  { %17959 = vmatprep.subr.mxu1 %v15774_v45 }
0x583e   :  { %18402 = vpow2.f32 %v12792_v26  ;;  %v12790_v14 = vmul.f32 1.442695, %v12788_v2  ;;  %v15812_v26 = vld [vmem:[%s19507_s6 + $0xd0] sm:$0xff]  ;;  %v15811_v2 = vld [vmem:[%s19507_s6 + $0xc8] sm:$0xff] }
0x5840   :  { %18404 = vpow2.f32 %v12790_v14 }
0x584b   :  { %v18403_v58 = vpop.eup %18402 }
0x584c   :  { %v12797_v59 = vsel %vm826_vm11, %v18403_v58, 0.0 }
0x584d   :  { %v18405_v42 = vpop.eup %18404  ;;  %12798 = vadd.xlane.f32.xlu1 %v12797_v59  ;;  %v15829_v59 = vld [vmem:[%s19524_s26 + $0xd8] sm:$0xff] }
0x584e   :  { %v12794_v6 = vsel %vm826_vm11, %v18405_v42, 0.0 }
0x584f   :  { %12795 = vadd.xlane.f32.xlu0 %v12794_v6  ;;  %v15823_v6 = vld [vmem:[%s19549_s13 + $0x6] ss:$0 sm:$0xff] }
0x58d6   :  { %v12799_v34 = vpop.xlane.xlu1 %12798 }
0x58d7   :  { %18406 = vrcp.f32 %v12799_v34 }
0x58d8   :  { %v12796_v10 = vpop.xlane.xlu0 %12795 }
0x58d9   :  { %18408 = vrcp.f32 %v12796_v10 }
0x58e4   :  { %v18407_v43 = vpop.eup %18406 }
0x58e5   :  { %v12803_v62 = vmul.f32 %v18407_v43, %v18403_v58  ;;  %v15810_v58 = vld [vmem:[%s19507_s6 + $0xc0] sm:$0xff]  ;;  %v15827_v43 = vld [vmem:[%s19524_s26 + $0xc8] sm:$0xff] }
0x58e6   :  { %v18409_v28 = vpop.eup %18408 }
0x58e7   :  { %v12802_v15 = vmul.f32 %v18409_v28, %v18405_v42 }
0x58e9   :  { %17904 = vmatprep.mubr.msk.f32.mxu0 %vm826_vm11, %v12802_v15 }
0x58ea   :  { %17905 = vmatmul.mubr.msk.f32.vlgmr.msra.gmra.mxu0 %vm826_vm11, %v12803_v62  ;;  %v15826_v62 = vld [vmem:[%s19524_s26 + $0xc0] sm:$0xff] }
0x58eb   :  { %17919 = vmatpush3.msra.mxu0 %v15786_v7  ;;  %17926 = vmatprep.mubr.msk.f32.mxu0 %vm415_vm3, %v19509_v24  ;;  %v15828_v7 = vld [vmem:[%s19524_s26 + $0xd0] sm:$0xff] }
0x58ec   :  { %17920 = vmatprep.subr.mxu0 %v15785_v61 }
0x58ed   :  { %17921 = vmatpush3.msra.mxu0 %v15785_v61 }
0x58ee   :  { %17922 = vmatprep.subr.mxu0 %v15784_v60 }
0x58ef   :  { %17923 = vmatpush3.msra.mxu0 %v15784_v60 }
0x58f0   :  { %17924 = vmatprep.subr.mxu0 %v15783_v16 }
0x58f1   :  { %17925 = vmatpush3.msra.mxu0 %v15783_v16 }
0x58f2   :  { %17927 = vmatmul.mubr.msk.f32.vlgmr.msra.gmra.mxu0 %vm415_vm3, %v19511_v29 }
0x58f3   :  { %17944 = vmatprep.mubr.msk.f32.mxu0 %vm738_vm10, %v12967_v23  ;;  %v15815_v23 = vld [vmem:[%s19560_s24 + $0x6] ss:$0 sm:$0xff] }
0x59aa   :  { %v17906_v52 = vpop.f32.mrf.mxu0 }
0x59ac   :  { %v12876_v51 = vpop.f32.mrf.mxu0 }
0x59b2   :  { %v17928_v36 = vpop.f32.mrf.mxu0 }
0x59b3   :  { %v13060_v18 = vadd.f32 %v17928_v36, %v15788_v4  ;;  %v15831_v36 = vld [vmem:[%s19565_s14 + $0x6] ss:$0 sm:$0xff] }
0x59b4   :  { %v13054_v50 = vpop.f32.mrf.mxu0 }
0x59b5   :  { %v13055_v0 = vadd.f32 %v15788_v4, %v13054_v50  ;;  %17940 = vmatprep.subr.msk.mxu0 %vm738_vm10, %v13060_v18 }
0x59b6   :  { %17941 = vmatpush3.xpose.msk.msra.mxu0 %vm738_vm10, %v13060_v18 }
0x59b7   :  { %17942 = vmatprep.subr.msk.mxu0 %vm738_vm10, %v13055_v0 }
0x59ba   :  { %17943 = vmatpush3.xpose.msk.msra.mxu0 %vm738_vm10, %v13055_v0 }
0x59bb   :  { %17954 = vmatprep.subr.mxu0 %v15805_v46 }
0x59bd   :  { %17945 = vmatmul.mubr.msk.f32.vlgmr.msra.gmra.mxu0 %vm738_vm10, %v12972_v54 }
0x59be   :  { %17955 = vmatpush3.msra.mxu0 %v15805_v46  ;;  %v15846_v46 = vld [vmem:[%s19507_s6 + $0xf8] sm:$0xff] }
0x59bf   :  { %17964 = vmatprep.subr.mxu0 %v15813_v38 }
0x5a7d   :  { %v17946_v19 = vpop.f32.mrf.mxu0 }
0x5a7e   :  { %v13235_v22 = vadd.f32 %v20092_v40, %v17946_v19 }
0x5a7f   :  { %v13229_v21 = vpop.f32.mrf.mxu0 }
0x5a80   :  { %v13230_v8 = vadd.f32 %v20096_v25, %v13229_v21  ;;  %v13241_v49 = vsel %vm826_vm11, %v13235_v22, -inf }
0x5a81   :  { %13242 = vmax.xlane.f32.xlu1 %v13241_v49 }
0x5a82   :  { %v13238_v30 = vsel %vm826_vm11, %v13230_v8, -inf }
0x5a83   :  { %13239 = vmax.xlane.f32.xlu0 %v13238_v30 }
0x5b0a   :  { %v13243_v32 = vpop.xlane.xlu1 %13242 }
0x5b0b   :  { %v13245_v33 = vsub.f32 %v13235_v22, %v13243_v32 }
0x5b0c   :  { %v13240_v35 = vpop.xlane.xlu0 %13239 }
0x5b0d   :  { %v13248_v37 = vmul.f32 1.442695, %v13245_v33  ;;  %v13244_v17 = vsub.f32 %v13230_v8, %v13240_v35 }
0x5b0f   :  { %18410 = vpow2.f32 %v13248_v37  ;;  %v13246_v48 = vmul.f32 1.442695, %v13244_v17 }
0x5b11   :  { %18412 = vpow2.f32 %v13246_v48 }
0x5b1c   :  { %v18411_v56 = vpop.eup %18410 }
0x5b1d   :  { %v13253_v39 = vsel %vm826_vm11, %v18411_v56, 0.0 }
0x5b1e   :  { %v18413_v41 = vpop.eup %18412  ;;  %13254 = vadd.xlane.f32.xlu1 %v13253_v39 }
0x5b1f   :  { %v13250_v9 = vsel %vm826_vm11, %v18413_v41, 0.0 }
0x5b20   :  { %13251 = vadd.xlane.f32.xlu0 %v13250_v9 }
0x5ba7   :  { %v13255_v31 = vpop.xlane.xlu1 %13254 }
0x5ba8   :  { %18414 = vrcp.f32 %v13255_v31  ;;  %v15840_v31 = vld [vmem:[%s19626_s27 + $0x30] sm:$0xff] }
0x5ba9   :  { %v13252_v47 = vpop.xlane.xlu0 %13251 }
0x5baa   :  { %18416 = vrcp.f32 %v13252_v47 }
0x5bb5   :  { %v18415_v53 = vpop.eup %18414 }
0x5bb6   :  { %v13259_v44 = vmul.f32 %v18415_v53, %v18411_v56 }
0x5bb7   :  { %v18417_v54 = vpop.eup %18416 }
0x5bb8   :  { %v13258_v1 = vmul.f32 %v18417_v54, %v18413_v41 }
0x5bba   :  { %17951 = vmatprep.mubr.msk.f32.mxu1 %vm826_vm11, %v13258_v1 }
0x5bbb   :  { %17952 = vmatmul.mubr.msk.f32.vlgmr.msra.gmra.mxu1 %vm826_vm11, %v13259_v44 }
0x5bbc   :  { %17961 = vmatprep.mubr.msk.f32.mxu1 %vm738_vm10, %v12876_v51  ;;  %17960 = vmatpush3.msra.mxu1 %v15774_v45 }
0x5bbd   :  { %17975 = vmatprep.subr.mxu1 %v15821_v13 }
0x5bbf   :  { %17962 = vmatmul.mubr.msk.f32.vlgmr.msra.gmra.mxu1 %vm738_vm10, %v17906_v52 }
0x5bc0   :  { %17976 = vmatpush3.msra.mxu1 %v15821_v13  ;;  %17983 = vmatprep.mubr.msk.f32.mxu1 %vm415_vm3, %v19509_v24 }
0x5bc1   :  { %17977 = vmatprep.subr.mxu1 %v15820_v11 }
0x5bc2   :  { %17978 = vmatpush3.msra.mxu1 %v15820_v11  ;;  %v15845_v11 = vld [vmem:[%s19507_s6 + $0xf0] sm:$0xff] }
0x5bc3   :  { %17979 = vmatprep.subr.mxu1 %v15819_v5 }
0x5bc4   :  { %17980 = vmatpush3.msra.mxu1 %v15819_v5  ;;  %v15844_v5 = vld [vmem:[%s19507_s6 + $0xe8] sm:$0xff] }
0x5bc5   :  { %17981 = vmatprep.subr.mxu1 %v15818_v57 }
0x5bc6   :  { %17982 = vmatpush3.msra.mxu1 %v15818_v57  ;;  %v15843_v57 = vld [vmem:[%s19507_s6 + $0xe0] sm:$0xff] }
0x5bc7   :  { %17984 = vmatmul.mubr.msk.f32.vlgmr.msra.gmra.mxu1 %vm415_vm3, %v19511_v29 }
0x5c7b   :  { %v17953_v20 = vpop.f32.mrf.mxu1 }
0x5c7d   :  { %v13332_v27 = vpop.f32.mrf.mxu1 }
0x5c7e   :  { %17956 = vmatprep.mubr.msk.f32.mxu0 %vm738_vm10, %v13332_v27  ;;  %v15859_v27 = vld [vmem:[%s19524_s26 + $0xe0] sm:$0xff] }
0x5c7f   :  { %17957 = vmatmul.mubr.msk.f32.vlgmr.msra.gmra.mxu0 %vm738_vm10, %v17953_v20  ;;  %v20149_v14 = vpop.f32.mrf.mxu1  ;;  %v15861_v20 = vld [vmem:[%s19524_s26 + $0xf0] sm:$0xff] }
0x5c80   :  { %17965 = vmatpush3.msra.mxu0 %v15813_v38  ;;  %17972 = vmatprep.mubr.msk.f32.mxu0 %vm415_vm3, %v20056_v63  ;;  %v15862_v38 = vld [vmem:[%s19524_s26 + $0xf8] sm:$0xff] }
0x5c81   :  { %17966 = vmatprep.subr.mxu0 %v15812_v26  ;;  %v20153_v42 = vpop.f32.mrf.mxu1 }
0x5c82   :  { %17967 = vmatpush3.msra.mxu0 %v15812_v26 }
0x5c83   :  { %17968 = vmatprep.subr.mxu0 %v15811_v2 }
0x5c84   :  { %17969 = vmatpush3.msra.mxu0 %v15811_v2 }
0x5c85   :  { %17970 = vmatprep.subr.mxu0 %v15810_v58 }
0x5c86   :  { %17971 = vmatpush3.msra.mxu0 %v15810_v58  ;;  %v15853_v58 = vld [vmem:[%s19478_s22 + $0xf0] sm:$0xff] }
0x5c87   :  { %17973 = vmatmul.mubr.msk.f32.vlgmr.msra.gmra.mxu0 %vm415_vm3, %v20058_v3  ;;  %v17985_v34 = vpop.f32.mrf.mxu1  ;;  %17986 = vmatprep.subr.mxu0 %v15829_v59 }
0x5c88   :  { %v13678_v10 = vadd.f32 %v17985_v34, %v15823_v6  ;;  %17987 = vmatpush3.msra.mxu0 %v15829_v59  ;;  %17994 = vmatprep.mubr.msk.f32.mxu0 %vm415_vm3, %v19509_v24  ;;  %v15852_v59 = vld [vmem:[%s19478_s22 + $0xe8] sm:$0xff] }
0x5c89   :  { %v13672_v28 = vpop.f32.mrf.mxu1  ;;  %17988 = vmatprep.subr.mxu0 %v15828_v7 }
0x5c8a   :  { %v13673_v15 = vadd.f32 %v15823_v6, %v13672_v28  ;;  %17989 = vmatpush3.msra.mxu0 %v15828_v7  ;;  %17997 = vmatprep.subr.msk.mxu1 %vm738_vm10, %v13678_v10  ;;  %v15848_v6 = vld [vmem:[%s19560_s24 + $0x7] ss:$0 sm:$0xff]  ;;  %s18510_s24 = smov 49  }
0x5c8b   :  { %17990 = vmatprep.subr.mxu0 %v15827_v43  ;;  %17998 = vmatpush3.xpose.msk.msra.mxu1 %vm738_vm10, %v13678_v10  ;;  %v15851_v7 = vld [vmem:[%s19478_s22 + $0xe0] sm:$0xff] }
0x5c8c   :  { %17991 = vmatpush3.msra.mxu0 %v15827_v43  ;;  %17999 = vmatprep.subr.msk.mxu1 %vm738_vm10, %v13673_v15 }
0x5c8d   :  { %17992 = vmatprep.subr.mxu0 %v15826_v62 }
0x5c8e   :  { %17993 = vmatpush3.msra.mxu0 %v15826_v62 }
0x5c8f   :  { %17995 = vmatmul.mubr.msk.f32.vlgmr.msra.gmra.mxu0 %vm415_vm3, %v19511_v29  ;;  %18000 = vmatpush3.xpose.msk.msra.mxu1 %vm738_vm10, %v13673_v15 }
0x5c90   :  { %18011 = vmatprep.subr.mxu1 %v15840_v31 }
0x5d3f   :  { %v20169_v61 = vpop.f32.mrf.mxu0 }
0x5d41   :  { %v20171_v60 = vpop.f32.mrf.mxu0 }
0x5d47   :  { %v17974_v16 = vpop.f32.mrf.mxu0 }
0x5d48   :  { %v13590_v4 = vadd.f32 %v17974_v16, %v15815_v23 }
0x5d49   :  { %v13584_v52 = vpop.f32.mrf.mxu0 }
0x5d4a   :  { %v13585_v51 = vadd.f32 %v15815_v23, %v13584_v52  ;;  %v13502_v52 = vadd.f32 %v20149_v14, %v20169_v61 }
0x5d4c   :  { %18001 = vmatprep.mubr.msk.f32.mxu1 %vm738_vm10, %v13585_v51 }
0x5d4d   :  { %18002 = vmatmul.mubr.msk.f32.vlgmr.msra.gmra.mxu1 %vm738_vm10, %v13590_v4  ;;  %v13497_v4 = vadd.f32 %v20153_v42, %v20171_v60 }
0x5d4e   :  { %18012 = vmatpush3.msra.mxu1 %v15840_v31 }
0x5d4f   :  { %v17996_v18 = vpop.f32.mrf.mxu0 }
0x5d50   :  { %v13766_v50 = vadd.f32 %v17996_v18, %v15831_v36 }
0x5d51   :  { %v13760_v0 = vpop.f32.mrf.mxu0 }
0x5d52   :  { %v13761_v19 = vadd.f32 %v15831_v36, %v13760_v0  ;;  %18004 = vmatprep.subr.mxu0 %v13766_v50 }
0x5d53   :  { %18005 = vmatpush3.msra.mxu0 %v13766_v50  ;;  %v15856_v50 = vld [vmem:[%s19549_s13 + $0x7] ss:$0 sm:$0xff] }
0x5d54   :  { %18006 = vmatprep.subr.mxu0 %v13761_v19 }
0x5d55   :  { %18007 = vmatpush3.msra.mxu0 %v13761_v19 }
0x5d56   :  { %18016 = vmatprep.subr.mxu0 %v15846_v46 }
0x5e0d   :  { %v18003_v22 = vpop.f32.mrf.mxu1 }
0x5e0e   :  { %v13853_v21 = vadd.f32 %v20092_v40, %v18003_v22 }
0x5e0f   :  { %v13847_v8 = vpop.f32.mrf.mxu1 }
0x5e10   :  { %v13848_v49 = vadd.f32 %v20096_v25, %v13847_v8  ;;  %v13859_v30 = vsel %vm826_vm11, %v13853_v21, -inf }
0x5e11   :  { %13860 = vmax.xlane.f32.xlu1 %v13859_v30 }
0x5e12   :  { %v13856_v32 = vsel %vm826_vm11, %v13848_v49, -inf }
0x5e13   :  { %13857 = vmax.xlane.f32.xlu0 %v13856_v32 }
0x5e9a   :  { %v13861_v33 = vpop.xlane.xlu1 %13860 }
0x5e9b   :  { %v13863_v35 = vsub.f32 %v13853_v21, %v13861_v33 }
0x5e9c   :  { %v13858_v37 = vpop.xlane.xlu0 %13857 }
0x5e9d   :  { %v13866_v17 = vmul.f32 1.442695, %v13863_v35  ;;  %v13862_v48 = vsub.f32 %v13848_v49, %v13858_v37 }
0x5e9f   :  { %18418 = vpow2.f32 %v13866_v17  ;;  %v13864_v56 = vmul.f32 1.442695, %v13862_v48 }
0x5ea1   :  { %18420 = vpow2.f32 %v13864_v56 }
0x5eac   :  { %v18419_v39 = vpop.eup %18418 }
0x5ead   :  { %v13871_v41 = vsel %vm826_vm11, %v18419_v39, 0.0 }
0x5eae   :  { %v18421_v9 = vpop.eup %18420  ;;  %13872 = vadd.xlane.f32.xlu1 %v13871_v41 }
0x5eaf   :  { %v13868_v45 = vsel %vm826_vm11, %v18421_v9, 0.0 }
0x5eb0   :  { %13869 = vadd.xlane.f32.xlu0 %v13868_v45 }
0x5f37   :  { %v13873_v47 = vpop.xlane.xlu1 %13872 }
0x5f38   :  { %18422 = vrcp.f32 %v13873_v47 }
0x5f39   :  { %v13870_v53 = vpop.xlane.xlu0 %13869 }
0x5f3a   :  { %18424 = vrcp.f32 %v13870_v53 }
0x5f45   :  { %v18423_v54 = vpop.eup %18422 }
0x5f46   :  { %v13877_v13 = vmul.f32 %v18423_v54, %v18419_v39  ;;  %v15873_v39 = vld [vmem:[%s19626_s27 + $0x38] sm:$0xff] }
0x5f47   :  { %v18425_v1 = vpop.eup %18424 }
0x5f48   :  { %v13876_v44 = vmul.f32 %v18425_v1, %v18421_v9  ;;  %v15876_v1 = vld [vmem:[%s19739_s29 + $0x1] ss:$0 sm:$0xff]  ;;  %s15053_s29 = sld [smem:[%s20294_s0 + %s18510_s24]]  }
0x5f4a   :  { %18008 = vmatprep.mubr.msk.f32.mxu0 %vm826_vm11, %v13876_v44 }
0x5f4b   :  { %18009 = vmatmul.mubr.msk.f32.vlgmr.msra.gmra.mxu0 %vm826_vm11, %v13877_v13 }
0x5f4c   :  { %18017 = vmatpush3.msra.mxu0 %v15846_v46  ;;  %18024 = vmatprep.mubr.msk.f32.mxu0 %vm415_vm3, %v20056_v63  ;;  %v15860_v63 = vld [vmem:[%s19524_s26 + $0xe8] sm:$0xff] }
0x5f4d   :  { %18018 = vmatprep.subr.mxu0 %v15845_v11 }
0x5f4e   :  { %18019 = vmatpush3.msra.mxu0 %v15845_v11 }
0x5f4f   :  { %18020 = vmatprep.subr.mxu0 %v15844_v5 }
0x5f50   :  { %18021 = vmatpush3.msra.mxu0 %v15844_v5 }
0x5f51   :  { %18022 = vmatprep.subr.mxu0 %v15843_v57 }
0x5f52   :  { %18023 = vmatpush3.msra.mxu0 %v15843_v57 }
0x5f53   :  { %18025 = vmatmul.mubr.msk.f32.vlgmr.msra.gmra.mxu0 %vm415_vm3, %v20058_v3  ;;  %18038 = vmatprep.subr.mxu0 %v15862_v38  ;;  %v15854_v3 = vld [vmem:[%s19478_s22 + $0xf8] sm:$0xff]  ;;  %s18509_s22 = smov 48  }
0x5f54   :  { %18039 = vmatpush3.msra.mxu0 %v15862_v38  ;;  %18046 = vmatprep.mubr.msk.f32.mxu0 %vm415_vm3, %v19509_v24  ;;  %s15052_s13 = sld [smem:[%s20294_s0 + %s18509_s22]]  }
0x5f55   :  { %18040 = vmatprep.subr.mxu0 %v15861_v20  ;;  %18027 = vmatprep.subr.mxu1 %v15854_v3 }
0x5f56   :  { %18041 = vmatpush3.msra.mxu0 %v15861_v20 }
0x5f57   :  { %18042 = vmatprep.subr.mxu0 %v15860_v63 }
0x5f58   :  { %18043 = vmatpush3.msra.mxu0 %v15860_v63 }
0x5f59   :  { %18044 = vmatprep.subr.mxu0 %v15859_v27 }
0x5f5a   :  { %18045 = vmatpush3.msra.mxu0 %v15859_v27 }
0x5f5b   :  { %18047 = vmatmul.mubr.msk.f32.vlgmr.msra.gmra.mxu0 %vm415_vm3, %v19511_v29 }
0x600b   :  { %v18010_v26 = vpop.f32.mrf.mxu0 }
0x600d   :  { %v13950_v2 = vpop.f32.mrf.mxu0 }
0x600e   :  { %18013 = vmatprep.mubr.msk.f32.mxu1 %vm738_vm10, %v13950_v2 }
0x600f   :  { %18014 = vmatmul.mubr.msk.f32.vlgmr.msra.gmra.mxu1 %vm738_vm10, %v18010_v26 }
0x6010   :  { %18028 = vmatpush3.msra.mxu1 %v15854_v3  ;;  %18035 = vmatprep.mubr.msk.f32.mxu1 %vm415_vm3, %v19509_v24  ;;  %v15864_v24 = vld [vmem:[%s19565_s14 + $0x7] ss:$0 sm:$0xff] }
0x6011   :  { %18029 = vmatprep.subr.mxu1 %v15853_v58 }
0x6012   :  { %18030 = vmatpush3.msra.mxu1 %v15853_v58 }
0x6013   :  { %v18026_v34 = vpop.f32.mrf.mxu0  ;;  %18031 = vmatprep.subr.mxu1 %v15852_v59 }
0x6014   :  { %v14129_v10 = vadd.f32 %v18026_v34, %v15848_v6  ;;  %18032 = vmatpush3.msra.mxu1 %v15852_v59 }
0x6015   :  { %v14123_v43 = vpop.f32.mrf.mxu0  ;;  %18033 = vmatprep.subr.mxu1 %v15851_v7 }
0x6016   :  { %v14124_v28 = vadd.f32 %v15848_v6, %v14123_v43  ;;  %18034 = vmatpush3.msra.mxu1 %v15851_v7  ;;  %v15884_v43 = vld [vmem:[%s19763_s7 + $0x38] sm:$0xff] }
0x6017   :  { %18036 = vmatmul.mubr.msk.f32.vlgmr.msra.gmra.mxu1 %vm415_vm3, %v19511_v29 }
0x6018   :  { %18053 = vmatprep.mubr.msk.f32.mxu1 %vm738_vm10, %v14124_v28  ;;  %v15883_v28 = vld [vmem:[%s19763_s7 + $0x30] sm:$0xff] }
0x601b   :  { %v18048_v15 = vpop.f32.mrf.mxu0 }
0x601c   :  { %v14305_v62 = vadd.f32 %v18048_v15, %v15864_v24  ;;  %v15881_v15 = vld [vmem:[%s19763_s7 + $0x20] sm:$0xff] }
0x601d   :  { %v14299_v16 = vpop.f32.mrf.mxu0 }
0x601e   :  { %v14300_v23 = vadd.f32 %v15864_v24, %v14299_v16  ;;  %18056 = vmatprep.subr.mxu0 %v14305_v62  ;;  %v15882_v24 = vld [vmem:[%s19763_s7 + $0x28] sm:$0xff]  ;;  %v15892_v16 = vld [vmem:[%s19772_s2 + $0x70] sm:$0xff] }
0x601f   :  { %18057 = vmatpush3.msra.mxu0 %v14305_v62  ;;  %v15893_v62 = vld [vmem:[%s19772_s2 + $0x78] sm:$0xff] }
0x6020   :  { %18058 = vmatprep.subr.mxu0 %v14300_v23 }
0x6021   :  { %18059 = vmatpush3.msra.mxu0 %v14300_v23  ;;  %v15891_v23 = vld [vmem:[%s19772_s2 + $0x68] sm:$0xff] }
0x6022   :  { %18068 = vmatprep.subr.mxu0 %v15884_v43 }
0x60cf   :  { %v18015_v51 = vpop.f32.mrf.mxu1 }
0x60d0   :  { %v14043_v29 = vadd.f32 %v18015_v51, %v13502_v52  ;;  %v15890_v52 = vld [vmem:[%s19772_s2 + $0x60] sm:$0xff] }
0x60d1   :  { %v14033_v36 = vpop.f32.mrf.mxu1 }
0x60d2   :  { %v14042_v18 = vadd.f32 %v14033_v36, %v13497_v4 }
0x60d7   :  { %v18037_v0 = vpop.f32.mrf.mxu1 }
0x60d8   :  { %v14217_v19 = vadd.f32 %v18037_v0, %v15856_v50 }
0x60d9   :  { %v14211_v22 = vpop.f32.mrf.mxu1 }
0x60da   :  { %v14212_v21 = vadd.f32 %v15856_v50, %v14211_v22  ;;  %18049 = vmatprep.subr.msk.mxu1 %vm738_vm10, %v14217_v19 }
0x60db   :  { %18050 = vmatpush3.xpose.msk.msra.mxu1 %vm738_vm10, %v14217_v19 }
0x60dc   :  { %18051 = vmatprep.subr.msk.mxu1 %vm738_vm10, %v14212_v21 }
0x60df   :  { %18052 = vmatpush3.xpose.msk.msra.mxu1 %vm738_vm10, %v14212_v21 }
0x60e0   :  { %18063 = vmatprep.subr.mxu1 %v15873_v39 }
0x60e2   :  { %18054 = vmatmul.mubr.msk.f32.vlgmr.msra.gmra.mxu1 %vm738_vm10, %v14129_v10 }
0x60e3   :  { %18064 = vmatpush3.msra.mxu1 %v15873_v39  ;;  %v15889_v39 = vld [vmem:[%s19772_s2 + $0x58] sm:$0xff] }
0x60e4   :  { %18079 = vmatprep.subr.mxu1 %v15893_v62 }
0x61a2   :  { %v18055_v14 = vpop.f32.mrf.mxu1 }
0x61a3   :  { %v14392_v42 = vadd.f32 %v20092_v40, %v18055_v14 }
0x61a4   :  { %v14386_v61 = vpop.f32.mrf.mxu1 }
0x61a5   :  { %v14387_v60 = vadd.f32 %v20096_v25, %v14386_v61  ;;  %v14398_v8 = vsel %vm826_vm11, %v14392_v42, -inf }
0x61a6   :  { %14399 = vmax.xlane.f32.xlu1 %v14398_v8 }
0x61a7   :  { %v14395_v49 = vsel %vm826_vm11, %v14387_v60, -inf }
0x61a8   :  { %14396 = vmax.xlane.f32.xlu0 %v14395_v49 }
0x622f   :  { %v14400_v30 = vpop.xlane.xlu1 %14399 }
0x6230   :  { %v14402_v32 = vsub.f32 %v14392_v42, %v14400_v30  ;;  %v15879_v30 = vld [vmem:[%s19176_s5 + $0x5] ss:$0 sm:$0xff] }
0x6231   :  { %v14397_v33 = vpop.xlane.xlu0 %14396 }
0x6232   :  { %v14405_v35 = vmul.f32 1.442695, %v14402_v32  ;;  %v14401_v37 = vsub.f32 %v14387_v60, %v14397_v33 }
0x6234   :  { %18426 = vpow2.f32 %v14405_v35  ;;  %v14403_v17 = vmul.f32 1.442695, %v14401_v37 }
0x6236   :  { %18428 = vpow2.f32 %v14403_v17 }
0x6241   :  { %v18427_v48 = vpop.eup %18426 }
0x6242   :  { %v14410_v40 = vsel %vm826_vm11, %v18427_v48, 0.0 }
0x6243   :  { %v18429_v56 = vpop.eup %18428  ;;  %14411 = vadd.xlane.f32.xlu1 %v14410_v40 }
0x6244   :  { %v14407_v25 = vsel %vm826_vm11, %v18429_v56, 0.0 }
0x6245   :  { %14408 = vadd.xlane.f32.xlu0 %v14407_v25 }
0x62cc   :  { %v14412_v41 = vpop.xlane.xlu1 %14411 }
0x62cd   :  { %18430 = vrcp.f32 %v14412_v41  ;;  %v15888_v41 = vld [vmem:[%s19772_s2 + $0x50] sm:$0xff] }
0x62ce   :  { %v14409_v9 = vpop.xlane.xlu0 %14408 }
0x62cf   :  { %18432 = vrcp.f32 %v14409_v9  ;;  %v15887_v9 = vld [vmem:[%s19772_s2 + $0x48] sm:$0xff] }
0x62da   :  { %v18431_v45 = vpop.eup %18430 }
0x62db   :  { %v14416_v47 = vmul.f32 %v18431_v45, %v18427_v48  ;;  %v15880_v48 = vld [vmem:[%s19183_s12 + $0x5] ss:$0 sm:$0xff]  ;;  %s15051_s12 = sld [smem:[%s20294_s0 + %s18506_s30]]  }
0x62dc   :  { %v18433_v46 = vpop.eup %18432  ;;  %v15886_v45 = vld [vmem:[%s19772_s2 + $0x40] sm:$0xff] }
0x62dd   :  { %v14415_v31 = vmul.f32 %v18433_v46, %v18429_v56  ;;  %v15895_v46 = vld [vmem:[%s19790_s8 + $0x1] ss:$0 sm:$0xff] }
0x62df   :  { %18060 = vmatprep.mubr.msk.f32.mxu0 %vm826_vm11, %v14415_v31 }
0x62e0   :  { %18061 = vmatmul.mubr.msk.f32.vlgmr.msra.gmra.mxu0 %vm826_vm11, %v14416_v47 }
0x62e1   :  { %18069 = vmatpush3.msra.mxu0 %v15884_v43 }
0x62e2   :  { %18070 = vmatprep.subr.mxu0 %v15883_v28 }
0x62e3   :  { %18071 = vmatpush3.msra.mxu0 %v15883_v28  ;;  %v14909_v28 = vld [vmem:[%s15051_s12 + $0x10] sm:$0xff] }
0x62e4   :  { %18072 = vmatprep.subr.mxu0 %v15882_v24 }
0x62e5   :  { %18073 = vmatpush3.msra.mxu0 %v15882_v24  ;;  %v14908_v24 = vld [vmem:[%s15051_s12 + $0x8] sm:$0xff] }
0x62e6   :  { %18074 = vmatprep.subr.mxu0 %v15881_v15 }
0x62e7   :  { %18075 = vmatpush3.msra.mxu0 %v15881_v15  ;;  %v14907_v15 = vld [vmem:[%s15051_s12] sm:$0xff] }
0x63a0   :  { %v18062_v53 = vpop.f32.mrf.mxu0 }
0x63a2   :  { %v14489_v54 = vpop.f32.mrf.mxu0 }
0x63a3   :  { %18065 = vmatprep.mubr.msk.f32.mxu1 %vm738_vm10, %v14489_v54 }
0x63a4   :  { %18066 = vmatmul.mubr.msk.f32.vlgmr.msra.gmra.mxu1 %vm738_vm10, %v18062_v53 }
0x63a5   :  { %18080 = vmatpush3.msra.mxu1 %v15893_v62 }
0x63a6   :  { %18081 = vmatprep.subr.mxu1 %v15892_v16 }
0x63a7   :  { %18082 = vmatpush3.msra.mxu1 %v15892_v16 }
0x63a8   :  { %18083 = vmatprep.subr.mxu1 %v15891_v23 }
0x63a9   :  { %18084 = vmatpush3.msra.mxu1 %v15891_v23 }
0x63aa   :  { %18085 = vmatprep.subr.mxu1 %v15890_v52 }
0x63ab   :  { %18086 = vmatpush3.msra.mxu1 %v15890_v52 }
0x63ac   :  { %18087 = vmatprep.subr.mxu1 %v15889_v39 }
0x63ad   :  { %18088 = vmatpush3.msra.mxu1 %v15889_v39 }
0x63ae   :  { %18089 = vmatprep.subr.mxu1 %v15888_v41 }
0x63af   :  { %18090 = vmatpush3.msra.mxu1 %v15888_v41 }
0x63b0   :  { %18091 = vmatprep.subr.mxu1 %v15887_v9 }
0x63b1   :  { %18092 = vmatpush3.msra.mxu1 %v15887_v9 }
0x63b2   :  { %18093 = vmatprep.subr.mxu1 %v15886_v45 }
0x63b3   :  { %18094 = vmatpush3.msra.mxu1 %v15886_v45 }
0x6464   :  { %v18067_v44 = vpop.f32.mrf.mxu1 }
0x6465   :  { %v14582_v13 = vadd.f32 %v18067_v44, %v14043_v29 }
0x6466   :  { %v14572_v11 = vpop.f32.mrf.mxu1 }
0x6467   :  { %v14590_v5 = vadd.f32 %v15876_v1, %v14582_v13  ;;  %v14581_v57 = vadd.f32 %v14572_v11, %v14042_v18  ;;  %v15898_v13 = vld [vmem:[%s19798_s23 + $0x1] ss:$0 sm:$0xff] }
0x6469   :  { %v20238_v38 = vadd.f32 %v14590_v5, %v20031_v12  ;;  %v14589_v20 = vadd.f32 %v15876_v1, %v14581_v57 }
0x646b   :  { %v20241_v63 = vadd.f32 %v14589_v20, %v20035_v55  ;;  %v14600_v27 = vsel %vm415_vm3, %v20238_v38, 0.0 }
0x646c   :  { %14601 = vadd.xlane.f32.xlu1 %v14600_v27 }
0x646d   :  { %v14597_v3 = vsel %vm415_vm3, %v20241_v63, 0.0 }
0x646e   :  { %14598 = vadd.xlane.f32.xlu0 %v14597_v3 }
0x64f5   :  { %v14602_v26 = vpop.xlane.xlu1 %14601 }
0x64f6   :  { %v14604_v2 = vmul.f32 0.03125, %v14602_v26 }
0x64f7   :  { %v14599_v58 = vpop.xlane.xlu0 %14598 }
0x64f8   :  { %v14606_v12 = vsub.f32 %v20238_v38, %v14604_v2  ;;  %v14603_v59 = vmul.f32 0.03125, %v14599_v58 }
0x64fa   :  { %v14605_v55 = vsub.f32 %v20241_v63, %v14603_v59  ;;  %v14608_v6 = vmul.f32 %v14606_v12, %v14606_v12  ;;  %v14642_v33 = vmul.f32 %v15879_v30, %v14606_v12 }
0x64fc   :  { %v14612_v7 = vsel %vm415_vm3, %v14608_v6, 0.0  ;;  %v14607_v34 = vmul.f32 %v14605_v55, %v14605_v55  ;;  %v14641_v35 = vmul.f32 %v15879_v30, %v14605_v55 }
0x64fd   :  { %14613 = vadd.xlane.f32.xlu1 %v14612_v7 }
0x64fe   :  { %v14609_v10 = vsel %vm415_vm3, %v14607_v34, 0.0 }
0x64ff   :  { %14610 = vadd.xlane.f32.xlu0 %v14609_v10 }
0x6586   :  { %v14614_v51 = vpop.xlane.xlu1 %14613 }
0x6587   :  { %v14616_v4 = vmul.f32 0.032258064, %v14614_v51 }
0x6588   :  { %v14611_v29 = vpop.xlane.xlu0 %14610 }
0x6589   :  { %18434 = vrsqrt.f32 %v14616_v4  ;;  %v14615_v36 = vmul.f32 0.032258064, %v14611_v29  ;;  %vm14626_vm10 = vcmp.eq.f32.partialorder %v14616_v4, inf  ;;  %v14629_v0 = vand.u32 2147483648, %v14616_v4 }
0x658a   :  { %vm14628_vm11 = vcmp.eq.f32.partialorder %v14616_v4, 0.0 }
0x658b   :  { %18436 = vrsqrt.f32 %v14615_v36  ;;  %vm14619_vm12 = vcmp.eq.f32.partialorder %v14615_v36, inf  ;;  %v14622_v61 = vand.u32 2147483648, %v14615_v36  ;;  %vm14621_vm13 = vcmp.eq.f32.partialorder %v14615_v36, 0.0 }
0x6596   :  { %v18435_v18 = vpop.eup %18434 }
0x6597   :  { %v14625_v50 = vmul.f32 %v18435_v18, %v14616_v4 }
0x6598   :  { %v18437_v19 = vpop.eup %18436 }
0x6599   :  { %v14627_v22 = vsel %vm14626_vm10, %v14616_v4, %v14625_v50  ;;  %v14618_v14 = vmul.f32 %v18437_v19, %v14615_v36 }
0x659a   :  { %v14630_v21 = vsel %vm14628_vm11, %v14629_v0, %v14627_v22 }
0x659b   :  { %v14632_v42 = vadd.f32 1e-06, %v14630_v21  ;;  %v14620_v60 = vsel %vm14619_vm12, %v14615_v36, %v14618_v14 }
0x659c   :  { %v14623_v8 = vsel %vm14621_vm13, %v14622_v61, %v14620_v60  ;;  %v15901_v61 = vld [vmem:[%s15049_s28] ss:$0 sm:$0xff] }
0x659d   :  { %18438 = vrcp.f32 %v14632_v42  ;;  %v14631_v49 = vadd.f32 1e-06, %v14623_v8 }
0x659f   :  { %18440 = vrcp.f32 %v14631_v49 }
0x65aa   :  { %v18439_v32 = vpop.eup %18438 }
0x65ab   :  { %v14644_v17 = vmul.f32 %v18439_v32, %v14642_v33  ;;  %v15902_v33 = vld [vmem:[%s15050_s19] ss:$0 sm:$0xff] }
0x65ac   :  { %v18441_v37 = vpop.eup %18440 }
0x65ad   :  { %v14643_v40 = vmul.f32 %v18441_v37, %v14641_v35  ;;  %v14652_v25 = vadd.f32 %v15880_v48, %v14644_v17 }
0x65af   :  { %v14651_v56 = vadd.f32 %v15880_v48, %v14643_v40  ;;  %v15903_v48 = vld [vmem:[%s15052_s13] ss:$0 sm:$0xff] }
0x65b1   :  { %18076 = vmatprep.mubr.msk.f32.mxu0 %vm415_vm3, %v14651_v56 }
0x65b2   :  { %18077 = vmatmul.mubr.msk.f32.vlgmr.msra.gmra.mxu0 %vm415_vm3, %v14652_v25 }
0x6672   :  { %v18078_v31 = vpop.f32.mrf.mxu0 }
0x6673   :  { %v14755_v47 = vadd.f32 %v18078_v31, %v15895_v46 }
0x6674   :  { %v14749_v53 = vpop.f32.mrf.mxu0 }
0x6675   :  { %v14750_v54 = vadd.f32 %v15895_v46, %v14749_v53  ;;  %v14759_v44 = vmax.f32 %v14755_v47, 0.0 }
0x6677   :  { %v14758_v1 = vmax.f32 %v14750_v54, 0.0 }
0x6679   :  { %18095 = vmatprep.mubr.msk.f32.mxu1 %vm230_vm0, %v14758_v1 }
0x667a   :  { %18096 = vmatmul.mubr.msk.f32.vlgmr.msra.gmra.mxu1 %vm230_vm0, %v14759_v44 }
0x673a   :  { %v18097_v11 = vpop.f32.mrf.mxu1 }
0x673b   :  { %v14844_v5 = vadd.f32 %v18097_v11, %v15898_v13 }
0x673c   :  { %v14838_v57 = vpop.f32.mrf.mxu1 }
0x673d   :  { %v14848_v20 = vadd.f32 %v14844_v5, %v20238_v38  ;;  %v14839_v27 = vadd.f32 %v15898_v13, %v14838_v57 }
0x673f   :  { %v14847_v3 = vadd.f32 %v14839_v27, %v20241_v63  ;;  %v14854_v26 = vsel %vm415_vm3, %v14848_v20, 0.0  ;;  %v14910_v63 = vld [vmem:[%s15051_s12 + $0x18] sm:$0xff] }
0x6740   :  { %14855 = vadd.xlane.f32.xlu1 %v14854_v26  ;;  %18098 = vmatprep.subr.mxu0 %v14910_v63 }
0x6741   :  { %v14851_v2 = vsel %vm415_vm3, %v14847_v3, 0.0  ;;  %18099 = vmatpush3.msra.mxu0 %v14910_v63 }
0x6742   :  { %14852 = vadd.xlane.f32.xlu0 %v14851_v2  ;;  %18100 = vmatprep.subr.mxu0 %v14909_v28 }
0x6743   :  { %18101 = vmatpush3.msra.mxu0 %v14909_v28 }
0x6744   :  { %18102 = vmatprep.subr.mxu0 %v14908_v24 }
0x6745   :  { %18103 = vmatpush3.msra.mxu0 %v14908_v24 }
0x6746   :  { %18104 = vmatprep.subr.mxu0 %v14907_v15 }
0x6747   :  { %18105 = vmatpush3.msra.mxu0 %v14907_v15 }
0x67c9   :  { %v14856_v58 = vpop.xlane.xlu1 %14855 }
0x67ca   :  { %v14858_v12 = vmul.f32 0.03125, %v14856_v58 }
0x67cb   :  { %v14853_v59 = vpop.xlane.xlu0 %14852 }
0x67cc   :  { %v14860_v55 = vsub.f32 %v14848_v20, %v14858_v12  ;;  %v14857_v6 = vmul.f32 0.03125, %v14853_v59 }
0x67ce   :  { %v14859_v7 = vsub.f32 %v14847_v3, %v14857_v6  ;;  %v14862_v34 = vmul.f32 %v14860_v55, %v14860_v55  ;;  %v14896_v8 = vmul.f32 %v15901_v61, %v14860_v55 }
0x67d0   :  { %v14866_v10 = vsel %vm415_vm3, %v14862_v34, 0.0  ;;  %v14861_v43 = vmul.f32 %v14859_v7, %v14859_v7  ;;  %v14895_v49 = vmul.f32 %v15901_v61, %v14859_v7 }
0x67d1   :  { %14867 = vadd.xlane.f32.xlu1 %v14866_v10 }
0x67d2   :  { %v14863_v38 = vsel %vm415_vm3, %v14861_v43, 0.0 }
0x67d3   :  { %14864 = vadd.xlane.f32.xlu0 %v14863_v38 }
0x685a   :  { %v14868_v62 = vpop.xlane.xlu1 %14867 }
0x685b   :  { %v14870_v16 = vmul.f32 0.032258064, %v14868_v62 }
0x685c   :  { %v14865_v23 = vpop.xlane.xlu0 %14864 }
0x685d   :  { %18442 = vrsqrt.f32 %v14870_v16  ;;  %v14869_v52 = vmul.f32 0.032258064, %v14865_v23  ;;  %vm14880_vm0 = vcmp.eq.f32.partialorder %v14870_v16, inf  ;;  %v14883_v29 = vand.u32 2147483648, %v14870_v16 }
0x685e   :  { %vm14882_vm14 = vcmp.eq.f32.partialorder %v14870_v16, 0.0 }
0x685f   :  { %18444 = vrsqrt.f32 %v14869_v52  ;;  %vm14873_vm15 = vcmp.eq.f32.partialorder %v14869_v52, inf  ;;  %v14876_v22 = vand.u32 2147483648, %v14869_v52  ;;  %vm14875_vm1 = vcmp.eq.f32.partialorder %v14869_v52, 0.0 }
0x686a   :  { %v18443_v51 = vpop.eup %18442 }
0x686b   :  { %v14879_v4 = vmul.f32 %v18443_v51, %v14870_v16 }
0x686c   :  { %v18445_v36 = vpop.eup %18444 }
0x686d   :  { %v14881_v18 = vsel %vm14880_vm0, %v14870_v16, %v14879_v4  ;;  %v14872_v0 = vmul.f32 %v18445_v36, %v14869_v52 }
0x686e   :  { %v14884_v50 = vsel %vm14882_vm14, %v14883_v29, %v14881_v18 }
0x686f   :  { %v14886_v19 = vadd.f32 1e-06, %v14884_v50  ;;  %v14874_v21 = vsel %vm14873_vm15, %v14869_v52, %v14872_v0 }
0x6870   :  { %v14877_v14 = vsel %vm14875_vm1, %v14876_v22, %v14874_v21 }
0x6871   :  { %18446 = vrcp.f32 %v14886_v19  ;;  %v14885_v42 = vadd.f32 1e-06, %v14877_v14 }
0x6873   :  { %18448 = vrcp.f32 %v14885_v42 }
0x687e   :  { %v18447_v60 = vpop.eup %18446 }
0x687f   :  { %v14898_v32 = vmul.f32 %v18447_v60, %v14896_v8 }
0x6880   :  { %v18449_v30 = vpop.eup %18448 }
0x6881   :  { %v14897_v35 = vmul.f32 %v18449_v30, %v14895_v49  ;;  %v14906_v17 = vadd.f32 %v15902_v33, %v14898_v32 }
0x6883   :  { %v14905_v37 = vadd.f32 %v15902_v33, %v14897_v35 }
0x6885   :  { %18106 = vmatprep.mubr.msk.f32.mxu0 %vm415_vm3, %v14905_v37 }
0x6886   :  { %18107 = vmatmul.mubr.msk.f32.vlgmr.msra.gmra.mxu0 %vm415_vm3, %v14906_v17 }
0x6946   :  { %v18108_v40 = vpop.f32.mrf.mxu0 }
0x6947   :  { %v14996_v56 = vadd.f32 %v18108_v40, %v15903_v48 }
0x6948   :  { %v14990_v25 = vpop.f32.mrf.mxu0 }
0x6949   :  { %15000 = vst [vmem:[%s15053_s29 + $0x8] sm:$0xff] %v14996_v56  ;;  %v14991_v39 = vadd.f32 %v15903_v48, %v14990_v25 }
0x694b   :  { %14999 = vst [vmem:[%s15053_s29] sm:$0xff] %v14991_v39 }

</bundles_post_ra>
